<compile_context>
chip_gen: v7x
topology: tpu7x:2x2x1
jax: 0.10.0
libtpu: 0.0.40
codegen_flags: <defaults>
</compile_context>

<pallas_src>
import functools

import jax
import jax.numpy as jnp
import numpy as np
from jax.experimental import pallas as pl
from jax.experimental.pallas import tpu as pltpu


def _pad_conv_axis(v, ax):
    """Zero-pad `v` with 2 rows on each side of axis `ax` (one concat total)."""
    pad_shape = list(v.shape)
    pad_shape[ax] = 2
    z = jnp.zeros(pad_shape, v.dtype)
    return jnp.concatenate([z, v, z], axis=ax)


def _im2col(v, ax, compute_dtype):
    """(T1, T2, C) -> (T1*T2, 5*C) im2col for a length-5, pad-2 conv along `ax`.

    Tap k (input offset k-2) is the static slice padded[..., k:k+L, ...]; taps
    are concatenated along the channel/lane axis so the whole conv becomes a
    single MXU contraction with K = 5*C (weights packed tap-major to match).
    """
    T1, T2, C = v.shape
    L = v.shape[ax]
    p = _pad_conv_axis(v.astype(compute_dtype), ax)
    cols = jnp.concatenate(
        [jax.lax.slice_in_dim(p, k, k + L, axis=ax) for k in range(5)], axis=-1)
    # (T1, T2) collapse is layout-free whenever T2 is a multiple of 8 (ensured
    # by the tile picker for the tiled-W stage; full-W tiles are typical).
    return cols.reshape(T1 * T2, 5 * C)


def _gru_stage_kernel(h_ref, x_ref, wx_ref, whzr_ref, whq_ref, b_ref, o_ref,
                      *, conv_axis, compute_dtype):
    """One fused SepConvGRU stage on a (1, T1, T2, C) tile.

    h_ref:    (1, T1, T2, Ch)    hidden state tile (f32)
    x_ref:    (1, T1, T2, Cx)    input tile (already compute dtype)
    wx_ref:   (5*Cx, 3*Ch)       tap-major packed x-part weights for z|r|q
    whzr_ref: (5*Ch, 2*Ch)       tap-major packed h-part weights for z|r
    whq_ref:  (5*Ch, Ch)         tap-major h-part weights for q (applied to r*h)
    b_ref:    (1, 3*Ch)          packed biases bz|br|bq (f32)
    o_ref:    (1, T1, T2, Ch)    new hidden state tile
    conv_axis: axis of the (T1, T2, C) view to convolve (0 = H, 1 = W).
    """
    _, T1, T2, Ch = h_ref.shape
    M = T1 * T2

    h32 = h_ref[0].astype(jnp.float32)           # (T1, T2, Ch), kept f32 for blend
    hcd = h32.astype(compute_dtype)
    x = x_ref[0]                                 # (T1, T2, Cx), compute dtype

    x_cols = _im2col(x, conv_axis, compute_dtype)      # (M, 5*Cx)
    h_cols = _im2col(hcd, conv_axis, compute_dtype)    # (M, 5*Ch)

    bias = b_ref[...].astype(jnp.float32)              # (1, 3*Ch)
    acc_x = jnp.dot(x_cols, wx_ref[...],
                    preferred_element_type=jnp.float32) + bias     # (M, 3*Ch)
    acc_h = jnp.dot(h_cols, whzr_ref[...],
                    preferred_element_type=jnp.float32)            # (M, 2*Ch)

    z = jax.nn.sigmoid(acc_x[:, :Ch] + acc_h[:, :Ch])
    r = jax.nn.sigmoid(acc_x[:, Ch:2 * Ch] + acc_h[:, Ch:])

    h_flat = h32.reshape(M, Ch)
    rh = (r * h_flat).astype(compute_dtype).reshape(T1, T2, Ch)
    rh_cols = _im2col(rh, conv_axis, compute_dtype)    # (M, 5*Ch)

    q = jnp.tanh(acc_x[:, 2 * Ch:] +
                 jnp.dot(rh_cols, whq_ref[...],
                         preferred_element_type=jnp.float32))
    h_new = (1.0 - z) * h_flat + z * q
    o_ref[...] = h_new.reshape(1, T1, T2, Ch).astype(o_ref.dtype)


def _pick_tile(dim, other, max_elems, sublane_tiled, want_multi):
    """Tile size along the tiled (non-conv) axis.

    The grid uses cdiv(dim, t); a partial final block is masked by Pallas, so t
    does not have to divide dim.  If the tiled axis is the sublane axis of the
    block, t must be a multiple of 8 (or the full axis).  When want_multi, the
    full-axis tile is avoided so the 'parallel' grid feeds >=2 cores (v7x).
    """
    cands = [t for t in range(1, dim + 1)
             if (not sublane_tiled) or t % 8 == 0 or t == dim]
    feasible = [t for t in cands if t * other <= max_elems]
    if not feasible:
        return min(cands)
    if want_multi:
        multi = [t for t in feasible if t < dim]
        if multi:
            feasible = multi
    return min(feasible, key=lambda t: (pl.cdiv(dim, t), t))


def _gru_stage(h, x, wx, whzr, whq, b, *, conv_axis_hw, compute_dtype,
               max_tile_elems, vmem_limit_bytes):
    """One fused SepConvGRU stage over the full (B, H, W, C) NHWC tensors."""
    B, H, W, Ch = h.shape
    Cx = x.shape[-1]
    want_multi = (B == 1)

    if conv_axis_hw == "W":                 # (1,5) convs: conv along W, tile H
        TH = _pick_tile(H, W, max_tile_elems, sublane_tiled=False,
                        want_multi=want_multi)
        TW = W
        grid = (B, pl.cdiv(H, TH))
        tile_idx = lambda bb, i: (bb, i, 0, 0)
        conv_axis = 1
    else:                                   # (5,1) convs: conv along H, tile W
        TH = H
        TW = _pick_tile(W, H, max_tile_elems, sublane_tiled=True,
                        want_multi=want_multi)
        grid = (B, pl.cdiv(W, TW))
        tile_idx = lambda bb, i: (bb, 0, i, 0)
        conv_axis = 0

    kernel = functools.partial(_gru_stage_kernel, conv_axis=conv_axis,
                               compute_dtype=compute_dtype)
    return pl.pallas_call(
        kernel,
        out_shape=jax.ShapeDtypeStruct((B, H, W, Ch), h.dtype),
        grid_spec=pltpu.PrefetchScalarGridSpec(
            num_scalar_prefetch=0,
            grid=grid,
            in_specs=[
                pl.BlockSpec((1, TH, TW, Ch), tile_idx),
                pl.BlockSpec((1, TH, TW, Cx), tile_idx),
                pl.BlockSpec(wx.shape, lambda bb, i: (0, 0)),
                pl.BlockSpec(whzr.shape, lambda bb, i: (0, 0)),
                pl.BlockSpec(whq.shape, lambda bb, i: (0, 0)),
                pl.BlockSpec(b.shape, lambda bb, i: (0, 0)),
            ],
            out_specs=pl.BlockSpec((1, TH, TW, Ch), tile_idx),
        ),
        compiler_params=pltpu.CompilerParams(
            dimension_semantics=("parallel", "parallel"),
            vmem_limit_bytes=vmem_limit_bytes,
        ),
    )(h, x, wx, whzr, whq, b)


def _pack_stage_params(w_z, b_z, w_r, b_r, w_q, b_q, hidden_dim, horizontal,
                       compute_dtype):
    """PyTorch OIHW separable-conv weights -> tap-major packed 2-D matmul weights."""
    def taps(w):                               # (Ch, Cin, kh, kw) -> (5, Cin, Ch)
        w2 = w[:, :, 0, :] if horizontal else w[:, :, :, 0]
        return jnp.transpose(w2, (2, 1, 0))

    Ch = hidden_dim
    tz, tr, tq = taps(w_z), taps(w_r), taps(w_q)
    Cx = tz.shape[1] - Ch
    # cat([h, x]) channel order: rows [0:Ch] act on h, rows [Ch:] act on x.
    wx = jnp.concatenate([tz[:, Ch:, :], tr[:, Ch:, :], tq[:, Ch:, :]], axis=-1)
    whzr = jnp.concatenate([tz[:, :Ch, :], tr[:, :Ch, :]], axis=-1)
    whq = tq[:, :Ch, :]
    b = jnp.concatenate([b_z, b_r, b_q]).reshape(1, 3 * Ch)
    # Row order after reshape is [tap0 channels, tap1 channels, ...], matching
    # the im2col column order in the kernel.
    return (wx.reshape(5 * Cx, 3 * Ch).astype(compute_dtype),
            whzr.reshape(5 * Ch, 2 * Ch).astype(compute_dtype),
            whq.reshape(5 * Ch, Ch).astype(compute_dtype),
            b.astype(jnp.float32))


def _vmem_limit_bytes():
    try:
        cap = pltpu.get_tpu_info().vmem_capacity_bytes
    except Exception:
        cap = 64 * 1024 * 1024          # conservative (v7x per-TC size)
    # ~75% of physical VMEM: ~48 MiB on v7x, ~96 MiB on v5e/v6e (capped).
    return min(int(cap * 3 // 4), 100 * 1024 * 1024)


def _auto_max_tile_elems(Ch, Cx, vmem_limit):
    """Spatial elements per tile, budgeted against the in-kernel working set."""
    per_elem = (
        2 * 2 * Ch * 4          # h block + out block (f32), double-buffered
        + 2 * Cx * 2            # x block (bf16), double-buffered
        + 5 * Cx * 2            # x im2col (bf16)
        + 2 * 5 * Ch * 2        # h / r*h im2col (bf16)
        + 5 * Ch * 4            # acc_x + acc_h (f32)
        + 8 * Ch * 4            # z, r, q, h_flat, h_new and temporaries (f32)
    )
    budget = max(vmem_limit - 8 * 1024 * 1024, per_elem * 256)  # weight headroom
    elems = max(256, budget // per_elem)
    return int(min(8192, 1 << int(np.floor(np.log2(elems)))))


@functools.partial(jax.jit, static_argnames=("compute_dtype", "max_tile_elems"))
def sepconv_gru_forward(h_nchw, x_nchw, params, compute_dtype=jnp.bfloat16,
                        max_tile_elems=None):
    """Full SepConvGRU forward.  h, x in PyTorch NCHW layout; returns new h (NCHW)."""
    Ch = h_nchw.shape[1]
    Cx = x_nchw.shape[1]
    vmem_limit = _vmem_limit_bytes()
    if max_tile_elems is None:
        max_tile_elems = _auto_max_tile_elems(Ch, Cx, vmem_limit)

    # Single NCHW -> NHWC transpose at the boundary.  x is cast to the compute
    # dtype ONCE here (it is re-read by stage 2, so its HBM traffic halves);
    # h stays f32 (it carries the state blend).
    h = jnp.transpose(h_nchw, (0, 2, 3, 1))
    x = jnp.transpose(x_nchw, (0, 2, 3, 1)).astype(compute_dtype)

    p1 = _pack_stage_params(params["wz1"], params["bz1"], params["wr1"],
                            params["br1"], params["wq1"], params["bq1"],
                            Ch, horizontal=True, compute_dtype=compute_dtype)
    p2 = _pack_stage_params(params["wz2"], params["bz2"], params["wr2"],
                            params["br2"], params["wq2"], params["bq2"],
                            Ch, horizontal=False, compute_dtype=compute_dtype)

    h = _gru_stage(h, x, *p1, conv_axis_hw="W", compute_dtype=compute_dtype,
                   max_tile_elems=max_tile_elems, vmem_limit_bytes=vmem_limit)
    h = _gru_stage(h, x, *p2, conv_axis_hw="H", compute_dtype=compute_dtype,
                   max_tile_elems=max_tile_elems, vmem_limit_bytes=vmem_limit)
    return jnp.transpose(h, (0, 3, 1, 2))


def _reference_forward(h, x, p):
    """Pure-JAX (lax.conv, f32, HIGHEST precision) reference in NCHW."""
    def conv(inp, w, b, pad):
        dn = jax.lax.conv_dimension_numbers(inp.shape, w.shape,
                                            ("NCHW", "OIHW", "NCHW"))
        out = jax.lax.conv_general_dilated(
            inp, w, (1, 1), [(pad[0], pad[0]), (pad[1], pad[1])],
            dimension_numbers=dn, precision=jax.lax.Precision.HIGHEST)
        return out + b[None, :, None, None]

    hx = jnp.concatenate([h, x], axis=1)
    z = jax.nn.sigmoid(conv(hx, p["wz1"], p["bz1"], (0, 2)))
    r = jax.nn.sigmoid(conv(hx, p["wr1"], p["br1"], (0, 2)))
    q = jnp.tanh(conv(jnp.concatenate([r * h, x], axis=1), p["wq1"], p["bq1"], (0, 2)))
    h = (1.0 - z) * h + z * q
    hx = jnp.concatenate([h, x], axis=1)
    z = jax.nn.sigmoid(conv(hx, p["wz2"], p["bz2"], (2, 0)))
    r = jax.nn.sigmoid(conv(hx, p["wr2"], p["br2"], (2, 0)))
    q = jnp.tanh(conv(jnp.concatenate([r * h, x], axis=1), p["wq2"], p["bq2"], (2, 0)))
    h = (1.0 - z) * h + z * q
    return h


if __name__ == "__main__":
    # Small config consistent with the module.  hidden_dim=128 (module default)
    # keeps channels lane-aligned (full 128-lane stores / MXU lanes); input_dim
    # is a constructor arg, kept small here.
    batch = 2
    hidden_dim = 128
    input_dim = 128
    H = W = 16
    cin = hidden_dim + input_dim

    key = jax.random.PRNGKey(0)
    keys = jax.random.split(key, 14)

    h0 = jax.random.normal(keys[0], (batch, hidden_dim, H, W), jnp.float32)
    x = jax.random.normal(keys[1], (batch, input_dim, H, W), jnp.float32)

    def mk_w(k, kh, kw):
        fan = cin * kh * kw
        return jax.random.normal(k, (hidden_dim, cin, kh, kw), jnp.float32) / np.sqrt(fan)

    def mk_b(k):
        return jax.random.normal(k, (hidden_dim,), jnp.float32) * 0.05

    params = dict(
        wz1=mk_w(keys[2], 1, 5), bz1=mk_b(keys[3]),
        wr1=mk_w(keys[4], 1, 5), br1=mk_b(keys[5]),
        wq1=mk_w(keys[6], 1, 5), bq1=mk_b(keys[7]),
        wz2=mk_w(keys[8], 5, 1), bz2=mk_b(keys[9]),
        wr2=mk_w(keys[10], 5, 1), br2=mk_b(keys[11]),
        wq2=mk_w(keys[12], 5, 1), bq2=mk_b(keys[13]),
    )

    # Small max_tile_elems so the multi-tile grid path of both stages is
    # exercised even at these 16x16 spatial sizes (production uses the auto
    # VMEM-derived budget).
    out = sepconv_gru_forward(h0, x, params, compute_dtype=jnp.bfloat16,
                              max_tile_elems=128)
    out = jax.block_until_ready(out)

    ref = jax.block_until_ready(_reference_forward(h0, x, params))
    # bf16 MXU inputs with f32 accumulation -> loose tolerance vs f32 reference.
    np.testing.assert_allclose(np.asarray(out), np.asarray(ref),
                               rtol=5e-2, atol=5e-2)

    print("KERNEL_OK")
</pallas_src>

<mosaic_0001>
module attributes {stable_mosaic.version = 11 : i64} {
  func.func @_gru_stage_kernel(%arg0: i32, %arg1: i32, %arg2: memref<1x8x16x128xf32, #tpu.memory_space<vmem>>, %arg3: memref<1x8x16x128xbf16, #tpu.memory_space<vmem>>, %arg4: memref<640x384xbf16, #tpu.memory_space<vmem>>, %arg5: memref<640x256xbf16, #tpu.memory_space<vmem>>, %arg6: memref<640x128xbf16, #tpu.memory_space<vmem>>, %arg7: memref<1x384xf32, #tpu.memory_space<vmem>>, %arg8: memref<1x8x16x128xf32, #tpu.memory_space<vmem>>) attributes {dimension_semantics = [#tpu.dimension_semantics<parallel>, #tpu.dimension_semantics<parallel>], iteration_bounds = array<i64: 2, 2>, scalar_prefetch = 0 : i64, scratch_operands = 0 : i64, tpu.core_type = #tpu.core_type<tc>, window_params = [{transform_indices = @transform_0, window_bounds = array<i64: 1, 8, 16, 128>}, {transform_indices = @transform_1, window_bounds = array<i64: 1, 8, 16, 128>}, {pipeline_mode = #tpu.pipeline_mode<synchronous>, transform_indices = @transform_2, window_bounds = array<i64: 640, 384>}, {pipeline_mode = #tpu.pipeline_mode<synchronous>, transform_indices = @transform_3, window_bounds = array<i64: 640, 256>}, {pipeline_mode = #tpu.pipeline_mode<synchronous>, transform_indices = @transform_4, window_bounds = array<i64: 640, 128>}, {pipeline_mode = #tpu.pipeline_mode<synchronous>, transform_indices = @transform_5, window_bounds = array<i64: 1, 384>}, {transform_indices = @transform_6, window_bounds = array<i64: 1, 8, 16, 128>}]} {
    %c0 = arith.constant 0 : index
    %c0_0 = arith.constant 0 : index
    %c0_1 = arith.constant 0 : index
    %c0_2 = arith.constant 0 : index
    %0 = vector.load %arg2[%c0, %c0_0, %c0_1, %c0_2] : memref<1x8x16x128xf32, #tpu.memory_space<vmem>>, vector<1x8x16x128xf32>
    %1 = vector.shape_cast %0 : vector<1x8x16x128xf32> to vector<8x16x128xf32>
    %2 = arith.truncf %1 : vector<8x16x128xf32> to vector<8x16x128xbf16>
    %c0_3 = arith.constant 0 : index
    %c0_4 = arith.constant 0 : index
    %c0_5 = arith.constant 0 : index
    %c0_6 = arith.constant 0 : index
    %3 = vector.load %arg3[%c0_3, %c0_4, %c0_5, %c0_6] : memref<1x8x16x128xbf16, #tpu.memory_space<vmem>>, vector<1x8x16x128xbf16>
    %4 = vector.shape_cast %3 : vector<1x8x16x128xbf16> to vector<8x16x128xbf16>
    %cst = arith.constant 0.000000e+00 : bf16
    %5 = vector.broadcast %cst : bf16 to vector<8x2x128xbf16>
    %6 = tpu.concatenate %5, %4, %5 in 1 : vector<8x2x128xbf16>, vector<8x16x128xbf16>, vector<8x2x128xbf16> -> vector<8x20x128xbf16>
    %7 = vector.extract_strided_slice %6 {offsets = [0, 0, 0], sizes = [8, 16, 128], strides = [1, 1, 1]} : vector<8x20x128xbf16> to vector<8x16x128xbf16>
    %8 = vector.extract_strided_slice %6 {offsets = [0, 1, 0], sizes = [8, 16, 128], strides = [1, 1, 1]} : vector<8x20x128xbf16> to vector<8x16x128xbf16>
    %9 = vector.extract_strided_slice %6 {offsets = [0, 2, 0], sizes = [8, 16, 128], strides = [1, 1, 1]} : vector<8x20x128xbf16> to vector<8x16x128xbf16>
    %10 = vector.extract_strided_slice %6 {offsets = [0, 3, 0], sizes = [8, 16, 128], strides = [1, 1, 1]} : vector<8x20x128xbf16> to vector<8x16x128xbf16>
    %11 = vector.extract_strided_slice %6 {offsets = [0, 4, 0], sizes = [8, 16, 128], strides = [1, 1, 1]} : vector<8x20x128xbf16> to vector<8x16x128xbf16>
    %12 = tpu.concatenate %7, %8, %9, %10, %11 in 2 : vector<8x16x128xbf16>, vector<8x16x128xbf16>, vector<8x16x128xbf16>, vector<8x16x128xbf16>, vector<8x16x128xbf16> -> vector<8x16x640xbf16>
    %13 = vector.shape_cast %12 : vector<8x16x640xbf16> to vector<128x640xbf16>
    %cst_7 = arith.constant 0.000000e+00 : bf16
    %14 = vector.broadcast %cst_7 : bf16 to vector<8x2x128xbf16>
    %15 = tpu.concatenate %14, %2, %14 in 1 : vector<8x2x128xbf16>, vector<8x16x128xbf16>, vector<8x2x128xbf16> -> vector<8x20x128xbf16>
    %16 = vector.extract_strided_slice %15 {offsets = [0, 0, 0], sizes = [8, 16, 128], strides = [1, 1, 1]} : vector<8x20x128xbf16> to vector<8x16x128xbf16>
    %17 = vector.extract_strided_slice %15 {offsets = [0, 1, 0], sizes = [8, 16, 128], strides = [1, 1, 1]} : vector<8x20x128xbf16> to vector<8x16x128xbf16>
    %18 = vector.extract_strided_slice %15 {offsets = [0, 2, 0], sizes = [8, 16, 128], strides = [1, 1, 1]} : vector<8x20x128xbf16> to vector<8x16x128xbf16>
    %19 = vector.extract_strided_slice %15 {offsets = [0, 3, 0], sizes = [8, 16, 128], strides = [1, 1, 1]} : vector<8x20x128xbf16> to vector<8x16x128xbf16>
    %20 = vector.extract_strided_slice %15 {offsets = [0, 4, 0], sizes = [8, 16, 128], strides = [1, 1, 1]} : vector<8x20x128xbf16> to vector<8x16x128xbf16>
    %21 = tpu.concatenate %16, %17, %18, %19, %20 in 2 : vector<8x16x128xbf16>, vector<8x16x128xbf16>, vector<8x16x128xbf16>, vector<8x16x128xbf16>, vector<8x16x128xbf16> -> vector<8x16x640xbf16>
    %22 = vector.shape_cast %21 : vector<8x16x640xbf16> to vector<128x640xbf16>
    %c0_8 = arith.constant 0 : index
    %c0_9 = arith.constant 0 : index
    %23 = vector.load %arg7[%c0_8, %c0_9] : memref<1x384xf32, #tpu.memory_space<vmem>>, vector<1x384xf32>
    %c0_10 = arith.constant 0 : index
    %c0_11 = arith.constant 0 : index
    %24 = vector.load %arg4[%c0_10, %c0_11] : memref<640x384xbf16, #tpu.memory_space<vmem>>, vector<640x384xbf16>
    %cst_12 = arith.constant dense<0.000000e+00> : vector<128x384xf32>
    %25 = tpu.matmul %13, %24, %cst_12 {dimension_numbers = #tpu.dot_dimension_numbers<[1], [0], [0], [1], [0, 0, 1, 1], [], []>} : vector<128x640xbf16>, vector<640x384xbf16>, vector<128x384xf32> -> vector<128x384xf32>
    %26 = vector.broadcast %23 : vector<1x384xf32> to vector<128x384xf32>
    %27 = arith.addf %25, %26 : vector<128x384xf32>
    %c0_13 = arith.constant 0 : index
    %c0_14 = arith.constant 0 : index
    %28 = vector.load %arg5[%c0_13, %c0_14] : memref<640x256xbf16, #tpu.memory_space<vmem>>, vector<640x256xbf16>
    %cst_15 = arith.constant dense<0.000000e+00> : vector<128x256xf32>
    %29 = tpu.matmul %22, %28, %cst_15 {dimension_numbers = #tpu.dot_dimension_numbers<[1], [0], [0], [1], [0, 0, 1, 1], [], []>} : vector<128x640xbf16>, vector<640x256xbf16>, vector<128x256xf32> -> vector<128x256xf32>
    %30 = vector.extract_strided_slice %27 {offsets = [0, 0], sizes = [128, 128], strides = [1, 1]} : vector<128x384xf32> to vector<128x128xf32>
    %31 = vector.extract_strided_slice %29 {offsets = [0, 0], sizes = [128, 128], strides = [1, 1]} : vector<128x256xf32> to vector<128x128xf32>
    %32 = arith.addf %30, %31 : vector<128x128xf32>
    %33 = arith.negf %32 : vector<128x128xf32>
    %34 = math.exp %33 : vector<128x128xf32>
    %cst_16 = arith.constant 1.000000e+00 : f32
    %35 = vector.broadcast %cst_16 : f32 to vector<128x128xf32>
    %36 = arith.addf %35, %34 : vector<128x128xf32>
    %37 = arith.divf %35, %36 : vector<128x128xf32>
    %38 = vector.extract_strided_slice %27 {offsets = [0, 128], sizes = [128, 128], strides = [1, 1]} : vector<128x384xf32> to vector<128x128xf32>
    %39 = vector.extract_strided_slice %29 {offsets = [0, 128], sizes = [128, 128], strides = [1, 1]} : vector<128x256xf32> to vector<128x128xf32>
    %40 = arith.addf %38, %39 : vector<128x128xf32>
    %41 = arith.negf %40 : vector<128x128xf32>
    %42 = math.exp %41 : vector<128x128xf32>
    %cst_17 = arith.constant 1.000000e+00 : f32
    %43 = vector.broadcast %cst_17 : f32 to vector<128x128xf32>
    %44 = arith.addf %43, %42 : vector<128x128xf32>
    %45 = arith.divf %43, %44 : vector<128x128xf32>
    %46 = vector.shape_cast %1 : vector<8x16x128xf32> to vector<128x128xf32>
    %47 = arith.mulf %45, %46 : vector<128x128xf32>
    %48 = arith.truncf %47 : vector<128x128xf32> to vector<128x128xbf16>
    %49 = vector.shape_cast %48 : vector<128x128xbf16> to vector<8x16x128xbf16>
    %cst_18 = arith.constant 0.000000e+00 : bf16
    %50 = vector.broadcast %cst_18 : bf16 to vector<8x2x128xbf16>
    %51 = tpu.concatenate %50, %49, %50 in 1 : vector<8x2x128xbf16>, vector<8x16x128xbf16>, vector<8x2x128xbf16> -> vector<8x20x128xbf16>
    %52 = vector.extract_strided_slice %51 {offsets = [0, 0, 0], sizes = [8, 16, 128], strides = [1, 1, 1]} : vector<8x20x128xbf16> to vector<8x16x128xbf16>
    %53 = vector.extract_strided_slice %51 {offsets = [0, 1, 0], sizes = [8, 16, 128], strides = [1, 1, 1]} : vector<8x20x128xbf16> to vector<8x16x128xbf16>
    %54 = vector.extract_strided_slice %51 {offsets = [0, 2, 0], sizes = [8, 16, 128], strides = [1, 1, 1]} : vector<8x20x128xbf16> to vector<8x16x128xbf16>
    %55 = vector.extract_strided_slice %51 {offsets = [0, 3, 0], sizes = [8, 16, 128], strides = [1, 1, 1]} : vector<8x20x128xbf16> to vector<8x16x128xbf16>
    %56 = vector.extract_strided_slice %51 {offsets = [0, 4, 0], sizes = [8, 16, 128], strides = [1, 1, 1]} : vector<8x20x128xbf16> to vector<8x16x128xbf16>
    %57 = tpu.concatenate %52, %53, %54, %55, %56 in 2 : vector<8x16x128xbf16>, vector<8x16x128xbf16>, vector<8x16x128xbf16>, vector<8x16x128xbf16>, vector<8x16x128xbf16> -> vector<8x16x640xbf16>
    %58 = vector.shape_cast %57 : vector<8x16x640xbf16> to vector<128x640xbf16>
    %59 = vector.extract_strided_slice %27 {offsets = [0, 256], sizes = [128, 128], strides = [1, 1]} : vector<128x384xf32> to vector<128x128xf32>
    %c0_19 = arith.constant 0 : index
    %c0_20 = arith.constant 0 : index
    %60 = vector.load %arg6[%c0_19, %c0_20] : memref<640x128xbf16, #tpu.memory_space<vmem>>, vector<640x128xbf16>
    %cst_21 = arith.constant dense<0.000000e+00> : vector<128x128xf32>
    %61 = tpu.matmul %58, %60, %cst_21 {dimension_numbers = #tpu.dot_dimension_numbers<[1], [0], [0], [1], [0, 0, 1, 1], [], []>} : vector<128x640xbf16>, vector<640x128xbf16>, vector<128x128xf32> -> vector<128x128xf32>
    %62 = arith.addf %59, %61 : vector<128x128xf32>
    %63 = math.tanh %62 : vector<128x128xf32>
    %cst_22 = arith.constant 1.000000e+00 : f32
    %64 = vector.broadcast %cst_22 : f32 to vector<128x128xf32>
    %65 = arith.subf %64, %37 : vector<128x128xf32>
    %66 = arith.mulf %65, %46 : vector<128x128xf32>
    %67 = arith.mulf %37, %63 : vector<128x128xf32>
    %68 = arith.addf %66, %67 : vector<128x128xf32>
    %69 = vector.shape_cast %68 : vector<128x128xf32> to vector<1x8x16x128xf32>
    %c0_23 = arith.constant 0 : index
    %c0_24 = arith.constant 0 : index
    %c0_25 = arith.constant 0 : index
    %c0_26 = arith.constant 0 : index
    %70 = vector.load %arg8[%c0_23, %c0_24, %c0_25, %c0_26] : memref<1x8x16x128xf32, #tpu.memory_space<vmem>>, vector<1x8x16x128xf32>
    tpu.vector_store %arg8[%c0_23, %c0_24, %c0_25, %c0_26], %69 {strides = array<i32>} : memref<1x8x16x128xf32, #tpu.memory_space<vmem>>, vector<1x8x16x128xf32>,
    return
  }
  func.func @transform_0(%arg0: i32, %arg1: i32) -> (i32, i32, i32, i32) {
    %c0_i32 = arith.constant 0 : i32
    %c0_i32_0 = arith.constant 0 : i32
    %c0_i32_1 = arith.constant 0 : i32
    return %arg0, %arg1, %c0_i32, %c0_i32_0 : i32, i32, i32, i32
  }
  func.func @transform_1(%arg0: i32, %arg1: i32) -> (i32, i32, i32, i32) {
    %c0_i32 = arith.constant 0 : i32
    %c0_i32_0 = arith.constant 0 : i32
    %c0_i32_1 = arith.constant 0 : i32
    return %arg0, %arg1, %c0_i32, %c0_i32_0 : i32, i32, i32, i32
  }
  func.func @transform_2(%arg0: i32, %arg1: i32) -> (i32, i32) {
    %c0_i32 = arith.constant 0 : i32
    %c0_i32_0 = arith.constant 0 : i32
    %c0_i32_1 = arith.constant 0 : i32
    return %c0_i32, %c0_i32_0 : i32, i32
  }
  func.func @transform_3(%arg0: i32, %arg1: i32) -> (i32, i32) {
    %c0_i32 = arith.constant 0 : i32
    %c0_i32_0 = arith.constant 0 : i32
    %c0_i32_1 = arith.constant 0 : i32
    return %c0_i32, %c0_i32_0 : i32, i32
  }
  func.func @transform_4(%arg0: i32, %arg1: i32) -> (i32, i32) {
    %c0_i32 = arith.constant 0 : i32
    %c0_i32_0 = arith.constant 0 : i32
    %c0_i32_1 = arith.constant 0 : i32
    return %c0_i32, %c0_i32_0 : i32, i32
  }
  func.func @transform_5(%arg0: i32, %arg1: i32) -> (i32, i32) {
    %c0_i32 = arith.constant 0 : i32
    %c0_i32_0 = arith.constant 0 : i32
    %c0_i32_1 = arith.constant 0 : i32
    return %c0_i32, %c0_i32_0 : i32, i32
  }
  func.func @transform_6(%arg0: i32, %arg1: i32) -> (i32, i32, i32, i32) {
    %c0_i32 = arith.constant 0 : i32
    %c0_i32_0 = arith.constant 0 : i32
    %c0_i32_1 = arith.constant 0 : i32
    return %arg0, %arg1, %c0_i32, %c0_i32_0 : i32, i32, i32, i32
  }
}

module attributes {stable_mosaic.version = 11 : i64} {
  func.func @_gru_stage_kernel(%arg0: i32, %arg1: i32, %arg2: memref<1x16x8x128xf32, #tpu.memory_space<vmem>>, %arg3: memref<1x16x8x128xbf16, #tpu.memory_space<vmem>>, %arg4: memref<640x384xbf16, #tpu.memory_space<vmem>>, %arg5: memref<640x256xbf16, #tpu.memory_space<vmem>>, %arg6: memref<640x128xbf16, #tpu.memory_space<vmem>>, %arg7: memref<1x384xf32, #tpu.memory_space<vmem>>, %arg8: memref<1x16x8x128xf32, #tpu.memory_space<vmem>>) attributes {dimension_semantics = [#tpu.dimension_semantics<parallel>, #tpu.dimension_semantics<parallel>], iteration_bounds = array<i64: 2, 2>, scalar_prefetch = 0 : i64, scratch_operands = 0 : i64, tpu.core_type = #tpu.core_type<tc>, window_params = [{transform_indices = @transform_0, window_bounds = array<i64: 1, 16, 8, 128>}, {transform_indices = @transform_1, window_bounds = array<i64: 1, 16, 8, 128>}, {pipeline_mode = #tpu.pipeline_mode<synchronous>, transform_indices = @transform_2, window_bounds = array<i64: 640, 384>}, {pipeline_mode = #tpu.pipeline_mode<synchronous>, transform_indices = @transform_3, window_bounds = array<i64: 640, 256>}, {pipeline_mode = #tpu.pipeline_mode<synchronous>, transform_indices = @transform_4, window_bounds = array<i64: 640, 128>}, {pipeline_mode = #tpu.pipeline_mode<synchronous>, transform_indices = @transform_5, window_bounds = array<i64: 1, 384>}, {transform_indices = @transform_6, window_bounds = array<i64: 1, 16, 8, 128>}]} {
    %c0 = arith.constant 0 : index
    %c0_0 = arith.constant 0 : index
    %c0_1 = arith.constant 0 : index
    %c0_2 = arith.constant 0 : index
    %0 = vector.load %arg2[%c0, %c0_0, %c0_1, %c0_2] : memref<1x16x8x128xf32, #tpu.memory_space<vmem>>, vector<1x16x8x128xf32>
    %1 = vector.shape_cast %0 : vector<1x16x8x128xf32> to vector<16x8x128xf32>
    %2 = arith.truncf %1 : vector<16x8x128xf32> to vector<16x8x128xbf16>
    %c0_3 = arith.constant 0 : index
    %c0_4 = arith.constant 0 : index
    %c0_5 = arith.constant 0 : index
    %c0_6 = arith.constant 0 : index
    %3 = vector.load %arg3[%c0_3, %c0_4, %c0_5, %c0_6] : memref<1x16x8x128xbf16, #tpu.memory_space<vmem>>, vector<1x16x8x128xbf16>
    %4 = vector.shape_cast %3 : vector<1x16x8x128xbf16> to vector<16x8x128xbf16>
    %cst = arith.constant 0.000000e+00 : bf16
    %5 = vector.broadcast %cst : bf16 to vector<2x8x128xbf16>
    %6 = tpu.concatenate %5, %4, %5 in 0 : vector<2x8x128xbf16>, vector<16x8x128xbf16>, vector<2x8x128xbf16> -> vector<20x8x128xbf16>
    %7 = vector.extract_strided_slice %6 {offsets = [0, 0, 0], sizes = [16, 8, 128], strides = [1, 1, 1]} : vector<20x8x128xbf16> to vector<16x8x128xbf16>
    %8 = vector.extract_strided_slice %6 {offsets = [1, 0, 0], sizes = [16, 8, 128], strides = [1, 1, 1]} : vector<20x8x128xbf16> to vector<16x8x128xbf16>
    %9 = vector.extract_strided_slice %6 {offsets = [2, 0, 0], sizes = [16, 8, 128], strides = [1, 1, 1]} : vector<20x8x128xbf16> to vector<16x8x128xbf16>
    %10 = vector.extract_strided_slice %6 {offsets = [3, 0, 0], sizes = [16, 8, 128], strides = [1, 1, 1]} : vector<20x8x128xbf16> to vector<16x8x128xbf16>
    %11 = vector.extract_strided_slice %6 {offsets = [4, 0, 0], sizes = [16, 8, 128], strides = [1, 1, 1]} : vector<20x8x128xbf16> to vector<16x8x128xbf16>
    %12 = tpu.concatenate %7, %8, %9, %10, %11 in 2 : vector<16x8x128xbf16>, vector<16x8x128xbf16>, vector<16x8x128xbf16>, vector<16x8x128xbf16>, vector<16x8x128xbf16> -> vector<16x8x640xbf16>
    %13 = vector.shape_cast %12 : vector<16x8x640xbf16> to vector<128x640xbf16>
    %cst_7 = arith.constant 0.000000e+00 : bf16
    %14 = vector.broadcast %cst_7 : bf16 to vector<2x8x128xbf16>
    %15 = tpu.concatenate %14, %2, %14 in 0 : vector<2x8x128xbf16>, vector<16x8x128xbf16>, vector<2x8x128xbf16> -> vector<20x8x128xbf16>
    %16 = vector.extract_strided_slice %15 {offsets = [0, 0, 0], sizes = [16, 8, 128], strides = [1, 1, 1]} : vector<20x8x128xbf16> to vector<16x8x128xbf16>
    %17 = vector.extract_strided_slice %15 {offsets = [1, 0, 0], sizes = [16, 8, 128], strides = [1, 1, 1]} : vector<20x8x128xbf16> to vector<16x8x128xbf16>
    %18 = vector.extract_strided_slice %15 {offsets = [2, 0, 0], sizes = [16, 8, 128], strides = [1, 1, 1]} : vector<20x8x128xbf16> to vector<16x8x128xbf16>
    %19 = vector.extract_strided_slice %15 {offsets = [3, 0, 0], sizes = [16, 8, 128], strides = [1, 1, 1]} : vector<20x8x128xbf16> to vector<16x8x128xbf16>
    %20 = vector.extract_strided_slice %15 {offsets = [4, 0, 0], sizes = [16, 8, 128], strides = [1, 1, 1]} : vector<20x8x128xbf16> to vector<16x8x128xbf16>
    %21 = tpu.concatenate %16, %17, %18, %19, %20 in 2 : vector<16x8x128xbf16>, vector<16x8x128xbf16>, vector<16x8x128xbf16>, vector<16x8x128xbf16>, vector<16x8x128xbf16> -> vector<16x8x640xbf16>
    %22 = vector.shape_cast %21 : vector<16x8x640xbf16> to vector<128x640xbf16>
    %c0_8 = arith.constant 0 : index
    %c0_9 = arith.constant 0 : index
    %23 = vector.load %arg7[%c0_8, %c0_9] : memref<1x384xf32, #tpu.memory_space<vmem>>, vector<1x384xf32>
    %c0_10 = arith.constant 0 : index
    %c0_11 = arith.constant 0 : index
    %24 = vector.load %arg4[%c0_10, %c0_11] : memref<640x384xbf16, #tpu.memory_space<vmem>>, vector<640x384xbf16>
    %cst_12 = arith.constant dense<0.000000e+00> : vector<128x384xf32>
    %25 = tpu.matmul %13, %24, %cst_12 {dimension_numbers = #tpu.dot_dimension_numbers<[1], [0], [0], [1], [0, 0, 1, 1], [], []>} : vector<128x640xbf16>, vector<640x384xbf16>, vector<128x384xf32> -> vector<128x384xf32>
    %26 = vector.broadcast %23 : vector<1x384xf32> to vector<128x384xf32>
    %27 = arith.addf %25, %26 : vector<128x384xf32>
    %c0_13 = arith.constant 0 : index
    %c0_14 = arith.constant 0 : index
    %28 = vector.load %arg5[%c0_13, %c0_14] : memref<640x256xbf16, #tpu.memory_space<vmem>>, vector<640x256xbf16>
    %cst_15 = arith.constant dense<0.000000e+00> : vector<128x256xf32>
    %29 = tpu.matmul %22, %28, %cst_15 {dimension_numbers = #tpu.dot_dimension_numbers<[1], [0], [0], [1], [0, 0, 1, 1], [], []>} : vector<128x640xbf16>, vector<640x256xbf16>, vector<128x256xf32> -> vector<128x256xf32>
    %30 = vector.extract_strided_slice %27 {offsets = [0, 0], sizes = [128, 128], strides = [1, 1]} : vector<128x384xf32> to vector<128x128xf32>
    %31 = vector.extract_strided_slice %29 {offsets = [0, 0], sizes = [128, 128], strides = [1, 1]} : vector<128x256xf32> to vector<128x128xf32>
    %32 = arith.addf %30, %31 : vector<128x128xf32>
    %33 = arith.negf %32 : vector<128x128xf32>
    %34 = math.exp %33 : vector<128x128xf32>
    %cst_16 = arith.constant 1.000000e+00 : f32
    %35 = vector.broadcast %cst_16 : f32 to vector<128x128xf32>
    %36 = arith.addf %35, %34 : vector<128x128xf32>
    %37 = arith.divf %35, %36 : vector<128x128xf32>
    %38 = vector.extract_strided_slice %27 {offsets = [0, 128], sizes = [128, 128], strides = [1, 1]} : vector<128x384xf32> to vector<128x128xf32>
    %39 = vector.extract_strided_slice %29 {offsets = [0, 128], sizes = [128, 128], strides = [1, 1]} : vector<128x256xf32> to vector<128x128xf32>
    %40 = arith.addf %38, %39 : vector<128x128xf32>
    %41 = arith.negf %40 : vector<128x128xf32>
    %42 = math.exp %41 : vector<128x128xf32>
    %cst_17 = arith.constant 1.000000e+00 : f32
    %43 = vector.broadcast %cst_17 : f32 to vector<128x128xf32>
    %44 = arith.addf %43, %42 : vector<128x128xf32>
    %45 = arith.divf %43, %44 : vector<128x128xf32>
    %46 = vector.shape_cast %1 : vector<16x8x128xf32> to vector<128x128xf32>
    %47 = arith.mulf %45, %46 : vector<128x128xf32>
    %48 = arith.truncf %47 : vector<128x128xf32> to vector<128x128xbf16>
    %49 = vector.shape_cast %48 : vector<128x128xbf16> to vector<16x8x128xbf16>
    %cst_18 = arith.constant 0.000000e+00 : bf16
    %50 = vector.broadcast %cst_18 : bf16 to vector<2x8x128xbf16>
    %51 = tpu.concatenate %50, %49, %50 in 0 : vector<2x8x128xbf16>, vector<16x8x128xbf16>, vector<2x8x128xbf16> -> vector<20x8x128xbf16>
    %52 = vector.extract_strided_slice %51 {offsets = [0, 0, 0], sizes = [16, 8, 128], strides = [1, 1, 1]} : vector<20x8x128xbf16> to vector<16x8x128xbf16>
    %53 = vector.extract_strided_slice %51 {offsets = [1, 0, 0], sizes = [16, 8, 128], strides = [1, 1, 1]} : vector<20x8x128xbf16> to vector<16x8x128xbf16>
    %54 = vector.extract_strided_slice %51 {offsets = [2, 0, 0], sizes = [16, 8, 128], strides = [1, 1, 1]} : vector<20x8x128xbf16> to vector<16x8x128xbf16>
    %55 = vector.extract_strided_slice %51 {offsets = [3, 0, 0], sizes = [16, 8, 128], strides = [1, 1, 1]} : vector<20x8x128xbf16> to vector<16x8x128xbf16>
    %56 = vector.extract_strided_slice %51 {offsets = [4, 0, 0], sizes = [16, 8, 128], strides = [1, 1, 1]} : vector<20x8x128xbf16> to vector<16x8x128xbf16>
    %57 = tpu.concatenate %52, %53, %54, %55, %56 in 2 : vector<16x8x128xbf16>, vector<16x8x128xbf16>, vector<16x8x128xbf16>, vector<16x8x128xbf16>, vector<16x8x128xbf16> -> vector<16x8x640xbf16>
    %58 = vector.shape_cast %57 : vector<16x8x640xbf16> to vector<128x640xbf16>
    %59 = vector.extract_strided_slice %27 {offsets = [0, 256], sizes = [128, 128], strides = [1, 1]} : vector<128x384xf32> to vector<128x128xf32>
    %c0_19 = arith.constant 0 : index
    %c0_20 = arith.constant 0 : index
    %60 = vector.load %arg6[%c0_19, %c0_20] : memref<640x128xbf16, #tpu.memory_space<vmem>>, vector<640x128xbf16>
    %cst_21 = arith.constant dense<0.000000e+00> : vector<128x128xf32>
    %61 = tpu.matmul %58, %60, %cst_21 {dimension_numbers = #tpu.dot_dimension_numbers<[1], [0], [0], [1], [0, 0, 1, 1], [], []>} : vector<128x640xbf16>, vector<640x128xbf16>, vector<128x128xf32> -> vector<128x128xf32>
    %62 = arith.addf %59, %61 : vector<128x128xf32>
    %63 = math.tanh %62 : vector<128x128xf32>
    %cst_22 = arith.constant 1.000000e+00 : f32
    %64 = vector.broadcast %cst_22 : f32 to vector<128x128xf32>
    %65 = arith.subf %64, %37 : vector<128x128xf32>
    %66 = arith.mulf %65, %46 : vector<128x128xf32>
    %67 = arith.mulf %37, %63 : vector<128x128xf32>
    %68 = arith.addf %66, %67 : vector<128x128xf32>
    %69 = vector.shape_cast %68 : vector<128x128xf32> to vector<1x16x8x128xf32>
    %c0_23 = arith.constant 0 : index
    %c0_24 = arith.constant 0 : index
    %c0_25 = arith.constant 0 : index
    %c0_26 = arith.constant 0 : index
    %70 = vector.load %arg8[%c0_23, %c0_24, %c0_25, %c0_26] : memref<1x16x8x128xf32, #tpu.memory_space<vmem>>, vector<1x16x8x128xf32>
    tpu.vector_store %arg8[%c0_23, %c0_24, %c0_25, %c0_26], %69 {strides = array<i32>} : memref<1x16x8x128xf32, #tpu.memory_space<vmem>>, vector<1x16x8x128xf32>,
    return
  }
  func.func @transform_0(%arg0: i32, %arg1: i32) -> (i32, i32, i32, i32) {
    %c0_i32 = arith.constant 0 : i32
    %c0_i32_0 = arith.constant 0 : i32
    %c0_i32_1 = arith.constant 0 : i32
    return %arg0, %c0_i32, %arg1, %c0_i32_0 : i32, i32, i32, i32
  }
  func.func @transform_1(%arg0: i32, %arg1: i32) -> (i32, i32, i32, i32) {
    %c0_i32 = arith.constant 0 : i32
    %c0_i32_0 = arith.constant 0 : i32
    %c0_i32_1 = arith.constant 0 : i32
    return %arg0, %c0_i32, %arg1, %c0_i32_0 : i32, i32, i32, i32
  }
  func.func @transform_2(%arg0: i32, %arg1: i32) -> (i32, i32) {
    %c0_i32 = arith.constant 0 : i32
    %c0_i32_0 = arith.constant 0 : i32
    %c0_i32_1 = arith.constant 0 : i32
    return %c0_i32, %c0_i32_0 : i32, i32
  }
  func.func @transform_3(%arg0: i32, %arg1: i32) -> (i32, i32) {
    %c0_i32 = arith.constant 0 : i32
    %c0_i32_0 = arith.constant 0 : i32
    %c0_i32_1 = arith.constant 0 : i32
    return %c0_i32, %c0_i32_0 : i32, i32
  }
  func.func @transform_4(%arg0: i32, %arg1: i32) -> (i32, i32) {
    %c0_i32 = arith.constant 0 : i32
    %c0_i32_0 = arith.constant 0 : i32
    %c0_i32_1 = arith.constant 0 : i32
    return %c0_i32, %c0_i32_0 : i32, i32
  }
  func.func @transform_5(%arg0: i32, %arg1: i32) -> (i32, i32) {
    %c0_i32 = arith.constant 0 : i32
    %c0_i32_0 = arith.constant 0 : i32
    %c0_i32_1 = arith.constant 0 : i32
    return %c0_i32, %c0_i32_0 : i32, i32
  }
  func.func @transform_6(%arg0: i32, %arg1: i32) -> (i32, i32, i32, i32) {
    %c0_i32 = arith.constant 0 : i32
    %c0_i32_0 = arith.constant 0 : i32
    %c0_i32_1 = arith.constant 0 : i32
    return %arg0, %c0_i32, %arg1, %c0_i32_0 : i32, i32, i32, i32
  }
}

</mosaic_0001>

<bundles_post_ra>
// kernel: sepconv_gru_forward.3
= control target key start
LH: loop header
LB: loop body
LE: loop exit
PB: predicated region body
PF: predicated region fallthrough
CT: control target
= control target key end

     0   :  { %s7538_s0 = inlined_call_operand.vmem [shape: f32[2,16,16,128], index: 0, kind: input, shape index: {}]   ;;  %s7539_s1 = inlined_call_operand.vmem [shape: bf16[2,16,16,128], index: 1, kind: input, shape index: {}]   ;;  %s7540_s2 = inlined_call_operand.vmem [shape: bf16[640,384], index: 2, kind: input, shape index: {}]   ;;  %s7541_s3 = inlined_call_operand.vmem [shape: bf16[640,256], index: 3, kind: input, shape index: {}]   ;;  %s7542_s4 = inlined_call_operand.vmem [shape: bf16[640,128], index: 4, kind: input, shape index: {}]   ;;  %s7543_s5 = inlined_call_operand.vmem [shape: f32[1,384], index: 5, kind: input, shape index: {}]   ;;  %s7544_s6 = inlined_call_operand.hbm [shape: f32[2,16,16,128], index: 6, kind: output, shape index: {}]  }
   0x1   :  { %7550 = sst [smem:[#allocation14_spill]] %s7538_s0 }
   0x2   :  { %11 = vsyncpa [#allocation5], 0 }
   0x3   :  { %13 = vsyncpa [#allocation5 + $0x1], 0  ;;  %s5757_s21 = smov 0   ;;  %s5759_s22 = smov 0  }
   0x4   :  { %s5761_s23 = smov 0   ;;  %s5763_s24 = smov 0  }
   0x5   :  { %s5765_s25 = smov 0   ;;  %s5767_s26 = smov 0  }
   0x6   :  { %s5769_s27 = smov 0   ;;  %s5771_s28 = smov 0  }
   0x7 LB: > { %s4085_s29 = sadd.s32 4294967295, %s5715_s28   ;;  %s4086_s30 = sadd.s32 4294967294, %s5715_s28   ;;  %s5715_s28 = sphi %s5771_s28, %s19_s28   ;;  %s5711_s27 = sphi %s5769_s27, %s7577_s27   ;;  %s5707_s26 = sphi %s5767_s26, %s7576_s26   ;;  %s5703_s25 = sphi %s5765_s25, %s7575_s25   ;;  %s5699_s24 = sphi %s5763_s24, %s7574_s24   ;;  %s5695_s23 = sphi %s5761_s23, %s7573_s23   ;;  %s5691_s22 = sphi %s5759_s22, %s7572_s22   ;;  %s5687_s21 = sphi %s5757_s21, %s7571_s21  }
   0x8   : > { %s28_s7 = sadd.s32 1, %s5707_s26  ;;  %s31_s8 = sadd.s32 1, %s5711_s27 }
   0x9   : > { %p29_p0 = scmp.ge.s32.totalorder %s28_s7, 2  ;;  %p47_p1 = scmp.ne.s32.totalorder %s5695_s23, %s5691_s22 }
   0xa   : > { %p48_p2 = scmp.eq.s32.totalorder %s5715_s28, 0  ;;  %p191_p5 = scmp.eq.s32.totalorder %s4085_s29, 3 }
   0xb   : > { %s7579_s7 = smov (%p29_p0, %s28_s7), 0  ;;  %s7581_s8 = smov (!%p29_p0, %s31_s8), %s5711_s27 }
   0xc   : > { %s36_s9 = ssub.s32 %s5707_s26, %s7579_s7  ;;  %p5809_p3 = por %p48_p2, %p47_p1 }
   0xd   : > { %p33_p4 = scmp.ge.s32.totalorder %s7581_s8, 2  ;;  %p196_p6 = scmp.ne.s32.totalorder %s5691_s22, %s5687_s21 }
   0xe   : > { %p197_p7 = scmp.eq.s32.totalorder %s4086_s30, 3  ;;  %p5817_p8 = por %p191_p5, %p47_p1 }
   0xf   : > { %s7583_s8 = smov (%p33_p4, %s7581_s8), 0  ;;  %s40_s15 = sadd.s32 1, %s5695_s23 }
  0x10   : > { %p5821_p9 = por %p197_p7, %p196_p6  ;;  %s35_s13 = ssub.s32 %s5711_s27, %s7583_s8 }
  0x11   : > { %s37_s14 = sor.u32 %s36_s9, %s35_s13  ;;  %p4088_p11 = scmp.ge.s32.totalorder %s5715_s28, 4 }
  0x12   : > { %p38_p10 = scmp.eq.s32.totalorder %s37_s14, 0 }
  0x13   : > { %225 = sbr.rel (%p4088_p11) target bundleno = 60 (0x3c), region = 32 }
  0x14   : > { %s5829_s16 = scalar_select %p38_p10, %s5695_s23, %s40_s15  }
  0x1a   : > { %228 = sbr.rel (!%p5809_p3) target bundleno = 44 (0x2c), region = 36  ;;  %s230_s17 = sand.u32 (%p5809_p3), 1, %s5695_s23  }
  0x1b   : > { %s4090_s18 = sshll.u32 (%p5809_p3), %s5711_s27, 5  ;;  %s4089_s19 = sshll.u32 (%p5809_p3), %s230_s17, 7 }
  0x1c   : > { %s234_s20 = sadd.s32 (%p5809_p3), %s5707_s26, %s4090_s18  ;;  %s7554_s0 = sld [smem:[#allocation14_spill]] (%p5809_p3) }
  0x1d   : > { %s4091_s29 = sshll.u32 (%p5809_p3), %s234_s20, 3  ;;  %s232_s14 = scalar_lea.vmem (%p5809_p3), [#allocation2], %s4089_s19 }
  0x22   : > { %s5840_s13 = scalar_lea.vmem %s7554_s0, %s4091_s29 }
  0x23   : > { %v294_v0 = vld [vmem:[%s5840_s13] sm:$0xff]  ;;  %v296_v1 = vld [vmem:[%s5840_s13 + $0x10] sm:$0xff] }
  0x24   : > { %v298_v2 = vld [vmem:[%s5840_s13 + $0x20] sm:$0xff]  ;;  %295 = vst [vmem:[%s232_s14] sm:$0xff] %v294_v0  ;;  %297 = vst [vmem:[%s232_s14 + $0x8] sm:$0xff] %v296_v1  ;;  %v300_v3 = vld [vmem:[%s5840_s13 + $0x30] sm:$0xff] }
  0x25   : > { %299 = vst [vmem:[%s232_s14 + $0x10] sm:$0xff] %v298_v2  ;;  %v302_v4 = vld [vmem:[%s5840_s13 + $0x40] sm:$0xff]  ;;  %v304_v5 = vld [vmem:[%s5840_s13 + $0x50] sm:$0xff]  ;;  %301 = vst [vmem:[%s232_s14 + $0x18] sm:$0xff] %v300_v3 }
  0x26   : > { %303 = vst [vmem:[%s232_s14 + $0x20] sm:$0xff] %v302_v4  ;;  %305 = vst [vmem:[%s232_s14 + $0x28] sm:$0xff] %v304_v5  ;;  %v306_v6 = vld [vmem:[%s5840_s13 + $0x60] sm:$0xff]  ;;  %v308_v7 = vld [vmem:[%s5840_s13 + $0x70] sm:$0xff] }
  0x27   : > { %v310_v8 = vld [vmem:[%s5840_s13 + $0x80] sm:$0xff]  ;;  %307 = vst [vmem:[%s232_s14 + $0x30] sm:$0xff] %v306_v6  ;;  %309 = vst [vmem:[%s232_s14 + $0x38] sm:$0xff] %v308_v7  ;;  %v312_v9 = vld [vmem:[%s5840_s13 + $0x90] sm:$0xff] }
  0x28   : > { %311 = vst [vmem:[%s232_s14 + $0x40] sm:$0xff] %v310_v8  ;;  %v314_v10 = vld [vmem:[%s5840_s13 + $0xa0] sm:$0xff]  ;;  %v316_v11 = vld [vmem:[%s5840_s13 + $0xb0] sm:$0xff]  ;;  %313 = vst [vmem:[%s232_s14 + $0x48] sm:$0xff] %v312_v9 }
  0x29   : > { %315 = vst [vmem:[%s232_s14 + $0x50] sm:$0xff] %v314_v10  ;;  %317 = vst [vmem:[%s232_s14 + $0x58] sm:$0xff] %v316_v11  ;;  %v318_v12 = vld [vmem:[%s5840_s13 + $0xc0] sm:$0xff]  ;;  %v320_v13 = vld [vmem:[%s5840_s13 + $0xd0] sm:$0xff] }
  0x2a   : > { %v322_v14 = vld [vmem:[%s5840_s13 + $0xe0] sm:$0xff]  ;;  %319 = vst [vmem:[%s232_s14 + $0x60] sm:$0xff] %v318_v12  ;;  %321 = vst [vmem:[%s232_s14 + $0x68] sm:$0xff] %v320_v13  ;;  %v324_v15 = vld [vmem:[%s5840_s13 + $0xf0] sm:$0xff] }
  0x2b   : > { %323 = vst [vmem:[%s232_s14 + $0x70] sm:$0xff] %v322_v14  ;;  %325 = vst [vmem:[%s232_s14 + $0x78] sm:$0xff] %v324_v15 }
  0x2c PF: > { %331 = sbr.rel (!%p5809_p3) target bundleno = 60 (0x3c), region = 74  ;;  %s333_s15 = sand.u32 (%p5809_p3), 1, %s5695_s23  }
  0x2d   : > { %s4093_s17 = sshll.u32 (%p5809_p3), %s5711_s27, 5  ;;  %s4092_s18 = sshll.u32 (%p5809_p3), %s333_s15, 6 }
  0x2e   : > { %s337_s19 = sadd.s32 (%p5809_p3), %s5707_s26, %s4093_s17  ;;  %s335_s10 = scalar_lea.vmem (%p5809_p3), [#allocation3], %s4092_s18 }
  0x2f   : > { %s4094_s20 = sshll.u32 (%p5809_p3), %s337_s19, 2 }
  0x30   : > { %s5866_s9 = scalar_lea.vmem (%p5809_p3), %s7539_s1, %s4094_s20 }
  0x31   : > { %v355_v16 = vld [vmem:[%s5866_s9] sm:$0xf] (%p5809_p3)  ;;  %v357_v17 = vld [vmem:[%s5866_s9 + $0x8] sm:$0xf] (%p5809_p3)  ;;  %v359_v18 = vld [vmem:[%s5866_s9 + $0x10] sm:$0xf] (%p5809_p3) }
  0x32   : > { %356 = vst [vmem:[%s335_s10] sm:$0xf] (%p5809_p3), %v355_v16  ;;  %358 = vst [vmem:[%s335_s10 + $0x4] sm:$0xf] (%p5809_p3), %v357_v17  ;;  %v361_v19 = vld [vmem:[%s5866_s9 + $0x18] sm:$0xf] (%p5809_p3) }
  0x33   : > { %360 = vst [vmem:[%s335_s10 + $0x8] sm:$0xf] %v359_v18  ;;  %v363_v20 = vld [vmem:[%s5866_s9 + $0x20] sm:$0xf]  ;;  %v365_v21 = vld [vmem:[%s5866_s9 + $0x28] sm:$0xf] }
  0x34   : > { %362 = vst [vmem:[%s335_s10 + $0xc] sm:$0xf] %v361_v19  ;;  %364 = vst [vmem:[%s335_s10 + $0x10] sm:$0xf] %v363_v20  ;;  %v367_v22 = vld [vmem:[%s5866_s9 + $0x30] sm:$0xf] }
  0x35   : > { %366 = vst [vmem:[%s335_s10 + $0x14] sm:$0xf] %v365_v21  ;;  %v369_v23 = vld [vmem:[%s5866_s9 + $0x38] sm:$0xf]  ;;  %v371_v24 = vld [vmem:[%s5866_s9 + $0x40] sm:$0xf] }
  0x36   : > { %368 = vst [vmem:[%s335_s10 + $0x18] sm:$0xf] %v367_v22  ;;  %370 = vst [vmem:[%s335_s10 + $0x1c] sm:$0xf] %v369_v23  ;;  %v373_v25 = vld [vmem:[%s5866_s9 + $0x48] sm:$0xf] }
  0x37   : > { %372 = vst [vmem:[%s335_s10 + $0x20] sm:$0xf] %v371_v24  ;;  %v375_v26 = vld [vmem:[%s5866_s9 + $0x50] sm:$0xf]  ;;  %v377_v27 = vld [vmem:[%s5866_s9 + $0x58] sm:$0xf] }
  0x38   : > { %374 = vst [vmem:[%s335_s10 + $0x24] sm:$0xf] %v373_v25  ;;  %376 = vst [vmem:[%s335_s10 + $0x28] sm:$0xf] %v375_v26  ;;  %v379_v28 = vld [vmem:[%s5866_s9 + $0x60] sm:$0xf] }
  0x39   : > { %378 = vst [vmem:[%s335_s10 + $0x2c] sm:$0xf] %v377_v27  ;;  %v381_v29 = vld [vmem:[%s5866_s9 + $0x68] sm:$0xf]  ;;  %v383_v30 = vld [vmem:[%s5866_s9 + $0x70] sm:$0xf] }
  0x3a   : > { %380 = vst [vmem:[%s335_s10 + $0x30] sm:$0xf] %v379_v28  ;;  %382 = vst [vmem:[%s335_s10 + $0x34] sm:$0xf] %v381_v29  ;;  %v385_v31 = vld [vmem:[%s5866_s9 + $0x78] sm:$0xf] }
  0x3b   : > { %384 = vst [vmem:[%s335_s10 + $0x38] sm:$0xf] %v383_v30  ;;  %386 = vst [vmem:[%s335_s10 + $0x3c] sm:$0xf] %v385_v31 }
  0x3c PF: > { %p4095_p12 = scmp.ge.s32.totalorder %s5715_s28, 1  ;;  %p440_p13 = scmp.lt.s32.totalorder %s5715_s28, 5 }
  0x3e   : > { %p441_p0 = pnand %p4095_p12, %p440_p13 }
  0x40   : > { %444 = sbr.rel (%p441_p0) target bundleno = 1109 (0x455), region = 115 }
  0x47   : > { %v5110_v32 = vld [vmem:[%s7540_s2 + $0x4] ss:$12 sps:$4 sm:$0xff]   ;;  %v5112_v33 = vld [vmem:[%s7540_s2] ss:$12 sps:$4 sm:$0xff]   ;;  %v5113_v34 = vld [vmem:[%s7540_s2 + $0x1c] ss:$12 sps:$4 sm:$0xff]  }
  0x48   : > { %1455 = vmatprep.subr.bf16.mxu0 %v5110_v32  ;;  %v5115_v35 = vld [vmem:[%s7540_s2 + $0x18] ss:$12 sps:$4 sm:$0xff]   ;;  %v5116_v36 = vld [vmem:[%s7540_s2 + $0x34] ss:$12 sps:$4 sm:$0xff]   ;;  %v5118_v37 = vld [vmem:[%s7540_s2 + $0x30] ss:$12 sps:$4 sm:$0xff]  }
  0x49   : > { %1456 = vmatpush1.bf16.msra.mxu0 %v5112_v33  ;;  %v5119_v38 = vld [vmem:[%s7540_s2 + $0x4c] ss:$12 sps:$4 sm:$0xff]   ;;  %v5121_v39 = vld [vmem:[%s7540_s2 + $0x48] ss:$12 sps:$4 sm:$0xff]   ;;  %v5122_v40 = vld [vmem:[%s7540_s2 + $0x64] ss:$12 sps:$4 sm:$0xff]  }
  0x4a   : > { %1457 = vmatprep.subr.bf16.mxu0 %v5113_v34  ;;  %s5914_s29 = sand.u32 1, %s5691_s22   ;;  %v5124_v41 = vld [vmem:[%s7540_s2 + $0x60] ss:$12 sps:$4 sm:$0xff]   ;;  %v5125_v42 = vld [vmem:[%s7540_s2 + $0x7c] ss:$12 sps:$4 sm:$0xff]   ;;  %v7546_v46 = vmov 0  }
  0x4b   : > { %s4097_s10 = sshll.u32 %s5914_s29, 6  ;;  %v5127_v43 = vld [vmem:[%s7540_s2 + $0x78] ss:$12 sps:$4 sm:$0xff]   ;;  %v5128_v44 = vld [vmem:[%s7540_s2 + $0x94] ss:$12 sps:$4 sm:$0xff]   ;;  %v6021_v13 = vcombine.low %v7546_v46, %v7546_v46  ;;  %s7545_s14 = sshll.u32 %s5914_s29, 7 }
  0x4c   : > { %s5929_s20 = scalar_lea.vmem [#allocation3], %s4097_s10  ;;  %v5130_v48 = vld [vmem:[%s7540_s2 + $0x90] ss:$12 sps:$4 sm:$0xff]   ;;  %v5131_v49 = vld [vmem:[%s7540_s2 + $0xac] ss:$12 sps:$4 sm:$0xff]   ;;  %s6569_s17 = scalar_lea.vmem [#allocation2], %s7545_s14 }
  0x4d   : > { %1458 = vmatpush1.bf16.msra.mxu0 %v5115_v35  ;;  %v5932_v45 = vld [vmem:[%s5929_s20] sm:$0xf]  ;;  %v5133_v50 = vld [vmem:[%s7540_s2 + $0xa8] ss:$12 sps:$4 sm:$0xff]   ;;  %v5134_v51 = vld [vmem:[%s7540_s2 + $0xc4] ss:$12 sps:$4 sm:$0xff]  }
  0x4e   : > { %1459 = vmatprep.subr.bf16.mxu0 %v5116_v36  ;;  %v4100_v47 = vcombine.low %v7546_v46, %v5932_v45  ;;  %v5136_v52 = vld [vmem:[%s7540_s2 + $0xc0] ss:$12 sps:$4 sm:$0xff]   ;;  %v5137_v53 = vld [vmem:[%s7540_s2 + $0xdc] ss:$12 sps:$4 sm:$0xff]   ;;  %v5139_v54 = vld [vmem:[%s7540_s2 + $0xd8] ss:$12 sps:$4 sm:$0xff]  }
  0x4f   : > { %v5140_v55 = vld [vmem:[%s7540_s2 + $0xf4] ss:$12 sps:$4 sm:$0xff]   ;;  %v5142_v56 = vld [vmem:[%s7540_s2 + $0xf0] ss:$12 sps:$4 sm:$0xff]   ;;  %v5143_v57 = vld [vmem:[%s7540_s2 + $0x10c] ss:$12 sps:$4 sm:$0xff]  }
  0x50   : > { %1487 = vmatprep.mubr.bf16.mxu0 %v4100_v47  ;;  %1826 = vmatprep.mubr.bf16.mxu1 %v4100_v47  ;;  %v5145_v58 = vld [vmem:[%s7540_s2 + $0x108] ss:$12 sps:$4 sm:$0xff]   ;;  %v5146_v59 = vld [vmem:[%s7540_s2 + $0x124] ss:$12 sps:$4 sm:$0xff]   ;;  %v5148_v60 = vld [vmem:[%s7540_s2 + $0x120] ss:$12 sps:$4 sm:$0xff]  }
  0x51   : > { %1460 = vmatpush1.bf16.msra.mxu0 %v5118_v37  ;;  %v5149_v61 = vld [vmem:[%s7540_s2 + $0x13c] ss:$12 sps:$4 sm:$0xff]   ;;  %v5151_v62 = vld [vmem:[%s7540_s2 + $0x138] ss:$12 sps:$4 sm:$0xff]   ;;  %v5152_v63 = vld [vmem:[%s7540_s2 + $0x154] ss:$12 sps:$4 sm:$0xff]  }
  0x52   : > { %1461 = vmatprep.subr.bf16.mxu0 %v5119_v38  ;;  %v5229_v0 = vld [vmem:[%s7540_s2 + $0xc8] ss:$12 sps:$4 sm:$0xff]   ;;  %v5154_v1 = vld [vmem:[%s7540_s2 + $0x150] ss:$12 sps:$4 sm:$0xff]   ;;  %v5231_v3 = vld [vmem:[%s7540_s2 + $0xe0] ss:$12 sps:$4 sm:$0xff]  }
  0x53   : > { %v5230_v2 = vld [vmem:[%s7540_s2 + $0x8] ss:$12 sps:$4 sm:$0xff]   ;;  %4427 = vmatprep.subr.bf16.mxu1 %v5229_v0  ;;  %v5232_v4 = vld [vmem:[%s7540_s2 + $0x20] ss:$12 sps:$4 sm:$0xff]   ;;  %v5236_v7 = vld [vmem:[%s7540_s2 + $0xf8] ss:$12 sps:$4 sm:$0xff]  }
  0x54   : > { %4428 = vmatpush3.bf16.msra.mxu1 %v5230_v2  ;;  %v5155_v5 = vld [vmem:[%s7540_s2 + $0x16c] ss:$12 sps:$4 sm:$0xff]   ;;  %v5157_v6 = vld [vmem:[%s7540_s2 + $0x168] ss:$12 sps:$4 sm:$0xff]   ;;  %v521_v8 = vld [vmem:[%s5929_s20 + $0x4] sm:$0xf] }
  0x55   : > { %1462 = vmatpush1.bf16.msra.mxu0 %v5121_v39  ;;  %4429 = vmatprep.subr.bf16.mxu1 %v5231_v3  ;;  %v522_v9 = vld [vmem:[%s5929_s20 + $0x8] sm:$0xf]  ;;  %v5163_v10 = vld [vmem:[%s7540_s2 + $0x184] ss:$12 sps:$4 sm:$0xff]   ;;  %v5161_v14 = vld [vmem:[%s7540_s2 + $0x180] ss:$12 sps:$4 sm:$0xff]   ;;  %v6057_v26 = vcombine.low %v5932_v45, %v521_v8 }
  0x56   : > { %1463 = vmatprep.subr.bf16.mxu0 %v5122_v40  ;;  %v5237_v11 = vld [vmem:[%s7540_s2 + $0x38] ss:$12 sps:$4 sm:$0xff]   ;;  %v5238_v12 = vld [vmem:[%s7540_s2 + $0x110] ss:$12 sps:$4 sm:$0xff]   ;;  %v6026_v15 = vcombine.low %v521_v8, %v522_v9  ;;  %v5243_v18 = vld [vmem:[%s7540_s2 + $0x128] ss:$12 sps:$4 sm:$0xff]  }
  0x57   : > { %v5166_v16 = vld [vmem:[%s7540_s2 + $0x19c] ss:$12 sps:$4 sm:$0xff]   ;;  %v523_v19 = vld [vmem:[%s5929_s20 + $0xc] sm:$0xf]  ;;  %v5164_v20 = vld [vmem:[%s7540_s2 + $0x198] ss:$12 sps:$4 sm:$0xff]  }
  0x58   : > { %4430 = vmatpush3.bf16.msra.mxu1 %v5232_v4  ;;  %v5239_v17 = vld [vmem:[%s7540_s2 + $0x50] ss:$12 sps:$4 sm:$0xff]   ;;  %v5169_v21 = vld [vmem:[%s7540_s2 + $0x1b4] ss:$12 sps:$4 sm:$0xff]   ;;  %v5172_v27 = vld [vmem:[%s7540_s2 + $0x1cc] ss:$12 sps:$4 sm:$0xff]   ;;  %v6096_v40 = vcombine.low %v522_v9, %v523_v19 }
  0x59   : > { %1464 = vmatpush1.bf16.msra.mxu0 %v5124_v41  ;;  %4431 = vmatprep.subr.bf16.mxu1 %v5236_v7  ;;  %v524_v22 = vld [vmem:[%s5929_s20 + $0x10] sm:$0xf]  ;;  %v5244_v23 = vld [vmem:[%s7540_s2 + $0x68] ss:$12 sps:$4 sm:$0xff]   ;;  %v5245_v25 = vld [vmem:[%s7540_s2 + $0x140] ss:$12 sps:$4 sm:$0xff]  }
  0x5a   : > { %1465 = vmatprep.subr.bf16.mxu0 %v5125_v42  ;;  %v5167_v24 = vld [vmem:[%s7540_s2 + $0x1b0] ss:$12 sps:$4 sm:$0xff]   ;;  %v6062_v28 = vcombine.low %v523_v19, %v524_v22  ;;  %v6065_v29 = vld [vmem:[%s5929_s20 + $0x38] sm:$0xf]  ;;  %v5246_v30 = vld [vmem:[%s7540_s2 + $0x80] ss:$12 sps:$4 sm:$0xff]  }
  0x5b   : > { %v5250_v31 = vld [vmem:[%s7540_s2 + $0x158] ss:$12 sps:$4 sm:$0xff]   ;;  %v6074_v32 = vld [vmem:[%s5929_s20 + $0x3c] sm:$0xf]  ;;  %v5170_v33 = vld [vmem:[%s7540_s2 + $0x1c8] ss:$12 sps:$4 sm:$0xff]  }
  0x5c   : > { %4432 = vmatpush3.bf16.msra.mxu1 %v5237_v11  ;;  %v5176_v34 = vld [vmem:[%s7540_s2 + $0x1e4] ss:$12 sps:$4 sm:$0xff]   ;;  %v6085_v35 = vcombine.low %v6065_v29, %v6074_v32  ;;  %v525_v36 = vld [vmem:[%s5929_s20 + $0x14] sm:$0xf]  ;;  %v526_v37 = vld [vmem:[%s5929_s20 + $0x18] sm:$0xf] }
  0x5d   : > { %1466 = vmatpush1.bf16.msra.mxu0 %v5127_v43  ;;  %4433 = vmatprep.subr.bf16.mxu1 %v5238_v12  ;;  %v5251_v38 = vld [vmem:[%s7540_s2 + $0x98] ss:$12 sps:$4 sm:$0xff]   ;;  %v5252_v39 = vld [vmem:[%s7540_s2 + $0x170] ss:$12 sps:$4 sm:$0xff]   ;;  %v5174_v41 = vld [vmem:[%s7540_s2 + $0x1e0] ss:$12 sps:$4 sm:$0xff]   ;;  %v6104_v43 = vcombine.low %v525_v36, %v526_v37 }
  0x5e   : > { %1467 = vmatprep.subr.bf16.mxu0 %v5128_v44  ;;  %v5179_v42 = vld [vmem:[%s7540_s2 + $0x1fc] ss:$12 sps:$4 sm:$0xff]   ;;  %v5177_v45 = vld [vmem:[%s7540_s2 + $0x1f8] ss:$12 sps:$4 sm:$0xff]   ;;  %v5190_v2 = vld [vmem:[%s7540_s2 + $0x240] ss:$12 sps:$4 sm:$0xff]  }
  0x5f   : > { %v5253_v44 = vld [vmem:[%s7540_s2 + $0xb0] ss:$12 sps:$4 sm:$0xff]   ;;  %v5273_v47 = vld [vmem:[%s7540_s2 + $0x248] ss:$12 sps:$4 sm:$0xff]   ;;  %v531_v9 = vld [vmem:[%s5929_s20 + $0x2c] sm:$0xf] }
  0x60   : > { %4434 = vmatpush3.bf16.msra.mxu1 %v5239_v17  ;;  %v5288_v0 = vld [vmem:[%s7540_s2 + $0x290] ss:$12 sps:$4 sm:$0xff]   ;;  %v5293_v7 = vld [vmem:[%s7540_s2 + $0x2a8] ss:$12 sps:$4 sm:$0xff]   ;;  %v5298_v12 = vld [vmem:[%s7540_s2 + $0x2c0] ss:$12 sps:$4 sm:$0xff]  }
  0x61   : > { %1468 = vmatpush1.bf16.msra.mxu0 %v5130_v48  ;;  %4435 = vmatprep.subr.bf16.mxu1 %v5243_v18  ;;  %v5184_v48 = vld [vmem:[%s7540_s2 + $0x214] ss:$12 sps:$4 sm:$0xff]   ;;  %v5195_v4 = vld [vmem:[%s7540_s2 + $0x25c] ss:$12 sps:$4 sm:$0xff]   ;;  %v5203_v18 = vld [vmem:[%s7540_s2 + $0x28c] ss:$12 sps:$4 sm:$0xff]  }
  0x62   : > { %1469 = vmatprep.subr.bf16.mxu0 %v5131_v49  ;;  %v527_v49 = vld [vmem:[%s5929_s20 + $0x1c] sm:$0xf]  ;;  %v5200_v8 = vld [vmem:[%s7540_s2 + $0x274] ss:$12 sps:$4 sm:$0xff]   ;;  %s7570_s15 = sshll.u32 %s5914_s29, 7  ;;  %s4408_s19 = sshll.u32 %s5703_s25, 5 }
  0x63   : > { %v5297_v11 = vld [vmem:[%s7540_s2 + $0x1e8] ss:$12 sps:$4 sm:$0xff]   ;;  %v5302_v19 = vld [vmem:[%s7540_s2 + $0x200] ss:$12 sps:$4 sm:$0xff]   ;;  %s7427_s18 = scalar_lea.vmem [#allocation4], %s7570_s15  ;;  %s3979_s30 = sadd.s32 %s5699_s24, %s4408_s19 }
  0x64   : > { %4436 = vmatpush3.bf16.msra.mxu1 %v5244_v23  ;;  %v533_v23 = vld [vmem:[%s5929_s20 + $0x34] sm:$0xf]  ;;  %s3982_s25 = sshll.u32 %s7427_s18, 4  ;;  %s4409_s14 = sshll.u32 %s3979_s30, 7  ;;  %s7475_s25 = int_to_ptr.vmem [resolvable:$true] %s3982_s25 }
  0x65   : > { %1470 = vmatpush1.bf16.msra.mxu0 %v5133_v50  ;;  %4437 = vmatprep.subr.bf16.mxu1 %v5245_v25  ;;  %v528_v50 = vld [vmem:[%s5929_s20 + $0x20] sm:$0xf]  ;;  %v5308_v25 = vld [vmem:[%s7540_s2 + $0x2f0] ss:$12 sps:$4 sm:$0xff]   ;;  %s7481_s13 = scalar_lea.hbm %s7544_s6, %s4409_s14  ;;  %s5718_s0 = smov [#allocation4]  }
  0x66   : > { %1471 = vmatprep.subr.bf16.mxu0 %v5134_v51  ;;  %v5277_v51 = vld [vmem:[%s7540_s2 + $0x188] ss:$12 sps:$4 sm:$0xff]   ;;  %s5625_s10 = sshll.u32 %s5718_s0, 4  ;;  %s5626_s10 = int_to_ptr.vmem [resolvable:$false] %s5625_s10 }
  0x67   : > { %s5627_s15 = scalar_lea.vmem %s5626_s10, 4096  ;;  %p5628_p4 = scmp.lt.s32.totalorder %s7475_s25, %s5626_s10 }
  0x68   : > { %4438 = vmatpush3.bf16.msra.mxu1 %v5246_v30 }
  0x69   : > { %1472 = vmatpush1.bf16.msra.mxu0 %v5136_v52  ;;  %4439 = vmatprep.subr.bf16.mxu1 %v5250_v31  ;;  %v6125_v52 = vcombine.low %v524_v22, %v525_v36  ;;  %v5208_v22 = vld [vmem:[%s7540_s2 + $0x2a4] ss:$12 sps:$4 sm:$0xff]   ;;  %v6235_v31 = vcombine.low %v533_v23, %v6065_v29  ;;  %v5216_v36 = vld [vmem:[%s7540_s2 + $0x2d4] ss:$12 sps:$4 sm:$0xff]  }
  0x6a   : > { %1473 = vmatprep.subr.bf16.mxu0 %v5137_v53  ;;  %v5278_v53 = vld [vmem:[%s7540_s2 + $0x260] ss:$12 sps:$4 sm:$0xff]   ;;  %v5209_v29 = vld [vmem:[%s7540_s2 + $0x2b8] ss:$12 sps:$4 sm:$0xff]  }
  0x6c   : > { %4440 = vmatpush3.bf16.msra.mxu1 %v5251_v38 }
  0x6d   : > { %1474 = vmatpush1.bf16.msra.mxu0 %v5139_v54  ;;  %4441 = vmatprep.subr.bf16.mxu1 %v5252_v39  ;;  %v5182_v54 = vld [vmem:[%s7540_s2 + $0x210] ss:$12 sps:$4 sm:$0xff]   ;;  %v5219_v39 = vld [vmem:[%s7540_s2 + $0x2ec] ss:$12 sps:$4 sm:$0xff]  }
  0x6e   : > { %1475 = vmatprep.subr.bf16.mxu0 %v5140_v55  ;;  %v6133_v55 = vcombine.low %v527_v49, %v528_v50 }
  0x70   : > { %4442 = vmatpush3.bf16.msra.mxu1 %v5253_v44  ;;  %v5220_v44 = vld [vmem:[%s7540_s2 + $0x300] ss:$12 sps:$4 sm:$0xff]  }
  0x71   : > { %1476 = vmatpush1.bf16.msra.mxu0 %v5142_v56  ;;  %4491 = vmatprep.subr.bf16.mxu1 %v5273_v47  ;;  %v5187_v56 = vld [vmem:[%s7540_s2 + $0x22c] ss:$12 sps:$4 sm:$0xff]  }
  0x72   : > { %1477 = vmatprep.subr.bf16.mxu0 %v5143_v57  ;;  %v5185_v57 = vld [vmem:[%s7540_s2 + $0x228] ss:$12 sps:$4 sm:$0xff]   ;;  %v5223_v47 = vld [vmem:[%s7540_s2 + $0x318] ss:$12 sps:$4 sm:$0xff]  }
  0x73   : > { %1827 = vmatmul.mubr.bf16.vlgmr.msra.gmra.mrb[0].mxu1 %v6021_v13 }
  0x74   : > { %1834 = vmatprep.mubr.bf16.mxu1 %v6026_v15  ;;  %4492 = vmatpush3.bf16.msra.mxu1 %v5277_v51  ;;  %v5233_v51 = vld [vmem:[%s7540_s2 + $0x348] ss:$12 sps:$4 sm:$0xff]  }
  0x75   : > { %1478 = vmatpush1.bf16.msra.mxu0 %v5145_v58  ;;  %v5282_v58 = vld [vmem:[%s7540_s2 + $0x1a0] ss:$12 sps:$4 sm:$0xff]   ;;  %4493 = vmatprep.subr.bf16.mxu1 %v5278_v53  ;;  %v5242_v53 = vld [vmem:[%s7540_s2 + $0x364] ss:$12 sps:$4 sm:$0xff]  }
  0x76   : > { %1479 = vmatprep.subr.bf16.mxu0 %v5146_v59  ;;  %v5283_v59 = vld [vmem:[%s7540_s2 + $0x278] ss:$12 sps:$4 sm:$0xff]  }
  0x78   : > { %4494 = vmatpush3.bf16.msra.mxu1 %v5282_v58  ;;  %v5247_v58 = vld [vmem:[%s7540_s2 + $0x378] ss:$12 sps:$4 sm:$0xff]  }
  0x79   : > { %1480 = vmatpush1.bf16.msra.mxu0 %v5148_v60  ;;  %v5192_v60 = vld [vmem:[%s7540_s2 + $0x244] ss:$12 sps:$4 sm:$0xff]   ;;  %4495 = vmatprep.subr.bf16.mxu1 %v5283_v59  ;;  %v5256_v59 = vld [vmem:[%s7540_s2 + $0x394] ss:$12 sps:$4 sm:$0xff]  }
  0x7a   : > { %1481 = vmatprep.subr.bf16.mxu0 %v5149_v61  ;;  %v529_v61 = vld [vmem:[%s5929_s20 + $0x24] sm:$0xf] }
  0x7b   : > { %1835 = vmatmul.mubr.bf16.gmra.mrb[4].mxu1 %v6057_v26 }
  0x7c   : > { %1842 = vmatprep.mubr.bf16.mxu1 %v6062_v28 }
  0x7d   : > { %1482 = vmatpush1.bf16.msra.mxu0 %v5151_v62  ;;  %v530_v62 = vld [vmem:[%s5929_s20 + $0x28] sm:$0xf] }
  0x7e   : > { %1483 = vmatprep.subr.bf16.mxu0 %v5152_v63  ;;  %v5287_v63 = vld [vmem:[%s7540_s2 + $0x1b8] ss:$12 sps:$4 sm:$0xff]   ;;  %v6167_v3 = vcombine.low %v529_v61, %v530_v62  ;;  %v6232_v30 = vcombine.low %v530_v62, %v531_v9 }
  0x7f   : > { %4496 = vmatpush3.bf16.msra.mxu1 %v5287_v63  ;;  %v5348_v62 = vld [vmem:[%s7540_s2 + $0x338] ss:$12 sps:$4 sm:$0xff]  }
  0x80   : > { %4497 = vmatprep.subr.bf16.mxu1 %v5288_v0  ;;  %v5263_v63 = vld [vmem:[%s7541_s3 + $0x4] ss:$8 sps:$4 sm:$0xff]   ;;  %v5356_v0 = vld [vmem:[%s7540_s2 + $0x368] ss:$12 sps:$4 sm:$0xff]  }
  0x81   : > { %1484 = vmatpush1.bf16.msra.mxu0 %v5154_v1  ;;  %v6162_v1 = vcombine.low %v526_v37, %v527_v49  ;;  %v5214_v37 = vld [vmem:[%s7540_s2 + $0x2d0] ss:$12 sps:$4 sm:$0xff]  }
  0x82   : > { %1485 = vmatprep.subr.bf16.mxu0 %v5155_v5  ;;  %v5292_v5 = vld [vmem:[%s7540_s2 + $0x1d0] ss:$12 sps:$4 sm:$0xff]  }
  0x83   : > { %4498 = vmatpush3.bf16.msra.mxu1 %v5292_v5  ;;  %v5226_v49 = vld [vmem:[%s7540_s2 + $0x330] ss:$12 sps:$4 sm:$0xff]   ;;  %v4116_v5 = vcombine.low %v6074_v32, %v7546_v46  ;;  %v5261_v32 = vld [vmem:[%s7541_s3] ss:$8 sps:$4 sm:$0xff]  }
  0x84   : > { %4499 = vmatprep.subr.bf16.mxu1 %v5293_v7  ;;  %1843 = vmatmul.mubr.bf16.gmra.mrb[8].mxu1 %v6096_v40  ;;  %v5269_v7 = vld [vmem:[%s7541_s3 + $0x24] ss:$8 sps:$4 sm:$0xff]  }
  0x85   : > { %1486 = vmatpush1.bf16.msra.mxu0 %v5157_v6  ;;  %v5193_v6 = vld [vmem:[%s7540_s2 + $0x258] ss:$12 sps:$4 sm:$0xff]   ;;  %1850 = vmatprep.mubr.bf16.mxu1 %v6104_v43 }
  0x86   : > { %1568 = vmatprep.subr.bf16.mxu0 %v5163_v10  ;;  %v532_v10 = vld [vmem:[%s5929_s20 + $0x30] sm:$0xf]  ;;  %s3968_s20 = scalar_lea.sflag [#allocation5], %s5914_s29 }
  0x87   : > { %v6201_v17 = vcombine.low %v531_v9, %v532_v10  ;;  %4500 = vmatpush3.bf16.msra.mxu1 %v5297_v11  ;;  %v6256_v38 = vcombine.low %v532_v10, %v533_v23  ;;  %v5272_v9 = vld [vmem:[%s7541_s3 + $0x34] ss:$8 sps:$4 sm:$0xff]   ;;  %v5270_v10 = vld [vmem:[%s7541_s3 + $0x30] ss:$8 sps:$4 sm:$0xff]   ;;  %v5276_v11 = vld [vmem:[%s7541_s3 + $0x44] ss:$8 sps:$4 sm:$0xff]  }
  0x88   : > { %1488 = vmatmul.mubr.bf16.vlgmr.msra.gmra.mrb[0].mxu0 %v6021_v13  ;;  %4501 = vmatprep.subr.bf16.mxu1 %v5298_v12  ;;  %v5274_v12 = vld [vmem:[%s7541_s3 + $0x40] ss:$8 sps:$4 sm:$0xff]   ;;  %v5289_v23 = vld [vmem:[%s7541_s3 + $0x70] ss:$8 sps:$4 sm:$0xff]  }
  0x89   : > { %1569 = vmatpush1.bf16.msra.mxu0 %v5161_v14  ;;  %1497 = vmatprep.mubr.bf16.mxu0 %v6026_v15  ;;  %v6196_v14 = vcombine.low %v528_v50, %v529_v61  ;;  %v5235_v50 = vld [vmem:[%s7540_s2 + $0x34c] ss:$12 sps:$4 sm:$0xff]  }
  0x8a   : > { %1570 = vmatprep.subr.bf16.mxu0 %v5166_v16  ;;  %v5198_v16 = vld [vmem:[%s7540_s2 + $0x270] ss:$12 sps:$4 sm:$0xff]   ;;  %v5260_v61 = vld [vmem:[%s7540_s2 + $0x3ac] ss:$12 sps:$4 sm:$0xff]  }
  0x8b   : > { %4502 = vmatpush3.bf16.msra.mxu1 %v5302_v19  ;;  %v6432_v19 = vld [vmem:[%s7541_s3 + $0x200] ss:$8 sps:$4 sm:$0xff]  }
  0x8c   : > { %1851 = vmatmul.mubr.bf16.gmra.mrb[12].mxu1 %v6125_v52 }
  0x8d   : > { %1571 = vmatpush1.bf16.msra.mxu0 %v5164_v20  ;;  %v5201_v20 = vld [vmem:[%s7540_s2 + $0x288] ss:$12 sps:$4 sm:$0xff]   ;;  %1858 = vmatprep.mubr.bf16.mxu1 %v6133_v55 }
  0x8e   : > { %1572 = vmatprep.subr.bf16.mxu0 %v5169_v21  ;;  %v5303_v21 = vld [vmem:[%s7540_s2 + $0x2d8] ss:$12 sps:$4 sm:$0xff]  }
  0x8f   : > { %4503 = vmatprep.subr.bf16.mxu1 %v5303_v21  ;;  %v5291_v21 = vld [vmem:[%s7541_s3 + $0x74] ss:$8 sps:$4 sm:$0xff]  }
  0x90   : > { %1498 = vmatmul.mubr.bf16.gmra.mrb[4].mxu0 %v6057_v26 }
  0x91   : > { %1573 = vmatpush1.bf16.msra.mxu0 %v5167_v24  ;;  %1507 = vmatprep.mubr.bf16.mxu0 %v6062_v28  ;;  %v5307_v24 = vld [vmem:[%s7540_s2 + $0x218] ss:$12 sps:$4 sm:$0xff]  }
  0x92   : > { %1574 = vmatprep.subr.bf16.mxu0 %v5172_v27  ;;  %v5206_v27 = vld [vmem:[%s7540_s2 + $0x2a0] ss:$12 sps:$4 sm:$0xff]   ;;  %4504 = vmatpush3.bf16.msra.mxu1 %v5307_v24 }
  0x93   : > { %4505 = vmatprep.subr.bf16.mxu1 %v5308_v25  ;;  %v5296_v24 = vld [vmem:[%s7541_s3 + $0x84] ss:$8 sps:$4 sm:$0xff]   ;;  %v6477_v25 = vld [vmem:[%s7541_s3 + $0x234] ss:$8 sps:$4 sm:$0xff]  }
  0x94   : > { %1859 = vmatmul.mubr.bf16.gmra.mrb[16].mxu1 %v6162_v1 }
  0x95   : > { %1575 = vmatpush1.bf16.msra.mxu0 %v5170_v33  ;;  %v5211_v33 = vld [vmem:[%s7540_s2 + $0x2bc] ss:$12 sps:$4 sm:$0xff]   ;;  %1866 = vmatprep.mubr.bf16.mxu1 %v6167_v3 }
  0x96   : > { %1576 = vmatprep.subr.bf16.mxu0 %v5176_v34  ;;  %v5312_v34 = vld [vmem:[%s7540_s2 + $0x230] ss:$12 sps:$4 sm:$0xff]  }
  0x97   : > { %4506 = vmatpush3.bf16.msra.mxu1 %v5312_v34  ;;  %v5299_v34 = vld [vmem:[%s7541_s3 + $0x90] ss:$8 sps:$4 sm:$0xff]  }
  0x98   : > { %1508 = vmatmul.mubr.bf16.gmra.mrb[8].mxu0 %v6096_v40 }
  0x99   : > { %1577 = vmatpush1.bf16.msra.mxu0 %v5174_v41  ;;  %1517 = vmatprep.mubr.bf16.mxu0 %v6104_v43  ;;  %v5217_v41 = vld [vmem:[%s7540_s2 + $0x2e8] ss:$12 sps:$4 sm:$0xff]  }
  0x9a   : > { %1578 = vmatprep.subr.bf16.mxu0 %v5179_v42  ;;  %v5222_v42 = vld [vmem:[%s7540_s2 + $0x304] ss:$12 sps:$4 sm:$0xff]  }
  0x9c   : > { %1867 = vmatmul.mubr.bf16.gmra.mrb[20].mxu1 %v6196_v14 }
  0x9d   : > { %1579 = vmatpush1.bf16.msra.mxu0 %v5177_v45  ;;  %v5225_v45 = vld [vmem:[%s7540_s2 + $0x31c] ss:$12 sps:$4 sm:$0xff]   ;;  %1874 = vmatprep.mubr.bf16.mxu1 %v6201_v17 }
  0x9e   : > { %1580 = vmatprep.subr.bf16.mxu0 %v5184_v48  ;;  %v5228_v48 = vld [vmem:[%s7540_s2 + $0x334] ss:$12 sps:$4 sm:$0xff]  }
  0xa0   : > { %1518 = vmatmul.mubr.bf16.gmra.mrb[12].mxu0 %v6125_v52 }
  0xa1   : > { %1581 = vmatpush1.bf16.msra.mxu0 %v5182_v54  ;;  %1527 = vmatprep.mubr.bf16.mxu0 %v6133_v55  ;;  %v5240_v54 = vld [vmem:[%s7540_s2 + $0x360] ss:$12 sps:$4 sm:$0xff]  }
  0xa2   : > { %1582 = vmatprep.subr.bf16.mxu0 %v5187_v56  ;;  %v5249_v56 = vld [vmem:[%s7540_s2 + $0x37c] ss:$12 sps:$4 sm:$0xff]  }
  0xa4   : > { %1875 = vmatmul.mubr.bf16.gmra.mrb[24].mxu1 %v6232_v30 }
  0xa5   : > { %1583 = vmatpush1.bf16.msra.mxu0 %v5185_v57  ;;  %1882 = vmatprep.mubr.bf16.mxu1 %v6235_v31  ;;  %v5340_v57 = vld [vmem:[%s7540_s2 + $0x308] ss:$12 sps:$4 sm:$0xff]  }
  0xa6   : > { %1584 = vmatprep.subr.bf16.mxu0 %v5192_v60  ;;  %4715 = vmatprep.subr.bf16.mxu1 %v5340_v57  ;;  %v5344_v60 = vld [vmem:[%s7540_s2 + $0x320] ss:$12 sps:$4 sm:$0xff]  }
  0xa8   : > { %1528 = vmatmul.mubr.bf16.gmra.mrb[16].mxu0 %v6162_v1 }
  0xa9   : > { %1585 = vmatpush1.bf16.msra.mxu0 %v5190_v2  ;;  %1537 = vmatprep.mubr.bf16.mxu0 %v6167_v3  ;;  %v5360_v2 = vld [vmem:[%s7540_s2 + $0x380] ss:$12 sps:$4 sm:$0xff]  }
  0xaa   : > { %1586 = vmatprep.subr.bf16.mxu0 %v5195_v4  ;;  %v5368_v4 = vld [vmem:[%s7540_s2 + $0x3b0] ss:$12 sps:$4 sm:$0xff]  }
  0xac   : > { %1883 = vmatmul.mubr.bf16.gmra.mrb[28].mxu1 %v6256_v38 }
  0xad   : > { %1587 = vmatpush1.bf16.msra.mxu0 %v5193_v6  ;;  %1923 = vmatprep.mubr.bf16.mxu1 %v6026_v15  ;;  %v5264_v6 = vld [vmem:[%s7541_s3 + $0x10] ss:$8 sps:$4 sm:$0xff]  }
  0xae   : > { %1588 = vmatprep.subr.bf16.mxu0 %v5200_v8  ;;  %v5267_v8 = vld [vmem:[%s7541_s3 + $0x20] ss:$8 sps:$4 sm:$0xff]  }
  0xb0   : > { %1538 = vmatmul.mubr.bf16.gmra.mrb[20].mxu0 %v6196_v14 }
  0xb1   : > { %1589 = vmatpush1.bf16.msra.mxu0 %v5198_v16  ;;  %1547 = vmatprep.mubr.bf16.mxu0 %v6201_v17  ;;  %v5281_v16 = vld [vmem:[%s7541_s3 + $0x54] ss:$8 sps:$4 sm:$0xff]  }
  0xb2   : > { %1590 = vmatprep.subr.bf16.mxu0 %v5203_v18  ;;  %v5286_v18 = vld [vmem:[%s7541_s3 + $0x64] ss:$8 sps:$4 sm:$0xff]  }
  0xb4   : > { %1924 = vmatmul.mubr.bf16.vlgmr.msra.gmra.mrb[32].mxu1 %v6057_v26 }
  0xb5   : > { %1591 = vmatpush1.bf16.msra.mxu0 %v5201_v20  ;;  %1931 = vmatprep.mubr.bf16.mxu1 %v6062_v28  ;;  %v5284_v20 = vld [vmem:[%s7541_s3 + $0x60] ss:$8 sps:$4 sm:$0xff]  }
  0xb6   : > { %1592 = vmatprep.subr.bf16.mxu0 %v5208_v22  ;;  %4716 = vmatpush3.bf16.msra.mxu1 %v5340_v57  ;;  %v6450_v22 = vld [vmem:[%s7541_s3 + $0x210] ss:$8 sps:$4 sm:$0xff]   ;;  %v5321_v57 = vld [vmem:[%s7541_s3 + $0xe4] ss:$8 sps:$4 sm:$0xff]  }
  0xb7   : > { %4717 = vmatprep.subr.bf16.mxu1 %v5344_v60 }
  0xb8   : > { %1548 = vmatmul.mubr.bf16.gmra.mrb[24].mxu0 %v6232_v30 }
  0xb9   : > { %1593 = vmatpush1.bf16.msra.mxu0 %v5206_v27  ;;  %1557 = vmatprep.mubr.bf16.mxu0 %v6235_v31  ;;  %v5294_v27 = vld [vmem:[%s7541_s3 + $0x80] ss:$8 sps:$4 sm:$0xff]  }
  0xba   : > { %1594 = vmatprep.subr.bf16.mxu0 %v5211_v33  ;;  %4718 = vmatpush3.bf16.msra.mxu1 %v5344_v60  ;;  %v6490_v33 = vld [vmem:[%s7541_s3 + $0x230] ss:$8 sps:$4 sm:$0xff]   ;;  %v5324_v60 = vld [vmem:[%s7541_s3 + $0xf4] ss:$8 sps:$4 sm:$0xff]  }
  0xbb   : > { %4719 = vmatprep.subr.bf16.mxu1 %v5348_v62 }
  0xbc   : > { %1932 = vmatmul.mubr.bf16.gmra.mrb[36].mxu1 %v6096_v40 }
  0xbd   : > { %1595 = vmatpush1.bf16.msra.mxu0 %v5209_v29  ;;  %1939 = vmatprep.mubr.bf16.mxu1 %v6104_v43  ;;  %v5306_v29 = vld [vmem:[%s7541_s3 + $0xa4] ss:$8 sps:$4 sm:$0xff]  }
  0xbe   : > { %1596 = vmatprep.subr.bf16.mxu0 %v5216_v36  ;;  %4720 = vmatpush3.bf16.msra.mxu1 %v5348_v62  ;;  %v6511_v36 = vld [vmem:[%s7541_s3 + $0x240] ss:$8 sps:$4 sm:$0xff]   ;;  %v5322_v62 = vld [vmem:[%s7541_s3 + $0xf0] ss:$8 sps:$4 sm:$0xff]  }
  0xc0   : > { %1558 = vmatmul.mubr.bf16.gmra.mrb[28].mxu0 %v6256_v38 }
  0xc1   : > { %1597 = vmatpush1.bf16.msra.mxu0 %v5214_v37  ;;  %1600 = vmatprep.mubr.bf16.mxu0 %v6026_v15  ;;  %v5254_v15 = vld [vmem:[%s7540_s2 + $0x390] ss:$12 sps:$4 sm:$0xff]   ;;  %v5304_v37 = vld [vmem:[%s7541_s3 + $0xa0] ss:$8 sps:$4 sm:$0xff]  }
  0xc2   : > { %1598 = vmatprep.subr.bf16.mxu0 %v5219_v39  ;;  %v5311_v39 = vld [vmem:[%s7541_s3 + $0xb4] ss:$8 sps:$4 sm:$0xff]  }
  0xc4   : > { %1940 = vmatmul.mubr.bf16.gmra.mrb[40].mxu1 %v6125_v52 }
  0xc5   : > { %1599 = vmatpush1.bf16.msra.mxu0 %v5217_v41  ;;  %1947 = vmatprep.mubr.bf16.mxu1 %v6133_v55  ;;  %v6530_v41 = vld [vmem:[%s7541_s3 + $0x250] ss:$8 sps:$4 sm:$0xff]  }
  0xc6   : > { %1681 = vmatprep.subr.bf16.mxu0 %v5222_v42  ;;  %v6537_v42 = vld [vmem:[%s7541_s3 + $0x264] ss:$8 sps:$4 sm:$0xff]  }
  0xc8   : > { %1601 = vmatmul.mubr.bf16.vlgmr.msra.gmra.mrb[0].mxu0 %v6057_v26  ;;  %v5258_v26 = vld [vmem:[%s7540_s2 + $0x3a8] ss:$12 sps:$4 sm:$0xff]  }
  0xc9   : > { %1682 = vmatpush1.bf16.msra.mxu0 %v5220_v44  ;;  %1610 = vmatprep.mubr.bf16.mxu0 %v6062_v28  ;;  %v5352_v28 = vld [vmem:[%s7540_s2 + $0x350] ss:$12 sps:$4 sm:$0xff]  }
  0xca   : > { %1683 = vmatprep.subr.bf16.mxu0 %v5225_v45  ;;  %4721 = vmatprep.subr.bf16.mxu1 %v5352_v28  ;;  %v5309_v44 = vld [vmem:[%s7541_s3 + $0xb0] ss:$8 sps:$4 sm:$0xff]   ;;  %v5315_v45 = vld [vmem:[%s7541_s3 + $0xc4] ss:$8 sps:$4 sm:$0xff]  }
  0xcb   : > { %4722 = vmatpush3.bf16.msra.mxu1 %v5352_v28  ;;  %v490_v28 = vld [vmem:[%s6569_s17 + $0x10] sm:$0xff] }
  0xcc   : > { %4723 = vmatprep.subr.bf16.mxu1 %v5356_v0  ;;  %1948 = vmatmul.mubr.bf16.gmra.mrb[44].mxu1 %v6162_v1 }
  0xcd   : > { %1684 = vmatpush1.bf16.msra.mxu0 %v5223_v47  ;;  %1955 = vmatprep.mubr.bf16.mxu1 %v6167_v3  ;;  %v6552_v47 = vld [vmem:[%s7541_s3 + $0x260] ss:$8 sps:$4 sm:$0xff]  }
  0xce   : > { %1685 = vmatprep.subr.bf16.mxu0 %v5228_v48  ;;  %v5313_v48 = vld [vmem:[%s7541_s3 + $0xc0] ss:$8 sps:$4 sm:$0xff]  }
  0xcf   : > { %4724 = vmatpush3.bf16.msra.mxu1 %v5356_v0  ;;  %v6621_v0 = vld [vmem:[%s6569_s17 + $0x40] sm:$0xff] }
  0xd0   : > { %1611 = vmatmul.mubr.bf16.gmra.mrb[4].mxu0 %v6096_v40  ;;  %4725 = vmatprep.subr.bf16.mxu1 %v5360_v2 }
  0xd1   : > { %1620 = vmatprep.mubr.bf16.mxu0 %v6104_v43  ;;  %1686 = vmatpush1.bf16.msra.mxu0 %v5226_v49  ;;  %v5364_v43 = vld [vmem:[%s7540_s2 + $0x398] ss:$12 sps:$4 sm:$0xff]   ;;  %v5318_v49 = vld [vmem:[%s7541_s3 + $0xd4] ss:$8 sps:$4 sm:$0xff]  }
  0xd2   : > { %1687 = vmatprep.subr.bf16.mxu0 %v5235_v50  ;;  %v488_v50 = vld [vmem:[%s6569_s17] sm:$0xff] }
  0xd3   : > { %4726 = vmatpush3.bf16.msra.mxu1 %v5360_v2 }
  0xd4   : > { %4727 = vmatprep.subr.bf16.mxu1 %v5364_v43  ;;  %1956 = vmatmul.mubr.bf16.gmra.mrb[48].mxu1 %v6196_v14 }
  0xd5   : > { %1688 = vmatpush1.bf16.msra.mxu0 %v5233_v51  ;;  %1963 = vmatprep.mubr.bf16.mxu1 %v6201_v17  ;;  %v6576_v51 = vld [vmem:[%s7541_s3 + $0x270] ss:$8 sps:$4 sm:$0xff]  }
  0xd6   : > { %1689 = vmatprep.subr.bf16.mxu0 %v5242_v53  ;;  %v6582_v53 = vld [vmem:[%s6569_s17 + $0x38] sm:$0xff] }
  0xd7   : > { %4728 = vmatpush3.bf16.msra.mxu1 %v5364_v43  ;;  %v5325_v43 = vld [vmem:[%s7541_s3 + $0x100] ss:$8 sps:$4 sm:$0xff]  }
  0xd8   : > { %1621 = vmatmul.mubr.bf16.gmra.mrb[8].mxu0 %v6125_v52  ;;  %4729 = vmatprep.subr.bf16.mxu1 %v5368_v4 }
  0xd9   : > { %1630 = vmatprep.mubr.bf16.mxu0 %v6133_v55  ;;  %1690 = vmatpush1.bf16.msra.mxu0 %v5240_v54  ;;  %v6375_v55 = vld [vmem:[%s7541_s3 + $0x204] ss:$8 sps:$4 sm:$0xff]   ;;  %v5316_v54 = vld [vmem:[%s7541_s3 + $0xd0] ss:$8 sps:$4 sm:$0xff]  }
  0xda   : > { %1691 = vmatprep.subr.bf16.mxu0 %v5249_v56  ;;  %v504_v56 = vpack.c.bf16 %v488_v50, %v488_v50 }
  0xdb   : > { %4730 = vmatpush3.bf16.msra.mxu1 %v5368_v4 }
  0xdc   : > { %4779 = vmatprep.subr.bf16.mxu1 %v6375_v55  ;;  %1964 = vmatmul.mubr.bf16.gmra.mrb[52].mxu1 %v6232_v30 }
  0xdd   : > { %1692 = vmatpush1.bf16.msra.mxu0 %v5247_v58  ;;  %1971 = vmatprep.mubr.bf16.mxu1 %v6235_v31  ;;  %v6592_v58 = vld [vmem:[%s6569_s17 + $0x30] sm:$0xff] }
  0xde   : > { %1693 = vmatprep.subr.bf16.mxu0 %v5256_v59  ;;  %v5319_v59 = vld [vmem:[%s7541_s3 + $0xe0] ss:$8 sps:$4 sm:$0xff]  }
  0xe0   : > { %1631 = vmatmul.mubr.bf16.gmra.mrb[12].mxu0 %v6162_v1 }
  0xe1   : > { %1640 = vmatprep.mubr.bf16.mxu0 %v6167_v3  ;;  %1694 = vmatpush1.bf16.msra.mxu0 %v5254_v15  ;;  %v5266_v3 = vld [vmem:[%s7541_s3 + $0x14] ss:$8 sps:$4 sm:$0xff]   ;;  %v4237_v15 = vcombine.low %v7546_v46, %v504_v56  ;;  %v6734_v56 = vpack.c.bf16 %v6621_v0, %v6582_v53 }
  0xe2   : > { %1695 = vmatprep.subr.bf16.mxu0 %v5260_v61  ;;  %v6610_v61 = vld [vmem:[%s6569_s17 + $0x48] sm:$0xff] }
  0xe3   : > { %v6625_v2 = vpack.c.bf16 %v6610_v61, %v6621_v0 }
  0xe4   : > { %1972 = vmatmul.mubr.bf16.gmra.mrb[56].mxu1 %v6256_v38 }
  0xe5   : > { %1696 = vmatpush1.bf16.msra.mxu0 %v5258_v26  ;;  %1979 = vmatprep.mubr.bf16.mxu1 %v4116_v5  ;;  %v5327_v26 = vld [vmem:[%s7541_s3 + $0x104] ss:$8 sps:$4 sm:$0xff]  }
  0xe6   : > { %2599 = vmatprep.subr.bf16.mxu0 %v5263_v63  ;;  %v489_v63 = vld [vmem:[%s6569_s17 + $0x8] sm:$0xff] }
  0xe7   : > { %v6630_v4 = vpack.c.bf16 %v490_v28, %v489_v63 }
  0xe8   : > { %1641 = vmatmul.mubr.bf16.gmra.mrb[16].mxu0 %v6196_v14 }
  0xe9   : > { %1650 = vmatprep.mubr.bf16.mxu0 %v6201_v17  ;;  %v5279_v17 = vld [vmem:[%s7541_s3 + $0x50] ss:$8 sps:$4 sm:$0xff]  }
  0xec   : > { %1980 = vmatmul.mubr.bf16.gmra.mrb[60].mxu1 %v6085_v35 }
  0xed   : > { %4731 = vmatprep.mubr.bf16.mxu1 %v6096_v40 }
  0xf0   : > { %1651 = vmatmul.mubr.bf16.gmra.mrb[20].mxu0 %v6232_v30 }
  0xf1   : > { %1660 = vmatprep.mubr.bf16.mxu0 %v6235_v31  ;;  %v5301_v31 = vld [vmem:[%s7541_s3 + $0x94] ss:$8 sps:$4 sm:$0xff]  }
  0xf4   : > { %4732 = vmatmul.mubr.bf16.vlgmr.msra.gmra.mrb[64].mxu1 %v6125_v52 }
  0xf5   : > { %4787 = vmatpush1.bf16.msra.mxu1 %v6432_v19  ;;  %4735 = vmatprep.mubr.bf16.mxu1 %v6162_v1 }
  0xf8   : > { %1661 = vmatmul.mubr.bf16.gmra.mrb[24].mxu0 %v6256_v38 }
  0xf9   : > { %1670 = vmatprep.mubr.bf16.mxu0 %v4116_v5  ;;  %v5330_v5 = vld [vmem:[%s7541_s3 + $0x114] ss:$8 sps:$4 sm:$0xff]  }
  0xfc   : > { %4736 = vmatmul.mubr.bf16.gmra.mrb[68].mxu1 %v6196_v14 }
  0xfd   : > { %4739 = vmatprep.mubr.bf16.mxu1 %v6232_v30 }
 0x100   : > { %1671 = vmatmul.mubr.bf16.gmra.mrb[28].mxu0 %v6085_v35 }
 0x101   : > { %1713 = vmatprep.mubr.bf16.mxu0 %v7546_v46 }
 0x104   : > { %4740 = vmatmul.mubr.bf16.gmra.mrb[72].mxu1 %v6256_v38 }
 0x105   : > { %4743 = vmatprep.mubr.bf16.mxu1 %v6085_v35 }
 0x108   : > { %1714 = vmatmul.mubr.bf16.vlgmr.msra.gmra.mrb[0].mxu0 %v6096_v40  ;;  %v6437_v40 = vld [vmem:[%s7541_s3 + $0x214] ss:$8 sps:$4 sm:$0xff]  }
 0x109   : > { %2600 = vmatpush1.bf16.msra.mxu0 %v5261_v32  ;;  %1723 = vmatprep.mubr.bf16.mxu0 %v7546_v46  ;;  %v6639_v32 = vld [vmem:[%s6569_s17 + $0x58] sm:$0xff] }
 0x10a   : > { %2601 = vmatprep.subr.bf16.mxu0 %v5266_v3  ;;  %4780 = vmatprep.subr.bf16.mxu1 %v6437_v40  ;;  %v5328_v3 = vld [vmem:[%s7541_s3 + $0x110] ss:$8 sps:$4 sm:$0xff]  }
 0x10b   : > { %4788 = vmatpush1.bf16.msra.mxu1 %v6450_v22 }
 0x10c   : > { %4744 = vmatmul.mubr.bf16.gmra.mrb[76].mxu1 %v6021_v13 }
 0x10d   : > { %2602 = vmatpush1.bf16.msra.mxu0 %v5264_v6  ;;  %2877 = vmatprep.mubr.bf16.mxu1 %v7546_v46  ;;  %v5333_v6 = vld [vmem:[%s7541_s3 + $0x124] ss:$8 sps:$4 sm:$0xff]  }
 0x10e   : > { %2603 = vmatprep.subr.bf16.mxu0 %v5269_v7  ;;  %v491_v7 = vld [vmem:[%s6569_s17 + $0x18] sm:$0xff] }
 0x110   : > { %1724 = vmatmul.mubr.bf16.gmra.mrb[4].mxu0 %v6125_v52  ;;  %v6457_v52 = vld [vmem:[%s7541_s3 + $0x224] ss:$8 sps:$4 sm:$0xff]  }
 0x111   : > { %2604 = vmatpush1.bf16.msra.mxu0 %v5267_v8  ;;  %1733 = vmatprep.mubr.bf16.mxu0 %v7546_v46  ;;  %v6650_v8 = vld [vmem:[%s6569_s17 + $0x20] sm:$0xff] }
 0x112   : > { %2605 = vmatprep.subr.bf16.mxu0 %v5272_v9  ;;  %4781 = vmatprep.subr.bf16.mxu1 %v6457_v52  ;;  %v6653_v9 = vld [vmem:[%s6569_s17 + $0x50] sm:$0xff] }
 0x115   : > { %2606 = vmatpush1.bf16.msra.mxu0 %v5270_v10  ;;  %v6657_v10 = vpack.c.bf16 %v6639_v32, %v6653_v9 }
 0x116   : > { %2607 = vmatprep.subr.bf16.mxu0 %v5276_v11  ;;  %v6659_v11 = vpack.c.bf16 %v489_v63, %v488_v50  ;;  %v5357_v63 = vld [vmem:[%s7541_s3 + $0x190] ss:$8 sps:$4 sm:$0xff]  }
 0x118   : > { %1734 = vmatmul.mubr.bf16.gmra.mrb[8].mxu0 %v6162_v1  ;;  %v6471_v1 = vld [vmem:[%s7541_s3 + $0x220] ss:$8 sps:$4 sm:$0xff]  }
 0x119   : > { %2608 = vmatpush1.bf16.msra.mxu0 %v5274_v12  ;;  %1743 = vmatprep.mubr.bf16.mxu0 %v7546_v46  ;;  %v5331_v12 = vld [vmem:[%s7541_s3 + $0x120] ss:$8 sps:$4 sm:$0xff]  }
 0x11a   : > { %2609 = vmatprep.subr.bf16.mxu0 %v5281_v16  ;;  %4789 = vmatpush1.bf16.msra.mxu1 %v6471_v1  ;;  %v6665_v16 = vpack.c.bf16 %v6650_v8, %v491_v7 }
 0x11b   : > { %4782 = vmatprep.subr.bf16.mxu1 %v6477_v25 }
 0x11d   : > { %2610 = vmatpush1.bf16.msra.mxu0 %v5279_v17  ;;  %v5336_v17 = vld [vmem:[%s7541_s3 + $0x134] ss:$8 sps:$4 sm:$0xff]  }
 0x11e   : > { %2611 = vmatprep.subr.bf16.mxu0 %v5286_v18  ;;  %4790 = vmatpush1.bf16.msra.mxu1 %v6490_v33  ;;  %v6674_v18 = vld [vmem:[%s6569_s17 + $0x68] sm:$0xff] }
 0x120   : > { %1744 = vmatmul.mubr.bf16.gmra.mrb[12].mxu0 %v6196_v14  ;;  %v6497_v14 = vld [vmem:[%s7541_s3 + $0x244] ss:$8 sps:$4 sm:$0xff]  }
 0x121   : > { %2612 = vmatpush1.bf16.msra.mxu0 %v5284_v20  ;;  %1753 = vmatprep.mubr.bf16.mxu0 %v7546_v46  ;;  %v5334_v20 = vld [vmem:[%s7541_s3 + $0x130] ss:$8 sps:$4 sm:$0xff]  }
 0x122   : > { %2613 = vmatprep.subr.bf16.mxu0 %v5291_v21  ;;  %4783 = vmatprep.subr.bf16.mxu1 %v6497_v14  ;;  %v5339_v21 = vld [vmem:[%s7541_s3 + $0x144] ss:$8 sps:$4 sm:$0xff]  }
 0x123   : > { %4791 = vmatpush1.bf16.msra.mxu1 %v6511_v36 }
 0x125   : > { %2614 = vmatpush1.bf16.msra.mxu0 %v5289_v23  ;;  %v6684_v23 = vld [vmem:[%s6569_s17 + $0x28] sm:$0xff] }
 0x126   : > { %2615 = vmatprep.subr.bf16.mxu0 %v5296_v24  ;;  %v6687_v24 = vld [vmem:[%s6569_s17 + $0x60] sm:$0xff]  ;;  %v6727_v50 = vpack.c.bf16 %v6684_v23, %v6650_v8 }
 0x128   : > { %1754 = vmatmul.mubr.bf16.gmra.mrb[16].mxu0 %v6232_v30  ;;  %v6517_v30 = vld [vmem:[%s7541_s3 + $0x254] ss:$8 sps:$4 sm:$0xff]  }
 0x129   : > { %2616 = vmatpush1.bf16.msra.mxu0 %v5294_v27  ;;  %1763 = vmatprep.mubr.bf16.mxu0 %v7546_v46  ;;  %v6691_v27 = vpack.c.bf16 %v6674_v18, %v6687_v24 }
 0x12a   : > { %2617 = vmatprep.subr.bf16.mxu0 %v5301_v31  ;;  %4784 = vmatprep.subr.bf16.mxu1 %v6517_v30  ;;  %v6693_v31 = vpack.c.bf16 %v491_v7, %v490_v28  ;;  %v5363_v28 = vld [vmem:[%s7541_s3 + $0x1a4] ss:$8 sps:$4 sm:$0xff]   ;;  %v5365_v7 = vld [vmem:[%s7541_s3 + $0x1b0] ss:$8 sps:$4 sm:$0xff]  }
 0x12b   : > { %4792 = vmatpush1.bf16.msra.mxu1 %v6530_v41 }
 0x12c   : > { %4785 = vmatprep.subr.bf16.mxu1 %v6537_v42 }
 0x12d   : > { %2618 = vmatpush1.bf16.msra.mxu0 %v5299_v34  ;;  %v5337_v34 = vld [vmem:[%s7541_s3 + $0x140] ss:$8 sps:$4 sm:$0xff]  }
 0x12e   : > { %2619 = vmatprep.subr.bf16.mxu0 %v5306_v29  ;;  %v6700_v29 = vpack.c.bf16 %v6592_v58, %v6684_v23 }
 0x12f   : > { %4793 = vmatpush1.bf16.msra.mxu1 %v6552_v47 }
 0x130   : > { %1764 = vmatmul.mubr.bf16.gmra.mrb[20].mxu0 %v6256_v38  ;;  %v6558_v38 = vld [vmem:[%s7541_s3 + $0x274] ss:$8 sps:$4 sm:$0xff]  }
 0x131   : > { %2620 = vmatpush1.bf16.msra.mxu0 %v5304_v37  ;;  %1773 = vmatprep.mubr.bf16.mxu0 %v7546_v46  ;;  %v5343_v37 = vld [vmem:[%s7541_s3 + $0x154] ss:$8 sps:$4 sm:$0xff]  }
 0x132   : > { %2621 = vmatprep.subr.bf16.mxu0 %v5311_v39  ;;  %4786 = vmatprep.subr.bf16.mxu1 %v6558_v38  ;;  %v6708_v39 = vld [vmem:[%s6569_s17 + $0x78] sm:$0xff] }
 0x133   : > { %4794 = vmatpush1.bf16.msra.mxu1 %v6576_v51 }
 0x135   : > { %2622 = vmatpush1.bf16.msra.mxu0 %v5309_v44  ;;  %v6712_v44 = vld [vmem:[%s6569_s17 + $0x70] sm:$0xff] }
 0x136   : > { %2623 = vmatprep.subr.bf16.mxu0 %v5315_v45  ;;  %v5341_v45 = vld [vmem:[%s7541_s3 + $0x150] ss:$8 sps:$4 sm:$0xff]  }
 0x138   : > { %1774 = vmatmul.mubr.bf16.gmra.mrb[24].mxu0 %v6085_v35  ;;  %v6597_v35 = vpack.c.bf16 %v6582_v53, %v6592_v58 }
 0x139   : > { %2624 = vmatpush1.bf16.msra.mxu0 %v5313_v48  ;;  %1783 = vmatprep.mubr.bf16.mxu0 %v7546_v46  ;;  %v6720_v48 = vpack.c.bf16 %v6708_v39, %v6712_v44 }
 0x13a   : > { %2625 = vmatprep.subr.bf16.mxu0 %v5318_v49  ;;  %2878 = vmatmul.mubr.bf16.vlgmr.msra.gmra.mrb[80].mxu1 %v6597_v35  ;;  %v5347_v49 = vld [vmem:[%s7541_s3 + $0x164] ss:$8 sps:$4 sm:$0xff]  }
 0x13b   : > { %2887 = vmatprep.mubr.bf16.mxu1 %v7546_v46 }
 0x13d   : > { %2626 = vmatpush1.bf16.msra.mxu0 %v5316_v54  ;;  %v5345_v54 = vld [vmem:[%s7541_s3 + $0x160] ss:$8 sps:$4 sm:$0xff]  }
 0x13e   : > { %2627 = vmatprep.subr.bf16.mxu0 %v5321_v57  ;;  %v5351_v57 = vld [vmem:[%s7541_s3 + $0x174] ss:$8 sps:$4 sm:$0xff]  }
 0x140   : > { %1784 = vmatmul.mubr.bf16.gmra.mrb[28].mxu0 %v6021_v13 }
 0x141   : > { %2628 = vmatpush1.bf16.msra.mxu0 %v5319_v59  ;;  %2631 = vmatprep.mubr.bf16.mxu0 %v4237_v15  ;;  %v5349_v59 = vld [vmem:[%s7541_s3 + $0x170] ss:$8 sps:$4 sm:$0xff]   ;;  %v5355_v15 = vld [vmem:[%s7541_s3 + $0x184] ss:$8 sps:$4 sm:$0xff]  }
 0x142   : > { %2629 = vmatprep.subr.bf16.mxu0 %v5324_v60  ;;  %2888 = vmatmul.mubr.bf16.gmra.mrb[84].mxu1 %v6625_v2  ;;  %v5353_v60 = vld [vmem:[%s7541_s3 + $0x180] ss:$8 sps:$4 sm:$0xff]  }
 0x143   : > { %2897 = vmatprep.mubr.bf16.mxu1 %v7546_v46 }
 0x145   : > { %2630 = vmatpush1.bf16.msra.mxu0 %v5322_v62  ;;  %v6754_v62 = vpack.c.bf16 %v6653_v9, %v6610_v61 }
 0x146   : > { %2712 = vmatprep.subr.bf16.mxu0 %v5327_v26  ;;  %v5359_v26 = vld [vmem:[%s7541_s3 + $0x194] ss:$8 sps:$4 sm:$0xff]  }
 0x148   : > { %2632 = vmatmul.mubr.bf16.vlgmr.msra.gmra.mrb[0].mxu0 %v6021_v13 }
 0x149   : > { %2713 = vmatpush1.bf16.msra.mxu0 %v5325_v43  ;;  %2641 = vmatprep.mubr.bf16.mxu0 %v6630_v4  ;;  %v5361_v43 = vld [vmem:[%s7541_s3 + $0x1a0] ss:$8 sps:$4 sm:$0xff]  }
 0x14a   : > { %2714 = vmatprep.subr.bf16.mxu0 %v5330_v5  ;;  %2898 = vmatmul.mubr.bf16.gmra.mrb[88].mxu1 %v6657_v10  ;;  %v6773_v5 = vpack.c.bf16 %v6687_v24, %v6639_v32 }
 0x14b   : > { %2907 = vmatprep.mubr.bf16.mxu1 %v7546_v46 }
 0x14d   : > { %2715 = vmatpush1.bf16.msra.mxu0 %v5328_v3  ;;  %v5367_v3 = vld [vmem:[%s7541_s3 + $0x1b4] ss:$8 sps:$4 sm:$0xff]  }
 0x14e   : > { %2716 = vmatprep.subr.bf16.mxu0 %v5333_v6  ;;  %v4443_v6 = vpop.f32.mrb[0].mxu1 }
 0x150   : > { %2642 = vmatmul.mubr.bf16.gmra.mrb[4].mxu0 %v6659_v11 }
 0x151   : > { %2717 = vmatpush1.bf16.msra.mxu0 %v5331_v12  ;;  %2651 = vmatprep.mubr.bf16.mxu0 %v6665_v16  ;;  %v4444_v12 = vpop.f32.mrb[1].mxu1 }
 0x152   : > { %2718 = vmatprep.subr.bf16.mxu0 %v5336_v17  ;;  %2908 = vmatmul.mubr.bf16.gmra.mrb[92].mxu1 %v6691_v27  ;;  %v5371_v17 = vld [vmem:[%s7541_s3 + $0x1c4] ss:$8 sps:$4 sm:$0xff]  }
 0x153   : > { %2917 = vmatprep.mubr.bf16.mxu1 %v7546_v46 }
 0x155   : > { %2719 = vmatpush1.bf16.msra.mxu0 %v5334_v20  ;;  %v6786_v20 = vadd.f32 %v4444_v12, %v4443_v6  ;;  %v5389_v6 = vld [vmem:[%s7541_s3 + $0x1f4] ss:$8 sps:$4 sm:$0xff]   ;;  %v5387_v12 = vld [vmem:[%s7541_s3 + $0x1f0] ss:$8 sps:$4 sm:$0xff]  }
 0x156   : > { %2720 = vmatprep.subr.bf16.mxu0 %v5339_v21  ;;  %v4446_v21 = vpop.f32.mrb[2].mxu1 }
 0x158   : > { %2652 = vmatmul.mubr.bf16.gmra.mrb[8].mxu0 %v6693_v31 }
 0x159   : > { %2721 = vmatpush1.bf16.msra.mxu0 %v5337_v34  ;;  %2661 = vmatprep.mubr.bf16.mxu0 %v6700_v29  ;;  %v4447_v34 = vpop.f32.mrb[3].mxu1 }
 0x15a   : > { %2722 = vmatprep.subr.bf16.mxu0 %v5343_v37  ;;  %2918 = vmatmul.mubr.bf16.gmra.mrb[96].mxu1 %v6720_v48  ;;  %v6788_v37 = vadd.f32 %v4447_v34, %v4446_v21 }
 0x15b   : > { %2927 = vmatprep.mubr.bf16.mxu1 %v7546_v46 }
 0x15d   : > { %2723 = vmatpush1.bf16.msra.mxu0 %v5341_v45  ;;  %v5369_v45 = vld [vmem:[%s7541_s3 + $0x1c0] ss:$8 sps:$4 sm:$0xff]  }
 0x15e   : > { %2724 = vmatprep.subr.bf16.mxu0 %v5347_v49  ;;  %v6795_v49 = vpack.c.bf16 %v6712_v44, %v6674_v18 }
 0x160   : > { %2662 = vmatmul.mubr.bf16.gmra.mrb[12].mxu0 %v6727_v50 }
 0x161   : > { %2725 = vmatpush1.bf16.msra.mxu0 %v5345_v54  ;;  %2671 = vmatprep.mubr.bf16.mxu0 %v6734_v56  ;;  %v5377_v54 = vld [vmem:[%s7541_s3 + $0x1d4] ss:$8 sps:$4 sm:$0xff]  }
 0x162   : > { %2726 = vmatprep.subr.bf16.mxu0 %v5351_v57  ;;  %2928 = vmatmul.mubr.bf16.gmra.mrb[100].mxu1 %v6021_v13  ;;  %v4449_v57 = vpop.f32.mrb[4].mxu1 }
 0x165   : > { %2727 = vmatpush1.bf16.msra.mxu0 %v5349_v59  ;;  %v5375_v59 = vld [vmem:[%s7541_s3 + $0x1d0] ss:$8 sps:$4 sm:$0xff]  }
 0x166   : > { %2728 = vmatprep.subr.bf16.mxu0 %v5355_v15  ;;  %v4450_v15 = vpop.f32.mrb[5].mxu1 }
 0x168   : > { %2672 = vmatmul.mubr.bf16.gmra.mrb[16].mxu0 %v6597_v35 }
 0x169   : > { %2729 = vmatpush1.bf16.msra.mxu0 %v5353_v60  ;;  %2681 = vmatprep.mubr.bf16.mxu0 %v6754_v62  ;;  %v5383_v60 = vld [vmem:[%s7541_s3 + $0x1e4] ss:$8 sps:$4 sm:$0xff]  }
 0x16a   : > { %2730 = vmatprep.subr.bf16.mxu0 %v5359_v26  ;;  %v6808_v26 = vadd.f32 %v4450_v15, %v4449_v57 }
 0x16d   : > { %2731 = vmatpush1.bf16.msra.mxu0 %v5357_v63  ;;  %v4452_v63 = vpop.f32.mrb[6].mxu1 }
 0x16e   : > { %2732 = vmatprep.subr.bf16.mxu0 %v5363_v28  ;;  %v4453_v28 = vpop.f32.mrb[7].mxu1 }
 0x170   : > { %2682 = vmatmul.mubr.bf16.gmra.mrb[20].mxu0 %v6625_v2 }
 0x171   : > { %2733 = vmatpush1.bf16.msra.mxu0 %v5361_v43  ;;  %2691 = vmatprep.mubr.bf16.mxu0 %v6773_v5  ;;  %v6810_v43 = vadd.f32 %v4453_v28, %v4452_v63 }
 0x172   : > { %2734 = vmatprep.subr.bf16.mxu0 %v5367_v3  ;;  %v5381_v3 = vld [vmem:[%s7541_s3 + $0x1e0] ss:$8 sps:$4 sm:$0xff]  }
 0x175   : > { %2735 = vmatpush1.bf16.msra.mxu0 %v5365_v7  ;;  %v4455_v7 = vpop.f32.mrb[8].mxu1 }
 0x176   : > { %2736 = vmatprep.subr.bf16.mxu0 %v5371_v17  ;;  %v4456_v17 = vpop.f32.mrb[9].mxu1 }
 0x177   : > { %v6823_v21 = vadd.f32 %v4456_v17, %v4455_v7  ;;  %v4458_v34 = vpop.f32.mrb[10].mxu1 }
 0x178   : > { %2692 = vmatmul.mubr.bf16.gmra.mrb[24].mxu0 %v6657_v10 }
 0x179   : > { %2737 = vmatpush1.bf16.msra.mxu0 %v5369_v45  ;;  %2701 = vmatprep.mubr.bf16.mxu0 %v6795_v49  ;;  %v4459_v45 = vpop.f32.mrb[11].mxu1 }
 0x17a   : > { %2738 = vmatprep.subr.bf16.mxu0 %v5377_v54  ;;  %v6825_v54 = vadd.f32 %v4459_v45, %v4458_v34  ;;  %v4461_v57 = vpop.f32.mrb[12].mxu1  ;;  %v519_v45 = vpack.c.bf16 %v6708_v39, %v6708_v39 }
 0x17d   : > { %2739 = vmatpush1.bf16.msra.mxu0 %v5375_v59  ;;  %v4462_v59 = vpop.f32.mrb[13].mxu1 }
 0x17e   : > { %2740 = vmatprep.subr.bf16.mxu0 %v5383_v60  ;;  %v4464_v15 = vpop.f32.mrb[14].mxu1 }
 0x17f   : > { %v4465_v60 = vpop.f32.mrb[15].mxu1 }
 0x180   : > { %2702 = vmatmul.mubr.bf16.gmra.mrb[28].mxu0 %v6691_v27  ;;  %v6834_v63 = vadd.f32 %v4465_v60, %v4464_v15 }
 0x181   : > { %2741 = vmatpush1.bf16.msra.mxu0 %v5381_v3  ;;  %2744 = vmatprep.mubr.bf16.mxu0 %v6630_v4  ;;  %v6832_v4 = vadd.f32 %v4462_v59, %v4461_v57 }
 0x182   : > { %2742 = vmatprep.subr.bf16.mxu0 %v5389_v6 }
 0x185   : > { %2743 = vmatpush1.bf16.msra.mxu0 %v5387_v12 }
 0x186   : > { %2825 = vmatprep.subr.bf16.mxu0 %v6375_v55  ;;  %v4467_v55 = vpop.f32.mrb[16].mxu1 }
 0x188   : > { %2745 = vmatmul.mubr.bf16.vlgmr.msra.gmra.mrb[0].mxu0 %v6659_v11 }
 0x189   : > { %2826 = vmatpush1.bf16.msra.mxu0 %v6432_v19  ;;  %2754 = vmatprep.mubr.bf16.mxu0 %v6665_v16  ;;  %v4468_v19 = vpop.f32.mrb[17].mxu1 }
 0x18a   : > { %2827 = vmatprep.subr.bf16.mxu0 %v6437_v40  ;;  %v6842_v40 = vadd.f32 %v4468_v19, %v4467_v55  ;;  %v4470_v11 = vpop.f32.mrb[18].mxu1 }
 0x18b   : > { %v4471_v16 = vpop.f32.mrb[19].mxu1 }
 0x18c   : > { %v6844_v28 = vadd.f32 %v4471_v16, %v4470_v11 }
 0x18d   : > { %2828 = vmatpush1.bf16.msra.mxu0 %v6450_v22  ;;  %v4473_v22 = vpop.f32.mrb[20].mxu1 }
 0x18e   : > { %2829 = vmatprep.subr.bf16.mxu0 %v6457_v52  ;;  %v4474_v52 = vpop.f32.mrb[21].mxu1 }
 0x190   : > { %2755 = vmatmul.mubr.bf16.gmra.mrb[4].mxu0 %v6693_v31 }
 0x191   : > { %2764 = vmatprep.mubr.bf16.mxu0 %v6700_v29  ;;  %2830 = vmatpush1.bf16.msra.mxu0 %v6471_v1  ;;  %v6852_v1 = vadd.f32 %v4474_v52, %v4473_v22 }
 0x192   : > { %2831 = vmatprep.subr.bf16.mxu0 %v6477_v25  ;;  %v4476_v25 = vpop.f32.mrb[22].mxu1 }
 0x193   : > { %v4477_v29 = vpop.f32.mrb[23].mxu1 }
 0x194   : > { %v6854_v3 = vadd.f32 %v4477_v29, %v4476_v25 }
 0x195   : > { %2832 = vmatpush1.bf16.msra.mxu0 %v6490_v33  ;;  %v764_v33 = vlaneseq }
 0x196   : > { %2833 = vmatprep.subr.bf16.mxu0 %v6497_v14  ;;  %v4479_v14 = vpop.f32.mrb[24].mxu1 }
 0x197   : > { %v6864_v7 = vshrl.u32 %v764_v33, 7 }
 0x198   : > { %2765 = vmatmul.mubr.bf16.gmra.mrb[8].mxu0 %v6727_v50 }
 0x199   : > { %2774 = vmatprep.mubr.bf16.mxu0 %v6734_v56  ;;  %2834 = vmatpush1.bf16.msra.mxu0 %v6511_v36  ;;  %v4480_v36 = vpop.f32.mrb[25].mxu1 }
 0x19a   : > { %2835 = vmatprep.subr.bf16.mxu0 %v6517_v30  ;;  %v6862_v30 = vadd.f32 %v4480_v36, %v4479_v14  ;;  %v4482_v56 = vpop.f32.mrb[26].mxu1 }
 0x19b   : > { %v4483_v6 = vpop.f32.mrb[27].mxu1 }
 0x19d   : > { %2836 = vmatpush1.bf16.msra.mxu0 %v6530_v41  ;;  %v6866_v41 = vadd.f32 %v4483_v6, %v4482_v56 }
 0x19e   : > { %2837 = vmatprep.subr.bf16.mxu0 %v6537_v42  ;;  %v774_v42 = vsub.s32 2, %v6864_v7 }
 0x1a0   : > { %2775 = vmatmul.mubr.bf16.gmra.mrb[12].mxu0 %v6597_v35  ;;  %v4485_v35 = vpop.f32.mrb[28].mxu1 }
 0x1a1   : > { %2784 = vmatprep.mubr.bf16.mxu0 %v6754_v62  ;;  %2838 = vmatpush1.bf16.msra.mxu0 %v6552_v47  ;;  %v6875_v47 = vld [vmem:[%s7543_s5] sm:$0x7] }
 0x1a2   : > { %2839 = vmatprep.subr.bf16.mxu0 %v6558_v38  ;;  %v4486_v38 = vpop.f32.mrb[29].mxu1  ;;  %v6880_v34 = vrot.slane %v6875_v47, %v774_v42 }
 0x1a3   : > { %v6877_v62 = vadd.f32 %v4486_v38, %v4485_v35  ;;  %v4488_v12 = vpop.f32.mrb[30].mxu1 }
 0x1a4   : > { %v4489_v17 = vpop.f32.mrb[31].mxu1  ;;  %v1832_v59 = vadd.f32 %v6788_v37, %v6880_v34  ;;  %v1840_v37 = vadd.f32 %v6810_v43, %v6880_v34  ;;  %v1848_v43 = vadd.f32 %v6825_v54, %v6880_v34  ;;  %v1856_v54 = vadd.f32 %v6834_v63, %v6880_v34 }
 0x1a5   : > { %2840 = vmatpush1.bf16.msra.mxu0 %v6576_v51  ;;  %v6882_v51 = vadd.f32 %v4489_v17, %v4488_v12 }
 0x1a8   : > { %2785 = vmatmul.mubr.bf16.gmra.mrb[16].mxu0 %v6625_v2  ;;  %v1829_v2 = vadd.f32 %v6786_v20, %v6880_v34  ;;  %v1837_v20 = vadd.f32 %v6808_v26, %v6880_v34 }
 0x1a9   : > { %2794 = vmatprep.mubr.bf16.mxu0 %v6773_v5  ;;  %v4507_v5 = vpop.f32.mrb[32].mxu1 }
 0x1aa   : > { %v4508_v57 = vpop.f32.mrb[33].mxu1 }
 0x1ab   : > { %v4509_v15 = vadd.f32 %v4508_v57, %v4507_v5  ;;  %v4510_v60 = vpop.f32.mrb[34].mxu1 }
 0x1ac   : > { %v4511_v55 = vpop.f32.mrb[35].mxu1 }
 0x1ad   : > { %v6892_v19 = vadd.f32 %v4509_v15, %v1829_v2  ;;  %v4512_v11 = vadd.f32 %v4511_v55, %v4510_v60 }
 0x1af   : > { %v6895_v16 = vadd.f32 %v4512_v11, %v1832_v59  ;;  %v1864_v11 = vadd.f32 %v6844_v28, %v6880_v34 }
 0x1b0   : > { %2795 = vmatmul.mubr.bf16.gmra.mrb[20].mxu0 %v6657_v10  ;;  %v4253_v10 = vcombine.low %v519_v45, %v7546_v46 }
 0x1b1   : > { %2804 = vmatprep.mubr.bf16.mxu0 %v6795_v49  ;;  %v4513_v49 = vpop.f32.mrb[36].mxu1 }
 0x1b2   : > { %v4514_v22 = vpop.f32.mrb[37].mxu1 }
 0x1b3   : > { %v4515_v52 = vadd.f32 %v4514_v22, %v4513_v49  ;;  %v4516_v25 = vpop.f32.mrb[38].mxu1 }
 0x1b4   : > { %v4517_v29 = vpop.f32.mrb[39].mxu1 }
 0x1b5   : > { %v6902_v33 = vadd.f32 %v4515_v52, %v1837_v20  ;;  %v4518_v14 = vadd.f32 %v4517_v29, %v4516_v25  ;;  %v4519_v26 = vpop.f32.mrb[40].mxu1  ;;  %v1869_v52 = vadd.f32 %v6852_v1, %v6880_v34  ;;  %v1880_v1 = vadd.f32 %v6866_v41, %v6880_v34 }
 0x1b6   : > { %v4520_v56 = vpop.f32.mrb[41].mxu1 }
 0x1b7   : > { %v6904_v36 = vadd.f32 %v4518_v14, %v1840_v37  ;;  %v4521_v6 = vadd.f32 %v4520_v56, %v4519_v26  ;;  %v4522_v42 = vpop.f32.mrb[42].mxu1 }
 0x1b8   : > { %2805 = vmatmul.mubr.bf16.gmra.mrb[24].mxu0 %v6691_v27  ;;  %v1845_v27 = vadd.f32 %v6823_v21, %v6880_v34  ;;  %v4523_v35 = vpop.f32.mrb[43].mxu1 }
 0x1b9   : > { %2814 = vmatprep.mubr.bf16.mxu0 %v4253_v10  ;;  %v4524_v12 = vadd.f32 %v4523_v35, %v4522_v42  ;;  %v4525_v21 = vpop.f32.mrb[44].mxu1 }
 0x1ba   : > { %v6912_v38 = vadd.f32 %v4521_v6, %v1845_v27  ;;  %v4526_v2 = vpop.f32.mrb[45].mxu1 }
 0x1bb   : > { %v6914_v17 = vadd.f32 %v4524_v12, %v1848_v43  ;;  %v4527_v5 = vadd.f32 %v4526_v2, %v4525_v21  ;;  %v4528_v45 = vpop.f32.mrb[46].mxu1  ;;  %v1877_v43 = vadd.f32 %v6862_v30, %v6880_v34  ;;  %v1888_v30 = vadd.f32 %v6882_v51, %v6880_v34 }
 0x1bc   : > { %v4529_v57 = vpop.f32.mrb[47].mxu1 }
 0x1bd   : > { %v4530_v15 = vadd.f32 %v4529_v57, %v4528_v45 }
 0x1bf   : > { %v6924_v60 = vadd.f32 %v4530_v15, %v1856_v54  ;;  %v1885_v54 = vadd.f32 %v6877_v62, %v6880_v34 }
 0x1c0   : > { %2815 = vmatmul.mubr.bf16.gmra.mrb[28].mxu0 %v6720_v48  ;;  %v1853_v48 = vadd.f32 %v6832_v4, %v6880_v34  ;;  %v4531_v4 = vpop.f32.mrb[48].mxu1 }
 0x1c1   : > { %2857 = vmatprep.mubr.bf16.mxu0 %v7546_v46  ;;  %v4532_v55 = vpop.f32.mrb[49].mxu1 }
 0x1c2   : > { %v6922_v59 = vadd.f32 %v4527_v5, %v1853_v48  ;;  %v4533_v10 = vadd.f32 %v4532_v55, %v4531_v4  ;;  %v4534_v63 = vpop.f32.mrb[50].mxu1 }
 0x1c3   : > { %v4535_v20 = vpop.f32.mrb[51].mxu1 }
 0x1c4   : > { %v4536_v22 = vadd.f32 %v4535_v20, %v4534_v63 }
 0x1c6   : > { %v6933_v37 = vadd.f32 %v4536_v22, %v1864_v11 }
 0x1c8   : > { %2858 = vmatmul.mubr.bf16.vlgmr.msra.gmra.mrb[0].mxu0 %v6693_v31  ;;  %v1861_v31 = vadd.f32 %v6842_v40, %v6880_v34  ;;  %v1872_v40 = vadd.f32 %v6854_v3, %v6880_v34 }
 0x1c9   : > { %2867 = vmatprep.mubr.bf16.mxu0 %v7546_v46 }
 0x1ca   : > { %v6931_v49 = vadd.f32 %v4533_v10, %v1861_v31 }
 0x1d0   : > { %2868 = vmatmul.mubr.bf16.gmra.mrb[4].mxu0 %v6727_v50  ;;  %v4537_v50 = vpop.f32.mrb[52].mxu1 }
 0x1d1   : > { %v4538_v25 = vpop.f32.mrb[53].mxu1 }
 0x1d2   : > { %v4539_v29 = vadd.f32 %v4538_v25, %v4537_v50  ;;  %v4540_v14 = vpop.f32.mrb[54].mxu1 }
 0x1d3   : > { %v4541_v27 = vpop.f32.mrb[55].mxu1 }
 0x1d4   : > { %v6939_v28 = vadd.f32 %v4539_v29, %v1869_v52  ;;  %v4542_v26 = vadd.f32 %v4541_v27, %v4540_v14  ;;  %v4543_v6 = vpop.f32.mrb[56].mxu1  ;;  %v5406_v14 = vld [vmem:[%s7542_s4] sm:$0xff]   ;;  %v5407_v27 = vld [vmem:[%s7542_s4 + $0x48] sm:$0xff]  }
 0x1d5   : > { %v4544_v42 = vpop.f32.mrb[57].mxu1 }
 0x1d6   : > { %v6941_v56 = vadd.f32 %v4542_v26, %v1872_v40  ;;  %v4545_v35 = vadd.f32 %v4544_v42, %v4543_v6  ;;  %v4546_v12 = vpop.f32.mrb[58].mxu1  ;;  %v5405_v40 = vld [vmem:[%s7542_s4 + $0x40] sm:$0xff]   ;;  %v5408_v26 = vld [vmem:[%s7542_s4 + $0x8] sm:$0xff]  }
 0x1d7   : > { %v4547_v48 = vpop.f32.mrb[59].mxu1  ;;  %4571 = vmatprep.subr.bf16.mxu1 %v5405_v40  ;;  %v5415_v40 = vld [vmem:[%s7542_s4 + $0x68] sm:$0xff]  }
 0x1d8   : > { %7555 = vst [vmem:[#allocation7_spill] sm:$0xff] %v6941_v56  ;;  %v6947_v3 = vadd.f32 %v4545_v35, %v1877_v43  ;;  %v4548_v21 = vadd.f32 %v4547_v48, %v4546_v12  ;;  %v4549_v5 = vpop.f32.mrb[60].mxu1  ;;  %4572 = vmatpush3.bf16.msra.mxu1 %v5406_v14  ;;  %v5409_v35 = vld [vmem:[%s7542_s4 + $0x50] sm:$0xff]  }
 0x1d9   : > { %v4550_v45 = vpop.f32.mrb[61].mxu1  ;;  %4573 = vmatprep.subr.bf16.mxu1 %v5407_v27  ;;  %v5410_v12 = vld [vmem:[%s7542_s4 + $0x10] sm:$0xff]   ;;  %v5416_v27 = vld [vmem:[%s7542_s4 + $0x28] sm:$0xff]  }
 0x1da   : > { %7556 = vst [vmem:[#allocation8_spill] sm:$0xff] %v6947_v3  ;;  %v6949_v2 = vadd.f32 %v4548_v21, %v1880_v1  ;;  %v4551_v57 = vadd.f32 %v4550_v45, %v4549_v5  ;;  %v4552_v15 = vpop.f32.mrb[62].mxu1  ;;  %v5412_v45 = vld [vmem:[%s7542_s4 + $0x18] sm:$0xff]  }
 0x1db   : > { %v4553_v31 = vpop.f32.mrb[63].mxu1 }
 0x1dc   : > { %7557 = vst [vmem:[#allocation9_spill] sm:$0xff] %v6949_v2  ;;  %v6955_v41 = vadd.f32 %v4551_v57, %v1885_v54  ;;  %v4554_v4 = vadd.f32 %v4553_v31, %v4552_v15  ;;  %4574 = vmatpush3.bf16.msra.mxu1 %v5408_v26  ;;  %v5411_v54 = vld [vmem:[%s7542_s4 + $0x58] sm:$0xff]   ;;  %v5413_v57 = vld [vmem:[%s7542_s4 + $0x60] sm:$0xff]  }
 0x1dd   : > { %4575 = vmatprep.subr.bf16.mxu1 %v5409_v35  ;;  %v5414_v15 = vld [vmem:[%s7542_s4 + $0x20] sm:$0xff]   ;;  %v5417_v35 = vld [vmem:[%s7542_s4 + $0x70] sm:$0xff]  }
 0x1de   : > { %7558 = vst [vmem:[#allocation10_spill] sm:$0xff] %v6955_v41  ;;  %v6957_v55 = vadd.f32 %v4554_v4, %v1888_v30 }
 0x1e0   : > { %7559 = vst [vmem:[#allocation11_spill] sm:$0xff] %v6957_v55  ;;  %4576 = vmatpush3.bf16.msra.mxu1 %v5410_v12  ;;  %v5418_v12 = vld [vmem:[%s7542_s4 + $0x30] sm:$0xff]  }
 0x1e1   : > { %4577 = vmatprep.subr.bf16.mxu1 %v5411_v54  ;;  %v5419_v54 = vld [vmem:[%s7542_s4 + $0x78] sm:$0xff]  }
 0x1e4   : > { %4578 = vmatpush3.bf16.msra.mxu1 %v5412_v45  ;;  %v5420_v45 = vld [vmem:[%s7542_s4 + $0x38] sm:$0xff]  }
 0x1e5   : > { %4579 = vmatprep.subr.bf16.mxu1 %v5413_v57  ;;  %v5421_v57 = vld [vmem:[%s7542_s4 + $0xc0] sm:$0xff]  }
 0x1e8   : > { %4580 = vmatpush3.bf16.msra.mxu1 %v5414_v15  ;;  %v766_v15 = vsub.s32 0, %v6864_v7 }
 0x1e9   : > { %4581 = vmatprep.subr.bf16.mxu1 %v5415_v40  ;;  %v770_v40 = vsub.s32 1, %v6864_v7 }
 0x1ec   : > { %4582 = vmatpush3.bf16.msra.mxu1 %v5416_v27  ;;  %v7061_v27 = vrot.slane %v6875_v47, %v766_v15 }
 0x1ed   : > { %4583 = vmatprep.subr.bf16.mxu1 %v5417_v35  ;;  %v7064_v35 = vrot.slane %v6875_v47, %v770_v40 }
 0x1f0   : > { %4584 = vmatpush3.bf16.msra.mxu1 %v5418_v12 }
 0x1f1   : > { %4585 = vmatprep.subr.bf16.mxu1 %v5419_v54 }
 0x1f4   : > { %4586 = vmatpush3.bf16.msra.mxu1 %v5420_v45 }
 0x1f5   : > { %4635 = vmatprep.subr.bf16.mxu1 %v5421_v57 }
 0x20d   : > { %v6959_v11 = vpop.f32.mrb[80].mxu1 }
 0x20e   : > { %v6961_v10 = vpop.f32.mrb[81].mxu1 }
 0x20f   : > { %v6963_v63 = vpop.f32.mrb[82].mxu1 }
 0x210   : > { %v6965_v62 = vpop.f32.mrb[83].mxu1 }
 0x215   : > { %v6967_v20 = vpop.f32.mrb[84].mxu1 }
 0x216   : > { %v6969_v22 = vpop.f32.mrb[85].mxu1 }
 0x217   : > { %v6971_v34 = vpop.f32.mrb[86].mxu1 }
 0x218   : > { %v6973_v51 = vpop.f32.mrb[87].mxu1 }
 0x21d   : > { %v6975_v52 = vpop.f32.mrb[88].mxu1 }
 0x21e   : > { %v6977_v50 = vpop.f32.mrb[89].mxu1 }
 0x21f   : > { %v6979_v25 = vpop.f32.mrb[90].mxu1 }
 0x220   : > { %v6984_v29 = vpop.f32.mrb[91].mxu1 }
 0x225   : > { %v6995_v43 = vpop.f32.mrb[92].mxu1 }
 0x226   : > { %v6997_v6 = vpop.f32.mrb[93].mxu1 }
 0x227   : > { %v6999_v42 = vpop.f32.mrb[94].mxu1 }
 0x228   : > { %v7001_v1 = vpop.f32.mrb[95].mxu1 }
 0x22d   : > { %v7009_v48 = vpop.f32.mrb[96].mxu1 }
 0x22e   : > { %v7011_v21 = vpop.f32.mrb[97].mxu1 }
 0x22f   : > { %v7016_v5 = vpop.f32.mrb[98].mxu1 }
 0x230   : > { %v7021_v30 = vpop.f32.mrb[99].mxu1 }
 0x235   : > { %v7029_v31 = vpop.f32.mrb[100].mxu1 }
 0x236   : > { %v7031_v4 = vpop.f32.mrb[101].mxu1 }
 0x237   : > { %v7036_v14 = vpop.f32.mrb[102].mxu1 }
 0x238   : > { %v7041_v26 = vpop.f32.mrb[103].mxu1 }
 0x26b   : > { %v2766_v12 = vpop.f32.mrb[8].mxu0 }
 0x26c   : > { %v4803_v46 = vadd.f32 %v2766_v12, %v7061_v27  ;;  %v2768_v54 = vpop.f32.mrb[9].mxu0 }
 0x26d   : > { %v4805_v45 = vadd.f32 %v2768_v54, %v7064_v35  ;;  %v2770_v55 = vpop.f32.mrb[10].mxu0 }
 0x26e   : > { %v4807_v41 = vadd.f32 %v2770_v55, %v7061_v27  ;;  %v7070_v57 = vadd.f32 %v4803_v46, %v6959_v11  ;;  %v2772_v2 = vpop.f32.mrb[11].mxu0 }
 0x26f   : > { %v4809_v7 = vadd.f32 %v2772_v2, %v7064_v35  ;;  %v4806_v15 = vadd.f32 %v4805_v45, %v6961_v10 }
 0x270   : > { %v7075_v47 = vadd.f32 %v4807_v41, %v6963_v63 }
 0x271   : > { %v4354_v40 = vmul.f32 -1.442695, %v4806_v15  ;;  %v4810_v12 = vadd.f32 %v4809_v7, %v6965_v62 }
 0x273   : > { %5445 = vpow2.f32 %v4354_v40  ;;  %v4355_v3 = vmul.f32 -1.442695, %v4810_v12  ;;  %v2776_v54 = vpop.f32.mrb[12].mxu0 }
 0x274   : > { %v4811_v56 = vadd.f32 %v2776_v54, %v7061_v27  ;;  %v2778_v55 = vpop.f32.mrb[13].mxu0 }
 0x275   : > { %5447 = vpow2.f32 %v4355_v3  ;;  %v4813_v46 = vadd.f32 %v2778_v55, %v7064_v35  ;;  %v2780_v11 = vpop.f32.mrb[14].mxu0 }
 0x276   : > { %v4815_v2 = vadd.f32 %v2780_v11, %v7061_v27  ;;  %v7082_v10 = vadd.f32 %v4811_v56, %v6967_v20  ;;  %v2782_v41 = vpop.f32.mrb[15].mxu0 }
 0x277   : > { %v4817_v63 = vadd.f32 %v2782_v41, %v7064_v35  ;;  %v4814_v62 = vadd.f32 %v4813_v46, %v6969_v22 }
 0x278   : > { %v7087_v45 = vadd.f32 %v4815_v2, %v6971_v34 }
 0x279   : > { %v4356_v7 = vmul.f32 -1.442695, %v4814_v62  ;;  %v4818_v15 = vadd.f32 %v4817_v63, %v6973_v51 }
 0x27b   : > { %5449 = vpow2.f32 %v4356_v7  ;;  %v4357_v3 = vmul.f32 -1.442695, %v4818_v15  ;;  %v2786_v40 = vpop.f32.mrb[16].mxu0 }
 0x27c   : > { %v4819_v12 = vadd.f32 %v2786_v40, %v7061_v27  ;;  %v2788_v54 = vpop.f32.mrb[17].mxu0 }
 0x27d   : > { %v5446_v55 = vpop.eup %5445  ;;  %5451 = vpow2.f32 %v4357_v3  ;;  %v4821_v56 = vadd.f32 %v2788_v54, %v7064_v35  ;;  %v2790_v20 = vpop.f32.mrb[18].mxu0 }
 0x27e   : > { %v3118_v11 = vadd.f32 1.0, %v5446_v55  ;;  %v4823_v22 = vadd.f32 %v2790_v20, %v7061_v27  ;;  %v7094_v34 = vadd.f32 %v4819_v12, %v6975_v52  ;;  %v2792_v46 = vpop.f32.mrb[19].mxu0 }
 0x27f   : > { %v5448_v2 = vpop.eup %5447  ;;  %v4825_v51 = vadd.f32 %v2792_v46, %v7064_v35  ;;  %v4822_v41 = vadd.f32 %v4821_v56, %v6977_v50 }
 0x280   : > { %5453 = vrcp.f32 %v3118_v11  ;;  %v3119_v63 = vadd.f32 1.0, %v5448_v2  ;;  %v7099_v62 = vadd.f32 %v4823_v22, %v6979_v25 }
 0x281   : > { %v4358_v7 = vmul.f32 -1.442695, %v4822_v41  ;;  %v4826_v15 = vadd.f32 %v4825_v51, %v6984_v29 }
 0x282   : > { %5455 = vrcp.f32 %v3119_v63 }
 0x283   : > { %v4359_v3 = vmul.f32 -1.442695, %v4826_v15  ;;  %v2796_v40 = vpop.f32.mrb[20].mxu0  ;;  %5457 = vpow2.f32 %v4358_v7 }
 0x284   : > { %v4827_v52 = vadd.f32 %v2796_v40, %v7061_v27  ;;  %v2798_v12 = vpop.f32.mrb[21].mxu0 }
 0x285   : > { %v5450_v54 = vpop.eup %5449  ;;  %v4829_v55 = vadd.f32 %v2798_v12, %v7064_v35  ;;  %v2800_v20 = vpop.f32.mrb[22].mxu0  ;;  %5459 = vpow2.f32 %v4359_v3 }
 0x286   : > { %v3120_v50 = vadd.f32 1.0, %v5450_v54  ;;  %v4831_v56 = vadd.f32 %v2800_v20, %v7061_v27  ;;  %v7106_v25 = vadd.f32 %v4827_v52, %v6995_v43  ;;  %v2802_v11 = vpop.f32.mrb[23].mxu0 }
 0x287   : > { %v5452_v29 = vpop.eup %5451  ;;  %v4833_v22 = vadd.f32 %v2802_v11, %v7064_v35  ;;  %v4830_v46 = vadd.f32 %v4829_v55, %v6997_v6 }
 0x288   : > { %5461 = vrcp.f32 %v3120_v50  ;;  %v3121_v2 = vadd.f32 1.0, %v5452_v29  ;;  %v7111_v51 = vadd.f32 %v4831_v56, %v6999_v42 }
 0x289   : > { %v4360_v41 = vmul.f32 -1.442695, %v4830_v46  ;;  %v4834_v63 = vadd.f32 %v4833_v22, %v7001_v1 }
 0x28a   : > { %v5454_v7 = vpop.eup %5453  ;;  %5463 = vrcp.f32 %v3121_v2 }
 0x28b   : > { %v4361_v15 = vmul.f32 -1.442695, %v4834_v63  ;;  %v2806_v3 = vpop.f32.mrb[24].mxu0  ;;  %5465 = vpow2.f32 %v4360_v41  ;;  %v3166_v12 = vmul.f32 %v5454_v7, %v6650_v8 }
 0x28c   : > { %v5456_v43 = vpop.eup %5455  ;;  %v4835_v40 = vadd.f32 %v2806_v3, %v7061_v27  ;;  %v2808_v52 = vpop.f32.mrb[25].mxu0 }
 0x28d   : > { %v3167_v6 = vmul.f32 %v5456_v43, %v6684_v23  ;;  %v4837_v54 = vadd.f32 %v2808_v52, %v7064_v35  ;;  %v2810_v42 = vpop.f32.mrb[26].mxu0  ;;  %v5458_v55 = vpop.eup %5457  ;;  %5467 = vpow2.f32 %v4361_v15 }
 0x28e   : > { %v4839_v1 = vadd.f32 %v2810_v42, %v7061_v27  ;;  %v7120_v20 = vadd.f32 %v4835_v40, %v7009_v48  ;;  %v2812_v50 = vpop.f32.mrb[27].mxu0  ;;  %v3122_v11 = vadd.f32 1.0, %v5458_v55 }
 0x28f   : > { %v7122_v56 = vpack.c.bf16 %v3167_v6, %v3166_v12  ;;  %v4841_v29 = vadd.f32 %v2812_v50, %v7064_v35  ;;  %v4838_v8 = vadd.f32 %v4837_v54, %v7011_v21  ;;  %v5460_v22 = vpop.eup %5459 }
 0x290   : > { %v7127_v23 = vadd.f32 %v4839_v1, %v7016_v5  ;;  %5469 = vrcp.f32 %v3122_v11  ;;  %v3123_v46 = vadd.f32 1.0, %v5460_v22 }
 0x291   : > { %v4362_v2 = vmul.f32 -1.442695, %v4838_v8  ;;  %v4842_v41 = vadd.f32 %v4841_v29, %v7021_v30 }
 0x292   : > { %v5462_v63 = vpop.eup %5461  ;;  %5471 = vrcp.f32 %v3123_v46 }
 0x293   : > { %v4363_v48 = vmul.f32 -1.442695, %v4842_v41  ;;  %v2816_v7 = vpop.f32.mrb[28].mxu0  ;;  %v3168_v40 = vmul.f32 %v5462_v63, %v6592_v58  ;;  %5473 = vpow2.f32 %v4362_v2 }
 0x294   : > { %v5464_v15 = vpop.eup %5463  ;;  %v4843_v3 = vadd.f32 %v2816_v7, %v7061_v27  ;;  %v2818_v43 = vpop.f32.mrb[29].mxu0 }
 0x295   : > { %v3169_v21 = vmul.f32 %v5464_v15, %v6582_v53  ;;  %v4845_v5 = vadd.f32 %v2818_v43, %v7064_v35  ;;  %v2820_v52 = vpop.f32.mrb[30].mxu0  ;;  %v5466_v12 = vpop.eup %5465  ;;  %5475 = vpow2.f32 %v4363_v48 }
 0x296   : > { %v4847_v6 = vadd.f32 %v2820_v52, %v7061_v27  ;;  %v7136_v30 = vadd.f32 %v4843_v3, %v7029_v31  ;;  %v2822_v54 = vpop.f32.mrb[31].mxu0  ;;  %v3124_v55 = vadd.f32 1.0, %v5466_v12 }
 0x297   : > { %v7138_v42 = vpack.c.bf16 %v3169_v21, %v3168_v40  ;;  %v4849_v1 = vadd.f32 %v2822_v54, %v7064_v35  ;;  %v5468_v58 = vpop.eup %5467  ;;  %v4846_v53 = vadd.f32 %v4845_v5, %v7031_v4 }
 0x298   : > { %5477 = vrcp.f32 %v3124_v55  ;;  %v3125_v50 = vadd.f32 1.0, %v5468_v58  ;;  %v7143_v11 = vadd.f32 %v4847_v6, %v7036_v14 }
 0x299   : > { %v4850_v29 = vadd.f32 %v4849_v1, %v7041_v26  ;;  %v4364_v8 = vmul.f32 -1.442695, %v4846_v53 }
 0x29a   : > { %v5470_v31 = vpop.eup %5469  ;;  %5479 = vrcp.f32 %v3125_v50 }
 0x29b   : > { %v4365_v22 = vmul.f32 -1.442695, %v4850_v29  ;;  %v7146_v46 = vpop.f32.mrb[0].mxu0  ;;  %5481 = vpow2.f32 %v4364_v8  ;;  %v3170_v4 = vmul.f32 %v5470_v31, %v6621_v0 }
 0x29c   : > { %v2861_v2 = vpop.f32.mrb[1].mxu0  ;;  %v5472_v41 = vpop.eup %5471 }
 0x29d   : > { %v4796_v63 = vadd.f32 %v2861_v2, %v7064_v35  ;;  %v7149_v48 = vpop.f32.mrb[2].mxu0  ;;  %v3171_v14 = vmul.f32 %v5472_v41, %v6610_v61  ;;  %v5474_v15 = vpop.eup %5473  ;;  %5483 = vpow2.f32 %v4365_v22 }
 0x29e   : > { %v2865_v7 = vpop.f32.mrb[3].mxu0  ;;  %v3126_v43 = vadd.f32 1.0, %v5474_v15 }
 0x29f   : > { %v4798_v26 = vadd.f32 %v2865_v7, %v7064_v35  ;;  %v7154_v3 = vpack.c.bf16 %v3171_v14, %v3170_v4  ;;  %v5476_v40 = vpop.eup %5475  ;;  %v4350_v21 = vmul.f32 -1.442695, %v4796_v63 }
 0x2a0   : > { %5485 = vrcp.f32 %v3126_v43  ;;  %v3127_v5 = vadd.f32 1.0, %v5476_v40 }
 0x2a1   : > { %v4351_v12 = vmul.f32 -1.442695, %v4798_v26 }
 0x2a2   : > { %v5478_v52 = vpop.eup %5477  ;;  %5487 = vrcp.f32 %v3127_v5 }
 0x2a3   : > { %v7156_v6 = vpop.f32.mrb[4].mxu0  ;;  %5489 = vpow2.f32 %v4350_v21  ;;  %v3172_v55 = vmul.f32 %v5478_v52, %v6653_v9 }
 0x2a4   : > { %v2871_v0 = vpop.f32.mrb[5].mxu0  ;;  %v5480_v54 = vpop.eup %5479  ;;  %5491 = vpow2.f32 %v4351_v12 }
 0x2a5   : > { %v7158_v61 = vpop.f32.mrb[6].mxu0  ;;  %v3173_v1 = vmul.f32 %v5480_v54, %v6639_v32  ;;  %v4800_v58 = vadd.f32 %v2871_v0, %v7064_v35  ;;  %v5482_v50 = vpop.eup %5481 }
 0x2a6   : > { %v2875_v53 = vpop.f32.mrb[7].mxu0  ;;  %v3128_v8 = vadd.f32 1.0, %v5482_v50  ;;  %v7179_v50 = vld [vmem:[%s6569_s17 + $0x8] sm:$0xff] }
 0x2a7   : > { %v7163_v29 = vpack.c.bf16 %v3173_v1, %v3172_v55  ;;  %v4802_v31 = vadd.f32 %v2875_v53, %v7064_v35  ;;  %v5484_v22 = vpop.eup %5483  ;;  %v4352_v41 = vmul.f32 -1.442695, %v4800_v58  ;;  %v7175_v58 = vld [vmem:[%s6569_s17] sm:$0xff]  ;;  %7560 = vst [vmem:[#allocation12_spill] sm:$0xff] %v7179_v50 }
 0x2a8   : > { %5493 = vrcp.f32 %v3128_v8  ;;  %v3129_v2 = vadd.f32 1.0, %v5484_v22  ;;  %v7561_v8 = vmov 0   ;;  %v5422_v22 = vld [vmem:[%s7542_s4 + $0x80] sm:$0xff]  }
 0x2a9   : > { %v4353_v4 = vmul.f32 -1.442695, %v4802_v31 }
 0x2aa   : > { %v5486_v63 = vpop.eup %5485  ;;  %5495 = vrcp.f32 %v3129_v2  ;;  %v5423_v2 = vld [vmem:[%s7542_s4 + $0xc8] sm:$0xff]  }
 0x2ab   : > { %5497 = vpow2.f32 %v4352_v41  ;;  %v3174_v14 = vmul.f32 %v5486_v63, %v6687_v24 }
 0x2ac   : > { %v5488_v9 = vpop.eup %5487  ;;  %5499 = vpow2.f32 %v4353_v4  ;;  %v5424_v4 = vld [vmem:[%s7542_s4 + $0x88] sm:$0xff]  }
 0x2ad   : > { %v5490_v32 = vpop.eup %5489  ;;  %v3175_v7 = vmul.f32 %v5488_v9, %v6674_v18  ;;  %v7197_v9 = vld [vmem:[%s6569_s17 + $0x10] sm:$0xff] }
 0x2ae   : > { %v3114_v15 = vadd.f32 1.0, %v5490_v32  ;;  %v5492_v26 = vpop.eup %5491 }
 0x2af   : > { %v7168_v43 = vpack.c.bf16 %v3175_v7, %v3174_v14  ;;  %v3115_v35 = vadd.f32 1.0, %v5492_v26  ;;  %v7201_v14 = vld [vmem:[%s6569_s17 + $0x18] sm:$0xff] }
 0x2b0   : > { %5501 = vrcp.f32 %v3114_v15  ;;  %7562 = vst [vmem:[#allocation13_spill] sm:$0xff] %v7201_v14  ;;  %v5425_v15 = vld [vmem:[%s7542_s4 + $0xd0] sm:$0xff]  }
 0x2b1   : > { %5503 = vrcp.f32 %v3115_v35  ;;  %v5426_v35 = vld [vmem:[%s7542_s4 + $0x90] sm:$0xff]  }
 0x2b2   : > { %v5494_v40 = vpop.eup %5493 }
 0x2b3   : > { %v3176_v5 = vmul.f32 %v5494_v40, %v6712_v44 }
 0x2b4   : > { %v5496_v21 = vpop.eup %5495 }
 0x2b5   : > { %v3177_v52 = vmul.f32 %v5496_v21, %v6708_v39  ;;  %v5498_v12 = vpop.eup %5497 }
 0x2b6   : > { %v3116_v24 = vadd.f32 1.0, %v5498_v12  ;;  %v5500_v18 = vpop.eup %5499 }
 0x2b7   : > { %v7172_v0 = vpack.c.bf16 %v3177_v52, %v3176_v5  ;;  %v3117_v54 = vadd.f32 1.0, %v5500_v18  ;;  %v5427_v52 = vld [vmem:[%s7542_s4 + $0xd8] sm:$0xff]  }
 0x2b8   : > { %5505 = vrcp.f32 %v3116_v24  ;;  %v3198_v24 = vunpack.c.l.b16 %v7122_v56  ;;  %v5428_v18 = vld [vmem:[%s7542_s4 + $0x98] sm:$0xff]  }
 0x2b9   : > { %5507 = vrcp.f32 %v3117_v54 }
 0x2ba   : > { %v5502_v55 = vpop.eup %5501 }
 0x2bb   : > { %v5504_v1 = vpop.eup %5503  ;;  %v3162_v53 = vmul.f32 %v7175_v58, %v5502_v55  ;;  %v5429_v55 = vld [vmem:[%s7542_s4 + $0xe0] sm:$0xff]  }
 0x2bc   : > { %v3163_v39 = vmul.f32 %v7179_v50, %v5504_v1  ;;  %v5430_v1 = vld [vmem:[%s7542_s4 + $0xa0] sm:$0xff]  }
 0x2be   : > { %v7182_v44 = vpack.c.bf16 %v3163_v39, %v3162_v53  ;;  %v3200_v53 = vunpack.c.l.b16 %v7138_v42  ;;  %v5431_v39 = vld [vmem:[%s7542_s4 + $0xe8] sm:$0xff]  }
 0x2c0   : > { %v4366_v31 = vcombine.low %v7561_v8, %v7182_v44  ;;  %v3195_v40 = vunpack.c.h.b16 %v7182_v44 }
 0x2c2   : > { %v5506_v41 = vpop.eup %5505  ;;  %3596 = vmatprep.mubr.bf16.mxu1 %v4366_v31  ;;  %v3199_v31 = vunpack.c.h.b16 %v7122_v56 }
 0x2c3   : > { %3597 = vmatmul.mubr.bf16.vlgmr.msra.gmra.mrb[104].mxu1 %v6021_v13  ;;  %v5508_v63 = vpop.eup %5507  ;;  %v3164_v32 = vmul.f32 %v7197_v9, %v5506_v41  ;;  %v5433_v41 = vld [vmem:[%s7542_s4 + $0xf0] sm:$0xff]  }
 0x2c4   : > { %4636 = vmatpush3.bf16.msra.mxu1 %v5422_v22  ;;  %v3165_v7 = vmul.f32 %v7201_v14, %v5508_v63  ;;  %v5432_v22 = vld [vmem:[%s7542_s4 + $0xa8] sm:$0xff]   ;;  %v5434_v63 = vld [vmem:[%s7542_s4 + $0xb0] sm:$0xff]  }
 0x2c5   : > { %4637 = vmatprep.subr.bf16.mxu1 %v5423_v2  ;;  %v3296_v2 = vpack.c.b16 %v3200_v53, %v3199_v31  ;;  %v3207_v53 = vunpack.c.h.b16 %v7168_v43  ;;  %v5438_v31 = vld [vmem:[%s7542_s4 + $0x108] sm:$0xff]  }
 0x2c6   : > { %v7207_v26 = vpack.c.bf16 %v3165_v7, %v3164_v32  ;;  %v5435_v32 = vld [vmem:[%s7542_s4 + $0xf8] sm:$0xff]   ;;  %v3201_v7 = vunpack.c.h.b16 %v7138_v42 }
 0x2c8   : > { %4638 = vmatpush3.bf16.msra.mxu1 %v5424_v4  ;;  %v3196_v21 = vunpack.c.l.b16 %v7207_v26  ;;  %v3197_v5 = vunpack.c.h.b16 %v7207_v26  ;;  %v3202_v4 = vunpack.c.l.b16 %v7154_v3 }
 0x2c9   : > { %4639 = vmatprep.subr.bf16.mxu1 %v5425_v15  ;;  %v5436_v15 = vld [vmem:[%s7542_s4 + $0xb8] sm:$0xff]  }
 0x2ca   : > { %v3292_v12 = vpack.c.b16 %v3196_v21, %v3195_v40  ;;  %v3294_v54 = vpack.c.b16 %v3198_v24, %v3197_v5  ;;  %v5437_v40 = vld [vmem:[%s7542_s4 + $0x100] sm:$0xff]   ;;  %v3204_v21 = vunpack.c.l.b16 %v7163_v29  ;;  %v3203_v5 = vunpack.c.h.b16 %v7154_v3 }
 0x2cb   : > { %v3206_v24 = vunpack.c.l.b16 %v7168_v43 }
 0x2cc   : > { %4640 = vmatpush3.bf16.msra.mxu1 %v5426_v35  ;;  %3604 = vmatprep.mubr.bf16.mxu1 %v3292_v12  ;;  %v3298_v35 = vpack.c.b16 %v3202_v4, %v3201_v7  ;;  %v3209_v4 = vunpack.c.h.b16 %v7172_v0 }
 0x2cd   : > { %4641 = vmatprep.subr.bf16.mxu1 %v5427_v52  ;;  %3605 = vmatmul.mubr.bf16.gmra.mrb[108].mxu1 %v7182_v44  ;;  %v3300_v52 = vpack.c.b16 %v3204_v21, %v3203_v5 }
 0x2ce   : > { %3612 = vmatprep.mubr.bf16.mxu1 %v3294_v54 }
 0x2d0   : > { %4642 = vmatpush3.bf16.msra.mxu1 %v5428_v18  ;;  %v3205_v18 = vunpack.c.h.b16 %v7163_v29 }
 0x2d1   : > { %4643 = vmatprep.subr.bf16.mxu1 %v5429_v55 }
 0x2d2   : > { %v3302_v55 = vpack.c.b16 %v3206_v24, %v3205_v18 }
 0x2d4   : > { %4644 = vmatpush3.bf16.msra.mxu1 %v5430_v1  ;;  %v3208_v1 = vunpack.c.l.b16 %v7172_v0 }
 0x2d5   : > { %4645 = vmatprep.subr.bf16.mxu1 %v5431_v39  ;;  %3613 = vmatmul.mubr.bf16.gmra.mrb[112].mxu1 %v7207_v26 }
 0x2d6   : > { %3620 = vmatprep.mubr.bf16.mxu1 %v3296_v2  ;;  %v3304_v39 = vpack.c.b16 %v3208_v1, %v3207_v53 }
 0x2d8   : > { %4646 = vmatpush3.bf16.msra.mxu1 %v5432_v22  ;;  %v5439_v22 = vld [vmem:[%s7542_s4 + $0x110] sm:$0xff]  }
 0x2d9   : > { %4647 = vmatprep.subr.bf16.mxu1 %v5433_v41  ;;  %v5440_v41 = vld [vmem:[%s7542_s4 + $0x118] sm:$0xff]  }
 0x2dc   : > { %4648 = vmatpush3.bf16.msra.mxu1 %v5434_v63  ;;  %v553_v63 = vunpack.c.l.b16 %v7561_v8 }
 0x2dd   : > { %4649 = vmatprep.subr.bf16.mxu1 %v5435_v32  ;;  %3621 = vmatmul.mubr.bf16.gmra.mrb[116].mxu1 %v7122_v56 }
 0x2de   : > { %3628 = vmatprep.mubr.bf16.mxu1 %v3298_v35  ;;  %v3306_v32 = vpack.c.b16 %v553_v63, %v3209_v4 }
 0x2e0   : > { %4650 = vmatpush3.bf16.msra.mxu1 %v5436_v15 }
 0x2e1   : > { %4747 = vmatprep.subr.bf16.mxu1 %v5437_v40 }
 0x2e5   : > { %3629 = vmatmul.mubr.bf16.gmra.mrb[120].mxu1 %v7138_v42 }
 0x2e6   : > { %3636 = vmatprep.mubr.bf16.mxu1 %v3300_v52 }
 0x2ed   : > { %3637 = vmatmul.mubr.bf16.gmra.mrb[124].mxu1 %v7154_v3 }
 0x2ee   : > { %3644 = vmatprep.mubr.bf16.mxu1 %v3302_v55 }
 0x2f5   : > { %3645 = vmatmul.mubr.bf16.gmra.mrb[128].mxu1 %v7163_v29 }
 0x2f6   : > { %3652 = vmatprep.mubr.bf16.mxu1 %v3304_v39 }
 0x2fd   : > { %3653 = vmatmul.mubr.bf16.gmra.mrb[132].mxu1 %v7168_v43 }
 0x2fe   : > { %3693 = vmatprep.mubr.bf16.mxu1 %v3292_v12  ;;  %v5442_v12 = vld [vmem:[%s7542_s4 + $0x128] sm:$0xff]  }
 0x305   : > { %3694 = vmatmul.mubr.bf16.vlgmr.msra.gmra.mrb[136].mxu1 %v7182_v44  ;;  %v5441_v44 = vld [vmem:[%s7542_s4 + $0x120] sm:$0xff]  }
 0x306   : > { %3701 = vmatprep.mubr.bf16.mxu1 %v3294_v54  ;;  %4748 = vmatpush3.bf16.msra.mxu1 %v5437_v40  ;;  %v5443_v54 = vld [vmem:[%s7542_s4 + $0x130] sm:$0xff]  }
 0x307   : > { %4749 = vmatprep.subr.bf16.mxu1 %v5438_v31 }
 0x30a   : > { %4750 = vmatpush3.bf16.msra.mxu1 %v5438_v31 }
 0x30b   : > { %4751 = vmatprep.subr.bf16.mxu1 %v5439_v22 }
 0x30d   : > { %3702 = vmatmul.mubr.bf16.gmra.mrb[140].mxu1 %v7207_v26 }
 0x30e   : > { %3709 = vmatprep.mubr.bf16.mxu1 %v3296_v2  ;;  %4752 = vmatpush3.bf16.msra.mxu1 %v5439_v22  ;;  %v5444_v2 = vld [vmem:[%s7542_s4 + $0x138] sm:$0xff]  }
 0x30f   : > { %4753 = vmatprep.subr.bf16.mxu1 %v5440_v41 }
 0x312   : > { %4754 = vmatpush3.bf16.msra.mxu1 %v5440_v41 }
 0x313   : > { %4755 = vmatprep.subr.bf16.mxu1 %v5441_v44 }
 0x315   : > { %3710 = vmatmul.mubr.bf16.gmra.mrb[144].mxu1 %v7122_v56 }
 0x316   : > { %3717 = vmatprep.mubr.bf16.mxu1 %v3298_v35  ;;  %4756 = vmatpush3.bf16.msra.mxu1 %v5441_v44 }
 0x317   : > { %4757 = vmatprep.subr.bf16.mxu1 %v5442_v12 }
 0x31a   : > { %4758 = vmatpush3.bf16.msra.mxu1 %v5442_v12 }
 0x31b   : > { %4759 = vmatprep.subr.bf16.mxu1 %v5443_v54 }
 0x31d   : > { %3718 = vmatmul.mubr.bf16.gmra.mrb[148].mxu1 %v7138_v42 }
 0x31e   : > { %3725 = vmatprep.mubr.bf16.mxu1 %v3300_v52  ;;  %4760 = vmatpush3.bf16.msra.mxu1 %v5443_v54 }
 0x31f   : > { %4761 = vmatprep.subr.bf16.mxu1 %v5444_v2 }
 0x322   : > { %4762 = vmatpush3.bf16.msra.mxu1 %v5444_v2 }
 0x325   : > { %3726 = vmatmul.mubr.bf16.gmra.mrb[152].mxu1 %v7154_v3 }
 0x326   : > { %3733 = vmatprep.mubr.bf16.mxu1 %v3302_v55 }
 0x32d   : > { %3734 = vmatmul.mubr.bf16.gmra.mrb[156].mxu1 %v7163_v29 }
 0x32e   : > { %3741 = vmatprep.mubr.bf16.mxu1 %v3304_v39 }
 0x335   : > { %3742 = vmatmul.mubr.bf16.gmra.mrb[160].mxu1 %v7168_v43 }
 0x336   : > { %3749 = vmatprep.mubr.bf16.mxu1 %v3306_v32 }
 0x33d   : > { %3750 = vmatmul.mubr.bf16.gmra.mrb[164].mxu1 %v7172_v0 }
 0x33e   : > { %4763 = vmatprep.mubr.bf16.mxu1 %v7207_v26 }
 0x345   : > { %4764 = vmatmul.mubr.bf16.vlgmr.msra.gmra.mrb[64].mxu1 %v7122_v56 }
 0x346   : > { %4767 = vmatprep.mubr.bf16.mxu1 %v7138_v42 }
 0x34d   : > { %4768 = vmatmul.mubr.bf16.gmra.mrb[68].mxu1 %v7154_v3 }
 0x34e   : > { %4771 = vmatprep.mubr.bf16.mxu1 %v7163_v29 }
 0x355   : > { %4772 = vmatmul.mubr.bf16.gmra.mrb[72].mxu1 %v7168_v43 }
 0x356   : > { %4775 = vmatprep.mubr.bf16.mxu1 %v7172_v0 }
 0x35d   : > { %4776 = vmatmul.mubr.bf16.gmra.mrb[76].mxu1 %v6021_v13 }
 0x396   : > { %v4587_v8 = vpop.f32.mrb[104].mxu1 }
 0x397   : > { %v4588_v7 = vpop.f32.mrb[105].mxu1 }
 0x398   : > { %v4589_v15 = vadd.f32 %v4588_v7, %v4587_v8  ;;  %v4590_v35 = vpop.f32.mrb[106].mxu1 }
 0x399   : > { %v4591_v40 = vpop.f32.mrb[107].mxu1 }
 0x39a   : > { %v4592_v26 = vadd.f32 %v4591_v40, %v4590_v35 }
 0x3a0   : > { %v4593_v21 = vpop.f32.mrb[108].mxu1 }
 0x3a1   : > { %v4594_v56 = vpop.f32.mrb[109].mxu1 }
 0x3a2   : > { %v4595_v5 = vadd.f32 %v4594_v56, %v4593_v21  ;;  %v4596_v42 = vpop.f32.mrb[110].mxu1 }
 0x3a3   : > { %v4597_v52 = vpop.f32.mrb[111].mxu1 }
 0x3a4   : > { %v4598_v3 = vadd.f32 %v4597_v52, %v4596_v42 }
 0x3a8   : > { %v4599_v24 = vpop.f32.mrb[112].mxu1 }
 0x3a9   : > { %v4600_v29 = vpop.f32.mrb[113].mxu1 }
 0x3aa   : > { %v4601_v18 = vadd.f32 %v4600_v29, %v4599_v24  ;;  %v4602_v43 = vpop.f32.mrb[114].mxu1 }
 0x3ab   : > { %v4603_v55 = vpop.f32.mrb[115].mxu1 }
 0x3ac   : > { %v4604_v0 = vadd.f32 %v4603_v55, %v4602_v43 }
 0x3b0   : > { %v4605_v1 = vpop.f32.mrb[116].mxu1 }
 0x3b1   : > { %v4606_v13 = vpop.f32.mrb[117].mxu1 }
 0x3b2   : > { %v7305_v53 = vadd.f32 %v4606_v13, %v4605_v1  ;;  %v4608_v39 = vpop.f32.mrb[118].mxu1 }
 0x3b3   : > { %v4609_v31 = vpop.f32.mrb[119].mxu1 }
 0x3b4   : > { %v4610_v22 = vadd.f32 %v4609_v31, %v4608_v39 }
 0x3b8   : > { %v4611_v41 = vpop.f32.mrb[120].mxu1 }
 0x3b9   : > { %v4612_v44 = vpop.f32.mrb[121].mxu1 }
 0x3ba   : > { %v7307_v12 = vadd.f32 %v4612_v44, %v4611_v41  ;;  %v4614_v54 = vpop.f32.mrb[122].mxu1 }
 0x3bb   : > { %v4615_v2 = vpop.f32.mrb[123].mxu1 }
 0x3bc   : > { %v7309_v63 = vadd.f32 %v4615_v2, %v4614_v54 }
 0x3c0   : > { %v4617_v4 = vpop.f32.mrb[124].mxu1 }
 0x3c1   : > { %v4618_v32 = vpop.f32.mrb[125].mxu1 }
 0x3c2   : > { %v7311_v8 = vadd.f32 %v4618_v32, %v4617_v4  ;;  %v4620_v7 = vpop.f32.mrb[126].mxu1 }
 0x3c3   : > { %v4621_v35 = vpop.f32.mrb[127].mxu1 }
 0x3c4   : > { %v7313_v40 = vadd.f32 %v4621_v35, %v4620_v7 }
 0x3c8   : > { %v4623_v21 = vpop.f32.mrb[128].mxu1 }
 0x3c9   : > { %v4624_v56 = vpop.f32.mrb[129].mxu1 }
 0x3ca   : > { %v7315_v42 = vadd.f32 %v4624_v56, %v4623_v21  ;;  %v4626_v52 = vpop.f32.mrb[130].mxu1 }
 0x3cb   : > { %v4627_v24 = vpop.f32.mrb[131].mxu1 }
 0x3cc   : > { %v7317_v29 = vadd.f32 %v4627_v24, %v4626_v52 }
 0x3d0   : > { %v4629_v43 = vpop.f32.mrb[132].mxu1 }
 0x3d1   : > { %v4630_v55 = vpop.f32.mrb[133].mxu1 }
 0x3d2   : > { %v7319_v1 = vadd.f32 %v4630_v55, %v4629_v43  ;;  %v4632_v13 = vpop.f32.mrb[134].mxu1 }
 0x3d3   : > { %v4633_v39 = vpop.f32.mrb[135].mxu1 }
 0x3d4   : > { %v7321_v31 = vadd.f32 %v4633_v39, %v4632_v13 }
 0x3d8   : > { %v4651_v41 = vpop.f32.mrb[136].mxu1 }
 0x3d9   : > { %v4652_v44 = vpop.f32.mrb[137].mxu1 }
 0x3da   : > { %v4653_v54 = vadd.f32 %v4652_v44, %v4651_v41  ;;  %v4654_v2 = vpop.f32.mrb[138].mxu1 }
 0x3db   : > { %v4655_v4 = vpop.f32.mrb[139].mxu1 }
 0x3dc   : > { %v3696_v32 = vadd.f32 %v4653_v54, %v4589_v15  ;;  %v4656_v7 = vadd.f32 %v4655_v4, %v4654_v2 }
 0x3de   : > { %v3699_v35 = vadd.f32 %v4656_v7, %v4592_v26  ;;  %v7324_v21 = vadd.f32 %v3696_v32, %v6892_v19 }
 0x3e0   : > { %v4657_v56 = vpop.f32.mrb[140].mxu1  ;;  %v7327_v52 = vadd.f32 %v3699_v35, %v6895_v16 }
 0x3e1   : > { %v4658_v24 = vpop.f32.mrb[141].mxu1 }
 0x3e2   : > { %v4659_v43 = vadd.f32 %v4658_v24, %v4657_v56  ;;  %v4660_v55 = vpop.f32.mrb[142].mxu1 }
 0x3e3   : > { %v4661_v13 = vpop.f32.mrb[143].mxu1 }
 0x3e4   : > { %v3704_v39 = vadd.f32 %v4659_v43, %v4595_v5  ;;  %v4662_v50 = vadd.f32 %v4661_v13, %v4660_v55 }
 0x3e6   : > { %v3707_v14 = vadd.f32 %v4662_v50, %v4598_v3  ;;  %v7330_v41 = vadd.f32 %v3704_v39, %v6902_v33 }
 0x3e8   : > { %v4663_v15 = vpop.f32.mrb[144].mxu1  ;;  %v7333_v26 = vadd.f32 %v3707_v14, %v6904_v36 }
 0x3e9   : > { %v4664_v19 = vpop.f32.mrb[145].mxu1 }
 0x3ea   : > { %v4665_v44 = vadd.f32 %v4664_v19, %v4663_v15  ;;  %v4666_v54 = vpop.f32.mrb[146].mxu1  ;;  %v4340_v15 = vmul.f32 -1.442695, %v7082_v10  ;;  %v4801_v19 = vadd.f32 %v7158_v61, %v7061_v27 }
 0x3eb   : > { %v4667_v2 = vpop.f32.mrb[147].mxu1 }
 0x3ec   : > { %v3712_v16 = vadd.f32 %v4665_v44, %v4601_v18  ;;  %v4668_v4 = vadd.f32 %v4667_v2, %v4666_v54  ;;  %v4338_v18 = vmul.f32 -1.442695, %v7070_v57 }
 0x3ee   : > { %v3715_v32 = vadd.f32 %v4668_v4, %v4604_v0  ;;  %v7336_v7 = vadd.f32 %v3712_v16, %v6912_v38  ;;  %v4339_v38 = vmul.f32 -1.442695, %v7075_v47  ;;  %5509 = vpow2.f32 %v4338_v18 }
 0x3ef   : > { %v4341_v47 = vmul.f32 -1.442695, %v7087_v45  ;;  %v4337_v16 = vmul.f32 -1.442695, %v4801_v19 }
 0x3f0   : > { %v4669_v5 = vpop.f32.mrb[148].mxu1  ;;  %v7339_v50 = vadd.f32 %v3715_v32, %v6914_v17  ;;  %5511 = vpow2.f32 %v4339_v38 }
 0x3f1   : > { %v4670_v33 = vpop.f32.mrb[149].mxu1  ;;  %5513 = vpow2.f32 %v4340_v15 }
 0x3f2   : > { %v4671_v3 = vadd.f32 %v4670_v33, %v4669_v5  ;;  %v4672_v35 = vpop.f32.mrb[150].mxu1  ;;  %5515 = vpow2.f32 %v4341_v47 }
 0x3f3   : > { %v4673_v56 = vpop.f32.mrb[151].mxu1 }
 0x3f4   : > { %v3720_v36 = vadd.f32 %v4671_v3, %v7305_v53  ;;  %v4674_v14 = vadd.f32 %v4673_v56, %v4672_v35  ;;  %v7563_v56 = vld [vmem:[#allocation7_spill] sm:$0xff] }
 0x3f6   : > { %v3723_v24 = vadd.f32 %v4674_v14, %v4610_v22  ;;  %v7343_v43 = vadd.f32 %v3720_v36, %v6922_v59  ;;  %v4799_v59 = vadd.f32 %v7156_v6, %v7061_v27  ;;  %v4797_v6 = vadd.f32 %v7149_v48, %v7061_v27 }
 0x3f8   : > { %v4675_v0 = vpop.f32.mrb[152].mxu1  ;;  %v7348_v55 = vadd.f32 %v3723_v24, %v6924_v60  ;;  %v4795_v60 = vadd.f32 %v7146_v46, %v7061_v27  ;;  %v4336_v54 = vmul.f32 -1.442695, %v4799_v59  ;;  %v4335_v32 = vmul.f32 -1.442695, %v4797_v6  ;;  %v5510_v33 = vpop.eup %5509  ;;  %v7565_v6 = vld [vmem:[#allocation9_spill] sm:$0xff] }
 0x3f9   : > { %v4676_v17 = vpop.f32.mrb[153].mxu1  ;;  %v3006_v3 = vadd.f32 1.0, %v5510_v33 }
 0x3fa   : > { %v4677_v13 = vadd.f32 %v4676_v17, %v4675_v0  ;;  %v4678_v39 = vpop.f32.mrb[154].mxu1  ;;  %v4334_v45 = vmul.f32 -1.442695, %v4795_v60  ;;  %5517 = vpow2.f32 %v4336_v54  ;;  %v5512_v27 = vpop.eup %5511 }
 0x3fb   : > { %v4679_v53 = vpop.f32.mrb[155].mxu1  ;;  %v5514_v14 = vpop.eup %5513  ;;  %v3007_v24 = vadd.f32 1.0, %v5512_v27  ;;  %v7566_v27 = vld [vmem:[#allocation10_spill] sm:$0xff] }
 0x3fc   : > { %v3728_v22 = vadd.f32 %v4677_v13, %v7307_v12  ;;  %v4680_v57 = vadd.f32 %v4679_v53, %v4678_v39  ;;  %5519 = vpow2.f32 %v4334_v45  ;;  %v5516_v17 = vpop.eup %5515  ;;  %v4343_v13 = vmul.f32 -1.442695, %v7099_v62 }
 0x3fd   : > { %5521 = vpow2.f32 %v4337_v16  ;;  %v4344_v53 = vmul.f32 -1.442695, %v7106_v25  ;;  %v4345_v62 = vmul.f32 -1.442695, %v7111_v51 }
 0x3fe   : > { %v3731_v44 = vadd.f32 %v4680_v57, %v7309_v63  ;;  %v7361_v10 = vadd.f32 %v3728_v22, %v6931_v49  ;;  %5523 = vpow2.f32 %v4335_v32  ;;  %v3009_v22 = vadd.f32 1.0, %v5516_v17 }
 0x3ff   : > { %5525 = vrcp.f32 %v3006_v3 }
 0x400   : > { %v4681_v12 = vpop.f32.mrb[156].mxu1  ;;  %v7366_v2 = vadd.f32 %v3731_v44, %v6933_v37  ;;  %5527 = vrcp.f32 %v3007_v24 }
 0x401   : > { %v4682_v46 = vpop.f32.mrb[157].mxu1 }
 0x402   : > { %v4683_v4 = vadd.f32 %v4682_v46, %v4681_v12  ;;  %v4684_v61 = vpop.f32.mrb[158].mxu1 }
 0x403   : > { %v4685_v63 = vpop.f32.mrb[159].mxu1 }
 0x404   : > { %v3736_v49 = vadd.f32 %v4683_v4, %v7311_v8  ;;  %v4686_v5 = vadd.f32 %v4685_v63, %v4684_v61  ;;  %v4342_v8 = vmul.f32 -1.442695, %v7094_v34  ;;  %v5518_v59 = vpop.eup %5517  ;;  %v7564_v34 = vld [vmem:[#allocation8_spill] sm:$0xff]  ;;  %v4348_v63 = vmul.f32 -1.442695, %v7136_v30 }
 0x405   : > { %v3004_v12 = vadd.f32 1.0, %v5518_v59 }
 0x406   : > { %v3739_v48 = vadd.f32 %v4686_v5, %v7313_v40  ;;  %v7371_v37 = vadd.f32 %v3736_v49, %v6939_v28  ;;  %v3008_v28 = vadd.f32 1.0, %v5514_v14  ;;  %5529 = vpow2.f32 %v4342_v8  ;;  %v5520_v60 = vpop.eup %5519 }
 0x407   : > { %5531 = vpow2.f32 %v4343_v13  ;;  %v5522_v19 = vpop.eup %5521  ;;  %v4349_v5 = vmul.f32 -1.442695, %v7143_v11 }
 0x408   : > { %v4687_v35 = vpop.f32.mrb[160].mxu1  ;;  %v7374_v36 = vadd.f32 %v3739_v48, %v7563_v56  ;;  %5533 = vrcp.f32 %v3008_v28  ;;  %v5524_v25 = vpop.eup %5523  ;;  %v3005_v4 = vadd.f32 1.0, %v5522_v19  ;;  %v7567_v56 = vld [vmem:[#allocation11_spill] sm:$0xff] }
 0x409   : > { %v4688_v18 = vpop.f32.mrb[161].mxu1  ;;  %5535 = vpow2.f32 %v4344_v53  ;;  %v3003_v51 = vadd.f32 1.0, %v5524_v25  ;;  %v7391_v49 = vpop.eup %5525 }
 0x40a   : > { %v4689_v38 = vadd.f32 %v4688_v18, %v4687_v35  ;;  %v4690_v0 = vpop.f32.mrb[162].mxu1  ;;  %5537 = vrcp.f32 %v3009_v22  ;;  %v7398_v3 = vpop.eup %5527 }
 0x40b   : > { %v4691_v40 = vpop.f32.mrb[163].mxu1  ;;  %5539 = vpow2.f32 %v4345_v62 }
 0x40c   : > { %v3744_v39 = vadd.f32 %v4689_v38, %v7315_v42  ;;  %v4692_v15 = vadd.f32 %v4691_v40, %v4690_v0  ;;  %v4346_v42 = vmul.f32 -1.442695, %v7120_v20  ;;  %v4347_v0 = vmul.f32 -1.442695, %v7127_v23 }
 0x40e   : > { %v3747_v57 = vadd.f32 %v4692_v15, %v7317_v29  ;;  %v7382_v47 = vadd.f32 %v3744_v39, %v7564_v34  ;;  %v3002_v29 = vadd.f32 1.0, %v5520_v60  ;;  %5541 = vpow2.f32 %v4346_v42 }
 0x40f   : > { %5543 = vrcp.f32 %v3004_v12 }
 0x410   : > { %v4693_v44 = vpop.f32.mrb[164].mxu1  ;;  %v7387_v54 = vadd.f32 %v3747_v57, %v7565_v6  ;;  %5545 = vrcp.f32 %v3002_v29  ;;  %v5530_v35 = vpop.eup %5529 }
 0x411   : > { %v4694_v45 = vpop.f32.mrb[165].mxu1  ;;  %5547 = vrcp.f32 %v3005_v4  ;;  %v5532_v30 = vpop.eup %5531  ;;  %v3010_v28 = vadd.f32 1.0, %v5530_v35 }
 0x412   : > { %v4695_v46 = vadd.f32 %v4694_v45, %v4693_v44  ;;  %v4696_v16 = vpop.f32.mrb[166].mxu1  ;;  %5549 = vrcp.f32 %v3003_v51  ;;  %v7404_v18 = vpop.eup %5533  ;;  %v3011_v15 = vadd.f32 1.0, %v5532_v30 }
 0x413   : > { %v4697_v61 = vpop.f32.mrb[167].mxu1  ;;  %5551 = vpow2.f32 %v4348_v63  ;;  %v5536_v38 = vpop.eup %5535  ;;  %v3891_v63 = vsub.f32 1.0, %v7391_v49 }
 0x414   : > { %v3752_v32 = vadd.f32 %v4695_v46, %v7319_v1  ;;  %v4698_v20 = vadd.f32 %v4697_v61, %v4696_v16  ;;  %5553 = vpow2.f32 %v4349_v5  ;;  %v7409_v40 = vpop.eup %5537  ;;  %v3012_v59 = vadd.f32 1.0, %v5536_v38 }
 0x415   : > { %v5540_v39 = vpop.eup %5539 }
 0x416   : > { %v3755_v33 = vadd.f32 %v4698_v20, %v7321_v31  ;;  %v7396_v48 = vadd.f32 %v3752_v32, %v7566_v27  ;;  %v3013_v44 = vadd.f32 1.0, %v5540_v39  ;;  %v7568_v27 = vld [vmem:[#allocation13_spill] sm:$0xff] }
 0x418   : > { %v4765_v1 = vpop.f32.mrb[64].mxu1  ;;  %v7401_v14 = vadd.f32 %v3755_v33, %v7567_v56  ;;  %v5542_v53 = vpop.eup %5541 }
 0x419   : > { %v4852_v24 = vadd.f32 %v7330_v41, %v4765_v1  ;;  %v3792_v11 = vpop.f32.mrb[65].mxu1  ;;  %v3014_v29 = vadd.f32 1.0, %v5542_v53 }
 0x41a   : > { %v4854_v31 = vadd.f32 %v7324_v21, %v3792_v11  ;;  %v4766_v8 = vpop.f32.mrb[66].mxu1  ;;  %v5544_v21 = vpop.eup %5543 }
 0x41b   : > { %5555 = vtanh.f32 %v4852_v24  ;;  %v4856_v17 = vadd.f32 %v7333_v26, %v4766_v8  ;;  %v3795_v13 = vpop.f32.mrb[67].mxu1  ;;  %v5546_v22 = vpop.eup %5545  ;;  %v3889_v62 = vsub.f32 1.0, %v5544_v21 }
 0x41c   : > { %5557 = vtanh.f32 %v4854_v31  ;;  %v4858_v41 = vadd.f32 %v7327_v52, %v3795_v13  ;;  %v5548_v57 = vpop.eup %5547  ;;  %v3887_v6 = vsub.f32 1.0, %v5546_v22 }
 0x41d   : > { %5559 = vtanh.f32 %v4856_v17  ;;  %v5550_v60 = vpop.eup %5549  ;;  %v3890_v46 = vsub.f32 1.0, %v5548_v57 }
 0x41e   : > { %5561 = vtanh.f32 %v4858_v41  ;;  %v5552_v42 = vpop.eup %5551  ;;  %v3888_v4 = vsub.f32 1.0, %v5550_v60 }
 0x41f   : > { %5563 = vpow2.f32 %v4347_v0  ;;  %v5554_v45 = vpop.eup %5553  ;;  %v3016_v51 = vadd.f32 1.0, %v5552_v42  ;;  %v3906_v35 = vmul.f32 %v7568_v27, %v3890_v46  ;;  %v5612_v46 = vld [vmem:[%s6569_s17 + $0x28] sm:$0xff] }
 0x420   : > { %5565 = vrcp.f32 %v3010_v28  ;;  %v4769_v23 = vpop.f32.mrb[68].mxu1 }
 0x421   : > { %5567 = vrcp.f32 %v3011_v15  ;;  %v4860_v26 = vadd.f32 %v7343_v43, %v4769_v23  ;;  %v3808_v34 = vpop.f32.mrb[69].mxu1 }
 0x422   : > { %5569 = vrcp.f32 %v3012_v59  ;;  %v4862_v52 = vadd.f32 %v7336_v7, %v3808_v34  ;;  %v4770_v19 = vpop.f32.mrb[70].mxu1  ;;  %v3905_v7 = vmul.f32 %v7197_v9, %v3889_v62  ;;  %v7569_v9 = vld [vmem:[#allocation12_spill] sm:$0xff]  ;;  %v5609_v34 = vld [vmem:[%s6569_s17 + $0x30] sm:$0xff] }
 0x423   : > { %5571 = vtanh.f32 %v4860_v26  ;;  %v4864_v25 = vadd.f32 %v7348_v55, %v4770_v19  ;;  %v3811_v12 = vpop.f32.mrb[71].mxu1  ;;  %v3903_v55 = vmul.f32 %v7175_v58, %v3887_v6  ;;  %v3904_v11 = vmul.f32 %v7569_v9, %v3888_v4  ;;  %v5611_v6 = vld [vmem:[%s6569_s17 + $0x38] sm:$0xff] }
 0x424   : > { %5573 = vtanh.f32 %v4862_v52  ;;  %v4866_v43 = vadd.f32 %v7339_v50, %v3811_v12  ;;  %v3893_v58 = vsub.f32 1.0, %v7404_v18  ;;  %v5610_v52 = vld [vmem:[%s6569_s17 + $0x20] sm:$0xff] }
 0x425   : > { %v5556_v16 = vpop.eup %5555  ;;  %5575 = vtanh.f32 %v4864_v25  ;;  %v3907_v19 = vmul.f32 %v5610_v52, %v3891_v63 }
 0x426   : > { %v5558_v61 = vpop.eup %5557  ;;  %v3921_v32 = vmul.f32 %v5556_v16, %v5544_v21  ;;  %5577 = vtanh.f32 %v4866_v43  ;;  %v3894_v21 = vsub.f32 1.0, %v7409_v40 }
 0x427   : > { %v5560_v20 = vpop.eup %5559  ;;  %5579 = vrcp.f32 %v3013_v44  ;;  %v3919_v5 = vmul.f32 %v5558_v61, %v5546_v22 }
 0x428   : > { %v5562_v33 = vpop.eup %5561  ;;  %5581 = vrcp.f32 %v3014_v29  ;;  %v3937_v50 = vadd.f32 %v3921_v32, %v3905_v7  ;;  %v3922_v1 = vmul.f32 %v5560_v20, %v5548_v57  ;;  %v4773_v56 = vpop.f32.mrb[72].mxu1  ;;  %v3892_v57 = vsub.f32 1.0, %v7398_v3 }
 0x429   : > { %v5564_v30 = vpop.eup %5563  ;;  %v3935_v24 = vadd.f32 %v3919_v5, %v3903_v55  ;;  %v3920_v31 = vmul.f32 %v5562_v33, %v5550_v60  ;;  %v4868_v8 = vadd.f32 %v7371_v37, %v4773_v56  ;;  %v3824_v38 = vpop.f32.mrb[73].mxu1  ;;  %5583 = vrcp.f32 %v3016_v51 }
 0x42a   : > { %v7422_v0 = vpop.eup %5565  ;;  %3953 = vst [vmem:[%s7427_s18 + $0x10] sm:$0xff] %v3937_v50  ;;  %v3938_v17 = vadd.f32 %v3922_v1, %v3906_v35  ;;  %v4870_v13 = vadd.f32 %v7361_v10, %v3824_v38  ;;  %v4774_v28 = vpop.f32.mrb[74].mxu1  ;;  %v3017_v37 = vadd.f32 1.0, %v5554_v45  ;;  %v3015_v22 = vadd.f32 1.0, %v5564_v30  ;;  %v5613_v35 = vld [vmem:[%s6569_s17 + $0x50] sm:$0xff]  ;;  %v5614_v30 = vld [vmem:[%s6569_s17 + $0x40] sm:$0xff] }
 0x42b   : > { %v7431_v41 = vpop.eup %5567  ;;  %3951 = vst [vmem:[%s7427_s18] sm:$0xff] %v3935_v24  ;;  %v3936_v39 = vadd.f32 %v3920_v31, %v3904_v11  ;;  %5585 = vtanh.f32 %v4868_v8  ;;  %v4872_v15 = vadd.f32 %v7374_v36, %v4774_v28  ;;  %v3827_v53 = vpop.f32.mrb[75].mxu1  ;;  %v3909_v60 = vmul.f32 %v5609_v34, %v3893_v58  ;;  %v5615_v31 = vld [vmem:[%s6569_s17 + $0x58] sm:$0xff] }
 0x42c   : > { %v5570_v59 = vpop.eup %5569  ;;  %3954 = vst [vmem:[%s7427_s18 + $0x18] sm:$0xff] %v3938_v17  ;;  %5587 = vtanh.f32 %v4870_v13  ;;  %v4874_v10 = vadd.f32 %v7366_v2, %v3827_v53  ;;  %v3910_v25 = vmul.f32 %v5611_v6, %v3894_v21  ;;  %v3908_v43 = vmul.f32 %v5612_v46, %v3892_v57  ;;  %v5616_v13 = vld [vmem:[%s6569_s17 + $0x48] sm:$0xff] }
 0x42d   : > { %v5572_v23 = vpop.eup %5571  ;;  %3952 = vst [vmem:[%s7427_s18 + $0x8] sm:$0xff] %v3936_v39  ;;  %5589 = vtanh.f32 %v4872_v15  ;;  %v3897_v51 = vsub.f32 1.0, %v5570_v59  ;;  %v3895_v20 = vsub.f32 1.0, %v7422_v0 }
 0x42e   : > { %v5574_v26 = vpop.eup %5573  ;;  %v3925_v36 = vmul.f32 %v5572_v23, %v7404_v18  ;;  %5591 = vtanh.f32 %v4874_v10 }
 0x42f   : > { %v5576_v62 = vpop.eup %5575  ;;  %5593 = vrcp.f32 %v3017_v37  ;;  %v3923_v42 = vmul.f32 %v5574_v26, %v7391_v49  ;;  %v3913_v1 = vmul.f32 %v5613_v35, %v3897_v51  ;;  %v3911_v24 = vmul.f32 %v5614_v30, %v3895_v20 }
 0x430   : > { %v5578_v2 = vpop.eup %5577  ;;  %5595 = vrcp.f32 %v3015_v22  ;;  %v3941_v44 = vadd.f32 %v3925_v36, %v3909_v60  ;;  %v3926_v12 = vmul.f32 %v5576_v62, %v7409_v40  ;;  %v4777_v45 = vpop.f32.mrb[76].mxu1  ;;  %v5618_v60 = vld [vmem:[%s6569_s17 + $0x60] sm:$0xff] }
 0x431   : > { %v5580_v29 = vpop.eup %5579  ;;  %v3939_v18 = vadd.f32 %v3923_v42, %v3907_v19  ;;  %v3924_v16 = vmul.f32 %v5578_v2, %v7398_v3  ;;  %v4876_v4 = vadd.f32 %v7396_v48, %v4777_v45  ;;  %v3840_v49 = vpop.f32.mrb[77].mxu1  ;;  %v5619_v42 = vld [vmem:[%s6569_s17 + $0x78] sm:$0xff] }
 0x432   : > { %v5582_v61 = vpop.eup %5581  ;;  %3957 = vst [vmem:[%s7427_s18 + $0x30] sm:$0xff] %v3941_v44  ;;  %v3942_v7 = vadd.f32 %v3926_v12, %v3910_v25  ;;  %v4878_v32 = vadd.f32 %v7382_v47, %v3840_v49  ;;  %v4778_v40 = vpop.f32.mrb[78].mxu1  ;;  %v3898_v5 = vsub.f32 1.0, %v5580_v29  ;;  %v3896_v47 = vsub.f32 1.0, %v7431_v41  ;;  %v5620_v25 = vld [vmem:[%s6569_s17 + $0x68] sm:$0xff] }
 0x433   : > { %3955 = vst [vmem:[%s7427_s18 + $0x20] sm:$0xff] %v3939_v18  ;;  %v3940_v63 = vadd.f32 %v3924_v16, %v3908_v43  ;;  %5597 = vtanh.f32 %v4876_v4  ;;  %v4880_v3 = vadd.f32 %v7401_v14, %v4778_v40  ;;  %v3843_v55 = vpop.f32.mrb[79].mxu1  ;;  %v5584_v48 = vpop.eup %5583  ;;  %v3899_v53 = vsub.f32 1.0, %v5582_v61 }
 0x434   : > { %3958 = vst [vmem:[%s7427_s18 + $0x38] sm:$0xff] %v3942_v7  ;;  %5599 = vtanh.f32 %v4878_v32  ;;  %v4882_v33 = vadd.f32 %v7387_v54, %v3843_v55  ;;  %v3914_v8 = vmul.f32 %v5615_v31, %v3898_v5  ;;  %v3912_v28 = vmul.f32 %v5616_v13, %v3896_v47 }
 0x435   : > { %v5586_v50 = vpop.eup %5585  ;;  %3956 = vst [vmem:[%s7427_s18 + $0x28] sm:$0xff] %v3940_v63  ;;  %5601 = vtanh.f32 %v4880_v3  ;;  %v3901_v15 = vsub.f32 1.0, %v5584_v48  ;;  %v3915_v36 = vmul.f32 %v5618_v60, %v3899_v53 }
 0x436   : > { %v5588_v27 = vpop.eup %5587  ;;  %v3929_v56 = vmul.f32 %v5586_v50, %v5570_v59  ;;  %5603 = vtanh.f32 %v4882_v33 }
 0x437   : > { %v5590_v14 = vpop.eup %5589  ;;  %v3927_v9 = vmul.f32 %v5588_v27, %v7422_v0 }
 0x438   : > { %v5592_v54 = vpop.eup %5591  ;;  %v3945_v11 = vadd.f32 %v3929_v56, %v3913_v1  ;;  %v3930_v38 = vmul.f32 %v5590_v14, %v5580_v29 }
 0x439   : > { %v5594_v58 = vpop.eup %5593  ;;  %v3943_v17 = vadd.f32 %v3927_v9, %v3911_v24  ;;  %v3928_v37 = vmul.f32 %v5592_v54, %v7431_v41  ;;  %v5617_v41 = vld [vmem:[%s6569_s17 + $0x70] sm:$0xff]  ;;  %s5621_s17 = scalar_lea.vmem %s7475_s25, 2048 }
 0x43a   : > { %v5596_v39 = vpop.eup %5595  ;;  %3961 = vst [vmem:[%s7427_s18 + $0x50] sm:$0xff] %v3945_v11  ;;  %v3946_v0 = vadd.f32 %v3930_v38, %v3914_v8  ;;  %v3902_v21 = vsub.f32 1.0, %v5594_v58  ;;  %v3917_v57 = vmul.f32 %v5617_v41, %v3901_v15  ;;  %p5622_p1 = scmp.ne.s32.totalorder %s7475_s25, %s5621_s17  ;;  %p5629_p5 = scmp.lt.s32.totalorder %s5627_s15, %s5621_s17 }
 0x43b   : > { %3959 = vst [vmem:[%s7427_s18 + $0x40] sm:$0xff] %v3943_v17  ;;  %v3944_v59 = vadd.f32 %v3928_v37, %v3912_v28  ;;  %v3900_v10 = vsub.f32 1.0, %v5596_v39 }
 0x43c   : > { %3962 = vst [vmem:[%s7427_s18 + $0x58] sm:$0xff] %v3946_v0  ;;  %v3918_v2 = vmul.f32 %v5619_v42, %v3902_v21  ;;  %p5623_p2 = pnand %p5622_p1, %p5817_p8  ;;  %p5630_p6 = por %p5629_p5, %p5628_p4 }
 0x43d   : > { %v5598_v22 = vpop.eup %5597  ;;  %3960 = vst [vmem:[%s7427_s18 + $0x48] sm:$0xff] %v3944_v59  ;;  %v3916_v12 = vmul.f32 %v5620_v25, %v3900_v10 }
 0x43e   : > { %v5600_v23 = vpop.eup %5599  ;;  %v3933_v26 = vmul.f32 %v5598_v22, %v5584_v48  ;;  %p5624_p3 = pneg %p5623_p2 }
 0x43f   : > { %v5602_v34 = vpop.eup %5601  ;;  %v3931_v62 = vmul.f32 %v5600_v23, %v5582_v61 }
 0x440   : > { %v5604_v52 = vpop.eup %5603  ;;  %v3949_v19 = vadd.f32 %v3933_v26, %v3917_v57  ;;  %v3934_v44 = vmul.f32 %v5602_v34, %v5594_v58  ;;  %p5631_p7 = pnand %p5630_p6, %p5624_p3 }
 0x441   : > { %v3947_v6 = vadd.f32 %v3931_v62, %v3915_v36  ;;  %v3932_v45 = vmul.f32 %v5604_v52, %v5596_v39 }
 0x442   : > { %3965 = vst [vmem:[%s7427_s18 + $0x70] sm:$0xff] %v3949_v19  ;;  %v3950_v29 = vadd.f32 %v3934_v44, %v3918_v2 }
 0x443   : > { %3963 = vst [vmem:[%s7427_s18 + $0x60] sm:$0xff] %v3947_v6  ;;  %v3948_v18 = vadd.f32 %v3932_v45, %v3916_v12 }
 0x444   : > { %3966 = vst [vmem:[%s7427_s18 + $0x78] sm:$0xff] %v3950_v29 }
 0x445   : > { %3964 = vst [vmem:[%s7427_s18 + $0x68] sm:$0xff] %v3948_v18 }
 0x446   : > { %5634 = shalt.err (!%p5631_p7)
}
 0x447   : > { %s5635_s18 = scalar_lea.hbm %s7481_s13, 2048  ;;  %s5639_s14 = scalar_lea.hbm %s7544_s6, 8192 }
 0x448   : > { %p5636_p10 = scmp.ne.s32.totalorder %s7481_s13, %s5635_s18  ;;  %p5640_p13 = scmp.lt.u32.totalorder %s7481_s13, %s7544_s6 }
 0x449   : > { %p5641_p0 = scmp.lt.u32.totalorder %s5639_s14, %s5635_s18  ;;  %p5643_p2 = scmp.lt.u32.totalorder %s5635_s18, %s7481_s13 }
 0x44a   : > { %p5637_p11 = pnand %p5636_p10, %p5817_p8 }
 0x44b   : > { %p5642_p1 = por %p5641_p0, %p5640_p13 }
 0x44c   : > { %p5638_p12 = pneg %p5637_p11 }
 0x44d   : > { %p5644_p3 = por %p5643_p2, %p5642_p1 }
 0x44f   : > { %p5645_p4 = pnand %p5644_p3, %p5638_p12 }
 0x451   : > { %5648 = shalt.err (!%p5645_p4)
}
 0x452   : > { %s5719_s17 = smov 128   ;;  %s5720_s0 = smov 256  }
 0x453   : > { %s5721_s10 = smov 8  }
 0x454   : > { %5035 = dma.vmem_to_hbm [thread:$0]  (%p5817_p8), %s7475_s25, 2048, %s7481_s13, %s3968_s20, %s5719_s17, %s5720_s0, %s5721_s10  }
 0x455 PF: > { %p5041_p5 = scmp.ge.s32.totalorder %s5715_s28, 2  ;;  %s3997_s15 = sand.u32 1, %s5687_s21  }
 0x456   : > { %s3998_s18 = scalar_lea.sflag [#allocation5], %s3997_s15 }
 0x457   : > { %p5038_p6 = pnand %p5041_p5, %p5821_p9 }
 0x459   : > { %5682 = dma.done.wait (!%p5038_p6), %s3998_s18, 2048  }
 0x45a   : > { %5684 = vsyncadd (!%p5038_p6), %s3998_s18, 4294965248  ;;  %s19_s28 = sadd.s32 1, %s5715_s28   ;;  %s7571_s21 = smov %s5691_s22 }
 0x45b   : > { %p16_p7 = scmp.ge.s32.totalorder %s19_s28, 6   ;;  %s7572_s22 = smov %s5695_s23 }
 0x45c   : > { %s7573_s23 = smov %s5829_s16  ;;  %s7574_s24 = smov %s5707_s26 }
 0x45d   : > { %s7575_s25 = smov %s5711_s27  ;;  %s7576_s26 = smov %s7579_s7 }
 0x45e   : > { %s7577_s27 = smov %s7583_s8  ;;  %18 = sbr.rel (!%p16_p7) target bundleno = 7 (0x7), region = 171 }
 0x465   :  { %4003 = vsyncpa [#allocation5], 1 }
 0x466   :  { %4005 = vsyncpa [#allocation5 + $0x1], 1 }

// kernel: sepconv_gru_forward.2
= control target key start
LH: loop header
LB: loop body
LE: loop exit
PB: predicated region body
PF: predicated region fallthrough
CT: control target
= control target key end

     0   :  { %s6265_s21 = smov 0   ;;  %s6267_s22 = smov 0   ;;  %s8696_s0 = inlined_call_operand.vmem [shape: f32[2,16,16,128], index: 0, kind: input, shape index: {}]   ;;  %s8697_s1 = inlined_call_operand.vmem [shape: bf16[2,16,16,128], index: 1, kind: input, shape index: {}]   ;;  %s8698_s2 = inlined_call_operand.vmem [shape: bf16[640,384], index: 2, kind: input, shape index: {}]   ;;  %s8699_s3 = inlined_call_operand.vmem [shape: bf16[640,256], index: 3, kind: input, shape index: {}]   ;;  %s8700_s4 = inlined_call_operand.vmem [shape: bf16[640,128], index: 4, kind: input, shape index: {}]   ;;  %s8701_s5 = inlined_call_operand.vmem [shape: f32[1,384], index: 5, kind: input, shape index: {}]   ;;  %s8702_s6 = inlined_call_operand.vmem [shape: f32[2,16,16,128], index: 6, kind: output, shape index: {}]  }
   0x1   :  { %s6269_s23 = smov 0   ;;  %s6271_s24 = smov 0  }
   0x2   :  { %s6273_s25 = smov 0  }
   0x3 LB: > { %s25_s26 = sadd.s32 1, %s6219_s23  ;;  %s28_s27 = sadd.s32 1, %s6223_s24  ;;  %s6227_s25 = sphi %s6273_s25, %s16_s25   ;;  %s6223_s24 = sphi %s6271_s24, %s8859_s24   ;;  %s6219_s23 = sphi %s6269_s23, %s8858_s23   ;;  %s6215_s22 = sphi %s6267_s22, %s8857_s22   ;;  %s6211_s21 = sphi %s6265_s21, %s8856_s21  }
   0x4   : > { %p26_p0 = scmp.ge.s32.totalorder %s25_s26, 2  ;;  %p4663_p1 = scmp.ge.s32.totalorder %s6227_s25, 1 }
   0x5   : > { %p252_p2 = scmp.lt.s32.totalorder %s6227_s25, 5 }
   0x6   : > { %s8861_s26 = smov (%p26_p0, %s25_s26), 0  ;;  %s8863_s27 = smov (!%p26_p0, %s28_s27), %s6223_s24 }
   0x7   : > { %p253_p3 = pnand %p4663_p1, %p252_p2  ;;  %p30_p4 = scmp.ge.s32.totalorder %s8863_s27, 2 }
   0x9   : > { %s8865_s27 = smov (%p30_p4, %s8863_s27), 0  ;;  %256 = sbr.rel (%p253_p3) target bundleno = 1047 (0x417), region = 44 }
  0x10   : > { %v5671_v0 = vld [vmem:[%s8698_s2 + $0x4] ss:$12 sps:$4 sm:$0xff]   ;;  %s4664_s30 = sshll.u32 %s6211_s21, 3  ;;  %v5673_v1 = vld [vmem:[%s8698_s2] ss:$12 sps:$4 sm:$0xff]   ;;  %p303_p5 = scmp.lt.s32.totalorder %s6215_s22, 1 }
  0x11   : > { %1823 = vmatprep.subr.bf16.mxu0 %v5671_v0  ;;  %v5674_v2 = vld [vmem:[%s8698_s2 + $0x1c] ss:$12 sps:$4 sm:$0xff]   ;;  %p305_p6 = scmp.lt.s32.totalorder %s4664_s30, 15  ;;  %v5676_v3 = vld [vmem:[%s8698_s2 + $0x18] ss:$12 sps:$4 sm:$0xff]   ;;  %vm424_vm0 = vcmask 1040384  }
  0x12   : > { %1824 = vmatpush1.bf16.msra.mxu0 %v5673_v1  ;;  %v5677_v4 = vld [vmem:[%s8698_s2 + $0x34] ss:$12 sps:$4 sm:$0xff]   ;;  %s8867_s22 = smov (!%p303_p5, %s6215_s22), 1  ;;  %v5679_v5 = vld [vmem:[%s8698_s2 + $0x30] ss:$12 sps:$4 sm:$0xff]   ;;  %vm563_vm3 = vcmask 1046528   ;;  %vm6499_vm4 = vmneg %vm424_vm0 }
  0x13   : > { %1825 = vmatprep.subr.bf16.mxu0 %v5674_v2  ;;  %s8869_s30 = smov (!%p305_p6, %s4664_s30), 15  ;;  %v5680_v6 = vld [vmem:[%s8698_s2 + $0x4c] ss:$12 sps:$4 sm:$0xff]   ;;  %s4666_s20 = sshll.u32 %s8867_s22, 5  ;;  %v5682_v7 = vld [vmem:[%s8698_s2 + $0x48] ss:$12 sps:$4 sm:$0xff]  }
  0x14   : > { %s4665_s19 = sshll.u32 %s8869_s30, 1  ;;  %v5683_v8 = vld [vmem:[%s8698_s2 + $0x64] ss:$12 sps:$4 sm:$0xff]   ;;  %v5685_v9 = vld [vmem:[%s8698_s2 + $0x60] ss:$12 sps:$4 sm:$0xff]   ;;  %vm677_vm5 = vcmask 1045504  }
  0x15   : > { %s6322_s8 = sadd.s32 %s4666_s20, %s4665_s19  ;;  %v5686_v10 = vld [vmem:[%s8698_s2 + $0x7c] ss:$12 sps:$4 sm:$0xff]   ;;  %v5688_v11 = vld [vmem:[%s8698_s2 + $0x78] ss:$12 sps:$4 sm:$0xff]   ;;  %v5689_v12 = vld [vmem:[%s8698_s2 + $0x94] ss:$12 sps:$4 sm:$0xff]  }
  0x16   : > { %1826 = vmatpush1.bf16.msra.mxu0 %v5676_v3  ;;  %s4671_s11 = sshll.u32 %s6322_s8, 2  ;;  %v5691_v14 = vld [vmem:[%s8698_s2 + $0x90] ss:$12 sps:$4 sm:$0xff]   ;;  %v5692_v15 = vld [vmem:[%s8698_s2 + $0xac] ss:$12 sps:$4 sm:$0xff]   ;;  %s4667_s17 = sshll.u32 %s6322_s8, 3 }
  0x17   : > { %1827 = vmatprep.subr.bf16.mxu0 %v5677_v4  ;;  %s6337_s16 = scalar_lea.vmem %s8697_s1, %s4671_s11  ;;  %v5694_v19 = vld [vmem:[%s8698_s2 + $0xa8] ss:$12 sps:$4 sm:$0xff]   ;;  %v5695_v23 = vld [vmem:[%s8698_s2 + $0xc4] ss:$12 sps:$4 sm:$0xff]   ;;  %vm458_vm1 = vsmask.f32 7424  ;;  %s7157_s21 = scalar_lea.vmem %s8696_s0, %s4667_s17 }
  0x18   : > { %v5719_v13 = vld [vmem:[%s6337_s16] sm:$0xff]   ;;  %v5698_v28 = vld [vmem:[%s8698_s2 + $0xdc] ss:$12 sps:$4 sm:$0xff]   ;;  %v5704_v36 = vld [vmem:[%s8698_s2 + $0x10c] ss:$12 sps:$4 sm:$0xff]   ;;  %s8625_s7 = scalar_lea.vmem %s8702_s6, %s4667_s17 }
  0x19   : > { %v6349_v16 = vrot.slane %v5719_v13, 7  ;;  %v5697_v26 = vld [vmem:[%s8698_s2 + $0xc0] ss:$12 sps:$4 sm:$0xff]   ;;  %v5700_v31 = vld [vmem:[%s8698_s2 + $0xd8] ss:$12 sps:$4 sm:$0xff]   ;;  %v5733_v42 = vld [vmem:[%s6337_s16 + $0x10] sm:$0xff]  }
  0x1a   : > { %1828 = vmatpush1.bf16.msra.mxu0 %v5679_v5  ;;  %v5701_v32 = vld [vmem:[%s8698_s2 + $0xf4] ss:$12 sps:$4 sm:$0xff]   ;;  %v5703_v35 = vld [vmem:[%s8698_s2 + $0xf0] ss:$12 sps:$4 sm:$0xff]   ;;  %v5726_v37 = vld [vmem:[%s6337_s16 + $0x8] sm:$0xff]   ;;  %v6408_v47 = vrot.slane %v5733_v42, 7 }
  0x1b   : > { %1829 = vmatprep.subr.bf16.mxu0 %v5680_v6  ;;  %v6353_v17 = vsel %vm424_vm0, 0, %v6349_v16  ;;  %v6357_v18 = vsel %vm424_vm0, %v6349_v16, 0  ;;  %v5706_v38 = vld [vmem:[%s8698_s2 + $0x108] ss:$12 sps:$4 sm:$0xff]   ;;  %v5707_v40 = vld [vmem:[%s8698_s2 + $0x124] ss:$12 sps:$4 sm:$0xff]  }
  0x1c   : > { %v459_v20 = vshrl.u32 %v6353_v17, 16  ;;  %v461_v21 = vshll.u32 %v6353_v17, 16  ;;  %v465_v22 = vshll.u32 %v6357_v18, 16  ;;  %v600_v39 = vshrl.u32 %v6357_v18, 16  ;;  %v5709_v43 = vld [vmem:[%s8698_s2 + $0x120] ss:$12 sps:$4 sm:$0xff]  }
  0x1d   : > { %v6395_v41 = vrot.slane %v5726_v37, 7  ;;  %v5710_v45 = vld [vmem:[%s8698_s2 + $0x13c] ss:$12 sps:$4 sm:$0xff]   ;;  %vm596_vm2 = vsmask.f32 6400  ;;  %v6424_v55 = vsel %vm424_vm0, 0, %v6408_v47 }
  0x1e   : > { %1830 = vmatpush1.bf16.msra.mxu0 %v5682_v7  ;;  %v463_v24 = vrot.slane %v461_v21, 1  ;;  %v467_v25 = vrot.slane %v465_v22, 1  ;;  %v597_v30 = vrot.slane %v459_v20, 1  ;;  %v598_v33 = vrot.slane %v461_v21, 2  ;;  %v5740_v49 = vld [vmem:[%s6337_s16 + $0x18] sm:$0xff]   ;;  %v5747_v56 = vld [vmem:[%s6337_s16 + $0x20] sm:$0xff]  }
  0x1f   : > { %1831 = vmatprep.subr.bf16.mxu0 %v5683_v8  ;;  %v602_v44 = vrot.slane %v600_v39, 1  ;;  %v6406_v46 = vsel %vm424_vm0, 0, %v6395_v41  ;;  %v603_v48 = vrot.slane %v465_v22, 2  ;;  %v5712_v50 = vld [vmem:[%s8698_s2 + $0x138] ss:$12 sps:$4 sm:$0xff]   ;;  %v6419_v53 = vsel %vm424_vm0, %v6395_v41, 0 }
  0x20   : > { %v464_v27 = vor.u32 %v463_v24, %v459_v20  ;;  %v599_v34 = vor.u32 %v598_v33, %v597_v30  ;;  %v5713_v52 = vld [vmem:[%s8698_s2 + $0x154] ss:$12 sps:$4 sm:$0xff]   ;;  %v8713_v54 = vshll.u32 %v6406_v46, 16  ;;  %v6432_v58 = vsel %vm424_vm0, %v6408_v47, 0  ;;  %v5715_v61 = vld [vmem:[%s8698_s2 + $0x150] ss:$12 sps:$4 sm:$0xff]  }
  0x21   : > { %v604_v51 = vor.u32 %v603_v48, %v602_v44  ;;  %v6434_v59 = vrot.slane %v5740_v49, 7  ;;  %v564_v60 = vrot.slane %v6353_v17, 1  ;;  %v8712_v62 = vshll.u32 %v6419_v53, 16  ;;  %v5716_v0 = vld [vmem:[%s8698_s2 + $0x16c] ss:$12 sps:$4 sm:$0xff]  }
  0x22   : > { %1832 = vmatpush1.bf16.msra.mxu0 %v5685_v9  ;;  %v468_v29 = vsel %vm458_vm1, %v464_v27, %v467_v25  ;;  %v565_v63 = vrot.slane %v6357_v18, 1  ;;  %v8714_v1 = vshrl.u32 %v6406_v46, 16  ;;  %v473_v2 = vrot.slane %v8713_v54, 1  ;;  %v5718_v9 = vld [vmem:[%s8698_s2 + $0x168] ss:$12 sps:$4 sm:$0xff]  }
  0x23   : > { %1833 = vmatprep.subr.bf16.mxu0 %v5686_v10  ;;  %1855 = vmatprep.mubr.bf16.mxu0 %v468_v29  ;;  %v6428_v57 = vsel %vm596_vm2, %v599_v34, %v604_v51  ;;  %v8710_v3 = vshll.u32 %v6424_v55, 16  ;;  %v8709_v4 = vshll.u32 %v6432_v58, 16  ;;  %v6450_v5 = vrot.slane %v5747_v56, 7  ;;  %v5722_v13 = vld [vmem:[%s8698_s2 + $0x184] ss:$12 sps:$4 sm:$0xff]  }
  0x24   : > { %2194 = vmatprep.mubr.bf16.mxu1 %v468_v29  ;;  %v6454_v6 = vsel %vm424_vm0, 0, %v6434_v59  ;;  %v6458_v7 = vsel %vm424_vm0, %v6434_v59, 0  ;;  %v6461_v8 = vsel %vm563_vm3, %v564_v60, %v565_v63  ;;  %v477_v10 = vrot.slane %v8712_v62, 1  ;;  %v5720_v21 = vld [vmem:[%s8698_s2 + $0x180] ss:$12 sps:$4 sm:$0xff]   ;;  %v5761_v60 = vld [vmem:[%s6337_s16 + $0x30] sm:$0xff]  }
  0x25   : > { %v568_v20 = vrot.slane %v6419_v53, 1  ;;  %v487_v22 = vrot.slane %v8709_v4, 1  ;;  %v8706_v24 = vshll.u32 %v6458_v7, 16  ;;  %v6488_v25 = vsel %vm424_vm0, 0, %v6450_v5  ;;  %v5784_v33 = vld [vmem:[%s8698_s2 + $0xc8] ss:$12 sps:$4 sm:$0xff]  }
  0x26   : > { %1834 = vmatpush1.bf16.msra.mxu0 %v5688_v11  ;;  %v5754_v11 = vld [vmem:[%s6337_s16 + $0x28] sm:$0xff]   ;;  %v571_v29 = vrot.slane %v6432_v58, 1  ;;  %v5723_v37 = vld [vmem:[%s8698_s2 + $0x198] ss:$12 sps:$4 sm:$0xff]   ;;  %5022 = vmatprep.subr.bf16.mxu1 %v5784_v33  ;;  %v5729_v39 = vld [vmem:[%s8698_s2 + $0x1b4] ss:$12 sps:$4 sm:$0xff]  }
  0x27   : > { %1835 = vmatprep.subr.bf16.mxu0 %v5689_v12  ;;  %v567_v12 = vrot.slane %v6406_v46, 1  ;;  %v6542_v44 = vrot.slane %v8706_v24, 1  ;;  %v573_v48 = vrot.slane %v6454_v6, 1  ;;  %v574_v49 = vrot.slane %v6458_v7, 1  ;;  %v5805_v24 = vld [vmem:[%s8698_s2 + $0x158] ss:$12 sps:$4 sm:$0xff]  }
  0x28   : > { %v8704_v51 = vshll.u32 %v6488_v25, 16  ;;  %v5807_v54 = vld [vmem:[%s8698_s2 + $0x170] ss:$12 sps:$4 sm:$0xff]  }
  0x29   : > { %v6494_v27 = vsel %vm563_vm3, %v567_v12, %v568_v20  ;;  %v6560_v63 = vsel %vm563_vm3, %v573_v48, %v574_v49  ;;  %v5730_v20 = vld [vmem:[%s8698_s2 + $0x1c8] ss:$12 sps:$4 sm:$0xff]  }
  0x2a   : > { %1836 = vmatpush1.bf16.msra.mxu0 %v5691_v14  ;;  %v474_v14 = vor.u32 %v473_v2, %v8714_v1  ;;  %v5732_v2 = vld [vmem:[%s8698_s2 + $0x1cc] ss:$12 sps:$4 sm:$0xff]   ;;  %v503_v33 = vrot.slane %v8704_v51, 1  ;;  %v5798_v48 = vld [vmem:[%s8698_s2 + $0x128] ss:$12 sps:$4 sm:$0xff]  }
  0x2b   : > { %1837 = vmatprep.subr.bf16.mxu0 %v5692_v15  ;;  %v8711_v15 = vshrl.u32 %v6424_v55, 16  ;;  %v5737_v51 = vld [vmem:[%s8698_s2 + $0x1f8] ss:$12 sps:$4 sm:$0xff]  }
  0x2c   : > { %v6513_v34 = vsel %vm458_vm1, %v474_v14, %v477_v10  ;;  %v6580_v14 = vrot.slane %v5761_v60, 7 }
  0x2e   : > { %1838 = vmatpush1.bf16.msra.mxu0 %v5694_v19  ;;  %v483_v19 = vrot.slane %v8710_v3, 1  ;;  %v6624_v60 = vsel %vm424_vm0, %v6580_v14, 0  ;;  %v5746_v3 = vld [vmem:[%s8698_s2 + $0x22c] ss:$12 sps:$4 sm:$0xff]  }
  0x2f   : > { %1839 = vmatprep.subr.bf16.mxu0 %v5695_v23  ;;  %v8707_v23 = vshll.u32 %v6454_v6, 16 }
  0x31   : > { %v493_v42 = vrot.slane %v8707_v23, 1 }
  0x32   : > { %1840 = vmatpush1.bf16.msra.mxu0 %v5697_v26  ;;  %v5725_v26 = vld [vmem:[%s8698_s2 + $0x19c] ss:$12 sps:$4 sm:$0xff]  }
  0x33   : > { %1841 = vmatprep.subr.bf16.mxu0 %v5698_v28  ;;  %v570_v28 = vrot.slane %v6424_v55, 1 }
  0x36   : > { %1842 = vmatpush1.bf16.msra.mxu0 %v5700_v31  ;;  %v6505_v31 = vsel %vm424_vm0, %v6450_v5, 0 }
  0x37   : > { %1843 = vmatprep.subr.bf16.mxu0 %v5701_v32  ;;  %v6507_v32 = vrot.slane %v5754_v11, 7 }
  0x39   : > { %v6553_v56 = vsel %vm424_vm0, 0, %v6507_v32  ;;  %v6573_v10 = vsel %vm424_vm0, %v6507_v32, 0 }
  0x3a   : > { %1844 = vmatpush1.bf16.msra.mxu0 %v5703_v35  ;;  %v6516_v35 = vsel %vm563_vm3, %v570_v28, %v571_v29  ;;  %v509_v11 = vshrl.u32 %v6553_v56, 16  ;;  %v577_v28 = vrot.slane %v6505_v31, 1  ;;  %v5736_v29 = vld [vmem:[%s8698_s2 + $0x1e4] ss:$12 sps:$4 sm:$0xff]  }
  0x3b   : > { %1845 = vmatprep.subr.bf16.mxu0 %v5704_v36  ;;  %v5785_v36 = vld [vmem:[%s8698_s2 + $0x8] ss:$12 sps:$4 sm:$0xff]  }
  0x3c   : > { %5023 = vmatpush3.bf16.msra.mxu1 %v5785_v36 }
  0x3e   : > { %1846 = vmatpush1.bf16.msra.mxu0 %v5706_v38  ;;  %v5786_v38 = vld [vmem:[%s8698_s2 + $0xe0] ss:$12 sps:$4 sm:$0xff]  }
  0x3f   : > { %1847 = vmatprep.subr.bf16.mxu0 %v5707_v40  ;;  %v8708_v40 = vshrl.u32 %v6454_v6, 16  ;;  %5024 = vmatprep.subr.bf16.mxu1 %v5786_v38  ;;  %v5794_v38 = vld [vmem:[%s8698_s2 + $0x50] ss:$12 sps:$4 sm:$0xff]  }
  0x41   : > { %v494_v49 = vor.u32 %v493_v42, %v8708_v40  ;;  %v5739_v42 = vld [vmem:[%s8698_s2 + $0x1fc] ss:$12 sps:$4 sm:$0xff]  }
  0x42   : > { %1848 = vmatpush1.bf16.msra.mxu0 %v5709_v43  ;;  %v5787_v43 = vld [vmem:[%s8698_s2 + $0x20] ss:$12 sps:$4 sm:$0xff]  }
  0x43   : > { %1849 = vmatprep.subr.bf16.mxu0 %v5710_v45  ;;  %v8705_v45 = vshrl.u32 %v6488_v25, 16  ;;  %5025 = vmatpush3.bf16.msra.mxu1 %v5787_v43 }
  0x46   : > { %1850 = vmatpush1.bf16.msra.mxu0 %v5712_v50  ;;  %v484_v50 = vor.u32 %v483_v19, %v8711_v15  ;;  %v5793_v19 = vld [vmem:[%s8698_s2 + $0x110] ss:$12 sps:$4 sm:$0xff]  }
  0x47   : > { %1851 = vmatprep.subr.bf16.mxu0 %v5713_v52  ;;  %v8703_v52 = vshll.u32 %v6505_v31, 16 }
  0x48   : > { %v6577_v12 = vsel %vm458_vm1, %v484_v50, %v487_v22  ;;  %v642_v22 = vrot.slane %v509_v11, 1  ;;  %v6620_v50 = vsel %vm424_vm0, 0, %v6580_v14 }
  0x49   : > { %v507_v36 = vrot.slane %v8703_v52, 1  ;;  %v5800_v52 = vld [vmem:[%s8698_s2 + $0x140] ss:$12 sps:$4 sm:$0xff]  }
  0x4a   : > { %1852 = vmatpush1.bf16.msra.mxu0 %v5715_v61  ;;  %v5727_v61 = vld [vmem:[%s8698_s2 + $0x1b0] ss:$12 sps:$4 sm:$0xff]  }
  0x4b   : > { %1853 = vmatprep.subr.bf16.mxu0 %v5716_v0  ;;  %v5791_v0 = vld [vmem:[%s8698_s2 + $0xf8] ss:$12 sps:$4 sm:$0xff]  }
  0x4c   : > { %5026 = vmatprep.subr.bf16.mxu1 %v5791_v0  ;;  %v5734_v0 = vld [vmem:[%s8698_s2 + $0x1e0] ss:$12 sps:$4 sm:$0xff]  }
  0x4e   : > { %1854 = vmatpush1.bf16.msra.mxu0 %v5718_v9  ;;  %v5792_v9 = vld [vmem:[%s8698_s2 + $0x38] ss:$12 sps:$4 sm:$0xff]  }
  0x4f   : > { %1936 = vmatprep.subr.bf16.mxu0 %v5722_v13  ;;  %v511_v13 = vshll.u32 %v6553_v56, 16  ;;  %5027 = vmatpush3.bf16.msra.mxu1 %v5792_v9  ;;  %v519_v9 = vshrl.u32 %v6620_v50, 16 }
  0x50   : > { %5028 = vmatprep.subr.bf16.mxu1 %v5793_v19  ;;  %v645_v19 = vshrl.u32 %v6573_v10, 16 }
  0x51   : > { %4805 = vmatmul.mubr.msk.bf16.vlgmr.msra.gmra.mrb[0].mxu0 %vm6499_vm4, %v6349_v16 }
  0x52   : > { %1937 = vmatpush1.bf16.msra.mxu0 %v5720_v21  ;;  %1865 = vmatprep.mubr.bf16.mxu0 %v6513_v34  ;;  %v5768_v21 = vld [vmem:[%s6337_s16 + $0x38] sm:$0xff]  }
  0x53   : > { %1938 = vmatprep.subr.bf16.mxu0 %v5725_v26  ;;  %v576_v26 = vrot.slane %v6488_v25, 1  ;;  %5029 = vmatpush3.bf16.msra.mxu1 %v5794_v38  ;;  %v504_v38 = vor.u32 %v503_v33, %v8705_v45  ;;  %v647_v33 = vrot.slane %v645_v19, 1  ;;  %v5743_v45 = vld [vmem:[%s8698_s2 + $0x214] ss:$12 sps:$4 sm:$0xff]  }
  0x54   : > { %5030 = vmatprep.subr.bf16.mxu1 %v5798_v48  ;;  %v525_v48 = vshll.u32 %v6624_v60, 16 }
  0x55   : > { %v6611_v43 = vsel %vm563_vm3, %v576_v26, %v577_v28  ;;  %v5799_v26 = vld [vmem:[%s8698_s2 + $0x68] ss:$12 sps:$4 sm:$0xff]   ;;  %v6684_v23 = vsel %vm458_vm1, %v504_v38, %v507_v36  ;;  %v513_v38 = vrot.slane %v511_v13, 1 }
  0x56   : > { %1939 = vmatpush1.bf16.msra.mxu0 %v5723_v37  ;;  %v515_v37 = vshll.u32 %v6573_v10, 16  ;;  %v657_v36 = vrot.slane %v525_v48, 2 }
  0x57   : > { %1940 = vmatprep.subr.bf16.mxu0 %v5729_v39  ;;  %v643_v39 = vrot.slane %v511_v13, 2  ;;  %5031 = vmatpush3.bf16.msra.mxu1 %v5799_v26 }
  0x58   : > { %v648_v28 = vrot.slane %v515_v37, 2  ;;  %5032 = vmatprep.subr.bf16.mxu1 %v5800_v52 }
  0x59   : > { %4807 = vmatmul.mubr.msk.bf16.gmra.mrb[4].mxu0 %vm6499_vm4, %v6395_v41 }
  0x5a   : > { %1941 = vmatpush1.bf16.msra.mxu0 %v5727_v61  ;;  %1875 = vmatprep.mubr.bf16.mxu0 %v6577_v12  ;;  %v644_v61 = vor.u32 %v643_v39, %v642_v22  ;;  %v579_v22 = vrot.slane %v6553_v56, 1  ;;  %v6645_v39 = vsel %vm458_vm1, %v494_v49, %v6542_v44  ;;  %v5801_v44 = vld [vmem:[%s8698_s2 + $0x80] ss:$12 sps:$4 sm:$0xff]  }
  0x5b   : > { %1942 = vmatprep.subr.bf16.mxu0 %v5732_v2  ;;  %v6630_v2 = vrot.slane %v5768_v21, 7  ;;  %v580_v21 = vrot.slane %v6573_v10, 1  ;;  %5033 = vmatpush3.bf16.msra.mxu1 %v5801_v44 }
  0x5c   : > { %5034 = vmatprep.subr.bf16.mxu1 %v5805_v24 }
  0x5d   : > { %v6665_v49 = vsel %vm563_vm3, %v579_v22, %v580_v21  ;;  %v6679_v19 = vsel %vm424_vm0, %v6630_v2, 0  ;;  %v649_v22 = vor.u32 %v648_v28, %v647_v33  ;;  %v651_v21 = vrot.slane %v519_v9, 1  ;;  %v5806_v33 = vld [vmem:[%s8698_s2 + $0x98] ss:$12 sps:$4 sm:$0xff]  }
  0x5e   : > { %1943 = vmatpush1.bf16.msra.mxu0 %v5730_v20  ;;  %v521_v20 = vshll.u32 %v6620_v50, 16  ;;  %v8716_v52 = vshll.u32 %v6679_v19, 16  ;;  %v663_v1 = vshrl.u32 %v6679_v19, 16 }
  0x5f   : > { %1944 = vmatprep.subr.bf16.mxu0 %v5736_v29  ;;  %v6659_v29 = vsel %vm424_vm0, 0, %v6630_v2  ;;  %v6692_v4 = vsel %vm596_vm2, %v644_v61, %v649_v22  ;;  %v582_v61 = vrot.slane %v6620_v50, 1  ;;  %v583_v22 = vrot.slane %v6624_v60, 1  ;;  %5035 = vmatpush3.bf16.msra.mxu1 %v5806_v33 }
  0x60   : > { %v8715_v26 = vshrl.u32 %v6659_v29, 16  ;;  %v8717_v40 = vshll.u32 %v6659_v29, 16  ;;  %v652_v28 = vrot.slane %v521_v20, 2  ;;  %v666_v24 = vrot.slane %v8716_v52, 2  ;;  %5036 = vmatprep.subr.bf16.mxu1 %v5807_v54 }
  0x61   : > { %4809 = vmatmul.mubr.msk.bf16.gmra.mrb[8].mxu0 %vm6499_vm4, %v6408_v47  ;;  %v678_v52 = vrot.slane %v6353_v17, 2  ;;  %v681_v17 = vrot.slane %v6406_v46, 2 }
  0x62   : > { %1945 = vmatpush1.bf16.msra.mxu0 %v5734_v0  ;;  %1885 = vmatprep.mubr.bf16.mxu0 %v6645_v39  ;;  %v5741_v0 = vld [vmem:[%s8698_s2 + $0x210] ss:$12 sps:$4 sm:$0xff]   ;;  %v653_v15 = vor.u32 %v652_v28, %v651_v21  ;;  %v660_v13 = vrot.slane %v8715_v26, 1  ;;  %v661_v44 = vrot.slane %v8717_v40, 2  ;;  %v585_v21 = vrot.slane %v6659_v29, 1 }
  0x63   : > { %1946 = vmatprep.subr.bf16.mxu0 %v5739_v42  ;;  %v654_v42 = vshrl.u32 %v6624_v60, 16  ;;  %v517_v28 = vrot.slane %v515_v37, 1  ;;  %v679_v40 = vrot.slane %v6357_v18, 2  ;;  %v514_v37 = vor.u32 %v513_v38, %v509_v11  ;;  %v5750_v18 = vld [vmem:[%s8698_s2 + $0x244] ss:$12 sps:$4 sm:$0xff]  }
  0x64   : > { %v662_v26 = vor.u32 %v661_v44, %v660_v13  ;;  %v682_v11 = vrot.slane %v6419_v53, 2  ;;  %v685_v38 = vrot.slane %v6432_v58, 2  ;;  %v687_v13 = vrot.slane %v6454_v6, 2 }
  0x65   : > { %v656_v62 = vrot.slane %v654_v42, 1  ;;  %v6752_v33 = vsel %vm677_vm5, %v678_v52, %v679_v40  ;;  %v5827_v52 = vld [vmem:[%s8698_s2 + $0x248] ss:$12 sps:$4 sm:$0xff]  }
  0x66   : > { %1947 = vmatpush1.bf16.msra.mxu0 %v5737_v51  ;;  %v6718_v51 = vsel %vm563_vm3, %v582_v61, %v583_v22  ;;  %v5808_v61 = vld [vmem:[%s8698_s2 + $0xb0] ss:$12 sps:$4 sm:$0xff]   ;;  %v665_v22 = vrot.slane %v663_v1, 1  ;;  %v6765_v54 = vsel %vm677_vm5, %v681_v17, %v682_v11  ;;  %v8737_v11 = vshll.u32 %v6659_v29, 16 }
  0x67   : > { %1948 = vmatprep.subr.bf16.mxu0 %v5743_v45  ;;  %v658_v42 = vor.u32 %v657_v36, %v656_v62  ;;  %v586_v45 = vrot.slane %v6679_v19, 1  ;;  %v5744_v62 = vld [vmem:[%s8698_s2 + $0x228] ss:$12 sps:$4 sm:$0xff]   ;;  %5037 = vmatpush3.bf16.msra.mxu1 %v5808_v61  ;;  %v5751_v61 = vld [vmem:[%s8698_s2 + $0x258] ss:$12 sps:$4 sm:$0xff]  }
  0x68   : > { %5086 = vmatprep.subr.bf16.mxu1 %v5827_v52  ;;  %v5755_v17 = vld [vmem:[%s8698_s2 + $0x270] ss:$12 sps:$4 sm:$0xff]   ;;  %v693_v52 = vrot.slane %v6553_v56, 2  ;;  %v8738_v56 = vshll.u32 %v6679_v19, 16 }
  0x69   : > { %4811 = vmatmul.mubr.msk.bf16.gmra.mrb[12].mxu0 %vm6499_vm4, %v6434_v59  ;;  %v6742_v36 = vsel %vm596_vm2, %v653_v15, %v658_v42  ;;  %v6745_v1 = vsel %vm563_vm3, %v585_v21, %v586_v45  ;;  %v684_v15 = vrot.slane %v6424_v55, 2  ;;  %v5753_v21 = vld [vmem:[%s8698_s2 + $0x25c] ss:$12 sps:$4 sm:$0xff]   ;;  %v523_v42 = vrot.slane %v521_v20, 1  ;;  %v5832_v20 = vld [vmem:[%s8698_s2 + $0x260] ss:$12 sps:$4 sm:$0xff]  }
  0x6a   : > { %1949 = vmatpush1.bf16.msra.mxu0 %v5741_v0  ;;  %1895 = vmatprep.mubr.bf16.mxu0 %v6684_v23  ;;  %v667_v0 = vor.u32 %v666_v24, %v665_v22  ;;  %v688_v24 = vrot.slane %v6458_v7, 2  ;;  %v690_v45 = vrot.slane %v6488_v25, 2  ;;  %v5831_v22 = vld [vmem:[%s8698_s2 + $0x188] ss:$12 sps:$4 sm:$0xff]  }
  0x6b   : > { %1950 = vmatprep.subr.bf16.mxu0 %v5746_v3  ;;  %v5748_v3 = vld [vmem:[%s8698_s2 + $0x240] ss:$12 sps:$4 sm:$0xff]   ;;  %v6768_v40 = vsel %vm677_vm5, %v684_v15, %v685_v38  ;;  %4821 = vmatmul.mubr.msk.bf16.vlgmr.msra.gmra.mrb[0].mxu1 %vm6499_vm4, %v6349_v16  ;;  %v533_v15 = vrot.slane %v8737_v11, 1  ;;  %v5857_v11 = vld [vmem:[%s8698_s2 + $0x2d8] ss:$12 sps:$4 sm:$0xff]  }
  0x6c   : > { %v6762_v44 = vsel %vm596_vm2, %v662_v26, %v667_v0  ;;  %v6778_v26 = vsel %vm458_vm1, %v514_v37, %v517_v28  ;;  %v6793_v28 = vsel %vm677_vm5, %v687_v13, %v688_v24  ;;  %2202 = vmatprep.mubr.bf16.mxu1 %v6513_v34  ;;  %v5757_v16 = vld [vmem:[%s8698_s2 + $0x274] ss:$12 sps:$4 sm:$0xff]   ;;  %v524_v37 = vor.u32 %v523_v42, %v519_v9  ;;  %v5837_v9 = vld [vmem:[%s8698_s2 + $0x278] ss:$12 sps:$4 sm:$0xff]  }
  0x6d   : > { %v527_v34 = vrot.slane %v525_v48, 1  ;;  %5087 = vmatpush3.bf16.msra.mxu1 %v5831_v22  ;;  %v5760_v48 = vld [vmem:[%s8698_s2 + $0x28c] ss:$12 sps:$4 sm:$0xff]   ;;  %v5758_v24 = vld [vmem:[%s8698_s2 + $0x288] ss:$12 sps:$4 sm:$0xff]   ;;  %v537_v42 = vrot.slane %v8738_v56, 1 }
  0x6e   : > { %1951 = vmatpush1.bf16.msra.mxu0 %v5744_v62  ;;  %v691_v62 = vrot.slane %v6505_v31, 2  ;;  %5088 = vmatprep.subr.bf16.mxu1 %v5832_v20  ;;  %v5841_v13 = vld [vmem:[%s8698_s2 + $0x1b8] ss:$12 sps:$4 sm:$0xff]   ;;  %v5846_v22 = vld [vmem:[%s8698_s2 + $0x1d0] ss:$12 sps:$4 sm:$0xff]  }
  0x6f   : > { %1952 = vmatprep.subr.bf16.mxu0 %v5750_v18  ;;  %v5836_v18 = vld [vmem:[%s8698_s2 + $0x1a0] ss:$12 sps:$4 sm:$0xff]   ;;  %v6829_v38 = vsel %vm458_vm1, %v524_v37, %v527_v34  ;;  %v5851_v37 = vld [vmem:[%s8698_s2 + $0x1e8] ss:$12 sps:$4 sm:$0xff]   ;;  %v696_v34 = vrot.slane %v6620_v50, 2 }
  0x70   : > { %v6818_v0 = vsel %vm677_vm5, %v690_v45, %v691_v62  ;;  %v8739_v45 = vshrl.u32 %v6659_v29, 16  ;;  %v5765_v50 = vld [vmem:[%s8698_s2 + $0x2b8] ss:$12 sps:$4 sm:$0xff]  }
  0x71   : > { %4813 = vmatmul.mubr.msk.bf16.gmra.mrb[16].mxu0 %vm6499_vm4, %v6450_v5  ;;  %5089 = vmatpush3.bf16.msra.mxu1 %v5836_v18  ;;  %v5852_v18 = vld [vmem:[%s8698_s2 + $0x2c0] ss:$12 sps:$4 sm:$0xff]  }
  0x72   : > { %1953 = vmatpush1.bf16.msra.mxu0 %v5748_v3  ;;  %1905 = vmatprep.mubr.bf16.mxu0 %v6778_v26  ;;  %v5842_v3 = vld [vmem:[%s8698_s2 + $0x290] ss:$12 sps:$4 sm:$0xff]  }
  0x73   : > { %1954 = vmatprep.subr.bf16.mxu0 %v5753_v21  ;;  %4823 = vmatmul.mubr.msk.bf16.gmra.mrb[4].mxu1 %vm6499_vm4, %v6395_v41  ;;  %v5764_v21 = vld [vmem:[%s8698_s2 + $0x2a4] ss:$12 sps:$4 sm:$0xff]   ;;  %v694_v41 = vrot.slane %v6573_v10, 2  ;;  %v5847_v10 = vld [vmem:[%s8698_s2 + $0x2a8] ss:$12 sps:$4 sm:$0xff]  }
  0x74   : > { %5090 = vmatprep.subr.bf16.mxu1 %v5837_v9  ;;  %2210 = vmatprep.mubr.bf16.mxu1 %v6577_v12  ;;  %v5762_v12 = vld [vmem:[%s8698_s2 + $0x2a0] ss:$12 sps:$4 sm:$0xff]  }
  0x75   : > { %5091 = vmatpush3.bf16.msra.mxu1 %v5841_v13  ;;  %v6861_v20 = vsel %vm677_vm5, %v693_v52, %v694_v41  ;;  %v8740_v13 = vshrl.u32 %v6406_v46, 16  ;;  %v8741_v52 = vshll.u32 %v6406_v46, 16  ;;  %v8742_v41 = vshll.u32 %v6419_v53, 16  ;;  %v5862_v46 = vld [vmem:[%s8698_s2 + $0x2f0] ss:$12 sps:$4 sm:$0xff]  }
  0x76   : > { %1955 = vmatpush1.bf16.msra.mxu0 %v5751_v61  ;;  %v534_v61 = vor.u32 %v533_v15, %v8739_v45  ;;  %5092 = vmatprep.subr.bf16.mxu1 %v5842_v3  ;;  %v5774_v15 = vld [vmem:[%s8698_s2 + $0x2ec] ss:$12 sps:$4 sm:$0xff]   ;;  %v700_v45 = vrot.slane %v6679_v19, 2 }
  0x77   : > { %1956 = vmatprep.subr.bf16.mxu0 %v5757_v16  ;;  %v5767_v16 = vld [vmem:[%s8698_s2 + $0x2bc] ss:$12 sps:$4 sm:$0xff]   ;;  %v606_v3 = vrot.slane %v8740_v13, 1  ;;  %v612_v56 = vrot.slane %v8742_v41, 2  ;;  %v8748_v41 = vshll.u32 %v6458_v7, 16 }
  0x78   : > { %v6873_v62 = vsel %vm458_vm1, %v534_v61, %v537_v42  ;;  %v699_v42 = vrot.slane %v6659_v29, 2  ;;  %v5861_v61 = vld [vmem:[%s8698_s2 + $0x218] ss:$12 sps:$4 sm:$0xff]   ;;  %v5772_v29 = vld [vmem:[%s8698_s2 + $0x2e8] ss:$12 sps:$4 sm:$0xff]  }
  0x79   : > { %4815 = vmatmul.mubr.msk.bf16.gmra.mrb[20].mxu0 %vm6499_vm4, %v6507_v32  ;;  %5093 = vmatpush3.bf16.msra.mxu1 %v5846_v22 }
  0x7a   : > { %1957 = vmatpush1.bf16.msra.mxu0 %v5755_v17  ;;  %1915 = vmatprep.mubr.bf16.mxu0 %v6829_v38  ;;  %v697_v17 = vrot.slane %v6624_v60, 2  ;;  %v5771_v60 = vld [vmem:[%s8698_s2 + $0x2d4] ss:$12 sps:$4 sm:$0xff]  }
  0x7b   : > { %1958 = vmatprep.subr.bf16.mxu0 %v5760_v48  ;;  %4825 = vmatmul.mubr.msk.bf16.gmra.mrb[8].mxu1 %vm6499_vm4, %v6408_v47  ;;  %v609_v47 = vshrl.u32 %v6419_v53, 16  ;;  %v5769_v48 = vld [vmem:[%s8698_s2 + $0x2d0] ss:$12 sps:$4 sm:$0xff]   ;;  %v6931_v53 = vsel %vm677_vm5, %v699_v42, %v700_v45  ;;  %v5790_v42 = vld [vmem:[%s8698_s2 + $0x34c] ss:$12 sps:$4 sm:$0xff]  }
  0x7c   : > { %5094 = vmatprep.subr.bf16.mxu1 %v5847_v10  ;;  %2218 = vmatprep.mubr.bf16.mxu1 %v6645_v39  ;;  %v6891_v9 = vsel %vm677_vm5, %v696_v34, %v697_v17  ;;  %v5856_v39 = vld [vmem:[%s8698_s2 + $0x200] ss:$12 sps:$4 sm:$0xff]   ;;  %v618_v10 = vshrl.u32 %v6432_v58, 16 }
  0x7d   : > { %5095 = vmatpush3.bf16.msra.mxu1 %v5851_v37  ;;  %v8743_v37 = vshrl.u32 %v6424_v55, 16 }
  0x7e   : > { %1959 = vmatpush1.bf16.msra.mxu0 %v5758_v24  ;;  %5096 = vmatprep.subr.bf16.mxu1 %v5852_v18  ;;  %v607_v24 = vrot.slane %v8741_v52, 2  ;;  %v8744_v18 = vshll.u32 %v6424_v55, 16  ;;  %v5778_v55 = vld [vmem:[%s8698_s2 + $0x318] ss:$12 sps:$4 sm:$0xff]  }
  0x7f   : > { %1960 = vmatprep.subr.bf16.mxu0 %v5764_v21  ;;  %v611_v21 = vrot.slane %v609_v47, 1  ;;  %v615_v34 = vrot.slane %v8743_v37, 1  ;;  %v620_v47 = vrot.slane %v618_v10, 1  ;;  %v8751_v10 = vshll.u32 %v6505_v31, 16 }
  0x80   : > { %v608_v19 = vor.u32 %v607_v24, %v606_v3  ;;  %v8747_v3 = vshll.u32 %v6454_v6, 16 }
  0x81   : > { %4817 = vmatmul.mubr.msk.bf16.gmra.mrb[24].mxu0 %vm6499_vm4, %v6580_v14  ;;  %5097 = vmatpush3.bf16.msra.mxu1 %v5856_v39  ;;  %v613_v22 = vor.u32 %v612_v56, %v611_v21  ;;  %v630_v56 = vrot.slane %v8748_v41, 2  ;;  %v5848_v41 = vld [vmem:[%s8699_s3 + $0x80] ss:$8 sps:$4 sm:$0xff]  }
  0x82   : > { %1961 = vmatpush1.bf16.msra.mxu0 %v5762_v12  ;;  %1925 = vmatprep.mubr.bf16.mxu0 %v6873_v62  ;;  %v5775_v12 = vld [vmem:[%s8698_s2 + $0x300] ss:$12 sps:$4 sm:$0xff]   ;;  %v625_v52 = vrot.slane %v8747_v3, 2 }
  0x83   : > { %1962 = vmatprep.subr.bf16.mxu0 %v5767_v16  ;;  %4827 = vmatmul.mubr.msk.bf16.gmra.mrb[12].mxu1 %vm6499_vm4, %v6434_v59  ;;  %v5777_v59 = vld [vmem:[%s8698_s2 + $0x304] ss:$12 sps:$4 sm:$0xff]   ;;  %v5780_v16 = vld [vmem:[%s8698_s2 + $0x31c] ss:$12 sps:$4 sm:$0xff]   ;;  %v6957_v17 = vsel %vm596_vm2, %v608_v19, %v613_v22 }
  0x84   : > { %5098 = vmatprep.subr.bf16.mxu1 %v5857_v11  ;;  %2226 = vmatprep.mubr.bf16.mxu1 %v6684_v23  ;;  %v5866_v23 = vld [vmem:[%s8698_s2 + $0x230] ss:$12 sps:$4 sm:$0xff]   ;;  %v5783_v11 = vld [vmem:[%s8698_s2 + $0x334] ss:$12 sps:$4 sm:$0xff]   ;;  %v5840_v3 = vld [vmem:[%s8699_s3 + $0x64] ss:$8 sps:$4 sm:$0xff]  }
  0x85   : > { %5099 = vmatpush3.bf16.msra.mxu1 %v5861_v61 }
  0x86   : > { %1963 = vmatpush1.bf16.msra.mxu0 %v5765_v50  ;;  %5100 = vmatprep.subr.bf16.mxu1 %v5862_v46  ;;  %v616_v50 = vrot.slane %v8744_v18, 2  ;;  %v8749_v46 = vshrl.u32 %v6488_v25, 16 }
  0x87   : > { %1964 = vmatprep.subr.bf16.mxu0 %v5771_v60  ;;  %v8745_v60 = vshll.u32 %v6432_v58, 16 }
  0x89   : > { %4819 = vmatmul.mubr.msk.bf16.gmra.mrb[28].mxu0 %vm6499_vm4, %v6630_v2  ;;  %v621_v39 = vrot.slane %v8745_v60, 2  ;;  %5101 = vmatpush3.bf16.msra.mxu1 %v5866_v23  ;;  %v639_v23 = vrot.slane %v8751_v10, 2  ;;  %v5817_v60 = vld [vmem:[%s8699_s3 + $0x4] ss:$8 sps:$4 sm:$0xff]  }
  0x8a   : > { %1965 = vmatpush1.bf16.msra.mxu0 %v5769_v48  ;;  %1968 = vmatprep.mubr.bf16.mxu0 %v6428_v57  ;;  %v617_v48 = vor.u32 %v616_v50, %v615_v34  ;;  %v5814_v50 = vld [vmem:[%s8698_s2 + $0x3ac] ss:$12 sps:$4 sm:$0xff]  }
  0x8b   : > { %1966 = vmatprep.subr.bf16.mxu0 %v5774_v15  ;;  %4829 = vmatmul.mubr.msk.bf16.gmra.mrb[16].mxu1 %vm6499_vm4, %v6450_v5  ;;  %v622_v58 = vor.u32 %v621_v39, %v620_v47  ;;  %v627_v5 = vshrl.u32 %v6458_v7, 16  ;;  %v8746_v15 = vshrl.u32 %v6454_v6, 16  ;;  %v5788_v6 = vld [vmem:[%s8698_s2 + $0x348] ss:$12 sps:$4 sm:$0xff]   ;;  %v636_v7 = vshrl.u32 %v6505_v31, 16 }
  0x8c   : > { %2234 = vmatprep.mubr.bf16.mxu1 %v6778_v26  ;;  %v5781_v26 = vld [vmem:[%s8698_s2 + $0x330] ss:$12 sps:$4 sm:$0xff]   ;;  %v5802_v31 = vld [vmem:[%s8698_s2 + $0x378] ss:$12 sps:$4 sm:$0xff]   ;;  %v5812_v47 = vld [vmem:[%s8698_s2 + $0x3a8] ss:$12 sps:$4 sm:$0xff]  }
  0x8d   : > { %v624_v13 = vrot.slane %v8746_v15, 1  ;;  %v6984_v24 = vsel %vm596_vm2, %v617_v48, %v622_v58  ;;  %v629_v21 = vrot.slane %v627_v5, 1  ;;  %v638_v22 = vrot.slane %v636_v7, 1  ;;  %v5906_v39 = vld [vmem:[%s8698_s2 + $0x350] ss:$12 sps:$4 sm:$0xff]  }
  0x8e   : > { %1967 = vmatpush1.bf16.msra.mxu0 %v5772_v29  ;;  %v633_v29 = vrot.slane %v8749_v46, 1  ;;  %v7087_v48 = vld [vmem:[%s8699_s3 + $0x204] ss:$8 sps:$4 sm:$0xff]   ;;  %v5815_v58 = vld [vmem:[%s8699_s3] ss:$8 sps:$4 sm:$0xff]   ;;  %v339_v46 = vld [vmem:[%s7157_s21 + $0x18] sm:$0xff] }
  0x8f   : > { %2049 = vmatprep.subr.bf16.mxu0 %v5777_v59  ;;  %v626_v45 = vor.u32 %v625_v52, %v624_v13  ;;  %v631_v61 = vor.u32 %v630_v56, %v629_v21  ;;  %v8750_v59 = vshll.u32 %v6488_v25, 16  ;;  %v5894_v25 = vld [vmem:[%s8698_s2 + $0x308] ss:$12 sps:$4 sm:$0xff]   ;;  %v640_v34 = vor.u32 %v639_v23, %v638_v22  ;;  %v5823_v5 = vld [vmem:[%s8699_s3 + $0x24] ss:$8 sps:$4 sm:$0xff]  }
  0x90   : > { %5310 = vmatprep.subr.bf16.mxu1 %v5894_v25  ;;  %v5830_v15 = vld [vmem:[%s8699_s3 + $0x44] ss:$8 sps:$4 sm:$0xff]   ;;  %v5833_v13 = vld [vmem:[%s8699_s3 + $0x50] ss:$8 sps:$4 sm:$0xff]   ;;  %v7167_v21 = vld [vmem:[%s8699_s3 + $0x200] ss:$8 sps:$4 sm:$0xff]  }
  0x91   : > { %1969 = vmatmul.mubr.bf16.vlgmr.msra.gmra.mrb[0].mxu0 %v6461_v8  ;;  %v634_v19 = vrot.slane %v8750_v59, 2  ;;  %v5843_v52 = vld [vmem:[%s8699_s3 + $0x70] ss:$8 sps:$4 sm:$0xff]   ;;  %v5855_v56 = vld [vmem:[%s8699_s3 + $0x94] ss:$8 sps:$4 sm:$0xff]  }
  0x92   : > { %2050 = vmatpush1.bf16.msra.mxu0 %v5775_v12  ;;  %1978 = vmatprep.mubr.bf16.mxu0 %v6957_v17  ;;  %v632_v12 = vsel %vm596_vm2, %v626_v45, %v631_v61  ;;  %v7186_v7 = vld [vmem:[%s8699_s3 + $0x210] ss:$8 sps:$4 sm:$0xff]   ;;  %v5860_v61 = vld [vmem:[%s8699_s3 + $0xa4] ss:$8 sps:$4 sm:$0xff]   ;;  %v5858_v59 = vld [vmem:[%s8699_s3 + $0xa0] ss:$8 sps:$4 sm:$0xff]  }
  0x93   : > { %2051 = vmatprep.subr.bf16.mxu0 %v5780_v16  ;;  %4831 = vmatmul.mubr.msk.bf16.gmra.mrb[20].mxu1 %vm6499_vm4, %v6507_v32  ;;  %v5797_v32 = vld [vmem:[%s8698_s2 + $0x364] ss:$12 sps:$4 sm:$0xff]   ;;  %v5804_v16 = vld [vmem:[%s8698_s2 + $0x37c] ss:$12 sps:$4 sm:$0xff]   ;;  %v635_v37 = vor.u32 %v634_v19, %v633_v29 }
  0x94   : > { %2242 = vmatprep.mubr.bf16.mxu1 %v6829_v38  ;;  %v5795_v38 = vld [vmem:[%s8698_s2 + $0x360] ss:$12 sps:$4 sm:$0xff]   ;;  %v5853_v45 = vld [vmem:[%s8699_s3 + $0x90] ss:$8 sps:$4 sm:$0xff]   ;;  %v7222_v19 = vld [vmem:[%s8699_s3 + $0x234] ss:$8 sps:$4 sm:$0xff]  }
  0x95   : > { %v641_v18 = vsel %vm596_vm2, %v635_v37, %v640_v34  ;;  %v7210_v29 = vld [vmem:[%s8699_s3 + $0x220] ss:$8 sps:$4 sm:$0xff]   ;;  %v7234_v23 = vld [vmem:[%s8699_s3 + $0x230] ss:$8 sps:$4 sm:$0xff]  }
  0x96   : > { %2052 = vmatpush1.bf16.msra.mxu0 %v5778_v55  ;;  %v5922_v55 = vld [vmem:[%s8698_s2 + $0x3b0] ss:$12 sps:$4 sm:$0xff]   ;;  %v340_v34 = vld [vmem:[%s7157_s21 + $0x20] sm:$0xff] }
  0x97   : > { %2053 = vmatprep.subr.bf16.mxu0 %v5783_v11  ;;  %v5818_v11 = vld [vmem:[%s8699_s3 + $0x10] ss:$8 sps:$4 sm:$0xff]  }
  0x99   : > { %1979 = vmatmul.mubr.bf16.gmra.mrb[4].mxu0 %v6494_v27 }
  0x9a   : > { %1988 = vmatprep.mubr.bf16.mxu0 %v6984_v24  ;;  %2054 = vmatpush1.bf16.msra.mxu0 %v5781_v26  ;;  %v5824_v26 = vld [vmem:[%s8699_s3 + $0x30] ss:$8 sps:$4 sm:$0xff]  }
  0x9b   : > { %2055 = vmatprep.subr.bf16.mxu0 %v5790_v42  ;;  %4833 = vmatmul.mubr.msk.bf16.gmra.mrb[24].mxu1 %vm6499_vm4, %v6580_v14  ;;  %v5811_v14 = vld [vmem:[%s8698_s2 + $0x394] ss:$12 sps:$4 sm:$0xff]  }
  0x9c   : > { %2250 = vmatprep.mubr.bf16.mxu1 %v6873_v62  ;;  %v5809_v62 = vld [vmem:[%s8698_s2 + $0x390] ss:$12 sps:$4 sm:$0xff]  }
  0x9d   : > { %v7178_v42 = vld [vmem:[%s8699_s3 + $0x214] ss:$8 sps:$4 sm:$0xff]  }
  0x9e   : > { %2056 = vmatpush1.bf16.msra.mxu0 %v5788_v6 }
  0x9f   : > { %2057 = vmatprep.subr.bf16.mxu0 %v5797_v32 }
  0xa1   : > { %1989 = vmatmul.mubr.bf16.gmra.mrb[8].mxu0 %v6516_v35 }
  0xa2   : > { %1998 = vmatprep.mubr.bf16.mxu0 %v632_v12  ;;  %2058 = vmatpush1.bf16.msra.mxu0 %v5795_v38  ;;  %v338_v38 = vld [vmem:[%s7157_s21 + $0x10] sm:$0xff] }
  0xa3   : > { %2059 = vmatprep.subr.bf16.mxu0 %v5804_v16  ;;  %4835 = vmatmul.mubr.msk.bf16.gmra.mrb[28].mxu1 %vm6499_vm4, %v6630_v2  ;;  %v5898_v2 = vld [vmem:[%s8698_s2 + $0x320] ss:$12 sps:$4 sm:$0xff]   ;;  %v353_v10 = vpack.c.bf16 %v339_v46, %v338_v38 }
  0xa4   : > { %2291 = vmatprep.mubr.bf16.mxu1 %v6428_v57  ;;  %v5902_v57 = vld [vmem:[%s8698_s2 + $0x338] ss:$12 sps:$4 sm:$0xff]  }
  0xa5   : > { %v5869_v16 = vld [vmem:[%s8699_s3 + $0xc4] ss:$8 sps:$4 sm:$0xff]   ;;  %v7254_v37 = vrot.slane %v353_v10, 7  ;;  %v5879_v10 = vld [vmem:[%s8699_s3 + $0x100] ss:$8 sps:$4 sm:$0xff]  }
  0xa6   : > { %2060 = vmatpush1.bf16.msra.mxu0 %v5802_v31  ;;  %v344_v46 = vld [vmem:[%s7157_s21 + $0x40] sm:$0xff] }
  0xa7   : > { %2061 = vmatprep.subr.bf16.mxu0 %v5811_v14  ;;  %v341_v14 = vld [vmem:[%s7157_s21 + $0x28] sm:$0xff] }
  0xa9   : > { %1999 = vmatmul.mubr.bf16.gmra.mrb[12].mxu0 %v6560_v63 }
  0xaa   : > { %2008 = vmatprep.mubr.bf16.mxu0 %v641_v18  ;;  %2062 = vmatpush1.bf16.msra.mxu0 %v5809_v62  ;;  %v7263_v62 = vld [vmem:[%s8699_s3 + $0x240] ss:$8 sps:$4 sm:$0xff]  }
  0xab   : > { %2063 = vmatprep.subr.bf16.mxu0 %v5814_v50  ;;  %2292 = vmatmul.mubr.bf16.vlgmr.msra.gmra.mrb[32].mxu1 %v6461_v8  ;;  %v5910_v8 = vld [vmem:[%s8698_s2 + $0x368] ss:$12 sps:$4 sm:$0xff]  }
  0xac   : > { %2299 = vmatprep.mubr.bf16.mxu1 %v6957_v17  ;;  %5311 = vmatpush3.bf16.msra.mxu1 %v5894_v25  ;;  %v5914_v17 = vld [vmem:[%s8698_s2 + $0x380] ss:$12 sps:$4 sm:$0xff]   ;;  %v5872_v50 = vld [vmem:[%s8699_s3 + $0xd4] ss:$8 sps:$4 sm:$0xff]  }
  0xad   : > { %5312 = vmatprep.subr.bf16.mxu1 %v5898_v2 }
  0xae   : > { %2064 = vmatpush1.bf16.msra.mxu0 %v5812_v47 }
  0xaf   : > { %2933 = vmatprep.subr.bf16.mxu0 %v5817_v60 }
  0xb0   : > { %5313 = vmatpush3.bf16.msra.mxu1 %v5898_v2  ;;  %v7279_v2 = vld [vmem:[%s8699_s3 + $0x254] ss:$8 sps:$4 sm:$0xff]  }
  0xb1   : > { %2009 = vmatmul.mubr.bf16.gmra.mrb[16].mxu0 %v6611_v43  ;;  %5314 = vmatprep.subr.bf16.mxu1 %v5902_v57 }
  0xb2   : > { %2018 = vmatprep.mubr.bf16.mxu0 %v6692_v4 }
  0xb3   : > { %2300 = vmatmul.mubr.bf16.gmra.mrb[36].mxu1 %v6494_v27  ;;  %v5918_v27 = vld [vmem:[%s8698_s2 + $0x398] ss:$12 sps:$4 sm:$0xff]  }
  0xb4   : > { %2307 = vmatprep.mubr.bf16.mxu1 %v6984_v24  ;;  %5315 = vmatpush3.bf16.msra.mxu1 %v5902_v57  ;;  %v337_v24 = vld [vmem:[%s7157_s21 + $0x8] sm:$0xff]  ;;  %v7283_v57 = vsel %vm424_vm0, 0, %v7254_v37 }
  0xb5   : > { %5316 = vmatprep.subr.bf16.mxu1 %v5906_v39 }
  0xb8   : > { %5317 = vmatpush3.bf16.msra.mxu1 %v5906_v39  ;;  %v354_v39 = vpack.c.bf16 %v341_v14, %v340_v34 }
  0xb9   : > { %2019 = vmatmul.mubr.bf16.gmra.mrb[20].mxu0 %v6665_v49  ;;  %5318 = vmatprep.subr.bf16.mxu1 %v5910_v8 }
  0xba   : > { %2028 = vmatprep.mubr.bf16.mxu0 %v6742_v36 }
  0xbb   : > { %2308 = vmatmul.mubr.bf16.gmra.mrb[40].mxu1 %v6516_v35  ;;  %v8722_v35 = vmov 0  }
  0xbc   : > { %2315 = vmatprep.mubr.bf16.mxu1 %v632_v12  ;;  %5319 = vmatpush3.bf16.msra.mxu1 %v5910_v8  ;;  %v5863_v12 = vld [vmem:[%s8699_s3 + $0xb0] ss:$8 sps:$4 sm:$0xff]  }
  0xbd   : > { %5320 = vmatprep.subr.bf16.mxu1 %v5914_v17  ;;  %v7291_v8 = vld [vmem:[%s8699_s3 + $0x250] ss:$8 sps:$4 sm:$0xff]  }
  0xc0   : > { %5321 = vmatpush3.bf16.msra.mxu1 %v5914_v17  ;;  %v5870_v17 = vld [vmem:[%s8699_s3 + $0xd0] ss:$8 sps:$4 sm:$0xff]  }
  0xc1   : > { %2029 = vmatmul.mubr.bf16.gmra.mrb[24].mxu0 %v6718_v51  ;;  %5322 = vmatprep.subr.bf16.mxu1 %v5918_v27 }
  0xc2   : > { %2038 = vmatprep.mubr.bf16.mxu0 %v6762_v44 }
  0xc3   : > { %2316 = vmatmul.mubr.bf16.gmra.mrb[44].mxu1 %v6560_v63  ;;  %v5820_v63 = vld [vmem:[%s8699_s3 + $0x14] ss:$8 sps:$4 sm:$0xff]  }
  0xc4   : > { %2323 = vmatprep.mubr.bf16.mxu1 %v641_v18  ;;  %5323 = vmatpush3.bf16.msra.mxu1 %v5918_v27  ;;  %v5867_v18 = vld [vmem:[%s8699_s3 + $0xc0] ss:$8 sps:$4 sm:$0xff]   ;;  %v5875_v27 = vld [vmem:[%s8699_s3 + $0xe4] ss:$8 sps:$4 sm:$0xff]  }
  0xc5   : > { %5324 = vmatprep.subr.bf16.mxu1 %v5922_v55 }
  0xc8   : > { %5325 = vmatpush3.bf16.msra.mxu1 %v5922_v55 }
  0xc9   : > { %2039 = vmatmul.mubr.bf16.gmra.mrb[28].mxu0 %v6745_v1  ;;  %5374 = vmatprep.subr.bf16.mxu1 %v7087_v48 }
  0xca   : > { %2081 = vmatprep.mubr.bf16.mxu0 %v8722_v35 }
  0xcb   : > { %2324 = vmatmul.mubr.bf16.gmra.mrb[48].mxu1 %v6611_v43  ;;  %v5821_v43 = vld [vmem:[%s8699_s3 + $0x20] ss:$8 sps:$4 sm:$0xff]  }
  0xcc   : > { %2331 = vmatprep.mubr.bf16.mxu1 %v6692_v4  ;;  %v5826_v4 = vld [vmem:[%s8699_s3 + $0x34] ss:$8 sps:$4 sm:$0xff]  }
  0xd1   : > { %2082 = vmatmul.mubr.bf16.vlgmr.msra.gmra.mrb[0].mxu0 %v6752_v33 }
  0xd2   : > { %2934 = vmatpush1.bf16.msra.mxu0 %v5815_v58  ;;  %2091 = vmatprep.mubr.bf16.mxu0 %v8722_v35 }
  0xd3   : > { %2935 = vmatprep.subr.bf16.mxu0 %v5820_v63  ;;  %2332 = vmatmul.mubr.bf16.gmra.mrb[52].mxu1 %v6665_v49  ;;  %v5828_v49 = vld [vmem:[%s8699_s3 + $0x40] ss:$8 sps:$4 sm:$0xff]   ;;  %v770_v63 = vshll.u32 %v7283_v57, 16 }
  0xd4   : > { %2339 = vmatprep.mubr.bf16.mxu1 %v6742_v36  ;;  %v5835_v36 = vld [vmem:[%s8699_s3 + $0x54] ss:$8 sps:$4 sm:$0xff]  }
  0xd6   : > { %2936 = vmatpush1.bf16.msra.mxu0 %v5818_v11  ;;  %v7313_v11 = vsel %vm424_vm0, %v7254_v37, 0 }
  0xd7   : > { %2937 = vmatprep.subr.bf16.mxu0 %v5823_v5  ;;  %v7315_v5 = vrot.slane %v354_v39, 7 }
  0xd9   : > { %2092 = vmatmul.mubr.bf16.gmra.mrb[4].mxu0 %v6765_v54 }
  0xda   : > { %2938 = vmatpush1.bf16.msra.mxu0 %v5821_v43  ;;  %2101 = vmatprep.mubr.bf16.mxu0 %v8722_v35  ;;  %v342_v43 = vld [vmem:[%s7157_s21 + $0x30] sm:$0xff] }
  0xdb   : > { %2939 = vmatprep.subr.bf16.mxu0 %v5826_v4  ;;  %2340 = vmatmul.mubr.bf16.gmra.mrb[56].mxu1 %v6718_v51  ;;  %v5838_v51 = vld [vmem:[%s8699_s3 + $0x60] ss:$8 sps:$4 sm:$0xff]   ;;  %v343_v4 = vld [vmem:[%s7157_s21 + $0x38] sm:$0xff] }
  0xdc   : > { %2347 = vmatprep.mubr.bf16.mxu1 %v6762_v44  ;;  %v5845_v44 = vld [vmem:[%s8699_s3 + $0x74] ss:$8 sps:$4 sm:$0xff]  }
  0xde   : > { %2940 = vmatpush1.bf16.msra.mxu0 %v5824_v26  ;;  %v7324_v26 = vld [vmem:[%s8699_s3 + $0x260] ss:$8 sps:$4 sm:$0xff]  }
  0xdf   : > { %2941 = vmatprep.subr.bf16.mxu0 %v5830_v15  ;;  %v5873_v15 = vld [vmem:[%s8699_s3 + $0xe0] ss:$8 sps:$4 sm:$0xff]  }
  0xe1   : > { %2102 = vmatmul.mubr.bf16.gmra.mrb[8].mxu0 %v6768_v40 }
  0xe2   : > { %2942 = vmatpush1.bf16.msra.mxu0 %v5828_v49  ;;  %2111 = vmatprep.mubr.bf16.mxu0 %v8722_v35  ;;  %v5878_v49 = vld [vmem:[%s8699_s3 + $0xf4] ss:$8 sps:$4 sm:$0xff]  }
  0xe3   : > { %2943 = vmatprep.subr.bf16.mxu0 %v5835_v36  ;;  %2348 = vmatmul.mubr.bf16.gmra.mrb[60].mxu1 %v6745_v1  ;;  %v5850_v1 = vld [vmem:[%s8699_s3 + $0x84] ss:$8 sps:$4 sm:$0xff]   ;;  %v768_v36 = vshrl.u32 %v7283_v57, 16 }
  0xe4   : > { %5326 = vmatprep.mubr.bf16.mxu1 %v6752_v33  ;;  %v336_v33 = vld [vmem:[%s7157_s21] sm:$0xff] }
  0xe5   : > { %v352_v6 = vpack.c.bf16 %v337_v24, %v336_v33  ;;  %v7357_v33 = vld [vmem:[%s8699_s3 + $0x270] ss:$8 sps:$4 sm:$0xff]  }
  0xe6   : > { %2944 = vmatpush1.bf16.msra.mxu0 %v5833_v13  ;;  %v772_v13 = vrot.slane %v770_v63, 1 }
  0xe7   : > { %2945 = vmatprep.subr.bf16.mxu0 %v5840_v3  ;;  %v7201_v32 = vrot.slane %v352_v6, 7  ;;  %v774_v3 = vshll.u32 %v7313_v11, 16 }
  0xe8   : > { %v773_v6 = vor.u32 %v772_v13, %v768_v36 }
  0xe9   : > { %2112 = vmatmul.mubr.bf16.gmra.mrb[12].mxu0 %v6793_v28  ;;  %v7226_v22 = vsel %vm424_vm0, 0, %v7201_v32  ;;  %v7252_v31 = vsel %vm424_vm0, %v7201_v32, 0 }
  0xea   : > { %2946 = vmatpush1.bf16.msra.mxu0 %v5838_v51  ;;  %2121 = vmatprep.mubr.bf16.mxu0 %v8722_v35  ;;  %v760_v25 = vshll.u32 %v7226_v22, 16  ;;  %v764_v60 = vshll.u32 %v7252_v31, 16  ;;  %v7341_v51 = vld [vmem:[%s8699_s3 + $0x274] ss:$8 sps:$4 sm:$0xff]  }
  0xeb   : > { %2947 = vmatprep.subr.bf16.mxu0 %v5845_v44  ;;  %5327 = vmatmul.mubr.bf16.vlgmr.msra.gmra.mrb[64].mxu1 %v6765_v54  ;;  %v7195_v54 = vld [vmem:[%s8699_s3 + $0x224] ss:$8 sps:$4 sm:$0xff]   ;;  %v7345_v44 = vsel %vm424_vm0, 0, %v7315_v5 }
  0xec   : > { %5382 = vmatpush1.bf16.msra.mxu1 %v7167_v21  ;;  %5330 = vmatprep.mubr.bf16.mxu1 %v6768_v40  ;;  %v5865_v40 = vld [vmem:[%s8699_s3 + $0xb4] ss:$8 sps:$4 sm:$0xff]   ;;  %v762_v47 = vrot.slane %v760_v25, 1  ;;  %v766_v58 = vrot.slane %v764_v60, 1  ;;  %v980_v24 = vrot.slane %v7345_v44, 2  ;;  %v778_v34 = vshrl.u32 %v7345_v44, 16 }
  0xed   : > { %5375 = vmatprep.subr.bf16.mxu1 %v7178_v42 }
  0xee   : > { %2948 = vmatpush1.bf16.msra.mxu0 %v5843_v52  ;;  %v7349_v52 = vsel %vm424_vm0, %v7315_v5, 0 }
  0xef   : > { %2949 = vmatprep.subr.bf16.mxu0 %v5850_v1  ;;  %v355_v1 = vpack.c.bf16 %v343_v4, %v342_v43 }
  0xf0   : > { %5383 = vmatpush1.bf16.msra.mxu1 %v7186_v7 }
  0xf1   : > { %2122 = vmatmul.mubr.bf16.gmra.mrb[16].mxu0 %v6818_v0  ;;  %5376 = vmatprep.subr.bf16.mxu1 %v7195_v54  ;;  %v7373_v38 = vrot.slane %v355_v1, 7  ;;  %v5885_v1 = vld [vmem:[%s8699_s3 + $0x120] ss:$8 sps:$4 sm:$0xff]  }
  0xf2   : > { %2950 = vmatpush1.bf16.msra.mxu0 %v5848_v41  ;;  %2131 = vmatprep.mubr.bf16.mxu0 %v8722_v35  ;;  %v981_v41 = vrot.slane %v7349_v52, 2 }
  0xf3   : > { %2951 = vmatprep.subr.bf16.mxu0 %v5855_v56  ;;  %5331 = vmatmul.mubr.bf16.gmra.mrb[68].mxu1 %v6793_v28  ;;  %v7243_v28 = vld [vmem:[%s8699_s3 + $0x244] ss:$8 sps:$4 sm:$0xff]   ;;  %v5876_v56 = vld [vmem:[%s8699_s3 + $0xf0] ss:$8 sps:$4 sm:$0xff]  }
  0xf4   : > { %5384 = vmatpush1.bf16.msra.mxu1 %v7210_v29  ;;  %5334 = vmatprep.mubr.bf16.mxu1 %v6818_v0  ;;  %v758_v0 = vshrl.u32 %v7226_v22, 16 }
  0xf5   : > { %5377 = vmatprep.subr.bf16.mxu1 %v7222_v19 }
  0xf6   : > { %2952 = vmatpush1.bf16.msra.mxu0 %v5853_v45  ;;  %v763_v55 = vor.u32 %v762_v47, %v758_v0  ;;  %v776_v45 = vrot.slane %v774_v3, 1  ;;  %v7397_v47 = vsel %vm424_vm0, %v7373_v38, 0 }
  0xf7   : > { %2953 = vmatprep.subr.bf16.mxu0 %v5860_v61  ;;  %v780_v61 = vshll.u32 %v7345_v44, 16 }
  0xf8   : > { %5385 = vmatpush1.bf16.msra.mxu1 %v7234_v23 }
  0xf9   : > { %2132 = vmatmul.mubr.bf16.gmra.mrb[20].mxu0 %v6861_v20  ;;  %5378 = vmatprep.subr.bf16.mxu1 %v7243_v28  ;;  %v782_v14 = vrot.slane %v780_v61, 1 }
  0xfa   : > { %2954 = vmatpush1.bf16.msra.mxu0 %v5858_v59  ;;  %2141 = vmatprep.mubr.bf16.mxu0 %v8722_v35  ;;  %v345_v59 = vld [vmem:[%s7157_s21 + $0x48] sm:$0xff] }
  0xfb   : > { %2955 = vmatprep.subr.bf16.mxu0 %v5865_v40  ;;  %5335 = vmatmul.mubr.bf16.gmra.mrb[72].mxu1 %v6861_v20  ;;  %v7300_v20 = vld [vmem:[%s8699_s3 + $0x264] ss:$8 sps:$4 sm:$0xff]   ;;  %v982_v40 = vsel %vm677_vm5, %v980_v24, %v981_v41  ;;  %v356_v39 = vpack.c.bf16 %v345_v59, %v344_v46  ;;  %v5890_v24 = vld [vmem:[%s8699_s3 + $0x134] ss:$8 sps:$4 sm:$0xff]  }
  0xfc   : > { %5386 = vmatpush1.bf16.msra.mxu1 %v7263_v62  ;;  %5338 = vmatprep.mubr.bf16.mxu1 %v6891_v9 }
  0xfd   : > { %5379 = vmatprep.subr.bf16.mxu1 %v7279_v2 }
  0xfe   : > { %2956 = vmatpush1.bf16.msra.mxu0 %v5863_v12  ;;  %v5884_v12 = vld [vmem:[%s8699_s3 + $0x114] ss:$8 sps:$4 sm:$0xff]  }
  0xff   : > { %2957 = vmatprep.subr.bf16.mxu0 %v5869_v16  ;;  %v777_v16 = vsel %vm458_vm1, %v773_v6, %v776_v45  ;;  %v794_v6 = vshll.u32 %v7397_v47, 16 }
 0x100   : > { %5387 = vmatpush1.bf16.msra.mxu1 %v7291_v8 }
 0x101   : > { %2142 = vmatmul.mubr.bf16.gmra.mrb[24].mxu0 %v6891_v9  ;;  %5380 = vmatprep.subr.bf16.mxu1 %v7300_v20  ;;  %v767_v9 = vsel %vm458_vm1, %v763_v55, %v766_v58  ;;  %v5882_v55 = vld [vmem:[%s8699_s3 + $0x110] ss:$8 sps:$4 sm:$0xff]   ;;  %v5887_v58 = vld [vmem:[%s8699_s3 + $0x124] ss:$8 sps:$4 sm:$0xff]  }
 0x102   : > { %2958 = vmatpush1.bf16.msra.mxu0 %v5867_v18  ;;  %2151 = vmatprep.mubr.bf16.mxu0 %v8722_v35  ;;  %v784_v18 = vshll.u32 %v7349_v52, 16 }
 0x103   : > { %2959 = vmatprep.subr.bf16.mxu0 %v5872_v50  ;;  %5339 = vmatmul.mubr.bf16.gmra.mrb[76].mxu1 %v6931_v53  ;;  %v7393_v50 = vsel %vm424_vm0, 0, %v7373_v38 }
 0x104   : > { %5388 = vmatpush1.bf16.msra.mxu1 %v7324_v26  ;;  %3211 = vmatprep.mubr.bf16.mxu1 %v8722_v35  ;;  %v786_v43 = vrot.slane %v784_v18, 1  ;;  %v790_v4 = vshll.u32 %v7393_v50, 16 }
 0x105   : > { %5381 = vmatprep.subr.bf16.mxu1 %v7341_v51 }
 0x106   : > { %2960 = vmatpush1.bf16.msra.mxu0 %v5870_v17  ;;  %v983_v17 = vrot.slane %v7393_v50, 2 }
 0x107   : > { %2961 = vmatprep.subr.bf16.mxu0 %v5875_v27  ;;  %v984_v27 = vrot.slane %v7397_v47, 2 }
 0x108   : > { %5389 = vmatpush1.bf16.msra.mxu1 %v7357_v33 }
 0x109   : > { %2152 = vmatmul.mubr.bf16.gmra.mrb[28].mxu0 %v6931_v53  ;;  %v5881_v53 = vld [vmem:[%s8699_s3 + $0x104] ss:$8 sps:$4 sm:$0xff]   ;;  %v985_v13 = vsel %vm677_vm5, %v983_v17, %v984_v27 }
 0x10a   : > { %2962 = vmatpush1.bf16.msra.mxu0 %v5873_v15  ;;  %2965 = vmatprep.mubr.bf16.mxu0 %v767_v9  ;;  %v7416_v15 = vrot.slane %v356_v39, 7  ;;  %v347_v9 = vld [vmem:[%s7157_s21 + $0x58] sm:$0xff]  ;;  %v348_v27 = vld [vmem:[%s7157_s21 + $0x60] sm:$0xff] }
 0x10b   : > { %2963 = vmatprep.subr.bf16.mxu0 %v5878_v49  ;;  %3212 = vmatmul.mubr.bf16.vlgmr.msra.gmra.mrb[80].mxu1 %v982_v40  ;;  %v346_v49 = vld [vmem:[%s7157_s21 + $0x50] sm:$0xff] }
 0x10c   : > { %3221 = vmatprep.mubr.bf16.mxu1 %v8722_v35  ;;  %v7434_v45 = vsel %vm424_vm0, 0, %v7416_v15  ;;  %v7438_v46 = vsel %vm424_vm0, %v7416_v15, 0  ;;  %v357_v59 = vpack.c.bf16 %v347_v9, %v346_v49 }
 0x10d   : > { %v986_v40 = vrot.slane %v7434_v45, 2  ;;  %v800_v39 = vshll.u32 %v7434_v45, 16  ;;  %v798_v9 = vshrl.u32 %v7434_v45, 16 }
 0x10e   : > { %2964 = vmatpush1.bf16.msra.mxu0 %v5876_v56  ;;  %v788_v56 = vshrl.u32 %v7393_v50, 16  ;;  %v7457_v17 = vrot.slane %v357_v59, 7 }
 0x10f   : > { %3046 = vmatprep.subr.bf16.mxu0 %v5881_v53  ;;  %v792_v53 = vrot.slane %v790_v4, 1 }
 0x111   : > { %4917 = vmatmul.mubr.msk.bf16.vlgmr.msra.gmra.mrb[0].mxu0 %vm6499_vm4, %v7201_v32  ;;  %v783_v32 = vor.u32 %v782_v14, %v778_v34  ;;  %v796_v14 = vrot.slane %v794_v6, 1 }
 0x112   : > { %3047 = vmatpush1.bf16.msra.mxu0 %v5879_v10  ;;  %2975 = vmatprep.mubr.bf16.mxu0 %v777_v16  ;;  %v987_v10 = vrot.slane %v7438_v46, 2  ;;  %v5893_v16 = vld [vmem:[%s8699_s3 + $0x144] ss:$8 sps:$4 sm:$0xff]  }
 0x113   : > { %3048 = vmatprep.subr.bf16.mxu0 %v5884_v12  ;;  %v787_v41 = vsel %vm458_vm1, %v783_v32, %v786_v43  ;;  %3222 = vmatmul.mubr.bf16.gmra.mrb[84].mxu1 %v985_v13  ;;  %v5888_v12 = vld [vmem:[%s8699_s3 + $0x130] ss:$8 sps:$4 sm:$0xff]   ;;  %v5891_v32 = vld [vmem:[%s8699_s3 + $0x140] ss:$8 sps:$4 sm:$0xff]   ;;  %v5897_v43 = vld [vmem:[%s8699_s3 + $0x154] ss:$8 sps:$4 sm:$0xff]  }
 0x114   : > { %3231 = vmatprep.mubr.bf16.mxu1 %v8722_v35  ;;  %v802_v13 = vrot.slane %v800_v39, 1 }
 0x116   : > { %3049 = vmatpush1.bf16.msra.mxu0 %v5882_v55  ;;  %v349_v55 = vld [vmem:[%s7157_s21 + $0x68] sm:$0xff] }
 0x117   : > { %3050 = vmatprep.subr.bf16.mxu0 %v5887_v58  ;;  %v988_v58 = vsel %vm677_vm5, %v986_v40, %v987_v10  ;;  %v5895_v10 = vld [vmem:[%s8699_s3 + $0x150] ss:$8 sps:$4 sm:$0xff]  }
 0x119   : > { %4919 = vmatmul.mubr.msk.bf16.gmra.mrb[4].mxu0 %vm6499_vm4, %v7254_v37  ;;  %v793_v37 = vor.u32 %v792_v53, %v788_v56  ;;  %v358_v53 = vpack.c.bf16 %v349_v55, %v348_v27  ;;  %v350_v27 = vld [vmem:[%s7157_s21 + $0x70] sm:$0xff]  ;;  %v351_v55 = vld [vmem:[%s7157_s21 + $0x78] sm:$0xff] }
 0x11a   : > { %3051 = vmatpush1.bf16.msra.mxu0 %v5885_v1  ;;  %2985 = vmatprep.mubr.bf16.mxu0 %v787_v41  ;;  %v8718_v1 = vshll.u32 %v7438_v46, 16  ;;  %v7479_v41 = vsel %vm424_vm0, %v7457_v17, 0 }
 0x11b   : > { %3052 = vmatprep.subr.bf16.mxu0 %v5890_v24  ;;  %v797_v49 = vsel %vm458_vm1, %v793_v37, %v796_v14  ;;  %v7475_v24 = vsel %vm424_vm0, 0, %v7457_v17  ;;  %3232 = vmatmul.mubr.bf16.gmra.mrb[88].mxu1 %v988_v58  ;;  %v990_v40 = vrot.slane %v7479_v41, 2  ;;  %v7498_v14 = vrot.slane %v358_v53, 7 }
 0x11c   : > { %3241 = vmatprep.mubr.bf16.mxu1 %v8722_v35  ;;  %v989_v59 = vrot.slane %v7475_v24, 2  ;;  %v8719_v37 = vshll.u32 %v7475_v24, 16 }
 0x11e   : > { %3053 = vmatpush1.bf16.msra.mxu0 %v5888_v12  ;;  %v5901_v12 = vld [vmem:[%s8699_s3 + $0x164] ss:$8 sps:$4 sm:$0xff]   ;;  %v991_v58 = vsel %vm677_vm5, %v989_v59, %v990_v40  ;;  %v812_v53 = vrot.slane %v8719_v37, 1  ;;  %v7516_v59 = vsel %vm424_vm0, 0, %v7498_v14  ;;  %v7520_v40 = vsel %vm424_vm0, %v7498_v14, 0 }
 0x11f   : > { %3054 = vmatprep.subr.bf16.mxu0 %v5893_v16  ;;  %v806_v16 = vrot.slane %v8718_v1, 1  ;;  %v8720_v1 = vshll.u32 %v7479_v41, 16 }
 0x121   : > { %4921 = vmatmul.mubr.msk.bf16.gmra.mrb[8].mxu0 %vm6499_vm4, %v7315_v5  ;;  %v803_v5 = vor.u32 %v802_v13, %v798_v9  ;;  %v8721_v13 = vshrl.u32 %v7475_v24, 16 }
 0x122   : > { %3055 = vmatpush1.bf16.msra.mxu0 %v5891_v32  ;;  %2995 = vmatprep.mubr.bf16.mxu0 %v797_v49  ;;  %v5899_v32 = vld [vmem:[%s8699_s3 + $0x160] ss:$8 sps:$4 sm:$0xff]  }
 0x123   : > { %3056 = vmatprep.subr.bf16.mxu0 %v5897_v43  ;;  %v5905_v43 = vld [vmem:[%s8699_s3 + $0x174] ss:$8 sps:$4 sm:$0xff]   ;;  %v807_v49 = vsel %vm458_vm1, %v803_v5, %v806_v16  ;;  %3242 = vmatmul.mubr.bf16.gmra.mrb[92].mxu1 %v991_v58  ;;  %v993_v5 = vrot.slane %v7520_v40, 2  ;;  %v5903_v16 = vld [vmem:[%s8699_s3 + $0x170] ss:$8 sps:$4 sm:$0xff]   ;;  %v8724_v58 = vshll.u32 %v7516_v59, 16 }
 0x124   : > { %3251 = vmatprep.mubr.bf16.mxu1 %v8722_v35 }
 0x126   : > { %3057 = vmatpush1.bf16.msra.mxu0 %v5895_v10  ;;  %v359_v10 = vpack.c.bf16 %v351_v55, %v350_v27  ;;  %v5909_v27 = vld [vmem:[%s8699_s3 + $0x184] ss:$8 sps:$4 sm:$0xff]   ;;  %v816_v55 = vrot.slane %v8720_v1, 1  ;;  %v8726_v1 = vshrl.u32 %v7516_v59, 16 }
 0x127   : > { %3058 = vmatprep.subr.bf16.mxu0 %v5901_v12  ;;  %v992_v12 = vrot.slane %v7516_v59, 2 }
 0x128   : > { %v7539_v37 = vrot.slane %v359_v10, 7  ;;  %v822_v10 = vrot.slane %v8724_v58, 1 }
 0x129   : > { %4923 = vmatmul.mubr.msk.bf16.gmra.mrb[12].mxu0 %vm6499_vm4, %v7373_v38  ;;  %v813_v38 = vor.u32 %v812_v53, %v8721_v13  ;;  %v8725_v13 = vshll.u32 %v7520_v40, 16 }
 0x12a   : > { %3059 = vmatpush1.bf16.msra.mxu0 %v5899_v32  ;;  %3005 = vmatprep.mubr.bf16.mxu0 %v807_v49  ;;  %v994_v32 = vsel %vm677_vm5, %v992_v12, %v993_v5  ;;  %v5913_v49 = vld [vmem:[%s8699_s3 + $0x194] ss:$8 sps:$4 sm:$0xff]   ;;  %v7555_v12 = vsel %vm424_vm0, 0, %v7539_v37  ;;  %v7559_v5 = vsel %vm424_vm0, %v7539_v37, 0 }
 0x12b   : > { %3060 = vmatprep.subr.bf16.mxu0 %v5905_v43  ;;  %v5907_v43 = vld [vmem:[%s8699_s3 + $0x180] ss:$8 sps:$4 sm:$0xff]   ;;  %v817_v53 = vsel %vm458_vm1, %v813_v38, %v816_v55  ;;  %3252 = vmatmul.mubr.bf16.gmra.mrb[96].mxu1 %v994_v32  ;;  %v5911_v38 = vld [vmem:[%s8699_s3 + $0x190] ss:$8 sps:$4 sm:$0xff]   ;;  %v5917_v55 = vld [vmem:[%s8699_s3 + $0x1a4] ss:$8 sps:$4 sm:$0xff]  }
 0x12c   : > { %3261 = vmatprep.mubr.bf16.mxu1 %v8722_v35  ;;  %v826_v32 = vrot.slane %v8725_v13, 1  ;;  %v830_v35 = vshll.u32 %v7555_v12, 16 }
 0x12e   : > { %3061 = vmatpush1.bf16.msra.mxu0 %v5903_v16  ;;  %v995_v16 = vrot.slane %v7555_v12, 2  ;;  %v832_v13 = vrot.slane %v830_v35, 1 }
 0x12f   : > { %3062 = vmatprep.subr.bf16.mxu0 %v5909_v27  ;;  %v996_v27 = vrot.slane %v7559_v5, 2 }
 0x131   : > { %4925 = vmatmul.mubr.msk.bf16.gmra.mrb[16].mxu0 %vm6499_vm4, %v7416_v15  ;;  %v823_v15 = vor.u32 %v822_v10, %v8726_v1  ;;  %v828_v10 = vshrl.u32 %v7555_v12, 16  ;;  %v8727_v1 = vshll.u32 %v7559_v5, 16 }
 0x132   : > { %3063 = vmatpush1.bf16.msra.mxu0 %v5907_v43  ;;  %3015 = vmatprep.mubr.bf16.mxu0 %v817_v53  ;;  %v997_v43 = vsel %vm677_vm5, %v995_v16, %v996_v27  ;;  %v5915_v53 = vld [vmem:[%s8699_s3 + $0x1a0] ss:$8 sps:$4 sm:$0xff]   ;;  %v5919_v16 = vld [vmem:[%s8699_s3 + $0x1b0] ss:$8 sps:$4 sm:$0xff]   ;;  %v897_v27 = vshrl.u32 %v7252_v31, 16 }
 0x133   : > { %3064 = vmatprep.subr.bf16.mxu0 %v5913_v49  ;;  %v5921_v49 = vld [vmem:[%s8699_s3 + $0x1b4] ss:$8 sps:$4 sm:$0xff]   ;;  %v827_v58 = vsel %vm458_vm1, %v823_v15, %v826_v32  ;;  %3262 = vmatmul.mubr.bf16.gmra.mrb[100].mxu1 %v997_v43  ;;  %v836_v15 = vrot.slane %v8727_v1, 1  ;;  %v895_v32 = vrot.slane %v760_v25, 2  ;;  %v5929_v25 = vld [vmem:[%s8699_s3 + $0x1d0] ss:$8 sps:$4 sm:$0xff]  }
 0x134   : > { %v899_v43 = vrot.slane %v897_v27, 1  ;;  %v906_v27 = vshrl.u32 %v7313_v11, 16  ;;  %v913_v1 = vrot.slane %v780_v61, 2 }
 0x136   : > { %3065 = vmatpush1.bf16.msra.mxu0 %v5911_v38  ;;  %v5925_v38 = vld [vmem:[%s8699_s3 + $0x1c4] ss:$8 sps:$4 sm:$0xff]  }
 0x137   : > { %3066 = vmatprep.subr.bf16.mxu0 %v5917_v55  ;;  %v833_v55 = vor.u32 %v832_v13, %v828_v10  ;;  %v5931_v13 = vld [vmem:[%s8699_s3 + $0x1d4] ss:$8 sps:$4 sm:$0xff]  }
 0x139   : > { %4927 = vmatmul.mubr.msk.bf16.gmra.mrb[20].mxu0 %vm6499_vm4, %v7457_v17  ;;  %v5923_v17 = vld [vmem:[%s8699_s3 + $0x1c0] ss:$8 sps:$4 sm:$0xff]  }
 0x13a   : > { %3067 = vmatpush1.bf16.msra.mxu0 %v5915_v53  ;;  %3025 = vmatprep.mubr.bf16.mxu0 %v827_v58  ;;  %v894_v58 = vrot.slane %v758_v0, 1  ;;  %v900_v53 = vrot.slane %v764_v60, 2  ;;  %v5937_v60 = vld [vmem:[%s8699_s3 + $0x1e4] ss:$8 sps:$4 sm:$0xff]  }
 0x13b   : > { %3068 = vmatprep.subr.bf16.mxu0 %v5921_v49  ;;  %v837_v49 = vsel %vm458_vm1, %v833_v55, %v836_v15 }
 0x13c   : > { %v896_v0 = vor.u32 %v895_v32, %v894_v58  ;;  %v903_v32 = vrot.slane %v768_v36, 1  ;;  %v862_v36 = vrot.slane %v7226_v22, 1 }
 0x13e   : > { %3069 = vmatpush1.bf16.msra.mxu0 %v5919_v16  ;;  %v901_v16 = vor.u32 %v900_v53, %v899_v43  ;;  %v5943_v53 = vld [vmem:[%s8699_s3 + $0x1f4] ss:$8 sps:$4 sm:$0xff]  }
 0x13f   : > { %3070 = vmatprep.subr.bf16.mxu0 %v5925_v38  ;;  %v5038_v38 = vpop.f32.mrb[0].mxu1 }
 0x140   : > { %v5039_v55 = vpop.f32.mrb[1].mxu1  ;;  %v902_v58 = vsel %vm596_vm2, %v896_v0, %v901_v16  ;;  %v863_v0 = vrot.slane %v7252_v31, 1  ;;  %v5941_v16 = vld [vmem:[%s8699_s3 + $0x1f0] ss:$8 sps:$4 sm:$0xff]  }
 0x141   : > { %4929 = vmatmul.mubr.msk.bf16.gmra.mrb[24].mxu0 %vm6499_vm4, %v7498_v14  ;;  %v7627_v15 = vadd.f32 %v5039_v55, %v5038_v38  ;;  %v5041_v14 = vpop.f32.mrb[2].mxu1 }
 0x142   : > { %3071 = vmatpush1.bf16.msra.mxu0 %v5923_v17  ;;  %3035 = vmatprep.mubr.bf16.mxu0 %v837_v49  ;;  %v5935_v17 = vld [vmem:[%s8699_s3 + $0x1e0] ss:$8 sps:$4 sm:$0xff]   ;;  %v5042_v43 = vpop.f32.mrb[3].mxu1  ;;  %v908_v49 = vrot.slane %v906_v27, 1 }
 0x143   : > { %3072 = vmatprep.subr.bf16.mxu0 %v5931_v13  ;;  %v904_v13 = vrot.slane %v770_v63, 2  ;;  %v7642_v38 = vadd.f32 %v5042_v43, %v5041_v14  ;;  %v915_v63 = vshrl.u32 %v7349_v52, 16  ;;  %v864_v14 = vsel %vm563_vm3, %v862_v36, %v863_v0 }
 0x146   : > { %3073 = vmatpush1.bf16.msra.mxu0 %v5929_v25  ;;  %v909_v25 = vrot.slane %v774_v3, 2  ;;  %v905_v3 = vor.u32 %v904_v13, %v903_v32  ;;  %v5044_v27 = vpop.f32.mrb[4].mxu1 }
 0x147   : > { %3074 = vmatprep.subr.bf16.mxu0 %v5937_v60  ;;  %v5045_v55 = vpop.f32.mrb[5].mxu1 }
 0x148   : > { %v910_v60 = vor.u32 %v909_v25, %v908_v49  ;;  %v5047_v43 = vpop.f32.mrb[6].mxu1  ;;  %v866_v25 = vrot.slane %v7313_v11, 1 }
 0x149   : > { %4931 = vmatmul.mubr.msk.bf16.gmra.mrb[28].mxu0 %vm6499_vm4, %v7539_v37  ;;  %v7654_v37 = vadd.f32 %v5045_v55, %v5044_v27  ;;  %v5048_v32 = vpop.f32.mrb[7].mxu1  ;;  %v927_v55 = vrot.slane %v794_v6, 2 }
 0x14a   : > { %3075 = vmatpush1.bf16.msra.mxu0 %v5935_v17  ;;  %3078 = vmatprep.mubr.bf16.mxu0 %v902_v58  ;;  %v912_v17 = vrot.slane %v778_v34, 1  ;;  %v917_v58 = vrot.slane %v915_v63, 1  ;;  %v911_v13 = vsel %vm596_vm2, %v905_v3, %v910_v60  ;;  %v7664_v49 = vadd.f32 %v5048_v32, %v5047_v43 }
 0x14b   : > { %3076 = vmatprep.subr.bf16.mxu0 %v5943_v53  ;;  %v918_v53 = vrot.slane %v784_v18, 2  ;;  %v865_v34 = vrot.slane %v7283_v57, 1  ;;  %v924_v18 = vshrl.u32 %v7397_v47, 16  ;;  %v921_v60 = vrot.slane %v788_v56, 1 }
 0x14c   : > { %v914_v61 = vor.u32 %v913_v1, %v912_v17  ;;  %v869_v43 = vrot.slane %v7349_v52, 1  ;;  %v933_v56 = vshrl.u32 %v7438_v46, 16 }
 0x14d   : > { %v919_v36 = vor.u32 %v918_v53, %v917_v58  ;;  %v867_v3 = vsel %vm563_vm3, %v865_v34, %v866_v25  ;;  %v926_v27 = vrot.slane %v924_v18, 1 }
 0x14e   : > { %3077 = vmatpush1.bf16.msra.mxu0 %v5941_v16  ;;  %v5050_v0 = vpop.f32.mrb[8].mxu1  ;;  %v935_v52 = vrot.slane %v933_v56, 1 }
 0x14f   : > { %3159 = vmatprep.subr.bf16.mxu0 %v7087_v48  ;;  %v5051_v48 = vpop.f32.mrb[9].mxu1  ;;  %v928_v17 = vor.u32 %v927_v55, %v926_v27 }
 0x150   : > { %v7671_v16 = vadd.f32 %v5051_v48, %v5050_v0  ;;  %v5053_v63 = vpop.f32.mrb[10].mxu1 }
 0x151   : > { %3079 = vmatmul.mubr.bf16.vlgmr.msra.gmra.mrb[0].mxu0 %v864_v14  ;;  %v5054_v1 = vpop.f32.mrb[11].mxu1 }
 0x152   : > { %3160 = vmatpush1.bf16.msra.mxu0 %v7167_v21  ;;  %3088 = vmatprep.mubr.bf16.mxu0 %v911_v13  ;;  %v920_v21 = vsel %vm596_vm2, %v914_v61, %v919_v36  ;;  %v7683_v14 = vadd.f32 %v5054_v1, %v5053_v63  ;;  %v8752_v13 = vshll.u32 %v7438_v46, 16 }
 0x153   : > { %3161 = vmatprep.subr.bf16.mxu0 %v7178_v42  ;;  %v922_v42 = vrot.slane %v790_v4, 2 }
 0x154   : > { %v936_v34 = vrot.slane %v8752_v13, 2 }
 0x156   : > { %3162 = vmatpush1.bf16.msra.mxu0 %v7186_v7  ;;  %v868_v7 = vrot.slane %v7345_v44, 1  ;;  %v5056_v4 = vpop.f32.mrb[12].mxu1  ;;  %v930_v44 = vrot.slane %v798_v9, 1  ;;  %v872_v9 = vrot.slane %v7397_v47, 1  ;;  %v937_v18 = vor.u32 %v936_v34, %v935_v52 }
 0x157   : > { %3163 = vmatprep.subr.bf16.mxu0 %v7195_v54  ;;  %v923_v54 = vor.u32 %v922_v42, %v921_v60  ;;  %v5057_v58 = vpop.f32.mrb[13].mxu1 }
 0x158   : > { %v870_v6 = vsel %vm563_vm3, %v868_v7, %v869_v43  ;;  %v7691_v53 = vadd.f32 %v5057_v58, %v5056_v4  ;;  %v5059_v32 = vpop.f32.mrb[14].mxu1  ;;  %v874_v7 = vrot.slane %v7434_v45, 1  ;;  %v875_v43 = vrot.slane %v7438_v46, 1 }
 0x159   : > { %3089 = vmatmul.mubr.bf16.gmra.mrb[4].mxu0 %v867_v3  ;;  %v929_v25 = vsel %vm596_vm2, %v923_v54, %v928_v17  ;;  %v8756_v45 = vshrl.u32 %v7516_v59, 16  ;;  %v8757_v46 = vshll.u32 %v7516_v59, 16 }
 0x15a   : > { %3098 = vmatprep.mubr.bf16.mxu0 %v920_v21  ;;  %3164 = vmatpush1.bf16.msra.mxu0 %v7210_v29  ;;  %v931_v29 = vrot.slane %v800_v39, 2  ;;  %v942_v39 = vshrl.u32 %v7479_v41, 16 }
 0x15b   : > { %3165 = vmatprep.subr.bf16.mxu0 %v7222_v19  ;;  %v5060_v19 = vpop.f32.mrb[15].mxu1 }
 0x15c   : > { %v7702_v61 = vadd.f32 %v5060_v19, %v5059_v32  ;;  %v932_v36 = vor.u32 %v931_v29, %v930_v44  ;;  %v944_v42 = vrot.slane %v942_v39, 1  ;;  %v948_v32 = vrot.slane %v8756_v45, 1 }
 0x15d   : > { %v949_v44 = vrot.slane %v8757_v46, 2  ;;  %v877_v19 = vrot.slane %v7475_v24, 1  ;;  %v884_v45 = vrot.slane %v7559_v5, 1 }
 0x15e   : > { %3166 = vmatpush1.bf16.msra.mxu0 %v7234_v23  ;;  %v871_v23 = vrot.slane %v7393_v50, 1  ;;  %v5062_v0 = vpop.f32.mrb[16].mxu1  ;;  %v938_v21 = vsel %vm596_vm2, %v932_v36, %v937_v18  ;;  %v8753_v50 = vshrl.u32 %v7475_v24, 16  ;;  %v960_v36 = vshrl.u32 %v7559_v5, 16 }
 0x15f   : > { %3167 = vmatprep.subr.bf16.mxu0 %v7243_v28  ;;  %v5063_v48 = vpop.f32.mrb[17].mxu1  ;;  %v1168_v18 = vlaneseq }
 0x160   : > { %v7709_v63 = vadd.f32 %v5063_v48, %v5062_v0  ;;  %v5065_v28 = vpop.f32.mrb[18].mxu1  ;;  %v873_v3 = vsel %vm563_vm3, %v871_v23, %v872_v9  ;;  %v939_v47 = vrot.slane %v8753_v50, 1  ;;  %v950_v23 = vor.u32 %v949_v44, %v948_v32 }
 0x161   : > { %3099 = vmatmul.mubr.bf16.gmra.mrb[8].mxu0 %v870_v6  ;;  %v5066_v60 = vpop.f32.mrb[19].mxu1  ;;  %v962_v50 = vrot.slane %v960_v36, 1 }
 0x162   : > { %3108 = vmatprep.mubr.bf16.mxu0 %v929_v25  ;;  %3168 = vmatpush1.bf16.msra.mxu0 %v7263_v62  ;;  %v8754_v62 = vshll.u32 %v7475_v24, 16  ;;  %v7721_v55 = vadd.f32 %v5066_v60, %v5065_v28  ;;  %v878_v25 = vrot.slane %v7479_v41, 1  ;;  %v958_v24 = vrot.slane %v830_v35, 2 }
 0x163   : > { %3169 = vmatprep.subr.bf16.mxu0 %v7279_v2  ;;  %v8755_v2 = vshll.u32 %v7479_v41, 16 }
 0x164   : > { %v940_v1 = vrot.slane %v8754_v62, 2  ;;  %v879_v28 = vsel %vm563_vm3, %v877_v19, %v878_v25  ;;  %v7754_v62 = vshrl.u32 %v1168_v18, 7 }
 0x165   : > { %v945_v27 = vrot.slane %v8755_v2, 2  ;;  %v881_v2 = vrot.slane %v7520_v40, 1 }
 0x166   : > { %3170 = vmatpush1.bf16.msra.mxu0 %v7291_v8  ;;  %v951_v8 = vshrl.u32 %v7520_v40, 16  ;;  %v941_v56 = vor.u32 %v940_v1, %v939_v47  ;;  %v5068_v17 = vpop.f32.mrb[20].mxu1  ;;  %v8759_v47 = vshll.u32 %v7559_v5, 16  ;;  %v8760_v5 = vmov 0  }
 0x167   : > { %3171 = vmatprep.subr.bf16.mxu0 %v7300_v20  ;;  %v946_v54 = vor.u32 %v945_v27, %v944_v42  ;;  %v5069_v4 = vpop.f32.mrb[21].mxu1  ;;  %v876_v20 = vsel %vm563_vm3, %v874_v7, %v875_v43  ;;  %v880_v42 = vrot.slane %v7516_v59, 1  ;;  %v1178_v7 = vsub.s32 2, %v7754_v62  ;;  %v7764_v43 = vld [vmem:[%s8701_s5] sm:$0x7] }
 0x168   : > { %v7729_v58 = vadd.f32 %v5069_v4, %v5068_v17  ;;  %v5071_v6 = vpop.f32.mrb[22].mxu1  ;;  %v953_v29 = vrot.slane %v951_v8, 1  ;;  %v963_v60 = vrot.slane %v8759_v47, 2 }
 0x169   : > { %3109 = vmatmul.mubr.bf16.gmra.mrb[12].mxu0 %v873_v3  ;;  %v947_v13 = vsel %vm596_vm2, %v941_v56, %v946_v54  ;;  %v882_v17 = vsel %vm563_vm3, %v880_v42, %v881_v2 }
 0x16a   : > { %3118 = vmatprep.mubr.bf16.mxu0 %v938_v21  ;;  %3172 = vmatpush1.bf16.msra.mxu0 %v7324_v26  ;;  %v8758_v26 = vshll.u32 %v7520_v40, 16  ;;  %v957_v21 = vrot.slane %v828_v10, 1  ;;  %v964_v10 = vor.u32 %v963_v60, %v962_v50  ;;  %v7771_v40 = vrot.slane %v7764_v43, %v1178_v7 }
 0x16b   : > { %3173 = vmatprep.subr.bf16.mxu0 %v7341_v51  ;;  %v5072_v51 = vpop.f32.mrb[23].mxu1 }
 0x16c   : > { %v954_v52 = vrot.slane %v8758_v26, 2  ;;  %v7739_v34 = vadd.f32 %v5072_v51, %v5071_v6  ;;  %v959_v27 = vor.u32 %v958_v24, %v957_v21  ;;  %v883_v6 = vrot.slane %v7555_v12, 1 }
 0x16d   : > { %v2197_v32 = vadd.f32 %v7627_v15, %v7771_v40  ;;  %v974_v15 = vrot.slane %v7226_v22, 2  ;;  %v2208_v18 = vadd.f32 %v7664_v49, %v7771_v40  ;;  %v2213_v49 = vadd.f32 %v7671_v16, %v7771_v40 }
 0x16e   : > { %3174 = vmatpush1.bf16.msra.mxu0 %v7357_v33  ;;  %v955_v9 = vor.u32 %v954_v52, %v953_v29  ;;  %v5074_v39 = vpop.f32.mrb[24].mxu1  ;;  %v965_v59 = vsel %vm596_vm2, %v959_v27, %v964_v10  ;;  %v2200_v29 = vadd.f32 %v7642_v38, %v7771_v40  ;;  %v885_v51 = vsel %vm563_vm3, %v883_v6, %v884_v45 }
 0x16f   : > { %v5075_v0 = vpop.f32.mrb[25].mxu1  ;;  %v2205_v38 = vadd.f32 %v7654_v37, %v7771_v40  ;;  %v978_v37 = vrot.slane %v7313_v11, 2  ;;  %v2216_v50 = vadd.f32 %v7683_v14, %v7771_v40  ;;  %v2221_v11 = vadd.f32 %v7691_v53, %v7771_v40 }
 0x170   : > { %v7744_v48 = vadd.f32 %v5075_v0, %v5074_v39  ;;  %v5077_v33 = vpop.f32.mrb[26].mxu1  ;;  %v956_v3 = vsel %vm596_vm2, %v950_v23, %v955_v9  ;;  %v975_v23 = vrot.slane %v7252_v31, 2  ;;  %v977_v31 = vrot.slane %v7283_v57, 2 }
 0x171   : > { %3119 = vmatmul.mubr.bf16.gmra.mrb[16].mxu0 %v876_v20  ;;  %v5078_v41 = vpop.f32.mrb[27].mxu1  ;;  %v2229_v6 = vadd.f32 %v7709_v63, %v7771_v40  ;;  %v2232_v53 = vadd.f32 %v7721_v55, %v7771_v40  ;;  %v2240_v63 = vadd.f32 %v7739_v34, %v7771_v40 }
 0x172   : > { %3128 = vmatprep.mubr.bf16.mxu0 %v947_v13  ;;  %v7756_v1 = vadd.f32 %v5078_v41, %v5077_v33  ;;  %v976_v33 = vsel %vm677_vm5, %v974_v15, %v975_v23  ;;  %v979_v42 = vsel %vm677_vm5, %v977_v31, %v978_v37 }
 0x176   : > { %v5080_v35 = vpop.f32.mrb[28].mxu1 }
 0x177   : > { %v5081_v8 = vpop.f32.mrb[29].mxu1 }
 0x178   : > { %v7766_v56 = vadd.f32 %v5081_v8, %v5080_v35  ;;  %v5083_v54 = vpop.f32.mrb[30].mxu1  ;;  %v2224_v35 = vadd.f32 %v7702_v61, %v7771_v40 }
 0x179   : > { %3129 = vmatmul.mubr.bf16.gmra.mrb[20].mxu0 %v879_v28  ;;  %v5084_v4 = vpop.f32.mrb[31].mxu1 }
 0x17a   : > { %3138 = vmatprep.mubr.bf16.mxu0 %v956_v3  ;;  %v7773_v20 = vadd.f32 %v5084_v4, %v5083_v54  ;;  %v2253_v37 = vadd.f32 %v7766_v56, %v7771_v40 }
 0x17e   : > { %v5102_v46 = vpop.f32.mrb[32].mxu1 }
 0x17f   : > { %v5103_v44 = vpop.f32.mrb[33].mxu1 }
 0x180   : > { %v5104_v26 = vadd.f32 %v5103_v44, %v5102_v46  ;;  %v5105_v52 = vpop.f32.mrb[34].mxu1 }
 0x181   : > { %3139 = vmatmul.mubr.bf16.gmra.mrb[24].mxu0 %v882_v17  ;;  %v5106_v13 = vpop.f32.mrb[35].mxu1 }
 0x182   : > { %3148 = vmatprep.mubr.bf16.mxu0 %v965_v59  ;;  %v7782_v19 = vadd.f32 %v5104_v26, %v2197_v32  ;;  %v5107_v25 = vadd.f32 %v5106_v13, %v5105_v52 }
 0x184   : > { %v7784_v12 = vadd.f32 %v5107_v25, %v2200_v29 }
 0x186   : > { %v5108_v9 = vpop.f32.mrb[36].mxu1 }
 0x187   : > { %v5109_v36 = vpop.f32.mrb[37].mxu1 }
 0x188   : > { %v5110_v39 = vadd.f32 %v5109_v36, %v5108_v9  ;;  %v5111_v0 = vpop.f32.mrb[38].mxu1  ;;  %v2245_v36 = vadd.f32 %v7744_v48, %v7771_v40  ;;  %v2256_v48 = vadd.f32 %v7773_v20, %v7771_v40 }
 0x189   : > { %3149 = vmatmul.mubr.bf16.gmra.mrb[28].mxu0 %v885_v51  ;;  %v5112_v28 = vpop.f32.mrb[39].mxu1  ;;  %v2237_v51 = vadd.f32 %v7729_v58, %v7771_v40  ;;  %v2248_v58 = vadd.f32 %v7756_v1, %v7771_v40 }
 0x18a   : > { %3191 = vmatprep.mubr.bf16.mxu0 %v8760_v5  ;;  %v7794_v3 = vadd.f32 %v5110_v39, %v2205_v38  ;;  %v5113_v21 = vadd.f32 %v5112_v28, %v5111_v0 }
 0x18c   : > { %v7796_v22 = vadd.f32 %v5113_v21, %v2208_v18 }
 0x18e   : > { %v5114_v24 = vpop.f32.mrb[40].mxu1 }
 0x18f   : > { %v5115_v41 = vpop.f32.mrb[41].mxu1 }
 0x190   : > { %v5116_v47 = vadd.f32 %v5115_v41, %v5114_v24  ;;  %v5117_v60 = vpop.f32.mrb[42].mxu1 }
 0x191   : > { %3192 = vmatmul.mubr.bf16.vlgmr.msra.gmra.mrb[0].mxu0 %v976_v33  ;;  %v5118_v2 = vpop.f32.mrb[43].mxu1 }
 0x192   : > { %3201 = vmatprep.mubr.bf16.mxu0 %v8760_v5  ;;  %v7806_v27 = vadd.f32 %v5116_v47, %v2213_v49  ;;  %v5119_v10 = vadd.f32 %v5118_v2, %v5117_v60 }
 0x194   : > { %v7808_v57 = vadd.f32 %v5119_v10, %v2216_v50 }
 0x196   : > { %v5120_v16 = vpop.f32.mrb[44].mxu1 }
 0x197   : > { %v5121_v7 = vpop.f32.mrb[45].mxu1 }
 0x198   : > { %v5122_v14 = vadd.f32 %v5121_v7, %v5120_v16  ;;  %v5123_v8 = vpop.f32.mrb[46].mxu1 }
 0x199   : > { %3202 = vmatmul.mubr.bf16.gmra.mrb[4].mxu0 %v979_v42  ;;  %v5124_v54 = vpop.f32.mrb[47].mxu1 }
 0x19a   : > { %v7814_v17 = vadd.f32 %v5122_v14, %v2221_v11  ;;  %v5125_v4 = vadd.f32 %v5124_v54, %v5123_v8  ;;  %v5959_v14 = vld [vmem:[%s8700_s4 + $0x40] sm:$0xff]  }
 0x19b   : > { %v5960_v54 = vld [vmem:[%s8700_s4] sm:$0xff]   ;;  %5166 = vmatprep.subr.bf16.mxu1 %v5959_v14 }
 0x19c   : > { %v7816_v59 = vadd.f32 %v5125_v4, %v2224_v35  ;;  %5167 = vmatpush3.bf16.msra.mxu1 %v5960_v54 }
 0x19e   : > { %8761 = vst [vmem:[#allocation2_spill] sm:$0xff] %v7816_v59  ;;  %v5126_v45 = vpop.f32.mrb[48].mxu1 }
 0x19f   : > { %v5127_v32 = vpop.f32.mrb[49].mxu1 }
 0x1a0   : > { %v5128_v46 = vadd.f32 %v5127_v32, %v5126_v45  ;;  %v5129_v44 = vpop.f32.mrb[50].mxu1  ;;  %v5961_v45 = vld [vmem:[%s8700_s4 + $0x48] sm:$0xff]  }
 0x1a1   : > { %v5130_v29 = vpop.f32.mrb[51].mxu1  ;;  %v5962_v32 = vld [vmem:[%s8700_s4 + $0x8] sm:$0xff]   ;;  %5168 = vmatprep.subr.bf16.mxu1 %v5961_v45 }
 0x1a2   : > { %v7822_v61 = vadd.f32 %v5128_v46, %v2229_v6  ;;  %v5131_v26 = vadd.f32 %v5130_v29, %v5129_v44  ;;  %5169 = vmatpush3.bf16.msra.mxu1 %v5962_v32 }
 0x1a4   : > { %8762 = vst [vmem:[#allocation3_spill] sm:$0xff] %v7822_v61  ;;  %v7824_v52 = vadd.f32 %v5131_v26, %v2232_v53  ;;  %v5963_v26 = vld [vmem:[%s8700_s4 + $0x50] sm:$0xff]  }
 0x1a5   : > { %5170 = vmatprep.subr.bf16.mxu1 %v5963_v26 }
 0x1a6   : > { %8763 = vst [vmem:[#allocation4_spill] sm:$0xff] %v7824_v52  ;;  %v5132_v13 = vpop.f32.mrb[52].mxu1 }
 0x1a7   : > { %v5133_v25 = vpop.f32.mrb[53].mxu1 }
 0x1a8   : > { %v5134_v5 = vadd.f32 %v5133_v25, %v5132_v13  ;;  %v5135_v15 = vpop.f32.mrb[54].mxu1  ;;  %v5965_v13 = vld [vmem:[%s8700_s4 + $0x58] sm:$0xff]  }
 0x1a9   : > { %v5136_v23 = vpop.f32.mrb[55].mxu1 }
 0x1aa   : > { %v7830_v55 = vadd.f32 %v5134_v5, %v2237_v51  ;;  %v5137_v38 = vadd.f32 %v5136_v23, %v5135_v15  ;;  %v5964_v51 = vld [vmem:[%s8700_s4 + $0x10] sm:$0xff]  }
 0x1ab   : > { %5171 = vmatpush3.bf16.msra.mxu1 %v5964_v51 }
 0x1ac   : > { %8764 = vst [vmem:[#allocation5_spill] sm:$0xff] %v7830_v55  ;;  %v7832_v9 = vadd.f32 %v5137_v38, %v2240_v63  ;;  %v5966_v63 = vld [vmem:[%s8700_s4 + $0x18] sm:$0xff]   ;;  %5172 = vmatprep.subr.bf16.mxu1 %v5965_v13  ;;  %v5967_v38 = vld [vmem:[%s8700_s4 + $0x60] sm:$0xff]  }
 0x1ae   : > { %8765 = vst [vmem:[#allocation6_spill] sm:$0xff] %v7832_v9  ;;  %v5138_v18 = vpop.f32.mrb[56].mxu1 }
 0x1af   : > { %v5139_v39 = vpop.f32.mrb[57].mxu1  ;;  %5173 = vmatpush3.bf16.msra.mxu1 %v5966_v63 }
 0x1b0   : > { %v5140_v0 = vadd.f32 %v5139_v39, %v5138_v18  ;;  %v5141_v33 = vpop.f32.mrb[58].mxu1  ;;  %5174 = vmatprep.subr.bf16.mxu1 %v5967_v38  ;;  %v5969_v18 = vld [vmem:[%s8700_s4 + $0x68] sm:$0xff]  }
 0x1b1   : > { %v5142_v28 = vpop.f32.mrb[59].mxu1 }
 0x1b2   : > { %v7838_v34 = vadd.f32 %v5140_v0, %v2245_v36  ;;  %v5143_v21 = vadd.f32 %v5142_v28, %v5141_v33  ;;  %v5968_v36 = vld [vmem:[%s8700_s4 + $0x20] sm:$0xff]  }
 0x1b3   : > { %5175 = vmatpush3.bf16.msra.mxu1 %v5968_v36 }
 0x1b4   : > { %8766 = vst [vmem:[#allocation7_spill] sm:$0xff] %v7838_v34  ;;  %v7840_v31 = vadd.f32 %v5143_v21, %v2248_v58  ;;  %v5970_v58 = vld [vmem:[%s8700_s4 + $0x28] sm:$0xff]   ;;  %5176 = vmatprep.subr.bf16.mxu1 %v5969_v18  ;;  %v5971_v21 = vld [vmem:[%s8700_s4 + $0x70] sm:$0xff]  }
 0x1b6   : > { %8767 = vst [vmem:[#allocation8_spill] sm:$0xff] %v7840_v31  ;;  %v5144_v49 = vpop.f32.mrb[60].mxu1 }
 0x1b7   : > { %v5145_v24 = vpop.f32.mrb[61].mxu1  ;;  %5177 = vmatpush3.bf16.msra.mxu1 %v5970_v58 }
 0x1b8   : > { %v5146_v41 = vadd.f32 %v5145_v24, %v5144_v49  ;;  %v5147_v50 = vpop.f32.mrb[62].mxu1  ;;  %5178 = vmatprep.subr.bf16.mxu1 %v5971_v21  ;;  %v5973_v49 = vld [vmem:[%s8700_s4 + $0x78] sm:$0xff]  }
 0x1b9   : > { %v5148_v47 = vpop.f32.mrb[63].mxu1  ;;  %v5974_v24 = vld [vmem:[%s8700_s4 + $0x38] sm:$0xff]  }
 0x1ba   : > { %v7846_v1 = vadd.f32 %v5146_v41, %v2253_v37  ;;  %v5149_v60 = vadd.f32 %v5148_v47, %v5147_v50  ;;  %v5972_v37 = vld [vmem:[%s8700_s4 + $0x30] sm:$0xff]   ;;  %v1170_v41 = vsub.s32 0, %v7754_v62  ;;  %v1174_v50 = vsub.s32 1, %v7754_v62 }
 0x1bb   : > { %5179 = vmatpush3.bf16.msra.mxu1 %v5972_v37 }
 0x1bc   : > { %8768 = vst [vmem:[#allocation9_spill] sm:$0xff] %v7846_v1  ;;  %v7848_v42 = vadd.f32 %v5149_v60, %v2256_v48  ;;  %5180 = vmatprep.subr.bf16.mxu1 %v5973_v49  ;;  %v5975_v48 = vld [vmem:[%s8700_s4 + $0xc0] sm:$0xff]   ;;  %v7952_v47 = vrot.slane %v7764_v43, %v1170_v41  ;;  %v7955_v60 = vrot.slane %v7764_v43, %v1174_v50 }
 0x1be   : > { %8769 = vst [vmem:[#allocation10_spill] sm:$0xff] %v7848_v42  ;;  %8770 = vst [vmem:[#allocation11_spill] sm:$0xff] %v7952_v47 }
 0x1bf   : > { %5181 = vmatpush3.bf16.msra.mxu1 %v5974_v24 }
 0x1c0   : > { %5230 = vmatprep.subr.bf16.mxu1 %v5975_v48 }
 0x1de   : > { %v7850_v2 = vpop.f32.mrb[80].mxu1 }
 0x1df   : > { %v7852_v10 = vpop.f32.mrb[81].mxu1 }
 0x1e0   : > { %v7854_v11 = vpop.f32.mrb[82].mxu1 }
 0x1e1   : > { %v7856_v56 = vpop.f32.mrb[83].mxu1 }
 0x1e6   : > { %v7858_v16 = vpop.f32.mrb[84].mxu1 }
 0x1e7   : > { %v7860_v7 = vpop.f32.mrb[85].mxu1 }
 0x1e8   : > { %v7862_v40 = vpop.f32.mrb[86].mxu1 }
 0x1e9   : > { %v7864_v20 = vpop.f32.mrb[87].mxu1 }
 0x1ee   : > { %v7866_v35 = vpop.f32.mrb[88].mxu1 }
 0x1ef   : > { %v7871_v8 = vpop.f32.mrb[89].mxu1 }
 0x1f0   : > { %v7876_v4 = vpop.f32.mrb[90].mxu1 }
 0x1f1   : > { %v7878_v6 = vpop.f32.mrb[91].mxu1 }
 0x1f6   : > { %v7886_v53 = vpop.f32.mrb[92].mxu1 }
 0x1f7   : > { %v7888_v46 = vpop.f32.mrb[93].mxu1 }
 0x1f8   : > { %v7890_v44 = vpop.f32.mrb[94].mxu1 }
 0x1f9   : > { %v7892_v29 = vpop.f32.mrb[95].mxu1 }
 0x1fe   : > { %v7903_v25 = vpop.f32.mrb[96].mxu1 }
 0x1ff   : > { %v7908_v5 = vpop.f32.mrb[97].mxu1 }
 0x200   : > { %v7910_v15 = vpop.f32.mrb[98].mxu1 }
 0x201   : > { %v7912_v23 = vpop.f32.mrb[99].mxu1 }
 0x206   : > { %v7923_v39 = vpop.f32.mrb[100].mxu1 }
 0x207   : > { %v7928_v0 = vpop.f32.mrb[101].mxu1 }
 0x208   : > { %v7930_v33 = vpop.f32.mrb[102].mxu1 }
 0x209   : > { %v7932_v28 = vpop.f32.mrb[103].mxu1 }
 0x234   : > { %v3100_v14 = vpop.f32.mrb[8].mxu0 }
 0x235   : > { %v5398_v54 = vadd.f32 %v3100_v14, %v7952_v47  ;;  %v3102_v45 = vpop.f32.mrb[9].mxu0 }
 0x236   : > { %v5400_v32 = vadd.f32 %v3102_v45, %v7955_v60  ;;  %v3104_v26 = vpop.f32.mrb[10].mxu0 }
 0x237   : > { %v5402_v51 = vadd.f32 %v3104_v26, %v7952_v47  ;;  %v7961_v13 = vadd.f32 %v5398_v54, %v7850_v2  ;;  %v3106_v63 = vpop.f32.mrb[11].mxu0 }
 0x238   : > { %v5404_v62 = vadd.f32 %v3106_v63, %v7955_v60  ;;  %v5401_v38 = vadd.f32 %v5400_v32, %v7852_v10 }
 0x239   : > { %8771 = vst [vmem:[#allocation12_spill] sm:$0xff] %v7961_v13  ;;  %v7966_v43 = vadd.f32 %v5402_v51, %v7854_v11 }
 0x23a   : > { %v4952_v36 = vmul.f32 -1.442695, %v5401_v38  ;;  %v5405_v18 = vadd.f32 %v5404_v62, %v7856_v56 }
 0x23b   : > { %8772 = vst [vmem:[#allocation13_spill] sm:$0xff] %v7966_v43 }
 0x23c   : > { %5999 = vpow2.f32 %v4952_v36  ;;  %v4953_v58 = vmul.f32 -1.442695, %v5405_v18  ;;  %v3110_v21 = vpop.f32.mrb[12].mxu0 }
 0x23d   : > { %v5406_v37 = vadd.f32 %v3110_v21, %v7952_v47  ;;  %v3112_v49 = vpop.f32.mrb[13].mxu0 }
 0x23e   : > { %6001 = vpow2.f32 %v4953_v58  ;;  %v5408_v2 = vadd.f32 %v3112_v49, %v7955_v60  ;;  %v3114_v24 = vpop.f32.mrb[14].mxu0 }
 0x23f   : > { %v5410_v48 = vadd.f32 %v3114_v24, %v7952_v47  ;;  %v7973_v10 = vadd.f32 %v5406_v37, %v7858_v16  ;;  %v3116_v11 = vpop.f32.mrb[15].mxu0 }
 0x240   : > { %v5412_v41 = vadd.f32 %v3116_v11, %v7955_v60  ;;  %v5409_v56 = vadd.f32 %v5408_v2, %v7860_v7 }
 0x241   : > { %8773 = vst [vmem:[#allocation14_spill] sm:$0xff] %v7973_v10  ;;  %v7978_v50 = vadd.f32 %v5410_v48, %v7862_v40 }
 0x242   : > { %v5413_v14 = vadd.f32 %v5412_v41, %v7864_v20  ;;  %v4954_v54 = vmul.f32 -1.442695, %v5409_v56 }
 0x243   : > { %8774 = vst [vmem:[#allocation15_spill] sm:$0xff] %v7978_v50 }
 0x244   : > { %v4955_v45 = vmul.f32 -1.442695, %v5413_v14  ;;  %v3120_v32 = vpop.f32.mrb[16].mxu0  ;;  %6003 = vpow2.f32 %v4954_v54 }
 0x245   : > { %v5414_v26 = vadd.f32 %v3120_v32, %v7952_v47  ;;  %v3122_v51 = vpop.f32.mrb[17].mxu0 }
 0x246   : > { %v6000_v63 = vpop.eup %5999  ;;  %v5416_v16 = vadd.f32 %v3122_v51, %v7955_v60  ;;  %v3124_v62 = vpop.f32.mrb[18].mxu0  ;;  %6005 = vpow2.f32 %v4955_v45 }
 0x247   : > { %v3452_v38 = vadd.f32 1.0, %v6000_v63  ;;  %v5418_v36 = vadd.f32 %v3124_v62, %v7952_v47  ;;  %v7985_v7 = vadd.f32 %v5414_v26, %v7866_v35  ;;  %v3126_v40 = vpop.f32.mrb[19].mxu0 }
 0x248   : > { %v6002_v18 = vpop.eup %6001  ;;  %v5420_v20 = vadd.f32 %v3126_v40, %v7955_v60  ;;  %v5417_v58 = vadd.f32 %v5416_v16, %v7871_v8 }
 0x249   : > { %8775 = vst [vmem:[#allocation16_spill] sm:$0xff] %v7985_v7  ;;  %6007 = vrcp.f32 %v3452_v38  ;;  %v3453_v21 = vadd.f32 1.0, %v6002_v18  ;;  %v7990_v37 = vadd.f32 %v5418_v36, %v7876_v4 }
 0x24a   : > { %v4956_v49 = vmul.f32 -1.442695, %v5417_v58  ;;  %v5421_v2 = vadd.f32 %v5420_v20, %v7878_v6  ;;  %v6159_v58 = vld [vmem:[%s7157_s21 + $0x20] sm:$0xff] }
 0x24b   : > { %8776 = vst [vmem:[#allocation17_spill] sm:$0xff] %v7990_v37  ;;  %6009 = vrcp.f32 %v3453_v21  ;;  %v6160_v21 = vld [vmem:[%s7157_s21 + $0x28] sm:$0xff] }
 0x24c   : > { %v4957_v24 = vmul.f32 -1.442695, %v5421_v2  ;;  %v3130_v48 = vpop.f32.mrb[20].mxu0  ;;  %6011 = vpow2.f32 %v4956_v49 }
 0x24d   : > { %v5422_v35 = vadd.f32 %v3130_v48, %v7952_v47  ;;  %v3132_v11 = vpop.f32.mrb[21].mxu0 }
 0x24e   : > { %v5424_v41 = vadd.f32 %v3132_v11, %v7955_v60  ;;  %v3134_v56 = vpop.f32.mrb[22].mxu0  ;;  %6013 = vpow2.f32 %v4957_v24  ;;  %v6004_v45 = vpop.eup %6003 }
 0x24f   : > { %v5426_v8 = vadd.f32 %v3134_v56, %v7952_v47  ;;  %v7997_v14 = vadd.f32 %v5422_v35, %v7886_v53  ;;  %v3136_v4 = vpop.f32.mrb[23].mxu0  ;;  %v3454_v36 = vadd.f32 1.0, %v6004_v45 }
 0x250   : > { %v5428_v6 = vadd.f32 %v3136_v4, %v7955_v60  ;;  %v5425_v54 = vadd.f32 %v5424_v41, %v7888_v46  ;;  %v6006_v26 = vpop.eup %6005 }
 0x251   : > { %8777 = vst [vmem:[#allocation18_spill] sm:$0xff] %v7997_v14  ;;  %v8002_v32 = vadd.f32 %v5426_v8, %v7890_v44  ;;  %v3455_v40 = vadd.f32 1.0, %v6006_v26 }
 0x252   : > { %v4958_v51 = vmul.f32 -1.442695, %v5425_v54  ;;  %v5429_v63 = vadd.f32 %v5428_v6, %v7892_v29 }
 0x253   : > { %8778 = vst [vmem:[#allocation19_spill] sm:$0xff] %v8002_v32  ;;  %v6008_v16 = vpop.eup %6007 }
 0x254   : > { %v4959_v62 = vmul.f32 -1.442695, %v5429_v63  ;;  %v3140_v38 = vpop.f32.mrb[24].mxu0  ;;  %v8007_v46 = vmul.f32 %v6159_v58, %v6008_v16  ;;  %6015 = vpow2.f32 %v4958_v51 }
 0x255   : > { %v6010_v53 = vpop.eup %6009  ;;  %v5430_v18 = vadd.f32 %v3140_v38, %v7952_v47  ;;  %v3142_v20 = vpop.f32.mrb[25].mxu0 }
 0x256   : > { %v8010_v49 = vmul.f32 %v6160_v21, %v6010_v53  ;;  %v5432_v44 = vadd.f32 %v3142_v20, %v7955_v60  ;;  %v3144_v2 = vpop.f32.mrb[26].mxu0  ;;  %v6012_v29 = vpop.eup %6011  ;;  %6017 = vpow2.f32 %v4959_v62 }
 0x257   : > { %v5434_v24 = vadd.f32 %v3144_v2, %v7952_v47  ;;  %v8015_v48 = vadd.f32 %v5430_v18, %v7903_v25  ;;  %v3146_v35 = vpop.f32.mrb[27].mxu0  ;;  %v3456_v11 = vadd.f32 1.0, %v6012_v29  ;;  %6019 = vrcp.f32 %v3455_v40 }
 0x258   : > { %v5436_v41 = vadd.f32 %v3146_v35, %v7955_v60  ;;  %v5433_v56 = vadd.f32 %v5432_v44, %v7908_v5  ;;  %v3514_v8 = vpack.c.bf16 %v8010_v49, %v8007_v46  ;;  %v6014_v4 = vpop.eup %6013  ;;  %6021 = vrcp.f32 %v3454_v36 }
 0x259   : > { %8779 = vst [vmem:[#allocation20_spill] sm:$0xff] %v8015_v48  ;;  %v8022_v6 = vadd.f32 %v5434_v24, %v7910_v15  ;;  %v3457_v54 = vadd.f32 1.0, %v6014_v4  ;;  %6023 = vrcp.f32 %v3456_v11 }
 0x25a   : > { %v4960_v45 = vmul.f32 -1.442695, %v5433_v56  ;;  %v5437_v25 = vadd.f32 %v5436_v41, %v7912_v23  ;;  %v6161_v56 = vld [vmem:[%s7157_s21 + $0x38] sm:$0xff] }
 0x25b   : > { %8780 = vst [vmem:[#allocation21_spill] sm:$0xff] %v8022_v6  ;;  %6025 = vrcp.f32 %v3457_v54 }
 0x25c   : > { %v4961_v26 = vmul.f32 -1.442695, %v5437_v25  ;;  %v3150_v51 = vpop.f32.mrb[28].mxu0  ;;  %6027 = vpow2.f32 %v4960_v45 }
 0x25d   : > { %v5438_v63 = vadd.f32 %v3150_v51, %v7952_v47  ;;  %v3152_v5 = vpop.f32.mrb[29].mxu0  ;;  %v6163_v51 = vld [vmem:[%s7157_s21 + $0x30] sm:$0xff] }
 0x25e   : > { %v5440_v16 = vadd.f32 %v3152_v5, %v7955_v60  ;;  %v3154_v62 = vpop.f32.mrb[30].mxu0  ;;  %v6016_v36 = vpop.eup %6015  ;;  %6029 = vpow2.f32 %v4961_v26 }
 0x25f   : > { %v5442_v38 = vadd.f32 %v3154_v62, %v7952_v47  ;;  %v8029_v15 = vadd.f32 %v5438_v63, %v7923_v39  ;;  %v3156_v53 = vpop.f32.mrb[31].mxu0  ;;  %v3458_v11 = vadd.f32 1.0, %v6016_v36 }
 0x260   : > { %v5444_v23 = vadd.f32 %v3156_v53, %v7955_v60  ;;  %v5441_v40 = vadd.f32 %v5440_v16, %v7928_v0  ;;  %v6018_v18 = vpop.eup %6017  ;;  %v6164_v16 = vld [vmem:[%s7157_s21 + $0x40] sm:$0xff] }
 0x261   : > { %8781 = vst [vmem:[#allocation22_spill] sm:$0xff] %v8029_v15  ;;  %v8034_v20 = vadd.f32 %v5442_v38, %v7930_v33  ;;  %v6020_v44 = vpop.eup %6019  ;;  %v3459_v2 = vadd.f32 1.0, %v6018_v18 }
 0x262   : > { %v4962_v58 = vmul.f32 -1.442695, %v5441_v40  ;;  %v5445_v21 = vadd.f32 %v5444_v23, %v7932_v28  ;;  %v6022_v39 = vpop.eup %6021  ;;  %v8040_v4 = vmul.f32 %v6161_v56, %v6020_v44  ;;  %v6162_v28 = vld [vmem:[%s7157_s21 + $0x48] sm:$0xff] }
 0x263   : > { %8782 = vst [vmem:[#allocation23_spill] sm:$0xff] %v8034_v20  ;;  %v6024_v35 = vpop.eup %6023  ;;  %v3502_v63 = vmul.f32 %v6163_v51, %v6022_v39  ;;  %v8184_v20 = vld [vmem:[%s7157_s21 + $0x18] sm:$0xff] }
 0x264   : > { %v4963_v29 = vmul.f32 -1.442695, %v5445_v21  ;;  %v8037_v24 = vpop.f32.mrb[0].mxu0  ;;  %6031 = vpow2.f32 %v4962_v58  ;;  %v8051_v62 = vmul.f32 %v6164_v16, %v6024_v35  ;;  %v6166_v16 = vld [vmem:[%s7157_s21 + $0x50] sm:$0xff]  ;;  %8792 = vst [vmem:[#allocation29_spill] sm:$0xff] %v8184_v20 }
 0x265   : > { %8783 = vst [vmem:[#allocation24_spill] sm:$0xff] %v8037_v24  ;;  %v3195_v41 = vpop.f32.mrb[1].mxu0  ;;  %v6026_v0 = vpop.eup %6025  ;;  %6033 = vrcp.f32 %v3459_v2  ;;  %v3515_v23 = vpack.c.bf16 %v8040_v4, %v3502_v63  ;;  %v8065_v4 = vrot.slane %v3514_v8, 7  ;;  %v6167_v8 = vld [vmem:[%s7157_s21 + $0x60] sm:$0xff] }
 0x266   : > { %v5391_v33 = vadd.f32 %v3195_v41, %v7955_v60  ;;  %v8043_v54 = vpop.f32.mrb[2].mxu0  ;;  %v8046_v45 = vmul.f32 %v6162_v28, %v6026_v0  ;;  %v6028_v26 = vpop.eup %6027  ;;  %6035 = vpow2.f32 %v4963_v29 }
 0x267   : > { %8784 = vst [vmem:[#allocation25_spill] sm:$0xff] %v8043_v54  ;;  %v3199_v25 = vpop.f32.mrb[3].mxu0  ;;  %6037 = vrcp.f32 %v3458_v11  ;;  %v3460_v38 = vadd.f32 1.0, %v6028_v26  ;;  %v6165_v26 = vld [vmem:[%s7157_s21 + $0x58] sm:$0xff] }
 0x268   : > { %v5393_v5 = vadd.f32 %v3199_v25, %v7955_v60  ;;  %v6030_v53 = vpop.eup %6029  ;;  %v4948_v36 = vmul.f32 -1.442695, %v5391_v33  ;;  %v3516_v18 = vpack.c.bf16 %v8046_v45, %v8051_v62 }
 0x269   : > { %6039 = vrcp.f32 %v3460_v38  ;;  %v3461_v40 = vadd.f32 1.0, %v6030_v53 }
 0x26a   : > { %v4949_v58 = vmul.f32 -1.442695, %v5393_v5 }
 0x26b   : > { %6041 = vrcp.f32 %v3461_v40 }
 0x26c   : > { %v8056_v21 = vpop.f32.mrb[4].mxu0  ;;  %6043 = vpow2.f32 %v4948_v36  ;;  %v6168_v36 = vld [vmem:[%s7157_s21 + $0x68] sm:$0xff] }
 0x26d   : > { %8785 = vst [vmem:[#allocation26_spill] sm:$0xff] %v8056_v21  ;;  %v3205_v44 = vpop.f32.mrb[5].mxu0  ;;  %6045 = vpow2.f32 %v4949_v58  ;;  %v8081_v58 = vsel %vm424_vm0, %v8065_v4, 0 }
 0x26e   : > { %v8058_v2 = vpop.f32.mrb[6].mxu0  ;;  %v5395_v39 = vadd.f32 %v3205_v44, %v7955_v60  ;;  %v6032_v35 = vpop.eup %6031 }
 0x26f   : > { %8786 = vst [vmem:[#allocation27_spill] sm:$0xff] %v8058_v2  ;;  %v3209_v29 = vpop.f32.mrb[7].mxu0  ;;  %v6034_v11 = vpop.eup %6033  ;;  %v3462_v41 = vadd.f32 1.0, %v6032_v35  ;;  %v5980_v2 = vld [vmem:[%s8700_s4 + $0x90] sm:$0xff]  }
 0x270   : > { %v5397_v0 = vadd.f32 %v3209_v29, %v7955_v60  ;;  %v6036_v56 = vpop.eup %6035  ;;  %v4950_v25 = vmul.f32 -1.442695, %v5395_v39  ;;  %v3507_v51 = vmul.f32 %v6165_v26, %v6034_v11  ;;  %v8071_v60 = vsel %vm424_vm0, 0, %v8065_v4 }
 0x271   : > { %v6038_v33 = vpop.eup %6037  ;;  %v3463_v28 = vadd.f32 1.0, %v6036_v56  ;;  %6047 = vrcp.f32 %v3462_v41  ;;  %v3588_v29 = vshrl.u32 %v8071_v60, 16  ;;  %v3590_v35 = vshll.u32 %v8071_v60, 16 }
 0x272   : > { %v4951_v5 = vmul.f32 -1.442695, %v5397_v0  ;;  %v3506_v38 = vmul.f32 %v6166_v16, %v6038_v33  ;;  %v3725_v56 = vshrl.u32 %v8081_v58, 16  ;;  %v3594_v33 = vshll.u32 %v8081_v58, 16  ;;  %v6169_v16 = vld [vmem:[%s7157_s21 + $0x78] sm:$0xff] }
 0x273   : > { %v6040_v63 = vpop.eup %6039  ;;  %6049 = vrcp.f32 %v3463_v28  ;;  %v8089_v28 = vrot.slane %v3515_v23, 7  ;;  %v3723_v26 = vrot.slane %v3590_v35, 2  ;;  %v3592_v23 = vrot.slane %v3590_v35, 1 }
 0x274   : > { %6051 = vpow2.f32 %v4950_v25  ;;  %v8074_v53 = vmul.f32 %v6167_v8, %v6040_v63  ;;  %v3517_v44 = vpack.c.bf16 %v3507_v51, %v3506_v38  ;;  %v3722_v25 = vrot.slane %v3588_v29, 1 }
 0x275   : > { %v6042_v46 = vpop.eup %6041  ;;  %6053 = vpow2.f32 %v4951_v5  ;;  %v3727_v5 = vrot.slane %v3725_v56, 1  ;;  %v8104_v41 = vrot.slane %v3516_v18, 7  ;;  %v8111_v35 = vsel %vm424_vm0, %v8089_v28, 0 }
 0x276   : > { %v6044_v49 = vpop.eup %6043  ;;  %v8077_v40 = vmul.f32 %v6168_v36, %v6042_v46  ;;  %v8096_v46 = vsel %vm424_vm0, 0, %v8089_v28  ;;  %v6170_v36 = vld [vmem:[%s7157_s21 + $0x70] sm:$0xff] }
 0x277   : > { %v3448_v39 = vadd.f32 1.0, %v6044_v49  ;;  %v6046_v11 = vpop.eup %6045  ;;  %v3728_v49 = vrot.slane %v3594_v33, 2  ;;  %v3600_v45 = vshll.u32 %v8096_v46, 16  ;;  %v8119_v18 = vsel %vm424_vm0, 0, %v8104_v41 }
 0x278   : > { %v3449_v0 = vadd.f32 1.0, %v6046_v11  ;;  %v3724_v11 = vor.u32 %v3723_v26, %v3722_v25  ;;  %v3593_v26 = vor.u32 %v3592_v23, %v3588_v29  ;;  %v6171_v29 = vld [vmem:[%s7157_s21] sm:$0xff]  ;;  %v8789_v1 = vshrl.u32 %v8119_v18, 16 }
 0x279   : > { %6055 = vrcp.f32 %v3448_v39  ;;  %v3729_v6 = vor.u32 %v3728_v49, %v3727_v5  ;;  %v8121_v5 = vrot.slane %v3517_v44, 7  ;;  %v8146_v44 = vrot.slane %v3600_v45, 1 }
 0x27a   : > { %6057 = vrcp.f32 %v3449_v0  ;;  %v8790_v15 = vshll.u32 %v8119_v18, 16  ;;  %v8810_v13 = vshll.u32 %v8119_v18, 16 }
 0x27b   : > { %v6048_v51 = vpop.eup %6047  ;;  %v8115_v62 = vsel %vm596_vm2, %v3724_v11, %v3729_v6  ;;  %v8133_v11 = vsel %vm424_vm0, %v8104_v41, 0 }
 0x27c   : > { %v8099_v39 = vmul.f32 %v6170_v36, %v6048_v51  ;;  %v8151_v36 = vsel %vm424_vm0, %v8121_v5, 0  ;;  %v3741_v31 = vrot.slane %v8790_v15, 2 }
 0x27d   : > { %v6050_v63 = vpop.eup %6049 }
 0x27e   : > { %v8092_v38 = vmul.f32 %v6169_v16, %v6050_v63  ;;  %v6052_v8 = vpop.eup %6051  ;;  %v8728_v63 = vshrl.u32 %v8096_v46, 16 }
 0x27f   : > { %v3450_v0 = vadd.f32 1.0, %v6052_v8  ;;  %v6054_v56 = vpop.eup %6053  ;;  %v3596_v8 = vrot.slane %v3594_v33, 1 }
 0x280   : > { %v3451_v51 = vadd.f32 1.0, %v6054_v56  ;;  %v6172_v56 = vld [vmem:[%s7157_s21 + $0x8] sm:$0xff] }
 0x281   : > { %6059 = vrcp.f32 %v3450_v0  ;;  %v3731_v0 = vrot.slane %v8728_v63, 1  ;;  %v8129_v6 = vsel %vm458_vm1, %v3593_v26, %v3596_v8  ;;  %v8139_v63 = vsel %vm424_vm0, 0, %v8121_v5 }
 0x282   : > { %6061 = vrcp.f32 %v3451_v51  ;;  %v3732_v51 = vrot.slane %v3600_v45, 2  ;;  %v8787_v26 = vshll.u32 %v8111_v35, 16 }
 0x283   : > { %v6056_v25 = vpop.eup %6055 }
 0x284   : > { %v6058_v49 = vpop.eup %6057  ;;  %v3496_v23 = vmul.f32 %v6171_v29, %v6056_v25  ;;  %v3734_v25 = vshrl.u32 %v8111_v35, 16  ;;  %v3737_v8 = vrot.slane %v8787_v26, 2  ;;  %v3681_v29 = vrot.slane %v8096_v46, 1 }
 0x285   : > { %v3497_v16 = vmul.f32 %v6172_v56, %v6058_v49  ;;  %v3733_v49 = vor.u32 %v3732_v51, %v3731_v0  ;;  %v3682_v56 = vrot.slane %v8111_v35, 1  ;;  %v3740_v0 = vrot.slane %v8789_v1, 1 }
 0x287   : > { %v3512_v33 = vpack.c.bf16 %v3497_v16, %v3496_v23  ;;  %v3736_v23 = vrot.slane %v3734_v25, 1  ;;  %v8156_v51 = vsel %vm563_vm3, %v3681_v29, %v3682_v56  ;;  %v8788_v25 = vpack.c.bf16 %v8077_v40, %v8074_v53 }
 0x288   : > { %v3743_v40 = vshrl.u32 %v8133_v11, 16 }
 0x289   : > { %v3528_v42 = vrot.slane %v3512_v33, 7  ;;  %v8167_v16 = vrot.slane %v8788_v25, 7  ;;  %v3738_v56 = vor.u32 %v3737_v8, %v3736_v23  ;;  %v8180_v25 = vld [vmem:[%s7157_s21 + $0x10] sm:$0xff] }
 0x28a   : > { %8791 = vst [vmem:[#allocation28_spill] sm:$0xff] %v8180_v25 }
 0x28b   : > { %v6060_v26 = vpop.eup %6059  ;;  %v8159_v45 = vsel %vm424_vm0, 0, %v3528_v42  ;;  %v8162_v33 = vsel %vm424_vm0, %v3528_v42, 0  ;;  %v8194_v37 = vsel %vm424_vm0, 0, %v8167_v16  ;;  %v8204_v9 = vsel %vm596_vm2, %v3733_v49, %v3738_v56 }
 0x28c   : > { %v6062_v48 = vpop.eup %6061  ;;  %v3672_v34 = vrot.slane %v8159_v45, 1  ;;  %v3673_v53 = vrot.slane %v8162_v33, 1  ;;  %v3498_v1 = vmul.f32 %v8180_v25, %v6060_v26  ;;  %v8731_v23 = vshrl.u32 %v8159_v45, 16 }
 0x28d   : > { %v3499_v8 = vmul.f32 %v8184_v20, %v6062_v48  ;;  %v8793_v15 = vshll.u32 %v8159_v45, 16  ;;  %v8794_v32 = vshll.u32 %v8162_v33, 16  ;;  %v8795_v26 = vshll.u32 %v8133_v11, 16 }
 0x28e   : > { %v8197_v7 = vsel %vm563_vm3, %v3672_v34, %v3673_v53  ;;  %v8211_v55 = vsel %vm424_vm0, %v8167_v16, 0  ;;  %v8796_v34 = vpack.c.bf16 %v8092_v38, %v8099_v39 }
 0x28f   : > { %v3572_v29 = vrot.slane %v8793_v15, 1  ;;  %v3576_v14 = vrot.slane %v8794_v32, 1  ;;  %v3746_v25 = vrot.slane %v8795_v26, 2  ;;  %v3513_v20 = vpack.c.bf16 %v3499_v8, %v3498_v1  ;;  %v5976_v32 = vld [vmem:[%s8700_s4 + $0x80] sm:$0xff]  }
 0x290   : > { %v3742_v15 = vor.u32 %v3741_v31, %v3740_v0  ;;  %v8216_v53 = vrot.slane %v8796_v34, 7  ;;  %v3745_v26 = vrot.slane %v3743_v40, 1  ;;  %v5977_v31 = vld [vmem:[%s8700_s4 + $0xc8] sm:$0xff]   ;;  %v3685_v0 = vrot.slane %v8133_v11, 1 }
 0x291   : > { %v3573_v48 = vor.u32 %v3572_v29, %v8731_v23  ;;  %v3684_v29 = vrot.slane %v8119_v18, 1  ;;  %v3529_v56 = vrot.slane %v3513_v20, 7  ;;  %v8797_v1 = vshrl.u32 %v8139_v63, 16 }
 0x292   : > { %v3747_v40 = vor.u32 %v3746_v25, %v3745_v26  ;;  %v8798_v34 = vshll.u32 %v8139_v63, 16  ;;  %v3761_v50 = vshrl.u32 %v8211_v55, 16 }
 0x293   : > { %v3577_v49 = vsel %vm458_vm1, %v3573_v48, %v3576_v14  ;;  %v3749_v8 = vrot.slane %v8797_v1, 1  ;;  %v8233_v14 = vsel %vm424_vm0, 0, %v3529_v56  ;;  %v8236_v20 = vsel %vm424_vm0, %v3529_v56, 0 }
 0x294   : > { %4168 = vmatprep.mubr.bf16.mxu1 %v3577_v49  ;;  %v3750_v23 = vrot.slane %v8798_v34, 2  ;;  %v8239_v48 = vsel %vm563_vm3, %v3684_v29, %v3685_v0  ;;  %v3752_v49 = vshrl.u32 %v8151_v36, 16  ;;  %v8249_v1 = vsel %vm424_vm0, 0, %v8216_v53 }
 0x295   : > { %5005 = vmatmul.mubr.msk.bf16.vlgmr.msra.gmra.mrb[104].mxu1 %vm6499_vm4, %v3528_v42  ;;  %v5978_v42 = vld [vmem:[%s8700_s4 + $0x88] sm:$0xff]   ;;  %v8799_v34 = vshll.u32 %v8151_v36, 16  ;;  %v3675_v29 = vrot.slane %v8233_v14, 1  ;;  %v3676_v0 = vrot.slane %v8236_v20, 1  ;;  %v8259_v38 = vsel %vm596_vm2, %v3742_v15, %v3747_v40 }
 0x296   : > { %5231 = vmatpush3.bf16.msra.mxu1 %v5976_v32  ;;  %v5979_v32 = vld [vmem:[%s8700_s4 + $0xd0] sm:$0xff]   ;;  %v3751_v26 = vor.u32 %v3750_v23, %v3749_v8  ;;  %v8732_v25 = vshrl.u32 %v8233_v14, 16  ;;  %v8800_v52 = vshll.u32 %v8233_v14, 16  ;;  %v3754_v15 = vrot.slane %v3752_v49, 1 }
 0x297   : > { %v3755_v39 = vrot.slane %v8799_v34, 2  ;;  %5232 = vmatprep.subr.bf16.mxu1 %v5977_v31  ;;  %v8267_v31 = vsel %vm424_vm0, %v8216_v53, 0  ;;  %v8272_v24 = vsel %vm563_vm3, %v3675_v29, %v3676_v0  ;;  %v8801_v8 = vshll.u32 %v8236_v20, 16 }
 0x298   : > { %v3582_v54 = vrot.slane %v8800_v52, 1  ;;  %v3687_v40 = vrot.slane %v8139_v63, 1  ;;  %v3688_v34 = vrot.slane %v8151_v36, 1  ;;  %v8802_v49 = vshrl.u32 %v8194_v37, 16 }
 0x299   : > { %v3586_v52 = vrot.slane %v8801_v8, 1  ;;  %v3756_v0 = vor.u32 %v3755_v39, %v3754_v15  ;;  %v5981_v8 = vld [vmem:[%s8700_s4 + $0xd8] sm:$0xff]   ;;  %v8804_v29 = vshll.u32 %v8211_v55, 16  ;;  %v8805_v15 = vshrl.u32 %v8096_v46, 16 }
 0x29a   : > { %v3583_v23 = vor.u32 %v3582_v54, %v8732_v25  ;;  %5233 = vmatpush3.bf16.msra.mxu1 %v5978_v42  ;;  %v3758_v61 = vrot.slane %v8802_v49, 1  ;;  %v8803_v54 = vshll.u32 %v8194_v37, 16  ;;  %v8806_v21 = vshrl.u32 %v8249_v1, 16 }
 0x29b   : > { %5234 = vmatprep.subr.bf16.mxu1 %v5979_v32  ;;  %v8293_v32 = vsel %vm563_vm3, %v3687_v40, %v3688_v34  ;;  %v3764_v39 = vrot.slane %v8804_v29, 2  ;;  %v3603_v49 = vor.u32 %v8146_v44, %v8805_v15  ;;  %v3763_v34 = vrot.slane %v3761_v50, 1 }
 0x29c   : > { %v3759_v25 = vrot.slane %v8803_v54, 2  ;;  %v3587_v42 = vsel %vm458_vm1, %v3583_v23, %v3586_v52  ;;  %v8302_v54 = vsel %vm596_vm2, %v3751_v26, %v3756_v0  ;;  %v3690_v52 = vrot.slane %v8194_v37, 1 }
 0x29d   : > { %4176 = vmatprep.mubr.bf16.mxu1 %v3587_v42  ;;  %v3691_v40 = vrot.slane %v8211_v55, 1  ;;  %v3767_v29 = vrot.slane %v8806_v21, 1  ;;  %v8807_v42 = vshll.u32 %v8249_v1, 16  ;;  %v3770_v44 = vshrl.u32 %v8267_v31, 16  ;;  %v5983_v21 = vld [vmem:[%s8700_s4 + $0xe0] sm:$0xff]  }
 0x29e   : > { %v3760_v23 = vor.u32 %v3759_v25, %v3758_v61  ;;  %5007 = vmatmul.mubr.msk.bf16.gmra.mrb[108].mxu1 %vm6499_vm4, %v3529_v56  ;;  %v5982_v61 = vld [vmem:[%s8700_s4 + $0x98] sm:$0xff]   ;;  %v8808_v56 = vshll.u32 %v8267_v31, 16  ;;  %v3693_v25 = vrot.slane %v8249_v1, 1  ;;  %v3694_v26 = vrot.slane %v8267_v31, 1 }
 0x29f   : > { %v3768_v47 = vrot.slane %v8807_v42, 2  ;;  %4184 = vmatprep.mubr.bf16.mxu1 %v8129_v6  ;;  %5235 = vmatpush3.bf16.msra.mxu1 %v5980_v2  ;;  %v3765_v6 = vor.u32 %v3764_v39, %v3763_v34  ;;  %v8325_v2 = vsel %vm563_vm3, %v3690_v52, %v3691_v40  ;;  %v3784_v15 = vrot.slane %v8159_v45, 2  ;;  %v5984_v34 = vld [vmem:[%s8700_s4 + $0xa0] sm:$0xff]  }
 0x2a0   : > { %v3773_v50 = vrot.slane %v8808_v56, 2  ;;  %5236 = vmatprep.subr.bf16.mxu1 %v5981_v8  ;;  %v3772_v42 = vrot.slane %v3770_v44, 1  ;;  %v8329_v10 = vsel %vm563_vm3, %v3693_v25, %v3694_v26  ;;  %v3785_v56 = vrot.slane %v8162_v33, 2 }
 0x2a1   : > { %v3769_v0 = vor.u32 %v3768_v47, %v3767_v29  ;;  %v3787_v59 = vrot.slane %v8233_v14, 2  ;;  %v8809_v8 = vshll.u32 %v8111_v35, 16  ;;  %v3612_v39 = vrot.slane %v8810_v13, 1 }
 0x2a2   : > { %v8338_v52 = vsel %vm596_vm2, %v3760_v23, %v3765_v6  ;;  %v3788_v47 = vrot.slane %v8236_v20, 2  ;;  %v3774_v40 = vor.u32 %v3773_v50, %v3772_v42  ;;  %v8345_v29 = vsel %vm677_vm5, %v3784_v15, %v3785_v56  ;;  %v5985_v23 = vld [vmem:[%s8700_s4 + $0xe8] sm:$0xff]   ;;  %v5987_v56 = vld [vmem:[%s8700_s4 + $0xf0] sm:$0xff]  }
 0x2a3   : > { %v3606_v43 = vrot.slane %v8809_v8, 1  ;;  %5237 = vmatpush3.bf16.msra.mxu1 %v5982_v61  ;;  %v3793_v44 = vrot.slane %v8096_v46, 2  ;;  %v3794_v25 = vrot.slane %v8111_v35, 2  ;;  %v3796_v26 = vrot.slane %v8119_v18, 2  ;;  %v5986_v15 = vld [vmem:[%s8700_s4 + $0xa8] sm:$0xff]  }
 0x2a4   : > { %5238 = vmatprep.subr.bf16.mxu1 %v5983_v21  ;;  %v8354_v61 = vsel %vm677_vm5, %v3787_v59, %v3788_v47  ;;  %v3797_v50 = vrot.slane %v8133_v11, 2  ;;  %v8359_v6 = vsel %vm596_vm2, %v3769_v0, %v3774_v40  ;;  %v3800_v35 = vrot.slane %v8151_v36, 2 }
 0x2a5   : > { %v3607_v13 = vsel %vm458_vm1, %v3603_v49, %v3606_v43  ;;  %v8362_v46 = vsel %vm677_vm5, %v3793_v44, %v3794_v25  ;;  %v3799_v43 = vrot.slane %v8139_v63, 2  ;;  %v3802_v49 = vrot.slane %v8194_v37, 2  ;;  %v5988_v44 = vld [vmem:[%s8700_s4 + $0xb0] sm:$0xff]  }
 0x2a6   : > { %5009 = vmatmul.mubr.msk.bf16.gmra.mrb[112].mxu1 %vm6499_vm4, %v8065_v4  ;;  %v8370_v59 = vsel %vm677_vm5, %v3796_v26, %v3797_v50  ;;  %v3803_v21 = vrot.slane %v8211_v55, 2  ;;  %v3805_v0 = vrot.slane %v8249_v1, 2  ;;  %v3806_v4 = vrot.slane %v8267_v31, 2  ;;  %v5991_v50 = vld [vmem:[%s8700_s4 + $0x100] sm:$0xff]  }
 0x2a7   : > { %4192 = vmatprep.mubr.bf16.mxu1 %v3607_v13  ;;  %5239 = vmatpush3.bf16.msra.mxu1 %v5984_v34  ;;  %v8379_v42 = vsel %vm677_vm5, %v3799_v43, %v3800_v35  ;;  %v8811_v34 = vshrl.u32 %v8119_v18, 16  ;;  %v8812_v25 = vshll.u32 %v8133_v11, 16  ;;  %v5990_v11 = vld [vmem:[%s8700_s4 + $0xb8] sm:$0xff]   ;;  %v8814_v43 = vshrl.u32 %v8139_v63, 16 }
 0x2a8   : > { %5240 = vmatprep.subr.bf16.mxu1 %v5985_v23  ;;  %v8386_v8 = vsel %vm677_vm5, %v3802_v49, %v3803_v21  ;;  %v8389_v47 = vsel %vm677_vm5, %v3805_v0, %v3806_v4  ;;  %v5989_v23 = vld [vmem:[%s8700_s4 + $0xf8] sm:$0xff]   ;;  %v8816_v0 = vshll.u32 %v8194_v37, 16  ;;  %v8817_v4 = vshrl.u32 %v8194_v37, 16 }
 0x2a9   : > { %v3613_v40 = vor.u32 %v3612_v39, %v8811_v34  ;;  %v3616_v13 = vrot.slane %v8812_v25, 1  ;;  %v8813_v39 = vshll.u32 %v8139_v63, 16  ;;  %v8818_v63 = vshll.u32 %v8211_v55, 16 }
 0x2aa   : > { %v8820_v25 = vshrl.u32 %v8249_v1, 16  ;;  %v8821_v37 = vshll.u32 %v8267_v31, 16  ;;  %v8822_v55 = vshrl.u32 %v8159_v45, 16 }
 0x2ab   : > { %5241 = vmatpush3.bf16.msra.mxu1 %v5986_v15  ;;  %v3617_v18 = vsel %vm458_vm1, %v3613_v40, %v3616_v13  ;;  %v3622_v26 = vrot.slane %v8813_v39, 1  ;;  %v3632_v15 = vrot.slane %v8816_v0, 1  ;;  %v3636_v34 = vrot.slane %v8818_v63, 1 }
 0x2ac   : > { %5242 = vmatprep.subr.bf16.mxu1 %v5987_v56  ;;  %v8823_v39 = vshll.u32 %v8159_v45, 16  ;;  %v8825_v45 = vshrl.u32 %v8233_v14, 16 }
 0x2ad   : > { %v3623_v35 = vor.u32 %v3622_v26, %v8814_v43  ;;  %v3633_v56 = vor.u32 %v3632_v15, %v8817_v4  ;;  %v8827_v15 = vshll.u32 %v8236_v20, 16 }
 0x2ae   : > { %5011 = vmatmul.mubr.msk.bf16.gmra.mrb[116].mxu1 %vm6499_vm4, %v8089_v28  ;;  %v8815_v28 = vshll.u32 %v8151_v36, 16 }
 0x2af   : > { %4200 = vmatprep.mubr.bf16.mxu1 %v3617_v18  ;;  %5243 = vmatpush3.bf16.msra.mxu1 %v5988_v44  ;;  %v3637_v36 = vsel %vm458_vm1, %v3633_v56, %v3636_v34  ;;  %v3707_v44 = vshrl.u32 %v8162_v33, 16  ;;  %v3704_v18 = vrot.slane %v8822_v55, 1  ;;  %v3719_v4 = vrot.slane %v8827_v15, 2  ;;  %v5992_v34 = vld [vmem:[%s8700_s4 + $0x108] sm:$0xff]  }
 0x2b0   : > { %5244 = vmatprep.subr.bf16.mxu1 %v5989_v23  ;;  %v3626_v49 = vrot.slane %v8815_v28, 1  ;;  %v3646_v23 = vrot.slane %v8821_v37, 1  ;;  %v3716_v28 = vshrl.u32 %v8236_v20, 16  ;;  %v3678_v20 = vrot.slane %v8071_v60, 1 }
 0x2b1   : > { %v3709_v26 = vrot.slane %v3707_v44, 1 }
 0x2b2   : > { %v3627_v21 = vsel %vm458_vm1, %v3623_v35, %v3626_v49 }
 0x2b3   : > { %5245 = vmatpush3.bf16.msra.mxu1 %v5990_v11  ;;  %v8824_v11 = vshll.u32 %v8162_v33, 16  ;;  %v3713_v33 = vrot.slane %v8825_v45, 1 }
 0x2b4   : > { %5342 = vmatprep.subr.bf16.mxu1 %v5991_v50 }
 0x2b5   : > { %v3710_v43 = vrot.slane %v8824_v11, 2 }
 0x2b6   : > { %5013 = vmatmul.mubr.msk.bf16.gmra.mrb[120].mxu1 %vm6499_vm4, %v8104_v41  ;;  %v8819_v41 = vshll.u32 %v8249_v1, 16 }
 0x2b7   : > { %4208 = vmatprep.mubr.bf16.mxu1 %v3627_v21  ;;  %v3711_v31 = vor.u32 %v3710_v43, %v3709_v26  ;;  %v8826_v21 = vshll.u32 %v8233_v14, 16  ;;  %v5994_v14 = vld [vmem:[%s8700_s4 + $0x118] sm:$0xff]  }
 0x2b8   : > { %v3642_v40 = vrot.slane %v8819_v41, 1  ;;  %v5998_v41 = vld [vmem:[%s8700_s4 + $0x138] sm:$0xff]  }
 0x2b9   : > { %v3714_v0 = vrot.slane %v8826_v21, 2 }
 0x2ba   : > { %v3643_v13 = vor.u32 %v3642_v40, %v8820_v25 }
 0x2bb   : > { %v3715_v56 = vor.u32 %v3714_v0, %v3713_v33 }
 0x2bc   : > { %v3647_v1 = vsel %vm458_vm1, %v3643_v13, %v3646_v23 }
 0x2be   : > { %5015 = vmatmul.mubr.msk.bf16.gmra.mrb[124].mxu1 %vm6499_vm4, %v8121_v5  ;;  %v3705_v5 = vrot.slane %v8823_v39, 2 }
 0x2bf   : > { %4216 = vmatprep.mubr.bf16.mxu1 %v3637_v36  ;;  %v5996_v36 = vld [vmem:[%s8700_s4 + $0x128] sm:$0xff]  }
 0x2c0   : > { %v3706_v35 = vor.u32 %v3705_v5, %v3704_v18 }
 0x2c2   : > { %v3712_v49 = vsel %vm596_vm2, %v3706_v35, %v3711_v31 }
 0x2c6   : > { %5017 = vmatmul.mubr.msk.bf16.gmra.mrb[128].mxu1 %vm6499_vm4, %v8167_v16  ;;  %v3718_v16 = vrot.slane %v3716_v28, 1 }
 0x2c7   : > { %4224 = vmatprep.mubr.bf16.mxu1 %v3647_v1 }
 0x2c8   : > { %v3720_v63 = vor.u32 %v3719_v4, %v3718_v16 }
 0x2ca   : > { %v3721_v30 = vsel %vm596_vm2, %v3715_v56, %v3720_v63 }
 0x2ce   : > { %5019 = vmatmul.mubr.msk.bf16.gmra.mrb[132].mxu1 %vm6499_vm4, %v8216_v53  ;;  %v5993_v53 = vld [vmem:[%s8700_s4 + $0x110] sm:$0xff]  }
 0x2cf   : > { %4265 = vmatprep.mubr.bf16.mxu1 %v3712_v49 }
 0x2d6   : > { %4266 = vmatmul.mubr.bf16.vlgmr.msra.gmra.mrb[136].mxu1 %v8197_v7  ;;  %v5995_v7 = vld [vmem:[%s8700_s4 + $0x120] sm:$0xff]  }
 0x2d7   : > { %4273 = vmatprep.mubr.bf16.mxu1 %v3721_v30  ;;  %5343 = vmatpush3.bf16.msra.mxu1 %v5991_v50  ;;  %v3679_v50 = vrot.slane %v8081_v58, 1 }
 0x2d8   : > { %5344 = vmatprep.subr.bf16.mxu1 %v5992_v34 }
 0x2db   : > { %5345 = vmatpush3.bf16.msra.mxu1 %v5992_v34 }
 0x2dc   : > { %5346 = vmatprep.subr.bf16.mxu1 %v5993_v53 }
 0x2de   : > { %4274 = vmatmul.mubr.bf16.gmra.mrb[140].mxu1 %v8272_v24  ;;  %v3680_v24 = vsel %vm563_vm3, %v3678_v20, %v3679_v50 }
 0x2df   : > { %4281 = vmatprep.mubr.bf16.mxu1 %v8115_v62  ;;  %5347 = vmatpush3.bf16.msra.mxu1 %v5993_v53  ;;  %v5997_v62 = vld [vmem:[%s8700_s4 + $0x130] sm:$0xff]  }
 0x2e0   : > { %5348 = vmatprep.subr.bf16.mxu1 %v5994_v14 }
 0x2e3   : > { %5349 = vmatpush3.bf16.msra.mxu1 %v5994_v14 }
 0x2e4   : > { %5350 = vmatprep.subr.bf16.mxu1 %v5995_v7 }
 0x2e6   : > { %4282 = vmatmul.mubr.bf16.gmra.mrb[144].mxu1 %v3680_v24 }
 0x2e7   : > { %4289 = vmatprep.mubr.bf16.mxu1 %v8204_v9  ;;  %5351 = vmatpush3.bf16.msra.mxu1 %v5995_v7  ;;  %v3790_v9 = vrot.slane %v8071_v60, 2 }
 0x2e8   : > { %5352 = vmatprep.subr.bf16.mxu1 %v5996_v36 }
 0x2eb   : > { %5353 = vmatpush3.bf16.msra.mxu1 %v5996_v36 }
 0x2ec   : > { %5354 = vmatprep.subr.bf16.mxu1 %v5997_v62 }
 0x2ee   : > { %4290 = vmatmul.mubr.bf16.gmra.mrb[148].mxu1 %v8156_v51  ;;  %v3791_v51 = vrot.slane %v8081_v58, 2 }
 0x2ef   : > { %4297 = vmatprep.mubr.bf16.mxu1 %v8259_v38  ;;  %5355 = vmatpush3.bf16.msra.mxu1 %v5997_v62 }
 0x2f0   : > { %5356 = vmatprep.subr.bf16.mxu1 %v5998_v41  ;;  %v3792_v38 = vsel %vm677_vm5, %v3790_v9, %v3791_v51 }
 0x2f3   : > { %5357 = vmatpush3.bf16.msra.mxu1 %v5998_v41 }
 0x2f6   : > { %4298 = vmatmul.mubr.bf16.gmra.mrb[152].mxu1 %v8239_v48 }
 0x2f7   : > { %4305 = vmatprep.mubr.bf16.mxu1 %v8302_v54 }
 0x2fe   : > { %4306 = vmatmul.mubr.bf16.gmra.mrb[156].mxu1 %v8293_v32 }
 0x2ff   : > { %4313 = vmatprep.mubr.bf16.mxu1 %v8338_v52 }
 0x306   : > { %4314 = vmatmul.mubr.bf16.gmra.mrb[160].mxu1 %v8325_v2 }
 0x307   : > { %4321 = vmatprep.mubr.bf16.mxu1 %v8359_v6 }
 0x30e   : > { %4322 = vmatmul.mubr.bf16.gmra.mrb[164].mxu1 %v8329_v10 }
 0x30f   : > { %5358 = vmatprep.mubr.bf16.mxu1 %v8345_v29 }
 0x316   : > { %5359 = vmatmul.mubr.bf16.vlgmr.msra.gmra.mrb[64].mxu1 %v8354_v61 }
 0x317   : > { %5362 = vmatprep.mubr.bf16.mxu1 %v3792_v38 }
 0x31e   : > { %5363 = vmatmul.mubr.bf16.gmra.mrb[68].mxu1 %v8362_v46 }
 0x31f   : > { %5366 = vmatprep.mubr.bf16.mxu1 %v8370_v59 }
 0x326   : > { %5367 = vmatmul.mubr.bf16.gmra.mrb[72].mxu1 %v8379_v42 }
 0x327   : > { %5370 = vmatprep.mubr.bf16.mxu1 %v8386_v8 }
 0x32e   : > { %5371 = vmatmul.mubr.bf16.gmra.mrb[76].mxu1 %v8389_v47 }
 0x368   : > { %v5182_v10 = vpop.f32.mrb[104].mxu1 }
 0x369   : > { %v5183_v48 = vpop.f32.mrb[105].mxu1 }
 0x36a   : > { %v5184_v60 = vadd.f32 %v5183_v48, %v5182_v10  ;;  %v5185_v32 = vpop.f32.mrb[106].mxu1 }
 0x36b   : > { %v5186_v58 = vpop.f32.mrb[107].mxu1 }
 0x36c   : > { %v5187_v54 = vadd.f32 %v5186_v58, %v5185_v32 }
 0x371   : > { %v5188_v2 = vpop.f32.mrb[108].mxu1 }
 0x372   : > { %v5189_v52 = vpop.f32.mrb[109].mxu1 }
 0x373   : > { %v5190_v29 = vadd.f32 %v5189_v52, %v5188_v2  ;;  %v5191_v61 = vpop.f32.mrb[110].mxu1 }
 0x374   : > { %v5192_v6 = vpop.f32.mrb[111].mxu1 }
 0x375   : > { %v5193_v46 = vadd.f32 %v5192_v6, %v5191_v61 }
 0x379   : > { %v5194_v40 = vpop.f32.mrb[112].mxu1 }
 0x37a   : > { %v5195_v59 = vpop.f32.mrb[113].mxu1 }
 0x37b   : > { %v5196_v44 = vadd.f32 %v5195_v59, %v5194_v40  ;;  %v5197_v42 = vpop.f32.mrb[114].mxu1 }
 0x37c   : > { %v5198_v25 = vpop.f32.mrb[115].mxu1 }
 0x37d   : > { %v5199_v8 = vadd.f32 %v5198_v25, %v5197_v42 }
 0x381   : > { %v5200_v13 = vpop.f32.mrb[116].mxu1 }
 0x382   : > { %v5201_v47 = vpop.f32.mrb[117].mxu1 }
 0x383   : > { %v8507_v37 = vadd.f32 %v5201_v47, %v5200_v13  ;;  %v5203_v23 = vpop.f32.mrb[118].mxu1 }
 0x384   : > { %v5204_v55 = vpop.f32.mrb[119].mxu1 }
 0x385   : > { %v5205_v18 = vadd.f32 %v5204_v55, %v5203_v23 }
 0x389   : > { %v5206_v39 = vpop.f32.mrb[120].mxu1 }
 0x38a   : > { %v5207_v5 = vpop.f32.mrb[121].mxu1 }
 0x38b   : > { %v8509_v26 = vadd.f32 %v5207_v5, %v5206_v39  ;;  %v5209_v11 = vpop.f32.mrb[122].mxu1 }
 0x38c   : > { %v5210_v43 = vpop.f32.mrb[123].mxu1 }
 0x38d   : > { %v8511_v1 = vadd.f32 %v5210_v43, %v5209_v11 }
 0x391   : > { %v5212_v35 = vpop.f32.mrb[124].mxu1 }
 0x392   : > { %v5213_v31 = vpop.f32.mrb[125].mxu1 }
 0x393   : > { %v8513_v28 = vadd.f32 %v5213_v31, %v5212_v35  ;;  %v5215_v49 = vpop.f32.mrb[126].mxu1 }
 0x394   : > { %v5216_v45 = vpop.f32.mrb[127].mxu1 }
 0x395   : > { %v8515_v33 = vadd.f32 %v5216_v45, %v5215_v49  ;;  %v8829_v49 = vld [vmem:[#allocation13_spill] sm:$0xff] }
 0x399   : > { %v5218_v21 = vpop.f32.mrb[128].mxu1 }
 0x39a   : > { %v5219_v0 = vpop.f32.mrb[129].mxu1 }
 0x39b   : > { %v8517_v16 = vadd.f32 %v5219_v0, %v5218_v21  ;;  %v5221_v15 = vpop.f32.mrb[130].mxu1  ;;  %v8830_v21 = vld [vmem:[#allocation2_spill] sm:$0xff] }
 0x39c   : > { %v5222_v4 = vpop.f32.mrb[131].mxu1 }
 0x39d   : > { %v8519_v56 = vadd.f32 %v5222_v4, %v5221_v15 }
 0x3a1   : > { %v5224_v63 = vpop.f32.mrb[132].mxu1 }
 0x3a2   : > { %v5225_v34 = vpop.f32.mrb[133].mxu1 }
 0x3a3   : > { %v8521_v30 = vadd.f32 %v5225_v34, %v5224_v63  ;;  %v5227_v53 = vpop.f32.mrb[134].mxu1  ;;  %v8831_v63 = vld [vmem:[#allocation14_spill] sm:$0xff] }
 0x3a4   : > { %v5228_v14 = vpop.f32.mrb[135].mxu1  ;;  %v4938_v34 = vmul.f32 -1.442695, %v8831_v63 }
 0x3a5   : > { %v8523_v7 = vadd.f32 %v5228_v14, %v5227_v53  ;;  %v8833_v53 = vld [vmem:[#allocation26_spill] sm:$0xff] }
 0x3a9   : > { %v5246_v20 = vpop.f32.mrb[136].mxu1 }
 0x3aa   : > { %v5247_v50 = vpop.f32.mrb[137].mxu1 }
 0x3ab   : > { %v5248_v36 = vadd.f32 %v5247_v50, %v5246_v20  ;;  %v5249_v24 = vpop.f32.mrb[138].mxu1  ;;  %v8834_v50 = vld [vmem:[#allocation15_spill] sm:$0xff] }
 0x3ac   : > { %v5250_v62 = vpop.f32.mrb[139].mxu1 }
 0x3ad   : > { %v4268_v41 = vadd.f32 %v5248_v36, %v5184_v60  ;;  %v5251_v9 = vadd.f32 %v5250_v62, %v5249_v24  ;;  %v4939_v36 = vmul.f32 -1.442695, %v8834_v50  ;;  %v8835_v24 = vld [vmem:[#allocation24_spill] sm:$0xff]  ;;  %v8845_v50 = vld [vmem:[#allocation7_spill] sm:$0xff] }
 0x3af   : > { %v4271_v51 = vadd.f32 %v5251_v9, %v5187_v54  ;;  %v8526_v38 = vadd.f32 %v4268_v41, %v7782_v19  ;;  %v8836_v41 = vld [vmem:[#allocation27_spill] sm:$0xff] }
 0x3b1   : > { %v5252_v10 = vpop.f32.mrb[140].mxu1  ;;  %v8529_v48 = vadd.f32 %v4271_v51, %v7784_v12 }
 0x3b2   : > { %v5253_v32 = vpop.f32.mrb[141].mxu1 }
 0x3b3   : > { %v5254_v58 = vadd.f32 %v5253_v32, %v5252_v10  ;;  %v5255_v2 = vpop.f32.mrb[142].mxu1  ;;  %v8837_v10 = vld [vmem:[#allocation3_spill] sm:$0xff] }
 0x3b4   : > { %v5256_v52 = vpop.f32.mrb[143].mxu1 }
 0x3b5   : > { %v4276_v61 = vadd.f32 %v5254_v58, %v5190_v29  ;;  %v5257_v6 = vadd.f32 %v5256_v52, %v5255_v2  ;;  %v8838_v58 = vld [vmem:[#allocation25_spill] sm:$0xff] }
 0x3b7   : > { %v4279_v40 = vadd.f32 %v5257_v6, %v5193_v46  ;;  %v8532_v59 = vadd.f32 %v4276_v61, %v7794_v3  ;;  %v8839_v61 = vld [vmem:[#allocation4_spill] sm:$0xff] }
 0x3b9   : > { %v5258_v60 = vpop.f32.mrb[144].mxu1  ;;  %v8535_v54 = vadd.f32 %v4279_v40, %v7796_v22 }
 0x3ba   : > { %v5259_v19 = vpop.f32.mrb[145].mxu1 }
 0x3bb   : > { %v5260_v42 = vadd.f32 %v5259_v19, %v5258_v60  ;;  %v5261_v25 = vpop.f32.mrb[146].mxu1 }
 0x3bc   : > { %v5262_v13 = vpop.f32.mrb[147].mxu1 }
 0x3bd   : > { %v4284_v12 = vadd.f32 %v5260_v42, %v5196_v44  ;;  %v5263_v47 = vadd.f32 %v5262_v13, %v5261_v25  ;;  %v8828_v44 = vld [vmem:[#allocation12_spill] sm:$0xff] }
 0x3bf   : > { %v4287_v23 = vadd.f32 %v5263_v47, %v5199_v8  ;;  %v8538_v55 = vadd.f32 %v4284_v12, %v7806_v27  ;;  %v4936_v8 = vmul.f32 -1.442695, %v8828_v44  ;;  %v4937_v27 = vmul.f32 -1.442695, %v8829_v49 }
 0x3c1   : > { %v5264_v29 = vpop.f32.mrb[148].mxu1  ;;  %v8541_v46 = vadd.f32 %v4287_v23, %v7808_v57  ;;  %6063 = vpow2.f32 %v4936_v8 }
 0x3c2   : > { %v5265_v3 = vpop.f32.mrb[149].mxu1  ;;  %6065 = vpow2.f32 %v4937_v27 }
 0x3c3   : > { %v5266_v39 = vadd.f32 %v5265_v3, %v5264_v29  ;;  %v5267_v5 = vpop.f32.mrb[150].mxu1  ;;  %6067 = vpow2.f32 %v4938_v34 }
 0x3c4   : > { %v5268_v11 = vpop.f32.mrb[151].mxu1  ;;  %6069 = vpow2.f32 %v4939_v36 }
 0x3c5   : > { %v4292_v22 = vadd.f32 %v5266_v39, %v8507_v37  ;;  %v5269_v43 = vadd.f32 %v5268_v11, %v5267_v5  ;;  %v8840_v39 = vld [vmem:[#allocation5_spill] sm:$0xff] }
 0x3c7   : > { %v4295_v35 = vadd.f32 %v5269_v43, %v5205_v18  ;;  %v8545_v31 = vadd.f32 %v4292_v22, %v7814_v17  ;;  %v8832_v18 = vld [vmem:[#allocation11_spill] sm:$0xff]  ;;  %v8841_v43 = vld [vmem:[#allocation6_spill] sm:$0xff] }
 0x3c8   : > { %v5394_v17 = vadd.f32 %v8833_v53, %v8832_v18  ;;  %v5390_v62 = vadd.f32 %v8835_v24, %v8832_v18  ;;  %v5396_v9 = vadd.f32 %v8836_v41, %v8832_v18  ;;  %v5392_v2 = vadd.f32 %v8838_v58, %v8832_v18  ;;  %v8844_v18 = vld [vmem:[#allocation18_spill] sm:$0xff]  ;;  %v8848_v58 = vld [vmem:[#allocation8_spill] sm:$0xff] }
 0x3c9   : > { %v5270_v45 = vpop.f32.mrb[152].mxu1  ;;  %v8550_v0 = vadd.f32 %v4295_v35, %v8830_v21  ;;  %v4942_v53 = vmul.f32 -1.442695, %v8844_v18 }
 0x3ca   : > { %v5271_v57 = vpop.f32.mrb[153].mxu1  ;;  %v4934_v52 = vmul.f32 -1.442695, %v5394_v17  ;;  %v4932_v40 = vmul.f32 -1.442695, %v5390_v62  ;;  %v8846_v62 = vld [vmem:[#allocation19_spill] sm:$0xff] }
 0x3cb   : > { %v5272_v15 = vadd.f32 %v5271_v57, %v5270_v45  ;;  %v5273_v4 = vpop.f32.mrb[154].mxu1  ;;  %v4935_v19 = vmul.f32 -1.442695, %v5396_v9  ;;  %v4933_v13 = vmul.f32 -1.442695, %v5392_v2  ;;  %v6064_v23 = vpop.eup %6063 }
 0x3cc   : > { %v5274_v37 = vpop.f32.mrb[155].mxu1  ;;  %6071 = vpow2.f32 %v4934_v52  ;;  %v6066_v29 = vpop.eup %6065  ;;  %v3340_v11 = vadd.f32 1.0, %v6064_v23  ;;  %v4943_v41 = vmul.f32 -1.442695, %v8846_v62 }
 0x3cd   : > { %v4300_v14 = vadd.f32 %v5272_v15, %v8509_v26  ;;  %v5275_v20 = vadd.f32 %v5274_v37, %v5273_v4  ;;  %6073 = vpow2.f32 %v4932_v40  ;;  %v6068_v44 = vpop.eup %6067  ;;  %v3341_v8 = vadd.f32 1.0, %v6066_v29  ;;  %v8843_v15 = vld [vmem:[#allocation17_spill] sm:$0xff]  ;;  %v8850_v29 = vld [vmem:[#allocation23_spill] sm:$0xff] }
 0x3ce   : > { %6075 = vpow2.f32 %v4935_v19  ;;  %v6070_v57 = vpop.eup %6069  ;;  %v4941_v4 = vmul.f32 -1.442695, %v8843_v15  ;;  %v3342_v63 = vadd.f32 1.0, %v6068_v44 }
 0x3cf   : > { %v4303_v51 = vadd.f32 %v5275_v20, %v8511_v1  ;;  %v8563_v32 = vadd.f32 %v4300_v14, %v8837_v10  ;;  %6077 = vpow2.f32 %v4933_v13  ;;  %v3343_v14 = vadd.f32 1.0, %v6070_v57 }
 0x3d0   : > { %6079 = vrcp.f32 %v3340_v11  ;;  %v8851_v11 = vld [vmem:[#allocation9_spill] sm:$0xff] }
 0x3d1   : > { %v5276_v26 = vpop.f32.mrb[156].mxu1  ;;  %v8568_v6 = vadd.f32 %v4303_v51, %v8839_v61  ;;  %6081 = vrcp.f32 %v3341_v8  ;;  %v8847_v51 = vld [vmem:[#allocation20_spill] sm:$0xff]  ;;  %v8852_v8 = vld [vmem:[#allocation10_spill] sm:$0xff] }
 0x3d2   : > { %v5277_v60 = vpop.f32.mrb[157].mxu1 }
 0x3d3   : > { %v5278_v42 = vadd.f32 %v5277_v60, %v5276_v26  ;;  %v5279_v25 = vpop.f32.mrb[158].mxu1 }
 0x3d4   : > { %v5280_v1 = vpop.f32.mrb[159].mxu1 }
 0x3d5   : > { %v4308_v12 = vadd.f32 %v5278_v42, %v8513_v28  ;;  %v5281_v47 = vadd.f32 %v5280_v1, %v5279_v25  ;;  %v8842_v28 = vld [vmem:[#allocation16_spill] sm:$0xff] }
 0x3d6   : > { %v4940_v27 = vmul.f32 -1.442695, %v8842_v28  ;;  %v6072_v17 = vpop.eup %6071 }
 0x3d7   : > { %v4311_v3 = vadd.f32 %v5281_v47, %v8515_v33  ;;  %v8573_v5 = vadd.f32 %v4308_v12, %v8840_v39  ;;  %v6074_v24 = vpop.eup %6073  ;;  %v3338_v26 = vadd.f32 1.0, %v6072_v17  ;;  %v8849_v12 = vld [vmem:[#allocation22_spill] sm:$0xff] }
 0x3d8   : > { %6083 = vpow2.f32 %v4940_v27  ;;  %v6076_v9 = vpop.eup %6075  ;;  %v4946_v47 = vmul.f32 -1.442695, %v8849_v12 }
 0x3d9   : > { %v5282_v22 = vpop.f32.mrb[160].mxu1  ;;  %v8576_v35 = vadd.f32 %v4311_v3, %v8841_v43  ;;  %6085 = vpow2.f32 %v4941_v4  ;;  %v6078_v52 = vpop.eup %6077  ;;  %v3339_v19 = vadd.f32 1.0, %v6076_v9  ;;  %v4947_v3 = vmul.f32 -1.442695, %v8850_v29  ;;  %v8853_v4 = vld [vmem:[#allocation21_spill] sm:$0xff] }
 0x3da   : > { %v5283_v49 = vpop.f32.mrb[161].mxu1  ;;  %6087 = vrcp.f32 %v3342_v63  ;;  %v3337_v25 = vadd.f32 1.0, %v6078_v52  ;;  %v8593_v23 = vpop.eup %6079 }
 0x3db   : > { %v5284_v45 = vadd.f32 %v5283_v49, %v5282_v22  ;;  %v5285_v21 = vpop.f32.mrb[162].mxu1  ;;  %6089 = vpow2.f32 %v4942_v53  ;;  %v8600_v43 = vpop.eup %6081 }
 0x3dc   : > { %v5286_v33 = vpop.f32.mrb[163].mxu1  ;;  %6091 = vrcp.f32 %v3343_v14 }
 0x3dd   : > { %v4316_v34 = vadd.f32 %v5284_v45, %v8517_v16  ;;  %v5287_v37 = vadd.f32 %v5286_v33, %v5285_v21  ;;  %v4944_v16 = vmul.f32 -1.442695, %v8847_v51  ;;  %6093 = vpow2.f32 %v4943_v41 }
 0x3de   : > { %v4945_v33 = vmul.f32 -1.442695, %v8853_v4 }
 0x3df   : > { %v4319_v20 = vadd.f32 %v5287_v37, %v8519_v56  ;;  %v8584_v36 = vadd.f32 %v4316_v34, %v8845_v50  ;;  %v3336_v56 = vadd.f32 1.0, %v6074_v24  ;;  %6095 = vpow2.f32 %v4944_v16 }
 0x3e0   : > { %6097 = vrcp.f32 %v3338_v26 }
 0x3e1   : > { %v5288_v10 = vpop.f32.mrb[164].mxu1  ;;  %v8589_v2 = vadd.f32 %v4319_v20, %v8848_v58  ;;  %6099 = vrcp.f32 %v3336_v56 }
 0x3e2   : > { %v5289_v61 = vpop.f32.mrb[165].mxu1  ;;  %6101 = vrcp.f32 %v3339_v19  ;;  %v6084_v44 = vpop.eup %6083 }
 0x3e3   : > { %v5290_v40 = vadd.f32 %v5289_v61, %v5288_v10  ;;  %v5291_v60 = vpop.f32.mrb[166].mxu1  ;;  %6103 = vrcp.f32 %v3337_v25  ;;  %v6086_v28 = vpop.eup %6085  ;;  %v3344_v18 = vadd.f32 1.0, %v6084_v44  ;;  %v8855_v44 = vld [vmem:[#allocation29_spill] sm:$0xff] }
 0x3e4   : > { %v5292_v42 = vpop.f32.mrb[167].mxu1  ;;  %6105 = vpow2.f32 %v4946_v47  ;;  %v8606_v21 = vpop.eup %6087  ;;  %v3345_v17 = vadd.f32 1.0, %v6086_v28  ;;  %v4463_v47 = vsub.f32 1.0, %v8593_v23 }
 0x3e5   : > { %v4324_v13 = vadd.f32 %v5290_v40, %v8521_v30  ;;  %v5293_v1 = vadd.f32 %v5292_v42, %v5291_v60  ;;  %6107 = vpow2.f32 %v4947_v3  ;;  %v6090_v15 = vpop.eup %6089 }
 0x3e6   : > { %v8611_v37 = vpop.eup %6091  ;;  %v3346_v20 = vadd.f32 1.0, %v6090_v15 }
 0x3e7   : > { %v4327_v39 = vadd.f32 %v5293_v1, %v8523_v7  ;;  %v8598_v22 = vadd.f32 %v4324_v13, %v8851_v11  ;;  %v6094_v53 = vpop.eup %6093  ;;  %v8854_v13 = vld [vmem:[#allocation28_spill] sm:$0xff] }
 0x3e8   : > { %v3347_v58 = vadd.f32 1.0, %v6094_v53 }
 0x3e9   : > { %v5360_v30 = vpop.f32.mrb[64].mxu1  ;;  %v8603_v49 = vadd.f32 %v4327_v39, %v8852_v8  ;;  %v6096_v14 = vpop.eup %6095 }
 0x3ea   : > { %v5447_v27 = vadd.f32 %v8532_v59, %v5360_v30  ;;  %v4364_v45 = vpop.f32.mrb[65].mxu1  ;;  %v3348_v40 = vadd.f32 1.0, %v6096_v14 }
 0x3eb   : > { %v5449_v7 = vadd.f32 %v8526_v38, %v4364_v45  ;;  %v5361_v57 = vpop.f32.mrb[66].mxu1  ;;  %v6098_v38 = vpop.eup %6097 }
 0x3ec   : > { %6109 = vtanh.f32 %v5447_v27  ;;  %v5451_v63 = vadd.f32 %v8535_v54, %v5361_v57  ;;  %v4367_v34 = vpop.f32.mrb[67].mxu1  ;;  %v6100_v50 = vpop.eup %6099  ;;  %v4461_v51 = vsub.f32 1.0, %v6098_v38 }
 0x3ed   : > { %6111 = vtanh.f32 %v5449_v7  ;;  %v5453_v59 = vadd.f32 %v8529_v48, %v4367_v34  ;;  %v6102_v62 = vpop.eup %6101  ;;  %v4459_v52 = vsub.f32 1.0, %v6100_v50  ;;  %v6176_v7 = vld [vmem:[%s7157_s21 + $0x8] sm:$0xff]  ;;  %v4465_v34 = vsub.f32 1.0, %v8606_v21 }
 0x3ee   : > { %6113 = vtanh.f32 %v5451_v63  ;;  %v6104_v9 = vpop.eup %6103  ;;  %v4462_v60 = vsub.f32 1.0, %v6102_v62  ;;  %v4477_v1 = vmul.f32 %v8854_v13, %v4461_v51  ;;  %v6177_v51 = vld [vmem:[%s7157_s21 + $0x30] sm:$0xff] }
 0x3ef   : > { %6115 = vtanh.f32 %v5453_v59  ;;  %v6106_v10 = vpop.eup %6105  ;;  %v4460_v42 = vsub.f32 1.0, %v6104_v9 }
 0x3f0   : > { %6117 = vpow2.f32 %v4945_v33  ;;  %v6108_v56 = vpop.eup %6107  ;;  %v3350_v25 = vadd.f32 1.0, %v6106_v10  ;;  %v4478_v30 = vmul.f32 %v8855_v44, %v4462_v60  ;;  %v6178_v10 = vld [vmem:[%s7157_s21 + $0x20] sm:$0xff] }
 0x3f1   : > { %6119 = vrcp.f32 %v3344_v18  ;;  %v5364_v24 = vpop.f32.mrb[68].mxu1  ;;  %v4476_v57 = vmul.f32 %v6176_v7, %v4460_v42  ;;  %v3351_v14 = vadd.f32 1.0, %v6108_v56 }
 0x3f2   : > { %6121 = vrcp.f32 %v3345_v17  ;;  %v5455_v54 = vadd.f32 %v8545_v31, %v5364_v24  ;;  %v4380_v41 = vpop.f32.mrb[69].mxu1  ;;  %v4466_v24 = vsub.f32 1.0, %v8611_v37 }
 0x3f3   : > { %6123 = vrcp.f32 %v3346_v20  ;;  %v5457_v48 = vadd.f32 %v8538_v55, %v4380_v41  ;;  %v5365_v16 = vpop.f32.mrb[70].mxu1  ;;  %v4464_v41 = vsub.f32 1.0, %v8600_v43 }
 0x3f4   : > { %6125 = vtanh.f32 %v5455_v54  ;;  %v5459_v26 = vadd.f32 %v8550_v0, %v5365_v16  ;;  %v4383_v61 = vpop.f32.mrb[71].mxu1 }
 0x3f5   : > { %6127 = vtanh.f32 %v5457_v48  ;;  %v5461_v31 = vadd.f32 %v8541_v46, %v4383_v61  ;;  %v6175_v46 = vld [vmem:[%s7157_s21] sm:$0xff]  ;;  %v4481_v48 = vmul.f32 %v6177_v51, %v4465_v34  ;;  %v6179_v61 = vld [vmem:[%s7157_s21 + $0x38] sm:$0xff] }
 0x3f6   : > { %v6110_v19 = vpop.eup %6109  ;;  %6129 = vtanh.f32 %v5459_v26  ;;  %v4475_v29 = vmul.f32 %v6175_v46, %v4459_v52  ;;  %v4482_v56 = vmul.f32 %v6179_v61, %v4466_v24 }
 0x3f7   : > { %v6112_v55 = vpop.eup %6111  ;;  %v4493_v12 = vmul.f32 %v6110_v19, %v6098_v38  ;;  %6131 = vtanh.f32 %v5461_v31  ;;  %v6180_v19 = vld [vmem:[%s7157_s21 + $0x28] sm:$0xff] }
 0x3f8   : > { %v6114_v0 = vpop.eup %6113  ;;  %6133 = vrcp.f32 %v3347_v58  ;;  %v4491_v3 = vmul.f32 %v6112_v55, %v6100_v50  ;;  %v4479_v58 = vmul.f32 %v6178_v10, %v4463_v47  ;;  %v4480_v42 = vmul.f32 %v6180_v19, %v4464_v41  ;;  %v6185_v41 = vld [vmem:[%s7157_s21 + $0x70] sm:$0xff] }
 0x3f9   : > { %v6116_v39 = vpop.eup %6115  ;;  %6135 = vrcp.f32 %v3348_v40  ;;  %v4509_v11 = vadd.f32 %v4493_v12, %v4477_v1  ;;  %v4494_v8 = vmul.f32 %v6114_v0, %v6102_v62  ;;  %v5368_v28 = vpop.f32.mrb[72].mxu1 }
 0x3fa   : > { %v6118_v27 = vpop.eup %6117  ;;  %v4507_v45 = vadd.f32 %v4491_v3, %v4475_v29  ;;  %v4492_v15 = vmul.f32 %v6116_v39, %v6104_v9  ;;  %v5463_v4 = vadd.f32 %v8573_v5, %v5368_v28  ;;  %v4396_v33 = vpop.f32.mrb[73].mxu1  ;;  %6137 = vrcp.f32 %v3350_v25 }
 0x3fb   : > { %v8631_v63 = vpop.eup %6119  ;;  %4525 = vst [vmem:[%s8625_s7 + $0x10] sm:$0xff] %v4509_v11  ;;  %v4510_v18 = vadd.f32 %v4494_v8, %v4478_v30  ;;  %v5465_v59 = vadd.f32 %v8563_v32, %v4396_v33  ;;  %v5369_v53 = vpop.f32.mrb[74].mxu1  ;;  %v3349_v62 = vadd.f32 1.0, %v6118_v27  ;;  %v6181_v30 = vld [vmem:[%s7157_s21 + $0x50] sm:$0xff]  ;;  %v6182_v27 = vld [vmem:[%s7157_s21 + $0x40] sm:$0xff] }
 0x3fc   : > { %v8636_v17 = vpop.eup %6121  ;;  %4523 = vst [vmem:[%s8625_s7] sm:$0xff] %v4507_v45  ;;  %v4508_v20 = vadd.f32 %v4492_v15, %v4476_v57  ;;  %6139 = vtanh.f32 %v5463_v4  ;;  %v5467_v5 = vadd.f32 %v8576_v35, %v5369_v53  ;;  %v4399_v38 = vpop.f32.mrb[75].mxu1  ;;  %v4467_v47 = vsub.f32 1.0, %v8631_v63  ;;  %v6183_v15 = vld [vmem:[%s7157_s21 + $0x58] sm:$0xff] }
 0x3fd   : > { %v6124_v50 = vpop.eup %6123  ;;  %4526 = vst [vmem:[%s8625_s7 + $0x18] sm:$0xff] %v4510_v18  ;;  %6141 = vtanh.f32 %v5465_v59  ;;  %v5469_v32 = vadd.f32 %v8568_v6, %v4399_v38  ;;  %v6184_v59 = vld [vmem:[%s7157_s21 + $0x48] sm:$0xff] }
 0x3fe   : > { %v6126_v54 = vpop.eup %6125  ;;  %4524 = vst [vmem:[%s8625_s7 + $0x8] sm:$0xff] %v4508_v20  ;;  %6143 = vtanh.f32 %v5467_v5  ;;  %v4469_v1 = vsub.f32 1.0, %v6124_v50  ;;  %v4483_v45 = vmul.f32 %v6182_v27, %v4467_v47 }
 0x3ff   : > { %v6128_v9 = vpop.eup %6127  ;;  %v4497_v35 = vmul.f32 %v6126_v54, %v8606_v21  ;;  %6145 = vtanh.f32 %v5469_v32 }
 0x400   : > { %v6130_v16 = vpop.eup %6129  ;;  %6147 = vrcp.f32 %v3351_v14  ;;  %v4495_v52 = vmul.f32 %v6128_v9, %v8593_v23  ;;  %v4485_v8 = vmul.f32 %v6181_v30, %v4469_v1 }
 0x401   : > { %v6132_v6 = vpop.eup %6131  ;;  %6149 = vrcp.f32 %v3349_v62  ;;  %v4513_v26 = vadd.f32 %v4497_v35, %v4481_v48  ;;  %v4498_v40 = vmul.f32 %v6130_v16, %v8611_v37  ;;  %v5372_v60 = vpop.f32.mrb[76].mxu1  ;;  %v6186_v48 = vld [vmem:[%s7157_s21 + $0x60] sm:$0xff] }
 0x402   : > { %v6134_v31 = vpop.eup %6133  ;;  %v4511_v21 = vadd.f32 %v4495_v52, %v4479_v58  ;;  %v4496_v55 = vmul.f32 %v6132_v6, %v8600_v43  ;;  %v5471_v25 = vadd.f32 %v8598_v22, %v5372_v60  ;;  %v4412_v23 = vpop.f32.mrb[77].mxu1  ;;  %v6187_v52 = vld [vmem:[%s7157_s21 + $0x78] sm:$0xff] }
 0x403   : > { %v6136_v13 = vpop.eup %6135  ;;  %4529 = vst [vmem:[%s8625_s7 + $0x30] sm:$0xff] %v4513_v26  ;;  %v4514_v12 = vadd.f32 %v4498_v40, %v4482_v56  ;;  %v5473_v0 = vadd.f32 %v8584_v36, %v4412_v23  ;;  %v5373_v37 = vpop.f32.mrb[78].mxu1  ;;  %v4470_v3 = vsub.f32 1.0, %v6134_v31  ;;  %v4468_v36 = vsub.f32 1.0, %v8636_v17  ;;  %v6188_v56 = vld [vmem:[%s7157_s21 + $0x68] sm:$0xff] }
 0x404   : > { %4527 = vst [vmem:[%s8625_s7 + $0x20] sm:$0xff] %v4511_v21  ;;  %v4512_v46 = vadd.f32 %v4496_v55, %v4480_v42  ;;  %6151 = vtanh.f32 %v5471_v25  ;;  %v5475_v43 = vadd.f32 %v8603_v49, %v5373_v37  ;;  %v4415_v29 = vpop.f32.mrb[79].mxu1  ;;  %v6138_v22 = vpop.eup %6137  ;;  %v4471_v38 = vsub.f32 1.0, %v6136_v13 }
 0x405   : > { %4530 = vst [vmem:[%s8625_s7 + $0x38] sm:$0xff] %v4514_v12  ;;  %6153 = vtanh.f32 %v5473_v0  ;;  %v5477_v39 = vadd.f32 %v8589_v2, %v4415_v29  ;;  %v4486_v4 = vmul.f32 %v6183_v15, %v4470_v3  ;;  %v4484_v53 = vmul.f32 %v6184_v59, %v4468_v36 }
 0x406   : > { %v6140_v11 = vpop.eup %6139  ;;  %4528 = vst [vmem:[%s8625_s7 + $0x28] sm:$0xff] %v4512_v46  ;;  %6155 = vtanh.f32 %v5475_v43  ;;  %v4473_v5 = vsub.f32 1.0, %v6138_v22  ;;  %v4487_v35 = vmul.f32 %v6186_v48, %v4471_v38 }
 0x407   : > { %v6142_v44 = vpop.eup %6141  ;;  %v4501_v28 = vmul.f32 %v6140_v11, %v6124_v50  ;;  %6157 = vtanh.f32 %v5477_v39 }
 0x408   : > { %v6144_v49 = vpop.eup %6143  ;;  %v4499_v7 = vmul.f32 %v6142_v44, %v8631_v63  ;;  %v4489_v9 = vmul.f32 %v6185_v41, %v4473_v5 }
 0x409   : > { %v6146_v2 = vpop.eup %6145  ;;  %v4517_v57 = vadd.f32 %v4501_v28, %v4485_v8  ;;  %v4502_v33 = vmul.f32 %v6144_v49, %v6134_v31 }
 0x40a   : > { %v6148_v34 = vpop.eup %6147  ;;  %v4515_v18 = vadd.f32 %v4499_v7, %v4483_v45  ;;  %v4500_v14 = vmul.f32 %v6146_v2, %v8636_v17 }
 0x40b   : > { %v6150_v20 = vpop.eup %6149  ;;  %4533 = vst [vmem:[%s8625_s7 + $0x50] sm:$0xff] %v4517_v57  ;;  %v4518_v63 = vadd.f32 %v4502_v33, %v4486_v4  ;;  %v4474_v24 = vsub.f32 1.0, %v6148_v34 }
 0x40c   : > { %4531 = vst [vmem:[%s8625_s7 + $0x40] sm:$0xff] %v4515_v18  ;;  %v4516_v50 = vadd.f32 %v4500_v14, %v4484_v53  ;;  %v4472_v32 = vsub.f32 1.0, %v6150_v20 }
 0x40d   : > { %4534 = vst [vmem:[%s8625_s7 + $0x58] sm:$0xff] %v4518_v63  ;;  %v4490_v6 = vmul.f32 %v6187_v52, %v4474_v24 }
 0x40e   : > { %v6152_v62 = vpop.eup %6151  ;;  %4532 = vst [vmem:[%s8625_s7 + $0x48] sm:$0xff] %v4516_v50  ;;  %v4488_v40 = vmul.f32 %v6188_v56, %v4472_v32 }
 0x40f   : > { %v6154_v54 = vpop.eup %6153  ;;  %v4505_v17 = vmul.f32 %v6152_v62, %v6138_v22 }
 0x410   : > { %v6156_v51 = vpop.eup %6155  ;;  %v4503_v16 = vmul.f32 %v6154_v54, %v6136_v13 }
 0x411   : > { %v6158_v10 = vpop.eup %6157  ;;  %v4521_v58 = vadd.f32 %v4505_v17, %v4489_v9  ;;  %v4506_v26 = vmul.f32 %v6156_v51, %v6148_v34 }
 0x412   : > { %v4519_v61 = vadd.f32 %v4503_v16, %v4487_v35  ;;  %v4504_v60 = vmul.f32 %v6158_v10, %v6150_v20 }
 0x413   : > { %4537 = vst [vmem:[%s8625_s7 + $0x70] sm:$0xff] %v4521_v58  ;;  %v4522_v31 = vadd.f32 %v4506_v26, %v4490_v6 }
 0x414   : > { %4535 = vst [vmem:[%s8625_s7 + $0x60] sm:$0xff] %v4519_v61  ;;  %v4520_v21 = vadd.f32 %v4504_v60, %v4488_v40 }
 0x415   : > { %4538 = vst [vmem:[%s8625_s7 + $0x78] sm:$0xff] %v4522_v31 }
 0x416   : > { %4536 = vst [vmem:[%s8625_s7 + $0x68] sm:$0xff] %v4520_v21 }
 0x417 PF: > { %s16_s25 = sadd.s32 1, %s6227_s25   ;;  %s8856_s21 = smov %s6219_s23 }
 0x418   : > { %p13_p7 = scmp.ge.s32.totalorder %s16_s25, 6   ;;  %s8857_s22 = smov %s6223_s24 }
 0x419   : > { %s8858_s23 = smov %s8861_s26  ;;  %s8859_s24 = smov %s8865_s27 }
 0x41a   :  { %15 = sbr.rel (!%p13_p7) target bundleno = 3 (0x3), region = 77 }

</bundles_post_ra>
